<compile_context>
chip_gen: v5e
topology: v5e:2x2
jax: 0.10.0
libtpu: 0.0.40
codegen_flags: <defaults>
</compile_context>

<pallas_src>
import functools

import numpy as np

import jax
import jax.numpy as jnp
from jax.experimental import pallas as pl
from jax.experimental.pallas import tpu as pltpu

EPS = 1e-5
LANE = 128


def _round_up(v, m):
    return ((v + m - 1) // m) * m


# ---------------------------------------------------------------------------
# In-kernel helpers
# ---------------------------------------------------------------------------
def _conv3x3_longk(read, w_ref, H, W, Cp, lead):
    """3x3 / stride-1 conv over the flat zero-padded layout as ONE long-K
    (K = 9*Cp) bf16 MXU matmul with f32 accumulation.

    `read(off, size)` must return `size` consecutive rows (row-major over the
    (H+2) x (W+2) padded image, starting at raw row `off`) of the padded
    activation, shape (size, Cp).  Output rows follow q = y*(W+2) + x'; the
    columns x' in {W, W+1} are junk (wrap-around) and are masked by the caller.
    """
    Wp2 = W + 2
    M = H * Wp2
    taps = []
    for dy in range(3):
        for dx in range(3):
            off = lead + dy * Wp2 + dx
            taps.append(read(off, M).astype(jnp.bfloat16))
    cols = jnp.concatenate(taps, axis=-1)          # (M, 9*Cp) bf16 im2col tile
    return jnp.dot(cols, w_ref[...], preferred_element_type=jnp.float32)


def _emit_masked_stats(s_ref, acc, mask):
    """Per-channel partial (sum, sum of squares) over VALID positions only."""
    accm = acc * mask                               # junk columns -> exactly 0
    s_ref[0, 0:1, :] = jnp.sum(accm, axis=0, keepdims=True)
    s_ref[0, 1:2, :] = jnp.sum(accm * acc, axis=0, keepdims=True)
    return accm


# ---------------------------------------------------------------------------
# Kernels
# ---------------------------------------------------------------------------
def _conv0_kernel(H, W, Cp, lead, x_ref, m_ref, w_ref, y_ref, s_ref):
    # conv0 over one image (halo already baked into x), emit BN0 partials.
    acc = _conv3x3_longk(lambda off, sz: x_ref[0, off:off + sz, :],
                         w_ref, H, W, Cp, lead)
    accm = _emit_masked_stats(s_ref, acc, m_ref[...])
    y_ref[0] = accm.astype(jnp.bfloat16)            # bf16 intermediate in HBM


def _bnrelu_conv1_kernel(H, W, Cp, lead, y0_ref, m_ref, sc_ref, bi_ref, w_ref,
                         y_ref, s_ref, slab_ref):
    # bn0 affine (precomputed scale/bias -> one FMA) + ReLU, kept in VMEM and
    # immediately consumed by conv1; emit BN1 partials.
    Wp2 = W + 2
    M = H * Wp2
    mask = m_ref[...]
    a = jnp.maximum(y0_ref[0].astype(jnp.float32) * sc_ref[...] + bi_ref[...],
                    0.0) * mask                     # halo/junk columns -> 0
    # Rebuild the padded layout in a VMEM slab with sublane-ALIGNED stores only
    # (lead chosen so `base` is a multiple of 8); the single shifted store of
    # `a` also writes the interior halo cells (its junk columns are zero).
    base = lead + W + 3
    slab_ref[0:base, :] = jnp.zeros((base, Cp), jnp.float32)
    slab_ref[base:base + M, :] = a
    tail = base + M
    slab_ref[tail:slab_ref.shape[0], :] = jnp.zeros(
        (slab_ref.shape[0] - tail, Cp), jnp.float32)

    acc = _conv3x3_longk(lambda off, sz: slab_ref[off:off + sz, :],
                         w_ref, H, W, Cp, lead)
    accm = _emit_masked_stats(s_ref, acc, mask)
    y_ref[0] = accm.astype(jnp.bfloat16)


def _bn_add_relu_kernel(y1_ref, r_ref, sc_ref, bi_ref, o_ref):
    # bn1 affine + residual add + ReLU, single lane-dense streaming pass.
    o_ref[0] = jnp.maximum(
        r_ref[0] + y1_ref[0].astype(jnp.float32) * sc_ref[...] + bi_ref[...],
        0.0)


# ---------------------------------------------------------------------------
# pallas_call wrappers
# ---------------------------------------------------------------------------
def _mosaic_params(working_set_bytes):
    # Explicit scoped-VMEM budget derived from the real working set, with
    # headroom, clamped to a value that is safe on v5e/v6e/v7x.
    vmem = int(min(max(2 * working_set_bytes + (4 << 20), 16 << 20), 60 << 20))
    return pltpu.CompilerParams(dimension_semantics=("parallel",),
                                vmem_limit_bytes=vmem)


def _conv0_call(x_in, mask, w, N, H, W, Cp, lead):
    M = H * (W + 2)
    P_in = x_in.shape[1]
    need = (2 * (P_in * Cp * 4 + M * 4 + 9 * Cp * Cp * 2 + M * Cp * 2 + 2 * Cp * 4)
            + M * 9 * Cp * 2 + 3 * M * Cp * 4)
    return pl.pallas_call(
        functools.partial(_conv0_kernel, H, W, Cp, lead),
        out_shape=(jax.ShapeDtypeStruct((N, M, Cp), jnp.bfloat16),
                   jax.ShapeDtypeStruct((N, 2, Cp), jnp.float32)),
        grid_spec=pltpu.PrefetchScalarGridSpec(
            num_scalar_prefetch=0,
            grid=(N,),
            in_specs=[
                pl.BlockSpec((1, P_in, Cp), lambda n: (n, 0, 0)),
                pl.BlockSpec((M, 1), lambda n: (0, 0)),
                pl.BlockSpec((9 * Cp, Cp), lambda n: (0, 0)),
            ],
            out_specs=(
                pl.BlockSpec((1, M, Cp), lambda n: (n, 0, 0)),
                pl.BlockSpec((1, 2, Cp), lambda n: (n, 0, 0)),
            ),
        ),
        compiler_params=_mosaic_params(need),
    )(x_in, mask, w)


def _bnrelu_conv1_call(y0, mask, sc, bi, w, N, H, W, Cp, lead, P_slab):
    M = H * (W + 2)
    need = (2 * (M * Cp * 2 + M * 4 + 2 * Cp * 4 + 9 * Cp * Cp * 2
                 + M * Cp * 2 + 2 * Cp * 4)
            + P_slab * Cp * 4 + M * 9 * Cp * 2 + 3 * M * Cp * 4)
    return pl.pallas_call(
        functools.partial(_bnrelu_conv1_kernel, H, W, Cp, lead),
        out_shape=(jax.ShapeDtypeStruct((N, M, Cp), jnp.bfloat16),
                   jax.ShapeDtypeStruct((N, 2, Cp), jnp.float32)),
        grid_spec=pltpu.PrefetchScalarGridSpec(
            num_scalar_prefetch=0,
            grid=(N,),
            in_specs=[
                pl.BlockSpec((1, M, Cp), lambda n: (n, 0, 0)),
                pl.BlockSpec((M, 1), lambda n: (0, 0)),
                pl.BlockSpec((1, Cp), lambda n: (0, 0)),
                pl.BlockSpec((1, Cp), lambda n: (0, 0)),
                pl.BlockSpec((9 * Cp, Cp), lambda n: (0, 0)),
            ],
            out_specs=(
                pl.BlockSpec((1, M, Cp), lambda n: (n, 0, 0)),
                pl.BlockSpec((1, 2, Cp), lambda n: (n, 0, 0)),
            ),
            scratch_shapes=[pltpu.VMEM((P_slab, Cp), jnp.float32)],
        ),
        compiler_params=_mosaic_params(need),
    )(y0, mask, sc, bi, w)


def _bn_add_relu_call(y1, resid, sc, bi, N, H, W, Cp):
    M = H * (W + 2)
    need = 2 * (M * Cp * 2 + M * Cp * 4 + 2 * Cp * 4 + M * Cp * 4) + M * Cp * 4
    return pl.pallas_call(
        _bn_add_relu_kernel,
        out_shape=jax.ShapeDtypeStruct((N, M, Cp), jnp.float32),
        grid_spec=pltpu.PrefetchScalarGridSpec(
            num_scalar_prefetch=0,
            grid=(N,),
            in_specs=[
                pl.BlockSpec((1, M, Cp), lambda n: (n, 0, 0)),
                pl.BlockSpec((1, M, Cp), lambda n: (n, 0, 0)),
                pl.BlockSpec((1, Cp), lambda n: (0, 0)),
                pl.BlockSpec((1, Cp), lambda n: (0, 0)),
            ],
            out_specs=pl.BlockSpec((1, M, Cp), lambda n: (n, 0, 0)),
        ),
        compiler_params=_mosaic_params(need),
    )(y1, resid, sc, bi)


# ---------------------------------------------------------------------------
# Host-side glue
# ---------------------------------------------------------------------------
def _bn_scale_bias(partial_stats, gamma, beta, count):
    """Fold per-image (sum, sumsq) partials into a fused per-channel FMA."""
    s = jnp.sum(partial_stats, axis=0)                       # (2, Cp)
    mean = s[0] / count
    var = jnp.maximum(s[1] / count - mean * mean, 0.0)       # biased variance
    scale = gamma * jax.lax.rsqrt(var + EPS)                 # padded gamma==0
    bias = beta - mean * scale
    return scale.reshape(1, -1), bias.reshape(1, -1)


def res18_basicblock_forward(x_nchw, params):
    """Forward pass of my_res18_basicblock (stride=1, in_channels==out_channels,
    BatchNorm in training mode with global batch statistics)."""
    N, C, H, W = x_nchw.shape
    assert params["w0"].shape == (3, 3, C, C) and params["w1"].shape == (3, 3, C, C), \
        "only stride=1 with in_channels == out_channels (no downsample) is supported"

    Cp = _round_up(C, LANE)            # lane-dense channel padding
    cpad = Cp - C
    Wp2 = W + 2
    M = H * Wp2                        # conv-output rows (incl. 2 junk cols/row)
    P_img = (H + 2) * Wp2              # flat padded-image rows
    lead = (-(W + 3)) % 8              # makes kernel-2's shifted store aligned
    P_in = _round_up(lead + P_img + 2, 8)
    count = float(N * H * W)

    x = jnp.transpose(x_nchw, (0, 2, 3, 1)).astype(jnp.float32)   # NCHW -> NHWC
    # Bake the full spatial halo + channel pad in at the XLA level, flatten.
    xpad = jnp.pad(x, ((0, 0), (1, 1), (1, 1), (0, cpad)))         # (N,H+2,W+2,Cp)
    x_in = jnp.pad(xpad.reshape(N, P_img, Cp),
                   ((0, 0), (lead, P_in - lead - P_img), (0, 0)))  # (N,P_in,Cp) f32

    # Residual pre-shaped to the conv-output layout (junk columns are zero).
    resid = x_in[:, lead + W + 3: lead + W + 3 + M, :]

    # Valid-column mask over the output layout (zero at x' in {W, W+1}).
    outmask = jnp.asarray(
        (np.arange(M) % Wp2 < W).astype(np.float32).reshape(M, 1))

    def prep_w(w):                     # (3,3,C,C) HWIO -> (9*Cp, Cp) bf16
        wp = jnp.pad(w, ((0, 0), (0, 0), (0, cpad), (0, cpad)))
        return wp.reshape(9 * Cp, Cp).astype(jnp.bfloat16)

    def prep_gb(g, b):                 # gamma zero-padded: padded channels stay 0
        return jnp.pad(g, (0, cpad)), jnp.pad(b, (0, cpad))

    w0, w1 = prep_w(params["w0"]), prep_w(params["w1"])
    g0, b0 = prep_gb(params["g0"], params["b0"])
    g1, b1 = prep_gb(params["g1"], params["b1"])

    # conv0 (+ BN0 partial stats)
    y0, st0 = _conv0_call(x_in, outmask, w0, N, H, W, Cp, lead)
    sc0, bi0 = _bn_scale_bias(st0, g0, b0, count)

    # bn0 affine + ReLU fused with conv1 (+ BN1 partial stats); the post-ReLU
    # activation never leaves VMEM.
    y1, st1 = _bnrelu_conv1_call(y0, outmask, sc0, bi0, w1,
                                 N, H, W, Cp, lead, P_in)
    sc1, bi1 = _bn_scale_bias(st1, g1, b1, count)

    # bn1 affine + residual add + ReLU
    out = _bn_add_relu_call(y1, resid, sc1, bi1, N, H, W, Cp)

    out = out.reshape(N, H, Wp2, Cp)[:, :, :W, :C]
    return jnp.transpose(out, (0, 3, 1, 2))                       # back to NCHW


def init_params(key, channels):
    """Deterministic synthetic parameters (HWIO conv weights, BN gamma/beta).
    Conv biases are omitted: training-mode BatchNorm cancels them exactly."""
    k0, k1 = jax.random.split(key)
    scale = 1.0 / ((9 * channels) ** 0.5)
    return dict(
        w0=jax.random.normal(k0, (3, 3, channels, channels), jnp.float32) * scale,
        g0=jnp.ones((channels,), jnp.float32),   # bn0.weight
        b0=jnp.zeros((channels,), jnp.float32),  # bn0.bias
        w1=jax.random.normal(k1, (3, 3, channels, channels), jnp.float32) * scale,
        g1=jnp.ones((channels,), jnp.float32),   # bn1.weight
        b1=jnp.zeros((channels,), jnp.float32),  # bn1.bias
    )


def _reference_forward(x_nchw, params):
    """Pure-XLA f32 reference of the PyTorch module (training-mode BN)."""
    x = x_nchw.astype(jnp.float32)

    def conv(v, w):
        return jax.lax.conv_general_dilated(
            v, w, window_strides=(1, 1), padding=((1, 1), (1, 1)),
            dimension_numbers=("NCHW", "HWIO", "NCHW"))

    def bn(v, g, b):
        mean = jnp.mean(v, axis=(0, 2, 3), keepdims=True)
        var = jnp.mean((v - mean) ** 2, axis=(0, 2, 3), keepdims=True)
        return ((v - mean) * jax.lax.rsqrt(var + EPS)
                * g.reshape(1, -1, 1, 1) + b.reshape(1, -1, 1, 1))

    h = jax.nn.relu(bn(conv(x, params["w0"]), params["g0"], params["b0"]))
    h = bn(conv(h, params["w1"]), params["g1"], params["b1"])
    return jax.nn.relu(x + h)


if __name__ == "__main__":
    key = jax.random.PRNGKey(0)
    kx, kp = jax.random.split(key)

    N, C, H, W = 2, 4, 16, 16          # small NCHW input, in_channels == out_channels
    x = jax.random.normal(kx, (N, C, H, W), jnp.float32)
    params = init_params(kp, C)

    fwd = jax.jit(res18_basicblock_forward)
    out = fwd(x, params)
    jax.block_until_ready(out)
    assert out.shape == (N, C, H, W) and out.dtype == jnp.float32

    ref = _reference_forward(x, params)
    err = float(jnp.max(jnp.abs(out - ref)))
    assert err < 0.1, f"max abs error vs reference too large: {err}"
    print("KERNEL_OK")
</pallas_src>

<mosaic_0001>
module attributes {stable_mosaic.version = 11 : i64} {
  func.func @_conv0_kernel(%arg0: i32, %arg1: memref<1x336x128xf32, #tpu.memory_space<vmem>>, %arg2: memref<288x1xf32, #tpu.memory_space<vmem>>, %arg3: memref<1152x128xbf16, #tpu.memory_space<vmem>>, %arg4: memref<1x288x128xbf16, #tpu.memory_space<vmem>>, %arg5: memref<1x2x128xf32, #tpu.memory_space<vmem>>) attributes {dimension_semantics = [#tpu.dimension_semantics<parallel>], iteration_bounds = array<i64: 2>, scalar_prefetch = 0 : i64, scratch_operands = 0 : i64, tpu.core_type = #tpu.core_type<tc>, window_params = [{transform_indices = @transform_0, window_bounds = array<i64: 1, 336, 128>}, {pipeline_mode = #tpu.pipeline_mode<synchronous>, transform_indices = @transform_1, window_bounds = array<i64: 288, 1>}, {pipeline_mode = #tpu.pipeline_mode<synchronous>, transform_indices = @transform_2, window_bounds = array<i64: 1152, 128>}, {transform_indices = @transform_3, window_bounds = array<i64: 1, 288, 128>}, {transform_indices = @transform_4, window_bounds = array<i64: 1, 2, 128>}]} {
    %c0 = arith.constant 0 : index
    %c5 = arith.constant 5 : index
    %c0_0 = arith.constant 0 : index
    %0 = vector.load %arg1[%c0, %c5, %c0_0] : memref<1x336x128xf32, #tpu.memory_space<vmem>>, vector<1x288x128xf32>
    %1 = vector.shape_cast %0 : vector<1x288x128xf32> to vector<288x128xf32>
    %2 = arith.truncf %1 : vector<288x128xf32> to vector<288x128xbf16>
    %c0_1 = arith.constant 0 : index
    %c6 = arith.constant 6 : index
    %c0_2 = arith.constant 0 : index
    %3 = vector.load %arg1[%c0_1, %c6, %c0_2] : memref<1x336x128xf32, #tpu.memory_space<vmem>>, vector<1x288x128xf32>
    %4 = vector.shape_cast %3 : vector<1x288x128xf32> to vector<288x128xf32>
    %5 = arith.truncf %4 : vector<288x128xf32> to vector<288x128xbf16>
    %c0_3 = arith.constant 0 : index
    %c7 = arith.constant 7 : index
    %c0_4 = arith.constant 0 : index
    %6 = vector.load %arg1[%c0_3, %c7, %c0_4] : memref<1x336x128xf32, #tpu.memory_space<vmem>>, vector<1x288x128xf32>
    %7 = vector.shape_cast %6 : vector<1x288x128xf32> to vector<288x128xf32>
    %8 = arith.truncf %7 : vector<288x128xf32> to vector<288x128xbf16>
    %c0_5 = arith.constant 0 : index
    %c23 = arith.constant 23 : index
    %c0_6 = arith.constant 0 : index
    %9 = vector.load %arg1[%c0_5, %c23, %c0_6] : memref<1x336x128xf32, #tpu.memory_space<vmem>>, vector<1x288x128xf32>
    %10 = vector.shape_cast %9 : vector<1x288x128xf32> to vector<288x128xf32>
    %11 = arith.truncf %10 : vector<288x128xf32> to vector<288x128xbf16>
    %c0_7 = arith.constant 0 : index
    %c24 = arith.constant 24 : index
    %c0_8 = arith.constant 0 : index
    %12 = vector.load %arg1[%c0_7, %c24, %c0_8] : memref<1x336x128xf32, #tpu.memory_space<vmem>>, vector<1x288x128xf32>
    %13 = vector.shape_cast %12 : vector<1x288x128xf32> to vector<288x128xf32>
    %14 = arith.truncf %13 : vector<288x128xf32> to vector<288x128xbf16>
    %c0_9 = arith.constant 0 : index
    %c25 = arith.constant 25 : index
    %c0_10 = arith.constant 0 : index
    %15 = vector.load %arg1[%c0_9, %c25, %c0_10] : memref<1x336x128xf32, #tpu.memory_space<vmem>>, vector<1x288x128xf32>
    %16 = vector.shape_cast %15 : vector<1x288x128xf32> to vector<288x128xf32>
    %17 = arith.truncf %16 : vector<288x128xf32> to vector<288x128xbf16>
    %c0_11 = arith.constant 0 : index
    %c41 = arith.constant 41 : index
    %c0_12 = arith.constant 0 : index
    %18 = vector.load %arg1[%c0_11, %c41, %c0_12] : memref<1x336x128xf32, #tpu.memory_space<vmem>>, vector<1x288x128xf32>
    %19 = vector.shape_cast %18 : vector<1x288x128xf32> to vector<288x128xf32>
    %20 = arith.truncf %19 : vector<288x128xf32> to vector<288x128xbf16>
    %c0_13 = arith.constant 0 : index
    %c42 = arith.constant 42 : index
    %c0_14 = arith.constant 0 : index
    %21 = vector.load %arg1[%c0_13, %c42, %c0_14] : memref<1x336x128xf32, #tpu.memory_space<vmem>>, vector<1x288x128xf32>
    %22 = vector.shape_cast %21 : vector<1x288x128xf32> to vector<288x128xf32>
    %23 = arith.truncf %22 : vector<288x128xf32> to vector<288x128xbf16>
    %c0_15 = arith.constant 0 : index
    %c43 = arith.constant 43 : index
    %c0_16 = arith.constant 0 : index
    %24 = vector.load %arg1[%c0_15, %c43, %c0_16] : memref<1x336x128xf32, #tpu.memory_space<vmem>>, vector<1x288x128xf32>
    %25 = vector.shape_cast %24 : vector<1x288x128xf32> to vector<288x128xf32>
    %26 = arith.truncf %25 : vector<288x128xf32> to vector<288x128xbf16>
    %27 = tpu.concatenate %2, %5, %8, %11, %14, %17, %20, %23, %26 in 1 : vector<288x128xbf16>, vector<288x128xbf16>, vector<288x128xbf16>, vector<288x128xbf16>, vector<288x128xbf16>, vector<288x128xbf16>, vector<288x128xbf16>, vector<288x128xbf16>, vector<288x128xbf16> -> vector<288x1152xbf16>
    %c0_17 = arith.constant 0 : index
    %c0_18 = arith.constant 0 : index
    %28 = vector.load %arg3[%c0_17, %c0_18] : memref<1152x128xbf16, #tpu.memory_space<vmem>>, vector<1152x128xbf16>
    %cst = arith.constant dense<0.000000e+00> : vector<288x128xf32>
    %29 = tpu.matmul %27, %28, %cst {dimension_numbers = #tpu.dot_dimension_numbers<[1], [0], [0], [1], [0, 0, 1, 1], [], []>} : vector<288x1152xbf16>, vector<1152x128xbf16>, vector<288x128xf32> -> vector<288x128xf32>
    %c0_19 = arith.constant 0 : index
    %c0_20 = arith.constant 0 : index
    %30 = vector.load %arg2[%c0_19, %c0_20] : memref<288x1xf32, #tpu.memory_space<vmem>>, vector<288x1xf32>
    %31 = vector.broadcast %30 : vector<288x1xf32> to vector<288x128xf32>
    %32 = arith.mulf %29, %31 : vector<288x128xf32>
    %cst_21 = arith.constant dense<0.000000e+00> : vector<128xf32>
    %33 = vector.multi_reduction <add>, %32, %cst_21 [0] : vector<288x128xf32> to vector<128xf32>
    %34 = vector.shape_cast %33 : vector<128xf32> to vector<1x128xf32>
    %c0_22 = arith.constant 0 : index
    %c0_23 = arith.constant 0 : index
    %c0_24 = arith.constant 0 : index
    %35 = vector.load %arg5[%c0_22, %c0_23, %c0_24] : memref<1x2x128xf32, #tpu.memory_space<vmem>>, vector<1x1x128xf32>
    %36 = vector.shape_cast %35 : vector<1x1x128xf32> to vector<1x128xf32>
    %37 = vector.shape_cast %34 : vector<1x128xf32> to vector<1x1x128xf32>
    tpu.vector_store %arg5[%c0_22, %c0_23, %c0_24], %37 {strides = array<i32>} : memref<1x2x128xf32, #tpu.memory_space<vmem>>, vector<1x1x128xf32>,
    %38 = arith.mulf %32, %29 : vector<288x128xf32>
    %cst_25 = arith.constant dense<0.000000e+00> : vector<128xf32>
    %39 = vector.multi_reduction <add>, %38, %cst_25 [0] : vector<288x128xf32> to vector<128xf32>
    %40 = vector.shape_cast %39 : vector<128xf32> to vector<1x128xf32>
    %c0_26 = arith.constant 0 : index
    %c1 = arith.constant 1 : index
    %c0_27 = arith.constant 0 : index
    %41 = vector.load %arg5[%c0_26, %c1, %c0_27] : memref<1x2x128xf32, #tpu.memory_space<vmem>>, vector<1x1x128xf32>
    %42 = vector.shape_cast %41 : vector<1x1x128xf32> to vector<1x128xf32>
    %43 = vector.shape_cast %40 : vector<1x128xf32> to vector<1x1x128xf32>
    tpu.vector_store %arg5[%c0_26, %c1, %c0_27], %43 {strides = array<i32>} : memref<1x2x128xf32, #tpu.memory_space<vmem>>, vector<1x1x128xf32>,
    %44 = arith.truncf %32 : vector<288x128xf32> to vector<288x128xbf16>
    %c0_28 = arith.constant 0 : index
    %c0_29 = arith.constant 0 : index
    %c0_30 = arith.constant 0 : index
    %45 = vector.load %arg4[%c0_28, %c0_29, %c0_30] : memref<1x288x128xbf16, #tpu.memory_space<vmem>>, vector<1x288x128xbf16>
    %46 = vector.shape_cast %45 : vector<1x288x128xbf16> to vector<288x128xbf16>
    %47 = vector.shape_cast %44 : vector<288x128xbf16> to vector<1x288x128xbf16>
    tpu.vector_store %arg4[%c0_28, %c0_29, %c0_30], %47 {strides = array<i32>} : memref<1x288x128xbf16, #tpu.memory_space<vmem>>, vector<1x288x128xbf16>,
    return
  }
  func.func @transform_0(%arg0: i32) -> (i32, i32, i32) {
    %c0_i32 = arith.constant 0 : i32
    %c0_i32_0 = arith.constant 0 : i32
    %c0_i32_1 = arith.constant 0 : i32
    return %arg0, %c0_i32, %c0_i32_0 : i32, i32, i32
  }
  func.func @transform_1(%arg0: i32) -> (i32, i32) {
    %c0_i32 = arith.constant 0 : i32
    %c0_i32_0 = arith.constant 0 : i32
    %c0_i32_1 = arith.constant 0 : i32
    return %c0_i32, %c0_i32_0 : i32, i32
  }
  func.func @transform_2(%arg0: i32) -> (i32, i32) {
    %c0_i32 = arith.constant 0 : i32
    %c0_i32_0 = arith.constant 0 : i32
    %c0_i32_1 = arith.constant 0 : i32
    return %c0_i32, %c0_i32_0 : i32, i32
  }
  func.func @transform_3(%arg0: i32) -> (i32, i32, i32) {
    %c0_i32 = arith.constant 0 : i32
    %c0_i32_0 = arith.constant 0 : i32
    %c0_i32_1 = arith.constant 0 : i32
    return %arg0, %c0_i32, %c0_i32_0 : i32, i32, i32
  }
  func.func @transform_4(%arg0: i32) -> (i32, i32, i32) {
    %c0_i32 = arith.constant 0 : i32
    %c0_i32_0 = arith.constant 0 : i32
    %c0_i32_1 = arith.constant 0 : i32
    return %arg0, %c0_i32, %c0_i32_0 : i32, i32, i32
  }
}

module attributes {stable_mosaic.version = 11 : i64} {
  func.func @_bnrelu_conv1_kernel(%arg0: i32, %arg1: memref<1x288x128xbf16, #tpu.memory_space<vmem>>, %arg2: memref<288x1xf32, #tpu.memory_space<vmem>>, %arg3: memref<1x128xf32, #tpu.memory_space<vmem>>, %arg4: memref<1x128xf32, #tpu.memory_space<vmem>>, %arg5: memref<1152x128xbf16, #tpu.memory_space<vmem>>, %arg6: memref<1x288x128xbf16, #tpu.memory_space<vmem>>, %arg7: memref<1x2x128xf32, #tpu.memory_space<vmem>>, %arg8: memref<336x128xf32, #tpu.memory_space<vmem>>) attributes {dimension_semantics = [#tpu.dimension_semantics<parallel>], iteration_bounds = array<i64: 2>, scalar_prefetch = 0 : i64, scratch_operands = 1 : i64, tpu.core_type = #tpu.core_type<tc>, window_params = [{transform_indices = @transform_0, window_bounds = array<i64: 1, 288, 128>}, {pipeline_mode = #tpu.pipeline_mode<synchronous>, transform_indices = @transform_1, window_bounds = array<i64: 288, 1>}, {pipeline_mode = #tpu.pipeline_mode<synchronous>, transform_indices = @transform_2, window_bounds = array<i64: 1, 128>}, {pipeline_mode = #tpu.pipeline_mode<synchronous>, transform_indices = @transform_3, window_bounds = array<i64: 1, 128>}, {pipeline_mode = #tpu.pipeline_mode<synchronous>, transform_indices = @transform_4, window_bounds = array<i64: 1152, 128>}, {transform_indices = @transform_5, window_bounds = array<i64: 1, 288, 128>}, {transform_indices = @transform_6, window_bounds = array<i64: 1, 2, 128>}]} {
    %c0 = arith.constant 0 : index
    %c0_0 = arith.constant 0 : index
    %0 = vector.load %arg2[%c0, %c0_0] : memref<288x1xf32, #tpu.memory_space<vmem>>, vector<288x1xf32>
    %c0_1 = arith.constant 0 : index
    %c0_2 = arith.constant 0 : index
    %c0_3 = arith.constant 0 : index
    %1 = vector.load %arg1[%c0_1, %c0_2, %c0_3] : memref<1x288x128xbf16, #tpu.memory_space<vmem>>, vector<1x288x128xbf16>
    %2 = vector.shape_cast %1 : vector<1x288x128xbf16> to vector<288x128xbf16>
    %3 = arith.extf %2 : vector<288x128xbf16> to vector<288x128xf32>
    %c0_4 = arith.constant 0 : index
    %c0_5 = arith.constant 0 : index
    %4 = vector.load %arg3[%c0_4, %c0_5] : memref<1x128xf32, #tpu.memory_space<vmem>>, vector<1x128xf32>
    %5 = vector.broadcast %4 : vector<1x128xf32> to vector<288x128xf32>
    %6 = arith.mulf %3, %5 : vector<288x128xf32>
    %c0_6 = arith.constant 0 : index
    %c0_7 = arith.constant 0 : index
    %7 = vector.load %arg4[%c0_6, %c0_7] : memref<1x128xf32, #tpu.memory_space<vmem>>, vector<1x128xf32>
    %8 = vector.broadcast %7 : vector<1x128xf32> to vector<288x128xf32>
    %9 = arith.addf %6, %8 : vector<288x128xf32>
    %cst = arith.constant 0.000000e+00 : f32
    %10 = vector.broadcast %cst : f32 to vector<288x128xf32>
    %11 = arith.maximumf %9, %10 : vector<288x128xf32>
    %12 = vector.broadcast %0 : vector<288x1xf32> to vector<288x128xf32>
    %13 = arith.mulf %11, %12 : vector<288x128xf32>
    %cst_8 = arith.constant 0.000000e+00 : f32
    %14 = vector.broadcast %cst_8 : f32 to vector<24x128xf32>
    %c0_9 = arith.constant 0 : index
    %c0_10 = arith.constant 0 : index
    %15 = vector.load %arg8[%c0_9, %c0_10] : memref<336x128xf32, #tpu.memory_space<vmem>>, vector<24x128xf32>
    tpu.vector_store %arg8[%c0_9, %c0_10], %14 {strides = array<i32>} : memref<336x128xf32, #tpu.memory_space<vmem>>, vector<24x128xf32>,
    %c24 = arith.constant 24 : index
    %c0_11 = arith.constant 0 : index
    %16 = vector.load %arg8[%c24, %c0_11] : memref<336x128xf32, #tpu.memory_space<vmem>>, vector<288x128xf32>
    tpu.vector_store %arg8[%c24, %c0_11], %13 {strides = array<i32>} : memref<336x128xf32, #tpu.memory_space<vmem>>, vector<288x128xf32>,
    %cst_12 = arith.constant 0.000000e+00 : f32
    %17 = vector.broadcast %cst_12 : f32 to vector<24x128xf32>
    %c312 = arith.constant 312 : index
    %c0_13 = arith.constant 0 : index
    %18 = vector.load %arg8[%c312, %c0_13] : memref<336x128xf32, #tpu.memory_space<vmem>>, vector<24x128xf32>
    tpu.vector_store %arg8[%c312, %c0_13], %17 {strides = array<i32>} : memref<336x128xf32, #tpu.memory_space<vmem>>, vector<24x128xf32>,
    %c5 = arith.constant 5 : index
    %c0_14 = arith.constant 0 : index
    %19 = vector.load %arg8[%c5, %c0_14] : memref<336x128xf32, #tpu.memory_space<vmem>>, vector<288x128xf32>
    %20 = arith.truncf %19 : vector<288x128xf32> to vector<288x128xbf16>
    %c6 = arith.constant 6 : index
    %c0_15 = arith.constant 0 : index
    %21 = vector.load %arg8[%c6, %c0_15] : memref<336x128xf32, #tpu.memory_space<vmem>>, vector<288x128xf32>
    %22 = arith.truncf %21 : vector<288x128xf32> to vector<288x128xbf16>
    %c7 = arith.constant 7 : index
    %c0_16 = arith.constant 0 : index
    %23 = vector.load %arg8[%c7, %c0_16] : memref<336x128xf32, #tpu.memory_space<vmem>>, vector<288x128xf32>
    %24 = arith.truncf %23 : vector<288x128xf32> to vector<288x128xbf16>
    %c23 = arith.constant 23 : index
    %c0_17 = arith.constant 0 : index
    %25 = vector.load %arg8[%c23, %c0_17] : memref<336x128xf32, #tpu.memory_space<vmem>>, vector<288x128xf32>
    %26 = arith.truncf %25 : vector<288x128xf32> to vector<288x128xbf16>
    %c24_18 = arith.constant 24 : index
    %c0_19 = arith.constant 0 : index
    %27 = vector.load %arg8[%c24_18, %c0_19] : memref<336x128xf32, #tpu.memory_space<vmem>>, vector<288x128xf32>
    %28 = arith.truncf %27 : vector<288x128xf32> to vector<288x128xbf16>
    %c25 = arith.constant 25 : index
    %c0_20 = arith.constant 0 : index
    %29 = vector.load %arg8[%c25, %c0_20] : memref<336x128xf32, #tpu.memory_space<vmem>>, vector<288x128xf32>
    %30 = arith.truncf %29 : vector<288x128xf32> to vector<288x128xbf16>
    %c41 = arith.constant 41 : index
    %c0_21 = arith.constant 0 : index
    %31 = vector.load %arg8[%c41, %c0_21] : memref<336x128xf32, #tpu.memory_space<vmem>>, vector<288x128xf32>
    %32 = arith.truncf %31 : vector<288x128xf32> to vector<288x128xbf16>
    %c42 = arith.constant 42 : index
    %c0_22 = arith.constant 0 : index
    %33 = vector.load %arg8[%c42, %c0_22] : memref<336x128xf32, #tpu.memory_space<vmem>>, vector<288x128xf32>
    %34 = arith.truncf %33 : vector<288x128xf32> to vector<288x128xbf16>
    %c43 = arith.constant 43 : index
    %c0_23 = arith.constant 0 : index
    %35 = vector.load %arg8[%c43, %c0_23] : memref<336x128xf32, #tpu.memory_space<vmem>>, vector<288x128xf32>
    %36 = arith.truncf %35 : vector<288x128xf32> to vector<288x128xbf16>
    %37 = tpu.concatenate %20, %22, %24, %26, %28, %30, %32, %34, %36 in 1 : vector<288x128xbf16>, vector<288x128xbf16>, vector<288x128xbf16>, vector<288x128xbf16>, vector<288x128xbf16>, vector<288x128xbf16>, vector<288x128xbf16>, vector<288x128xbf16>, vector<288x128xbf16> -> vector<288x1152xbf16>
    %c0_24 = arith.constant 0 : index
    %c0_25 = arith.constant 0 : index
    %38 = vector.load %arg5[%c0_24, %c0_25] : memref<1152x128xbf16, #tpu.memory_space<vmem>>, vector<1152x128xbf16>
    %cst_26 = arith.constant dense<0.000000e+00> : vector<288x128xf32>
    %39 = tpu.matmul %37, %38, %cst_26 {dimension_numbers = #tpu.dot_dimension_numbers<[1], [0], [0], [1], [0, 0, 1, 1], [], []>} : vector<288x1152xbf16>, vector<1152x128xbf16>, vector<288x128xf32> -> vector<288x128xf32>
    %40 = vector.broadcast %0 : vector<288x1xf32> to vector<288x128xf32>
    %41 = arith.mulf %39, %40 : vector<288x128xf32>
    %cst_27 = arith.constant dense<0.000000e+00> : vector<128xf32>
    %42 = vector.multi_reduction <add>, %41, %cst_27 [0] : vector<288x128xf32> to vector<128xf32>
    %43 = vector.shape_cast %42 : vector<128xf32> to vector<1x128xf32>
    %c0_28 = arith.constant 0 : index
    %c0_29 = arith.constant 0 : index
    %c0_30 = arith.constant 0 : index
    %44 = vector.load %arg7[%c0_28, %c0_29, %c0_30] : memref<1x2x128xf32, #tpu.memory_space<vmem>>, vector<1x1x128xf32>
    %45 = vector.shape_cast %44 : vector<1x1x128xf32> to vector<1x128xf32>
    %46 = vector.shape_cast %43 : vector<1x128xf32> to vector<1x1x128xf32>
    tpu.vector_store %arg7[%c0_28, %c0_29, %c0_30], %46 {strides = array<i32>} : memref<1x2x128xf32, #tpu.memory_space<vmem>>, vector<1x1x128xf32>,
    %47 = arith.mulf %41, %39 : vector<288x128xf32>
    %cst_31 = arith.constant dense<0.000000e+00> : vector<128xf32>
    %48 = vector.multi_reduction <add>, %47, %cst_31 [0] : vector<288x128xf32> to vector<128xf32>
    %49 = vector.shape_cast %48 : vector<128xf32> to vector<1x128xf32>
    %c0_32 = arith.constant 0 : index
    %c1 = arith.constant 1 : index
    %c0_33 = arith.constant 0 : index
    %50 = vector.load %arg7[%c0_32, %c1, %c0_33] : memref<1x2x128xf32, #tpu.memory_space<vmem>>, vector<1x1x128xf32>
    %51 = vector.shape_cast %50 : vector<1x1x128xf32> to vector<1x128xf32>
    %52 = vector.shape_cast %49 : vector<1x128xf32> to vector<1x1x128xf32>
    tpu.vector_store %arg7[%c0_32, %c1, %c0_33], %52 {strides = array<i32>} : memref<1x2x128xf32, #tpu.memory_space<vmem>>, vector<1x1x128xf32>,
    %53 = arith.truncf %41 : vector<288x128xf32> to vector<288x128xbf16>
    %c0_34 = arith.constant 0 : index
    %c0_35 = arith.constant 0 : index
    %c0_36 = arith.constant 0 : index
    %54 = vector.load %arg6[%c0_34, %c0_35, %c0_36] : memref<1x288x128xbf16, #tpu.memory_space<vmem>>, vector<1x288x128xbf16>
    %55 = vector.shape_cast %54 : vector<1x288x128xbf16> to vector<288x128xbf16>
    %56 = vector.shape_cast %53 : vector<288x128xbf16> to vector<1x288x128xbf16>
    tpu.vector_store %arg6[%c0_34, %c0_35, %c0_36], %56 {strides = array<i32>} : memref<1x288x128xbf16, #tpu.memory_space<vmem>>, vector<1x288x128xbf16>,
    return
  }
  func.func @transform_0(%arg0: i32) -> (i32, i32, i32) {
    %c0_i32 = arith.constant 0 : i32
    %c0_i32_0 = arith.constant 0 : i32
    %c0_i32_1 = arith.constant 0 : i32
    return %arg0, %c0_i32, %c0_i32_0 : i32, i32, i32
  }
  func.func @transform_1(%arg0: i32) -> (i32, i32) {
    %c0_i32 = arith.constant 0 : i32
    %c0_i32_0 = arith.constant 0 : i32
    %c0_i32_1 = arith.constant 0 : i32
    return %c0_i32, %c0_i32_0 : i32, i32
  }
  func.func @transform_2(%arg0: i32) -> (i32, i32) {
    %c0_i32 = arith.constant 0 : i32
    %c0_i32_0 = arith.constant 0 : i32
    %c0_i32_1 = arith.constant 0 : i32
    return %c0_i32, %c0_i32_0 : i32, i32
  }
  func.func @transform_3(%arg0: i32) -> (i32, i32) {
    %c0_i32 = arith.constant 0 : i32
    %c0_i32_0 = arith.constant 0 : i32
    %c0_i32_1 = arith.constant 0 : i32
    return %c0_i32, %c0_i32_0 : i32, i32
  }
  func.func @transform_4(%arg0: i32) -> (i32, i32) {
    %c0_i32 = arith.constant 0 : i32
    %c0_i32_0 = arith.constant 0 : i32
    %c0_i32_1 = arith.constant 0 : i32
    return %c0_i32, %c0_i32_0 : i32, i32
  }
  func.func @transform_5(%arg0: i32) -> (i32, i32, i32) {
    %c0_i32 = arith.constant 0 : i32
    %c0_i32_0 = arith.constant 0 : i32
    %c0_i32_1 = arith.constant 0 : i32
    return %arg0, %c0_i32, %c0_i32_0 : i32, i32, i32
  }
  func.func @transform_6(%arg0: i32) -> (i32, i32, i32) {
    %c0_i32 = arith.constant 0 : i32
    %c0_i32_0 = arith.constant 0 : i32
    %c0_i32_1 = arith.constant 0 : i32
    return %arg0, %c0_i32, %c0_i32_0 : i32, i32, i32
  }
}

module attributes {stable_mosaic.version = 11 : i64} {
  func.func @_bn_add_relu_kernel(%arg0: i32, %arg1: memref<1x288x128xbf16, #tpu.memory_space<vmem>>, %arg2: memref<1x288x128xf32, #tpu.memory_space<vmem>>, %arg3: memref<1x128xf32, #tpu.memory_space<vmem>>, %arg4: memref<1x128xf32, #tpu.memory_space<vmem>>, %arg5: memref<1x288x128xf32, #tpu.memory_space<vmem>>) attributes {dimension_semantics = [#tpu.dimension_semantics<parallel>], iteration_bounds = array<i64: 2>, scalar_prefetch = 0 : i64, scratch_operands = 0 : i64, tpu.core_type = #tpu.core_type<tc>, window_params = [{transform_indices = @transform_0, window_bounds = array<i64: 1, 288, 128>}, {transform_indices = @transform_1, window_bounds = array<i64: 1, 288, 128>}, {pipeline_mode = #tpu.pipeline_mode<synchronous>, transform_indices = @transform_2, window_bounds = array<i64: 1, 128>}, {pipeline_mode = #tpu.pipeline_mode<synchronous>, transform_indices = @transform_3, window_bounds = array<i64: 1, 128>}, {transform_indices = @transform_4, window_bounds = array<i64: 1, 288, 128>}]} {
    %c0 = arith.constant 0 : index
    %c0_0 = arith.constant 0 : index
    %c0_1 = arith.constant 0 : index
    %0 = vector.load %arg2[%c0, %c0_0, %c0_1] : memref<1x288x128xf32, #tpu.memory_space<vmem>>, vector<1x288x128xf32>
    %1 = vector.shape_cast %0 : vector<1x288x128xf32> to vector<288x128xf32>
    %c0_2 = arith.constant 0 : index
    %c0_3 = arith.constant 0 : index
    %c0_4 = arith.constant 0 : index
    %2 = vector.load %arg1[%c0_2, %c0_3, %c0_4] : memref<1x288x128xbf16, #tpu.memory_space<vmem>>, vector<1x288x128xbf16>
    %3 = vector.shape_cast %2 : vector<1x288x128xbf16> to vector<288x128xbf16>
    %4 = arith.extf %3 : vector<288x128xbf16> to vector<288x128xf32>
    %c0_5 = arith.constant 0 : index
    %c0_6 = arith.constant 0 : index
    %5 = vector.load %arg3[%c0_5, %c0_6] : memref<1x128xf32, #tpu.memory_space<vmem>>, vector<1x128xf32>
    %6 = vector.broadcast %5 : vector<1x128xf32> to vector<288x128xf32>
    %7 = arith.mulf %4, %6 : vector<288x128xf32>
    %8 = arith.addf %1, %7 : vector<288x128xf32>
    %c0_7 = arith.constant 0 : index
    %c0_8 = arith.constant 0 : index
    %9 = vector.load %arg4[%c0_7, %c0_8] : memref<1x128xf32, #tpu.memory_space<vmem>>, vector<1x128xf32>
    %10 = vector.broadcast %9 : vector<1x128xf32> to vector<288x128xf32>
    %11 = arith.addf %8, %10 : vector<288x128xf32>
    %cst = arith.constant 0.000000e+00 : f32
    %12 = vector.broadcast %cst : f32 to vector<288x128xf32>
    %13 = arith.maximumf %11, %12 : vector<288x128xf32>
    %c0_9 = arith.constant 0 : index
    %c0_10 = arith.constant 0 : index
    %c0_11 = arith.constant 0 : index
    %14 = vector.load %arg5[%c0_9, %c0_10, %c0_11] : memref<1x288x128xf32, #tpu.memory_space<vmem>>, vector<1x288x128xf32>
    %15 = vector.shape_cast %14 : vector<1x288x128xf32> to vector<288x128xf32>
    %16 = vector.shape_cast %13 : vector<288x128xf32> to vector<1x288x128xf32>
    tpu.vector_store %arg5[%c0_9, %c0_10, %c0_11], %16 {strides = array<i32>} : memref<1x288x128xf32, #tpu.memory_space<vmem>>, vector<1x288x128xf32>,
    return
  }
  func.func @transform_0(%arg0: i32) -> (i32, i32, i32) {
    %c0_i32 = arith.constant 0 : i32
    %c0_i32_0 = arith.constant 0 : i32
    %c0_i32_1 = arith.constant 0 : i32
    return %arg0, %c0_i32, %c0_i32_0 : i32, i32, i32
  }
  func.func @transform_1(%arg0: i32) -> (i32, i32, i32) {
    %c0_i32 = arith.constant 0 : i32
    %c0_i32_0 = arith.constant 0 : i32
    %c0_i32_1 = arith.constant 0 : i32
    return %arg0, %c0_i32, %c0_i32_0 : i32, i32, i32
  }
  func.func @transform_2(%arg0: i32) -> (i32, i32) {
    %c0_i32 = arith.constant 0 : i32
    %c0_i32_0 = arith.constant 0 : i32
    %c0_i32_1 = arith.constant 0 : i32
    return %c0_i32, %c0_i32_0 : i32, i32
  }
  func.func @transform_3(%arg0: i32) -> (i32, i32) {
    %c0_i32 = arith.constant 0 : i32
    %c0_i32_0 = arith.constant 0 : i32
    %c0_i32_1 = arith.constant 0 : i32
    return %c0_i32, %c0_i32_0 : i32, i32
  }
  func.func @transform_4(%arg0: i32) -> (i32, i32, i32) {
    %c0_i32 = arith.constant 0 : i32
    %c0_i32_0 = arith.constant 0 : i32
    %c0_i32_1 = arith.constant 0 : i32
    return %arg0, %c0_i32, %c0_i32_0 : i32, i32, i32
  }
}

</mosaic_0001>

<bundles_post_ra>
// kernel: res18_basicblock_forward.5
= control target key start
LH: loop header
LB: loop body
LE: loop exit
PB: predicated region body
PF: predicated region fallthrough
CT: control target
= control target key end

     0   :  { %s725_s15 = smov 0   ;;  %s931_s0 = inlined_call_operand.vmem [shape: bf16[2,288,128], index: 0, kind: input, shape index: {}]   ;;  %s932_s1 = inlined_call_operand.vmem [shape: f32[2,288,128], index: 1, kind: input, shape index: {}]   ;;  %s933_s2 = inlined_call_operand.vmem [shape: f32[1,128], index: 2, kind: input, shape index: {}]   ;;  %s934_s3 = inlined_call_operand.vmem [shape: f32[1,128], index: 3, kind: input, shape index: {}]   ;;  %s935_s4 = inlined_call_operand.vmem [shape: f32[2,288,128], index: 4, kind: output, shape index: {}]  }
   0x1 LB: > { %s581_s16 = sadd.s32 4294967295, %s698_s15   ;;  %p585_p0 = scmp.ge.s32.totalorder %s698_s15, 1  ;;  %s698_s15 = sphi %s725_s15, %s14_s15  }
   0x2   : > { %p172_p1 = scmp.lt.s32.totalorder %s698_s15, 3 }
   0x4   : > { %p173_p2 = pnand %p585_p0, %p172_p1 }
   0x5   : > { %p203_p3 = scmp.lt.s32.totalorder (!%p173_p2), %s581_s16, 1 }
   0x6   : > { %176 = sbr.rel (%p173_p2) target bundleno = 69 (0x45), region = 36 }
   0xb   : > { %s937_s16 = smov (!%p203_p3, %s581_s16), 1  ;;  %v745_v0 = vld [vmem:[%s933_s2] ss:$0 sm:$0xff] }
   0xc   : > { %s680_s17 = smul.u32 144, %s937_s16  ;;  %v761_v6 = vld [vmem:[%s934_s3] ss:$0 sm:$0xff] }
   0xd   : > { %s681_s18 = smul.u32 288, %s937_s16 }
   0xe   : > { %s740_s21 = scalar_lea.vmem %s931_s0, %s680_s17 }
   0xf   : > { %s752_s26 = scalar_lea.vmem %s932_s1, %s681_s18  ;;  %v592_v1 = vld [vmem:[%s740_s21] sm:$0xff]   ;;  %v663_v2 = vld [vmem:[%s740_s21 + $0x8] sm:$0xff]   ;;  %v664_v3 = vld [vmem:[%s740_s21 + $0x10] sm:$0xff]   ;;  %s788_s5 = scalar_lea.vmem %s935_s4, %s681_s18 }
  0x10   : > { %v218_v4 = vld [vmem:[%s752_s26] sm:$0xff]  ;;  %v593_v5 = vunpack.c.l.bf16 %v592_v1  ;;  %v594_v7 = vunpack.c.h.bf16 %v592_v1  ;;  %v597_v8 = vunpack.c.l.bf16 %v663_v2  ;;  %v598_v9 = vunpack.c.h.bf16 %v663_v2  ;;  %v219_v10 = vld [vmem:[%s752_s26 + $0x8] sm:$0xff]  ;;  %v220_v11 = vld [vmem:[%s752_s26 + $0x10] sm:$0xff] }
  0x11   : > { %v221_v12 = vld [vmem:[%s752_s26 + $0x18] sm:$0xff]  ;;  %v601_v13 = vunpack.c.l.bf16 %v664_v3  ;;  %v602_v14 = vunpack.c.h.bf16 %v664_v3  ;;  %v222_v19 = vld [vmem:[%s752_s26 + $0x20] sm:$0xff]  ;;  %v223_v20 = vld [vmem:[%s752_s26 + $0x28] sm:$0xff] }
  0x12   : > { %v330_v15 = vmul.f32 %v745_v0, %v593_v5  ;;  %v331_v16 = vmul.f32 %v745_v0, %v594_v7  ;;  %v332_v17 = vmul.f32 %v745_v0, %v597_v8  ;;  %v333_v18 = vmul.f32 %v745_v0, %v598_v9  ;;  %v665_v21 = vld [vmem:[%s740_s21 + $0x18] sm:$0xff]   ;;  %v224_v30 = vld [vmem:[%s752_s26 + $0x30] sm:$0xff]  ;;  %v666_v44 = vld [vmem:[%s740_s21 + $0x20] sm:$0xff]  }
  0x13   : > { %v334_v22 = vmul.f32 %v745_v0, %v601_v13  ;;  %v335_v23 = vmul.f32 %v745_v0, %v602_v14  ;;  %v605_v24 = vunpack.c.l.bf16 %v665_v21  ;;  %v606_v25 = vunpack.c.h.bf16 %v665_v21  ;;  %v225_v31 = vld [vmem:[%s752_s26 + $0x38] sm:$0xff]  ;;  %v667_v45 = vld [vmem:[%s740_s21 + $0x28] sm:$0xff]   ;;  %v668_v50 = vld [vmem:[%s740_s21 + $0x30] sm:$0xff]  }
  0x14   : > { %v366_v26 = vadd.f32 %v330_v15, %v218_v4  ;;  %v367_v27 = vadd.f32 %v331_v16, %v219_v10  ;;  %v368_v28 = vadd.f32 %v332_v17, %v220_v11  ;;  %v369_v29 = vadd.f32 %v333_v18, %v221_v12  ;;  %v226_v55 = vld [vmem:[%s752_s26 + $0x40] sm:$0xff]  ;;  %v669_v60 = vld [vmem:[%s740_s21 + $0x38] sm:$0xff]   ;;  %v227_v63 = vld [vmem:[%s752_s26 + $0x48] sm:$0xff] }
  0x15   : > { %v370_v32 = vadd.f32 %v334_v22, %v222_v19  ;;  %v371_v33 = vadd.f32 %v335_v23, %v223_v20  ;;  %v336_v34 = vmul.f32 %v745_v0, %v605_v24  ;;  %v337_v35 = vmul.f32 %v745_v0, %v606_v25  ;;  %v228_v1 = vld [vmem:[%s752_s26 + $0x50] sm:$0xff]  ;;  %v229_v2 = vld [vmem:[%s752_s26 + $0x58] sm:$0xff]  ;;  %v230_v10 = vld [vmem:[%s752_s26 + $0x60] sm:$0xff] }
  0x16   : > { %v406_v36 = vadd.f32 %v761_v6, %v366_v26  ;;  %v407_v37 = vadd.f32 %v761_v6, %v367_v27  ;;  %v408_v38 = vadd.f32 %v761_v6, %v368_v28  ;;  %v409_v39 = vadd.f32 %v761_v6, %v369_v29  ;;  %v231_v11 = vld [vmem:[%s752_s26 + $0x68] sm:$0xff]  ;;  %v232_v20 = vld [vmem:[%s752_s26 + $0x70] sm:$0xff]  ;;  %v233_v21 = vld [vmem:[%s752_s26 + $0x78] sm:$0xff] }
  0x17   : > { %v410_v40 = vadd.f32 %v761_v6, %v370_v32  ;;  %v411_v41 = vadd.f32 %v761_v6, %v371_v33  ;;  %v372_v42 = vadd.f32 %v336_v34, %v224_v30  ;;  %v373_v43 = vadd.f32 %v337_v35, %v225_v31  ;;  %v670_v34 = vld [vmem:[%s740_s21 + $0x40] sm:$0xff]   ;;  %v671_v35 = vld [vmem:[%s740_s21 + $0x48] sm:$0xff]  }
  0x18   : > { %v442_v46 = vmax.f32 %v406_v36, 0.0  ;;  %v443_v47 = vmax.f32 %v407_v37, 0.0  ;;  %v444_v48 = vmax.f32 %v408_v38, 0.0  ;;  %v445_v49 = vmax.f32 %v409_v39, 0.0 }
  0x19   : > { %v446_v51 = vmax.f32 %v410_v40, 0.0  ;;  %v447_v52 = vmax.f32 %v411_v41, 0.0  ;;  %v412_v53 = vadd.f32 %v761_v6, %v372_v42  ;;  %v413_v54 = vadd.f32 %v761_v6, %v373_v43  ;;  %v672_v40 = vld [vmem:[%s740_s21 + $0x50] sm:$0xff]  }
  0x1a   : > { %478 = vst [vmem:[%s788_s5] sm:$0xff] %v442_v46  ;;  %v609_v56 = vunpack.c.l.bf16 %v666_v44  ;;  %v610_v57 = vunpack.c.h.bf16 %v666_v44  ;;  %v613_v58 = vunpack.c.l.bf16 %v667_v45  ;;  %v614_v59 = vunpack.c.h.bf16 %v667_v45  ;;  %v234_v45 = vld [vmem:[%s752_s26 + $0x80] sm:$0xff] }
  0x1b   : > { %479 = vst [vmem:[%s788_s5 + $0x8] sm:$0xff] %v443_v47  ;;  %v448_v61 = vmax.f32 %v412_v53, 0.0  ;;  %v449_v62 = vmax.f32 %v413_v54, 0.0  ;;  %v617_v3 = vunpack.c.l.bf16 %v668_v50  ;;  %v618_v4 = vunpack.c.h.bf16 %v668_v50  ;;  %v673_v50 = vld [vmem:[%s740_s21 + $0x58] sm:$0xff]   ;;  %v235_v53 = vld [vmem:[%s752_s26 + $0x88] sm:$0xff]  ;;  %v236_v54 = vld [vmem:[%s752_s26 + $0x90] sm:$0xff] }
  0x1c   : > { %480 = vst [vmem:[%s788_s5 + $0x10] sm:$0xff] %v444_v48  ;;  %v338_v5 = vmul.f32 %v745_v0, %v609_v56  ;;  %v339_v7 = vmul.f32 %v745_v0, %v610_v57  ;;  %v340_v8 = vmul.f32 %v745_v0, %v613_v58  ;;  %v341_v9 = vmul.f32 %v745_v0, %v614_v59 }
  0x1d   : > { %481 = vst [vmem:[%s788_s5 + $0x18] sm:$0xff] %v445_v49  ;;  %v342_v12 = vmul.f32 %v745_v0, %v617_v3  ;;  %v343_v13 = vmul.f32 %v745_v0, %v618_v4  ;;  %v621_v14 = vunpack.c.l.bf16 %v669_v60  ;;  %v622_v15 = vunpack.c.h.bf16 %v669_v60 }
  0x1e   : > { %482 = vst [vmem:[%s788_s5 + $0x20] sm:$0xff] %v446_v51  ;;  %v374_v16 = vadd.f32 %v338_v5, %v226_v55  ;;  %v375_v17 = vadd.f32 %v339_v7, %v227_v63  ;;  %v376_v18 = vadd.f32 %v340_v8, %v228_v1  ;;  %v377_v19 = vadd.f32 %v341_v9, %v229_v2  ;;  %v237_v55 = vld [vmem:[%s752_s26 + $0x98] sm:$0xff]  ;;  %v239_v63 = vld [vmem:[%s752_s26 + $0xa8] sm:$0xff] }
  0x1f   : > { %483 = vst [vmem:[%s788_s5 + $0x28] sm:$0xff] %v447_v52  ;;  %v378_v22 = vadd.f32 %v342_v12, %v230_v10  ;;  %v379_v23 = vadd.f32 %v343_v13, %v231_v11  ;;  %v344_v24 = vmul.f32 %v745_v0, %v621_v14  ;;  %v345_v25 = vmul.f32 %v745_v0, %v622_v15  ;;  %v240_v10 = vld [vmem:[%s752_s26 + $0xb0] sm:$0xff]  ;;  %v241_v11 = vld [vmem:[%s752_s26 + $0xb8] sm:$0xff] }
  0x20   : > { %484 = vst [vmem:[%s788_s5 + $0x30] sm:$0xff] %v448_v61  ;;  %v414_v26 = vadd.f32 %v761_v6, %v374_v16  ;;  %v415_v27 = vadd.f32 %v761_v6, %v375_v17  ;;  %v416_v28 = vadd.f32 %v761_v6, %v376_v18  ;;  %v417_v29 = vadd.f32 %v761_v6, %v377_v19 }
  0x21   : > { %485 = vst [vmem:[%s788_s5 + $0x38] sm:$0xff] %v449_v62  ;;  %v418_v30 = vadd.f32 %v761_v6, %v378_v22  ;;  %v419_v31 = vadd.f32 %v761_v6, %v379_v23  ;;  %v380_v32 = vadd.f32 %v344_v24, %v232_v20  ;;  %v381_v33 = vadd.f32 %v345_v25, %v233_v21  ;;  %v238_v62 = vld [vmem:[%s752_s26 + $0xa0] sm:$0xff]  ;;  %v675_v25 = vld [vmem:[%s740_s21 + $0x68] sm:$0xff]  }
  0x22   : > { %v450_v36 = vmax.f32 %v414_v26, 0.0  ;;  %v451_v37 = vmax.f32 %v415_v27, 0.0  ;;  %v452_v38 = vmax.f32 %v416_v28, 0.0  ;;  %v453_v39 = vmax.f32 %v417_v29, 0.0  ;;  %v674_v24 = vld [vmem:[%s740_s21 + $0x60] sm:$0xff]  }
  0x23   : > { %v454_v41 = vmax.f32 %v418_v30, 0.0  ;;  %v455_v42 = vmax.f32 %v419_v31, 0.0  ;;  %v420_v43 = vadd.f32 %v761_v6, %v380_v32  ;;  %v421_v44 = vadd.f32 %v761_v6, %v381_v33  ;;  %v676_v30 = vld [vmem:[%s740_s21 + $0x70] sm:$0xff]  }
  0x24   : > { %486 = vst [vmem:[%s788_s5 + $0x40] sm:$0xff] %v450_v36  ;;  %v625_v46 = vunpack.c.l.bf16 %v670_v34  ;;  %v626_v47 = vunpack.c.h.bf16 %v670_v34  ;;  %v629_v48 = vunpack.c.l.bf16 %v671_v35  ;;  %v630_v49 = vunpack.c.h.bf16 %v671_v35  ;;  %v242_v35 = vld [vmem:[%s752_s26 + $0xc0] sm:$0xff] }
  0x25   : > { %487 = vst [vmem:[%s788_s5 + $0x48] sm:$0xff] %v451_v37  ;;  %v456_v51 = vmax.f32 %v420_v43, 0.0  ;;  %v457_v52 = vmax.f32 %v421_v44, 0.0  ;;  %v633_v56 = vunpack.c.l.bf16 %v672_v40  ;;  %v634_v57 = vunpack.c.h.bf16 %v672_v40  ;;  %v677_v40 = vld [vmem:[%s740_s21 + $0x78] sm:$0xff]   ;;  %v243_v43 = vld [vmem:[%s752_s26 + $0xc8] sm:$0xff]  ;;  %v244_v44 = vld [vmem:[%s752_s26 + $0xd0] sm:$0xff] }
  0x26   : > { %488 = vst [vmem:[%s788_s5 + $0x50] sm:$0xff] %v452_v38  ;;  %v346_v58 = vmul.f32 %v745_v0, %v625_v46  ;;  %v347_v59 = vmul.f32 %v745_v0, %v626_v47  ;;  %v348_v60 = vmul.f32 %v745_v0, %v629_v48  ;;  %v349_v61 = vmul.f32 %v745_v0, %v630_v49 }
  0x27   : > { %489 = vst [vmem:[%s788_s5 + $0x58] sm:$0xff] %v453_v39  ;;  %v350_v1 = vmul.f32 %v745_v0, %v633_v56  ;;  %v351_v2 = vmul.f32 %v745_v0, %v634_v57  ;;  %v637_v3 = vunpack.c.l.bf16 %v673_v50  ;;  %v638_v4 = vunpack.c.h.bf16 %v673_v50 }
  0x28   : > { %490 = vst [vmem:[%s788_s5 + $0x60] sm:$0xff] %v454_v41  ;;  %v382_v5 = vadd.f32 %v346_v58, %v234_v45  ;;  %v383_v7 = vadd.f32 %v347_v59, %v235_v53  ;;  %v384_v8 = vadd.f32 %v348_v60, %v236_v54  ;;  %v385_v9 = vadd.f32 %v349_v61, %v237_v55  ;;  %v245_v45 = vld [vmem:[%s752_s26 + $0xd8] sm:$0xff]  ;;  %v247_v53 = vld [vmem:[%s752_s26 + $0xe8] sm:$0xff] }
  0x29   : > { %491 = vst [vmem:[%s788_s5 + $0x68] sm:$0xff] %v455_v42  ;;  %v386_v12 = vadd.f32 %v350_v1, %v238_v62  ;;  %v387_v13 = vadd.f32 %v351_v2, %v239_v63  ;;  %v352_v14 = vmul.f32 %v745_v0, %v637_v3  ;;  %v353_v15 = vmul.f32 %v745_v0, %v638_v4  ;;  %v248_v62 = vld [vmem:[%s752_s26 + $0xf0] sm:$0xff]  ;;  %v249_v63 = vld [vmem:[%s752_s26 + $0xf8] sm:$0xff] }
  0x2a   : > { %492 = vst [vmem:[%s788_s5 + $0x70] sm:$0xff] %v456_v51  ;;  %v422_v16 = vadd.f32 %v761_v6, %v382_v5  ;;  %v423_v17 = vadd.f32 %v761_v6, %v383_v7  ;;  %v424_v18 = vadd.f32 %v761_v6, %v384_v8  ;;  %v425_v19 = vadd.f32 %v761_v6, %v385_v9 }
  0x2b   : > { %493 = vst [vmem:[%s788_s5 + $0x78] sm:$0xff] %v457_v52  ;;  %v426_v20 = vadd.f32 %v761_v6, %v386_v12  ;;  %v427_v21 = vadd.f32 %v761_v6, %v387_v13  ;;  %v388_v22 = vadd.f32 %v352_v14, %v240_v10  ;;  %v389_v23 = vadd.f32 %v353_v15, %v241_v11  ;;  %v246_v52 = vld [vmem:[%s752_s26 + $0xe0] sm:$0xff]  ;;  %v679_v15 = vld [vmem:[%s740_s21 + $0x88] sm:$0xff]  }
  0x2c   : > { %v458_v26 = vmax.f32 %v422_v16, 0.0  ;;  %v459_v27 = vmax.f32 %v423_v17, 0.0  ;;  %v460_v28 = vmax.f32 %v424_v18, 0.0  ;;  %v461_v29 = vmax.f32 %v425_v19, 0.0  ;;  %v678_v14 = vld [vmem:[%s740_s21 + $0x80] sm:$0xff]  }
  0x2d   : > { %v462_v31 = vmax.f32 %v426_v20, 0.0  ;;  %v463_v32 = vmax.f32 %v427_v21, 0.0  ;;  %v428_v33 = vadd.f32 %v761_v6, %v388_v22  ;;  %v429_v34 = vadd.f32 %v761_v6, %v389_v23  ;;  %v250_v23 = vld [vmem:[%s752_s26 + $0x100] sm:$0xff] }
  0x2e   : > { %494 = vst [vmem:[%s788_s5 + $0x80] sm:$0xff] %v458_v26  ;;  %v641_v36 = vunpack.c.l.bf16 %v674_v24  ;;  %v642_v37 = vunpack.c.h.bf16 %v674_v24  ;;  %v645_v38 = vunpack.c.l.bf16 %v675_v25  ;;  %v646_v39 = vunpack.c.h.bf16 %v675_v25 }
  0x2f   : > { %495 = vst [vmem:[%s788_s5 + $0x88] sm:$0xff] %v459_v27  ;;  %v464_v41 = vmax.f32 %v428_v33, 0.0  ;;  %v465_v42 = vmax.f32 %v429_v34, 0.0  ;;  %v649_v46 = vunpack.c.l.bf16 %v676_v30  ;;  %v650_v47 = vunpack.c.h.bf16 %v676_v30  ;;  %v251_v30 = vld [vmem:[%s752_s26 + $0x108] sm:$0xff] }
  0x30   : > { %496 = vst [vmem:[%s788_s5 + $0x90] sm:$0xff] %v460_v28  ;;  %v354_v48 = vmul.f32 %v745_v0, %v641_v36  ;;  %v355_v49 = vmul.f32 %v745_v0, %v642_v37  ;;  %v356_v50 = vmul.f32 %v745_v0, %v645_v38  ;;  %v357_v51 = vmul.f32 %v745_v0, %v646_v39 }
  0x31   : > { %497 = vst [vmem:[%s788_s5 + $0x98] sm:$0xff] %v461_v29  ;;  %v358_v54 = vmul.f32 %v745_v0, %v649_v46  ;;  %v359_v55 = vmul.f32 %v745_v0, %v650_v47  ;;  %v653_v56 = vunpack.c.l.bf16 %v677_v40  ;;  %v654_v57 = vunpack.c.h.bf16 %v677_v40 }
  0x32   : > { %498 = vst [vmem:[%s788_s5 + $0xa0] sm:$0xff] %v462_v31  ;;  %v390_v58 = vadd.f32 %v354_v48, %v242_v35  ;;  %v391_v59 = vadd.f32 %v355_v49, %v243_v43  ;;  %v392_v60 = vadd.f32 %v356_v50, %v244_v44  ;;  %v393_v61 = vadd.f32 %v357_v51, %v245_v45  ;;  %v252_v31 = vld [vmem:[%s752_s26 + $0x110] sm:$0xff] }
  0x33   : > { %499 = vst [vmem:[%s788_s5 + $0xa8] sm:$0xff] %v463_v32  ;;  %v394_v1 = vadd.f32 %v358_v54, %v246_v52  ;;  %v395_v2 = vadd.f32 %v359_v55, %v247_v53  ;;  %v360_v3 = vmul.f32 %v745_v0, %v653_v56  ;;  %v361_v4 = vmul.f32 %v745_v0, %v654_v57  ;;  %v253_v32 = vld [vmem:[%s752_s26 + $0x118] sm:$0xff] }
  0x34   : > { %500 = vst [vmem:[%s788_s5 + $0xb0] sm:$0xff] %v464_v41  ;;  %v430_v5 = vadd.f32 %v761_v6, %v390_v58  ;;  %v431_v7 = vadd.f32 %v761_v6, %v391_v59  ;;  %v432_v8 = vadd.f32 %v761_v6, %v392_v60  ;;  %v433_v9 = vadd.f32 %v761_v6, %v393_v61 }
  0x35   : > { %501 = vst [vmem:[%s788_s5 + $0xb8] sm:$0xff] %v465_v42  ;;  %v434_v10 = vadd.f32 %v761_v6, %v394_v1  ;;  %v435_v11 = vadd.f32 %v761_v6, %v395_v2  ;;  %v396_v12 = vadd.f32 %v360_v3, %v248_v62  ;;  %v397_v13 = vadd.f32 %v361_v4, %v249_v63 }
  0x36   : > { %v466_v16 = vmax.f32 %v430_v5, 0.0  ;;  %v467_v17 = vmax.f32 %v431_v7, 0.0  ;;  %v468_v18 = vmax.f32 %v432_v8, 0.0  ;;  %v469_v19 = vmax.f32 %v433_v9, 0.0 }
  0x37   : > { %v470_v20 = vmax.f32 %v434_v10, 0.0  ;;  %v436_v21 = vadd.f32 %v761_v6, %v396_v12  ;;  %v437_v22 = vadd.f32 %v761_v6, %v397_v13  ;;  %v657_v24 = vunpack.c.l.bf16 %v678_v14 }
  0x38   : > { %502 = vst [vmem:[%s788_s5 + $0xc0] sm:$0xff] %v466_v16  ;;  %v658_v25 = vunpack.c.h.bf16 %v678_v14  ;;  %v661_v26 = vunpack.c.l.bf16 %v679_v15  ;;  %v662_v27 = vunpack.c.h.bf16 %v679_v15  ;;  %v471_v28 = vmax.f32 %v435_v11, 0.0 }
  0x39   : > { %503 = vst [vmem:[%s788_s5 + $0xc8] sm:$0xff] %v467_v17  ;;  %v472_v29 = vmax.f32 %v436_v21, 0.0  ;;  %v362_v33 = vmul.f32 %v745_v0, %v657_v24  ;;  %v473_v37 = vmax.f32 %v437_v22, 0.0 }
  0x3a   : > { %504 = vst [vmem:[%s788_s5 + $0xd0] sm:$0xff] %v468_v18  ;;  %v363_v34 = vmul.f32 %v745_v0, %v658_v25  ;;  %v364_v35 = vmul.f32 %v745_v0, %v661_v26  ;;  %v365_v36 = vmul.f32 %v745_v0, %v662_v27 }
  0x3b   : > { %505 = vst [vmem:[%s788_s5 + $0xd8] sm:$0xff] %v469_v19  ;;  %v398_v38 = vadd.f32 %v362_v33, %v250_v23 }
  0x3c   : > { %506 = vst [vmem:[%s788_s5 + $0xe0] sm:$0xff] %v470_v20  ;;  %v399_v39 = vadd.f32 %v363_v34, %v251_v30  ;;  %v400_v40 = vadd.f32 %v364_v35, %v252_v31  ;;  %v401_v41 = vadd.f32 %v365_v36, %v253_v32 }
  0x3d   : > { %507 = vst [vmem:[%s788_s5 + $0xe8] sm:$0xff] %v471_v28  ;;  %v438_v42 = vadd.f32 %v761_v6, %v398_v38 }
  0x3e   : > { %508 = vst [vmem:[%s788_s5 + $0xf0] sm:$0xff] %v472_v29  ;;  %v439_v43 = vadd.f32 %v761_v6, %v399_v39  ;;  %v440_v44 = vadd.f32 %v761_v6, %v400_v40  ;;  %v441_v0 = vadd.f32 %v761_v6, %v401_v41 }
  0x3f   : > { %509 = vst [vmem:[%s788_s5 + $0xf8] sm:$0xff] %v473_v37  ;;  %v474_v45 = vmax.f32 %v438_v42, 0.0 }
  0x40   : > { %v475_v46 = vmax.f32 %v439_v43, 0.0  ;;  %v476_v47 = vmax.f32 %v440_v44, 0.0  ;;  %v477_v48 = vmax.f32 %v441_v0, 0.0 }
  0x41   : > { %510 = vst [vmem:[%s788_s5 + $0x100] sm:$0xff] %v474_v45 }
  0x42   : > { %511 = vst [vmem:[%s788_s5 + $0x108] sm:$0xff] %v475_v46 }
  0x43   : > { %512 = vst [vmem:[%s788_s5 + $0x110] sm:$0xff] %v476_v47 }
  0x44   : > { %513 = vst [vmem:[%s788_s5 + $0x118] sm:$0xff] %v477_v48 }
  0x45 PF: > { %s14_s15 = sadd.s32 1, %s698_s15  }
  0x46   : > { %p11_p4 = scmp.ge.s32.totalorder %s14_s15, 4  }
  0x48   :  { %13 = sbr.rel (!%p11_p4) target bundleno = 1 (0x1), region = 69 }

// kernel: res18_basicblock_forward.3
= control target key start
LH: loop header
LB: loop body
LE: loop exit
PB: predicated region body
PF: predicated region fallthrough
CT: control target
= control target key end

     0   :  { %s4035_s15 = smov 0   ;;  %s5138_s0 = inlined_call_operand.vmem [shape: f32[2,336,128], index: 0, kind: input, shape index: {}]   ;;  %s5139_s1 = inlined_call_operand.vmem [shape: f32[288,1], index: 1, kind: input, shape index: {}]   ;;  %s5140_s2 = inlined_call_operand.vmem [shape: bf16[1152,128], index: 2, kind: input, shape index: {}]   ;;  %s5141_s3 = inlined_call_operand.vmem [shape: bf16[2,288,128], index: 3, kind: output, shape index: {0}]   ;;  %s5142_s4 = inlined_call_operand.vmem [shape: f32[2,2,128], index: 4, kind: output, shape index: {1}]  }
   0x1 LB: > { %s3486_s16 = sadd.s32 4294967295, %s4007_s15   ;;  %p3490_p0 = scmp.ge.s32.totalorder %s4007_s15, 1  ;;  %s4007_s15 = sphi %s4035_s15, %s15_s15  }
   0x2   : > { %p165_p1 = scmp.lt.s32.totalorder %s4007_s15, 3 }
   0x4   : > { %p166_p2 = pnand %p3490_p0, %p165_p1 }
   0x6   : > { %169 = sbr.rel (%p166_p2) target bundleno = 848 (0x350), region = 32 }
   0xb   : > { %v3791_v0 = vld [vmem:[%s5140_s2 + $0x38] sm:$0xff]  ;;  %v3790_v1 = vld [vmem:[%s5140_s2 + $0x30] sm:$0xff]  ;;  %p195_p3 = scmp.lt.s32.totalorder %s3486_s16, 1  ;;  %v3789_v2 = vld [vmem:[%s5140_s2 + $0x28] sm:$0xff] }
   0xc   : > { %3963 = vmatpush.bf16.msra.mxu1 %v3791_v0  ;;  %3964 = vmatpush.bf16.msra.mxu2 %v3791_v0  ;;  %v3788_v3 = vld [vmem:[%s5140_s2 + $0x20] sm:$0xff]  ;;  %v3787_v4 = vld [vmem:[%s5140_s2 + $0x18] sm:$0xff]  ;;  %v3786_v7 = vld [vmem:[%s5140_s2 + $0x10] sm:$0xff] }
   0xd   : > { %2065 = vmatpush.bf16.msra.mxu0 %v3791_v0  ;;  %3965 = vmatpush.bf16.msra.mxu3 %v3791_v0  ;;  %s5152_s16 = smov (!%p195_p3, %s3486_s16), 1  ;;  %v3785_v16 = vld [vmem:[%s5140_s2 + $0x8] sm:$0xff]  ;;  %v3784_v27 = vld [vmem:[%s5140_s2] sm:$0xff]  ;;  %v3807_v30 = vld [vmem:[%s5140_s2 + $0xb8] sm:$0xff] }
   0xe   : > { %s3987_s25 = smul.u32 336, %s5152_s16  ;;  %v3799_v31 = vld [vmem:[%s5140_s2 + $0x78] sm:$0xff]  ;;  %v3806_v38 = vld [vmem:[%s5140_s2 + $0xb0] sm:$0xff]  ;;  %v3805_v49 = vld [vmem:[%s5140_s2 + $0xa8] sm:$0xff] }
   0xf   : > { %v3823_v32 = vld [vmem:[%s5140_s2 + $0x138] sm:$0xff]  ;;  %v3798_v39 = vld [vmem:[%s5140_s2 + $0x70] sm:$0xff]  ;;  %v3797_v52 = vld [vmem:[%s5140_s2 + $0x68] sm:$0xff]  ;;  %s3988_s18 = smul.u32 144, %s5152_s16 }
  0x10   : > { %3966 = vmatpush.bf16.msra.mxu1 %v3790_v1  ;;  %3967 = vmatpush.bf16.msra.mxu2 %v3790_v1  ;;  %s4064_s30 = scalar_lea.vmem %s5138_s0, %s3987_s25  ;;  %v3822_v40 = vld [vmem:[%s5140_s2 + $0x130] sm:$0xff]  ;;  %v3815_v46 = vld [vmem:[%s5140_s2 + $0xf8] sm:$0xff]  ;;  %v3821_v53 = vld [vmem:[%s5140_s2 + $0x128] sm:$0xff] }
  0x11   : > { %2066 = vmatpush.bf16.msra.mxu0 %v3790_v1  ;;  %3968 = vmatpush.bf16.msra.mxu3 %v3790_v1  ;;  %v219_v5 = vld [vmem:[%s4064_s30 + $0x55] sm:$0xff]  ;;  %v220_v6 = vld [vmem:[%s4064_s30 + $0x5d] sm:$0xff]  ;;  %v229_v8 = vld [vmem:[%s4064_s30 + $0xa5] sm:$0xff]  ;;  %s4923_s23 = scalar_lea.vmem %s5141_s3, %s3988_s18 }
  0x12   : > { %v230_v9 = vld [vmem:[%s4064_s30 + $0xad] sm:$0xff]  ;;  %v209_v10 = vld [vmem:[%s4064_s30 + $0x5] sm:$0xff]  ;;  %v255_v12 = vpack.c.bf16 %v219_v5, %v219_v5  ;;  %v256_v13 = vpack.c.bf16 %v220_v6, %v220_v6  ;;  %v265_v14 = vpack.c.bf16 %v229_v8, %v229_v8  ;;  %v239_v19 = vld [vmem:[%s4064_s30 + $0xf5] sm:$0xff] }
  0x13   : > { %v210_v11 = vld [vmem:[%s4064_s30 + $0xd] sm:$0xff]  ;;  %v266_v15 = vpack.c.bf16 %v230_v9, %v230_v9  ;;  %v245_v17 = vpack.c.bf16 %v209_v10, %v209_v10  ;;  %v240_v20 = vld [vmem:[%s4064_s30 + $0xfd] sm:$0xff]  ;;  %v275_v25 = vpack.c.bf16 %v239_v19, %v239_v19  ;;  %v221_v41 = vld [vmem:[%s4064_s30 + $0x65] sm:$0xff] }
  0x14   : > { %3969 = vmatpush.bf16.msra.mxu1 %v3789_v2  ;;  %3970 = vmatpush.bf16.msra.mxu2 %v3789_v2  ;;  %v246_v18 = vpack.c.bf16 %v210_v11, %v210_v11  ;;  %v767_v21 = vunpack.c.l.b16 %v255_v12  ;;  %v768_v22 = vunpack.c.l.b16 %v256_v13  ;;  %v777_v23 = vunpack.c.l.b16 %v265_v14  ;;  %v222_v42 = vld [vmem:[%s4064_s30 + $0x6d] sm:$0xff]  ;;  %v231_v44 = vld [vmem:[%s4064_s30 + $0xb5] sm:$0xff]  ;;  %v232_v45 = vld [vmem:[%s4064_s30 + $0xbd] sm:$0xff] }
  0x15   : > { %2067 = vmatpush.bf16.msra.mxu0 %v3789_v2  ;;  %3971 = vmatpush.bf16.msra.mxu3 %v3789_v2  ;;  %v778_v24 = vunpack.c.l.b16 %v266_v15  ;;  %v276_v26 = vpack.c.bf16 %v240_v20, %v240_v20  ;;  %v757_v28 = vunpack.c.l.b16 %v245_v17  ;;  %v787_v35 = vunpack.c.l.b16 %v275_v25  ;;  %v211_v47 = vld [vmem:[%s4064_s30 + $0x15] sm:$0xff]  ;;  %v212_v48 = vld [vmem:[%s4064_s30 + $0x1d] sm:$0xff]  ;;  %v241_v59 = vld [vmem:[%s4064_s30 + $0x105] sm:$0xff] }
  0x16   : > { %v758_v29 = vunpack.c.l.b16 %v246_v18  ;;  %v798_v33 = vpack.c.b16 %v768_v22, %v767_v21  ;;  %v257_v50 = vpack.c.bf16 %v221_v41, %v221_v41  ;;  %v258_v51 = vpack.c.bf16 %v222_v42, %v222_v42  ;;  %v3814_v58 = vld [vmem:[%s5140_s2 + $0xf0] sm:$0xff]  ;;  %v3804_v61 = vld [vmem:[%s5140_s2 + $0xa0] sm:$0xff]  ;;  %v3813_v8 = vld [vmem:[%s5140_s2 + $0xe8] sm:$0xff] }
  0x17   : > { %v803_v34 = vpack.c.b16 %v778_v24, %v777_v23  ;;  %v788_v36 = vunpack.c.l.b16 %v276_v26  ;;  %v267_v54 = vpack.c.bf16 %v231_v44, %v231_v44  ;;  %v268_v55 = vpack.c.bf16 %v232_v45, %v232_v45  ;;  %v242_v60 = vld [vmem:[%s4064_s30 + $0x10d] sm:$0xff]  ;;  %v3796_v0 = vld [vmem:[%s5140_s2 + $0x60] sm:$0xff]  ;;  %v3803_v9 = vld [vmem:[%s5140_s2 + $0x98] sm:$0xff] }
  0x18   : > { %3972 = vmatpush.bf16.msra.mxu1 %v3788_v3  ;;  %3973 = vmatpush.bf16.msra.mxu2 %v3788_v3  ;;  %v793_v37 = vpack.c.b16 %v758_v29, %v757_v28  ;;  %v247_v56 = vpack.c.bf16 %v211_v47, %v211_v47  ;;  %v248_v57 = vpack.c.bf16 %v212_v48, %v212_v48  ;;  %v769_v62 = vunpack.c.l.b16 %v257_v50  ;;  %v3820_v1 = vld [vmem:[%s5140_s2 + $0x120] sm:$0xff]  ;;  %v3795_v10 = vld [vmem:[%s5140_s2 + $0x58] sm:$0xff]  ;;  %v234_v19 = vld [vmem:[%s4064_s30 + $0xcd] sm:$0xff] }
  0x19   : > { %2068 = vmatpush.bf16.msra.mxu0 %v3788_v3  ;;  %3974 = vmatpush.bf16.msra.mxu3 %v3788_v3  ;;  %v808_v43 = vpack.c.b16 %v788_v36, %v787_v35  ;;  %v770_v63 = vunpack.c.l.b16 %v258_v51  ;;  %v779_v2 = vunpack.c.l.b16 %v267_v54  ;;  %v780_v3 = vunpack.c.l.b16 %v268_v55  ;;  %v224_v17 = vld [vmem:[%s4064_s30 + $0x7d] sm:$0xff]  ;;  %v233_v18 = vld [vmem:[%s4064_s30 + $0xc5] sm:$0xff]  ;;  %v3802_v21 = vld [vmem:[%s5140_s2 + $0x90] sm:$0xff] }
  0x1a   : > { %v278_v5 = vpack.c.bf16 %v242_v60, %v242_v60  ;;  %v759_v6 = vunpack.c.l.b16 %v247_v56  ;;  %v3819_v22 = vld [vmem:[%s5140_s2 + $0x118] sm:$0xff]  ;;  %v3812_v23 = vld [vmem:[%s5140_s2 + $0xe0] sm:$0xff]  ;;  %v214_v25 = vld [vmem:[%s4064_s30 + $0x2d] sm:$0xff]  ;;  %v260_v28 = vpack.c.bf16 %v224_v17, %v224_v17 }
  0x1b   : > { %v799_v11 = vpack.c.b16 %v770_v63, %v769_v62  ;;  %v804_v12 = vpack.c.b16 %v780_v3, %v779_v2  ;;  %v213_v24 = vld [vmem:[%s4064_s30 + $0x25] sm:$0xff]  ;;  %v3794_v26 = vld [vmem:[%s5140_s2 + $0x50] sm:$0xff]  ;;  %v244_v36 = vld [vmem:[%s4064_s30 + $0x11d] sm:$0xff] }
  0x1c   : > { %3975 = vmatpush.bf16.msra.mxu1 %v3787_v4  ;;  %3976 = vmatpush.bf16.msra.mxu2 %v3787_v4  ;;  %v790_v14 = vunpack.c.l.b16 %v278_v5  ;;  %v3801_v29 = vld [vmem:[%s5140_s2 + $0x88] sm:$0xff]  ;;  %v243_v35 = vld [vmem:[%s4064_s30 + $0x115] sm:$0xff]  ;;  %v236_v55 = vld [vmem:[%s4064_s30 + $0xdd] sm:$0xff] }
  0x1d   : > { %2069 = vmatpush.bf16.msra.mxu0 %v3787_v4  ;;  %3977 = vmatpush.bf16.msra.mxu3 %v3787_v4  ;;  %v277_v4 = vpack.c.bf16 %v241_v59, %v241_v59  ;;  %v279_v42 = vpack.c.bf16 %v243_v35, %v243_v35  ;;  %v235_v54 = vld [vmem:[%s4064_s30 + $0xd5] sm:$0xff]  ;;  %v3800_v59 = vld [vmem:[%s5140_s2 + $0x80] sm:$0xff]  ;;  %v3817_v60 = vld [vmem:[%s5140_s2 + $0x108] sm:$0xff] }
  0x1e   : > { %v216_v62 = vld [vmem:[%s4064_s30 + $0x3d] sm:$0xff]  ;;  %v271_v3 = vpack.c.bf16 %v235_v54, %v235_v54 }
  0x1f   : > { %v789_v13 = vunpack.c.l.b16 %v277_v4  ;;  %v3792_v63 = vld [vmem:[%s5140_s2 + $0x40] sm:$0xff]  ;;  %v272_v4 = vpack.c.bf16 %v236_v55, %v236_v55 }
  0x20   : > { %3978 = vmatpush.bf16.msra.mxu1 %v3786_v7  ;;  %3979 = vmatpush.bf16.msra.mxu2 %v3786_v7  ;;  %v3808_v2 = vld [vmem:[%s5140_s2 + $0xc0] sm:$0xff] }
  0x21   : > { %2070 = vmatpush.bf16.msra.mxu0 %v3786_v7  ;;  %3980 = vmatpush.bf16.msra.mxu3 %v3786_v7  ;;  %v760_v7 = vunpack.c.l.b16 %v248_v57  ;;  %v809_v20 = vpack.c.b16 %v790_v14, %v789_v13  ;;  %v3793_v57 = vld [vmem:[%s5140_s2 + $0x48] sm:$0xff]  ;;  %v3816_v5 = vld [vmem:[%s5140_s2 + $0x100] sm:$0xff]  ;;  %v784_v13 = vunpack.c.l.b16 %v272_v4  ;;  %v359_v4 = vld [vmem:[%s4064_s30 + $0x37] sm:$0xff] }
  0x22   : > { %v281_v55 = vld [vmem:[%s4064_s30 + $0x6] sm:$0xff] }
  0x23   : > { %v794_v15 = vpack.c.b16 %v760_v7, %v759_v6  ;;  %v252_v7 = vpack.c.bf16 %v216_v62, %v216_v62  ;;  %v317_v62 = vpack.c.bf16 %v281_v55, %v281_v55  ;;  %v364_v55 = vld [vmem:[%s4064_s30 + $0x5f] sm:$0xff] }
  0x24   : > { %3981 = vmatpush.bf16.msra.mxu1 %v3785_v16  ;;  %3982 = vmatpush.bf16.msra.mxu2 %v3785_v16 }
  0x25   : > { %2071 = vmatpush.bf16.msra.mxu0 %v3785_v16  ;;  %3983 = vmatpush.bf16.msra.mxu3 %v3785_v16  ;;  %v223_v16 = vld [vmem:[%s4064_s30 + $0x75] sm:$0xff]  ;;  %v764_v17 = vunpack.c.l.b16 %v252_v7 }
  0x28   : > { %3984 = vmatpush.bf16.msra.mxu1 %v3784_v27  ;;  %3985 = vmatpush.bf16.msra.mxu2 %v3784_v27 }
  0x29   : > { %2072 = vmatpush.bf16.msra.mxu0 %v3784_v27  ;;  %3986 = vmatpush.bf16.msra.mxu3 %v3784_v27  ;;  %v259_v27 = vpack.c.bf16 %v223_v16, %v223_v16 }
  0x2b   : > { %2098 = vmatmul.bf16.vlgmr.msra.gmra.mxu1 %v798_v33  ;;  %2123 = vmatmul.bf16.vlgmr.msra.gmra.mxu2 %v803_v34  ;;  %v249_v33 = vpack.c.bf16 %v213_v24, %v213_v24  ;;  %v250_v34 = vpack.c.bf16 %v214_v25, %v214_v25  ;;  %v228_v24 = vld [vmem:[%s4064_s30 + $0x9d] sm:$0xff]  ;;  %v237_v25 = vld [vmem:[%s4064_s30 + $0xe5] sm:$0xff] }
  0x2c   : > { %2263 = vmatpush.bf16.msrb.mxu2 %v3807_v30  ;;  %2164 = vmatpush.bf16.msrb.mxu1 %v3799_v31  ;;  %v3818_v30 = vld [vmem:[%s5140_s2 + $0x110] sm:$0xff]  ;;  %v269_v31 = vpack.c.bf16 %v233_v18, %v233_v18  ;;  %v264_v35 = vpack.c.bf16 %v228_v24, %v228_v24 }
  0x2d   : > { %2461 = vmatpush.bf16.msrb.mxu0 %v3823_v32  ;;  %2148 = vmatmul.bf16.vlgmr.msra.gmra.mxu3 %v808_v43  ;;  %v270_v32 = vpack.c.bf16 %v234_v19, %v234_v19  ;;  %v280_v43 = vpack.c.bf16 %v244_v36, %v244_v36  ;;  %v761_v44 = vunpack.c.l.b16 %v249_v33  ;;  %v762_v45 = vunpack.c.l.b16 %v250_v34  ;;  %v3855_v33 = vld [vmem:[%s5140_s2 + $0x238] sm:$0xff]  ;;  %v3830_v24 = vld [vmem:[%s5140_s2 + $0x170] sm:$0xff] }
  0x2e   : > { %2073 = vmatmul.bf16.vlgmr.msra.gmra.mxu0 %v793_v37  ;;  %2362 = vmatpush.bf16.msrb.mxu3 %v3815_v46  ;;  %v3811_v37 = vld [vmem:[%s5140_s2 + $0xd8] sm:$0xff]  ;;  %v3810_v46 = vld [vmem:[%s5140_s2 + $0xd0] sm:$0xff]  ;;  %v273_v36 = vpack.c.bf16 %v237_v25, %v237_v25  ;;  %v431_v25 = vld [vmem:[%s4064_s30 + $0x28] sm:$0xff] }
  0x2f   : > { %v782_v41 = vunpack.c.l.b16 %v270_v32  ;;  %v792_v50 = vunpack.c.l.b16 %v280_v43  ;;  %v795_v51 = vpack.c.b16 %v762_v45, %v761_v44  ;;  %v218_v32 = vld [vmem:[%s4064_s30 + $0x4d] sm:$0xff]  ;;  %v776_v43 = vunpack.c.l.b16 %v264_v35 }
  0x30   : > { %2264 = vmatpush.bf16.msrb.mxu2 %v3806_v38  ;;  %2165 = vmatpush.bf16.msrb.mxu1 %v3798_v39  ;;  %v771_v38 = vunpack.c.l.b16 %v259_v27  ;;  %v772_v39 = vunpack.c.l.b16 %v260_v28  ;;  %v3839_v27 = vld [vmem:[%s5140_s2 + $0x1b8] sm:$0xff]  ;;  %v238_v28 = vld [vmem:[%s4064_s30 + $0xed] sm:$0xff]  ;;  %v785_v44 = vunpack.c.l.b16 %v273_v36 }
  0x31   : > { %2462 = vmatpush.bf16.msrb.mxu0 %v3822_v40  ;;  %v781_v40 = vunpack.c.l.b16 %v269_v31  ;;  %v217_v31 = vld [vmem:[%s4064_s30 + $0x45] sm:$0xff] }
  0x32   : > { %2363 = vmatpush.bf16.msrb.mxu3 %v3814_v58  ;;  %v800_v47 = vpack.c.b16 %v772_v39, %v771_v38  ;;  %v3809_v58 = vld [vmem:[%s5140_s2 + $0xc8] sm:$0xff]  ;;  %v253_v38 = vpack.c.bf16 %v217_v31, %v217_v31  ;;  %v254_v39 = vpack.c.bf16 %v218_v32, %v218_v32 }
  0x33   : > { %v805_v48 = vpack.c.b16 %v782_v41, %v781_v40  ;;  %v357_v40 = vld [vmem:[%s4064_s30 + $0x27] sm:$0xff]  ;;  %v358_v41 = vld [vmem:[%s4064_s30 + $0x2f] sm:$0xff] }
  0x34   : > { %2265 = vmatpush.bf16.msrb.mxu2 %v3805_v49  ;;  %2166 = vmatpush.bf16.msrb.mxu1 %v3797_v52  ;;  %v791_v49 = vunpack.c.l.b16 %v279_v42  ;;  %v225_v52 = vld [vmem:[%s4064_s30 + $0x85] sm:$0xff] }
  0x35   : > { %2463 = vmatpush.bf16.msrb.mxu0 %v3821_v53  ;;  %v226_v53 = vld [vmem:[%s4064_s30 + $0x8d] sm:$0xff] }
  0x36   : > { %2364 = vmatpush.bf16.msrb.mxu3 %v3813_v8  ;;  %v810_v56 = vpack.c.b16 %v792_v50, %v791_v49  ;;  %v355_v8 = vld [vmem:[%s4064_s30 + $0x17] sm:$0xff]  ;;  %v766_v49 = vunpack.c.l.b16 %v254_v39  ;;  %v361_v32 = vld [vmem:[%s4064_s30 + $0x47] sm:$0xff] }
  0x37   : > { %v391_v14 = vpack.c.bf16 %v355_v8, %v355_v8  ;;  %v397_v36 = vpack.c.bf16 %v361_v32, %v361_v32  ;;  %v3853_v32 = vld [vmem:[%s5140_s2 + $0x228] sm:$0xff] }
  0x38   : > { %2266 = vmatpush.bf16.msrb.mxu2 %v3804_v61  ;;  %2167 = vmatpush.bf16.msrb.mxu1 %v3796_v0  ;;  %v215_v61 = vld [vmem:[%s4064_s30 + $0x35] sm:$0xff]  ;;  %v261_v0 = vpack.c.bf16 %v225_v52, %v225_v52 }
  0x39   : > { %2464 = vmatpush.bf16.msrb.mxu0 %v3820_v1  ;;  %v262_v1 = vpack.c.bf16 %v226_v53, %v226_v53  ;;  %v251_v6 = vpack.c.bf16 %v215_v61, %v215_v61  ;;  %v430_v61 = vld [vmem:[%s4064_s30 + $0x20] sm:$0xff] }
  0x3a   : > { %2365 = vmatpush.bf16.msrb.mxu3 %v3812_v23  ;;  %v227_v23 = vld [vmem:[%s4064_s30 + $0x95] sm:$0xff] }
  0x3b   : > { %2103 = vmatmul.bf16.gmra.mxu1 %v799_v11  ;;  %2128 = vmatmul.bf16.gmra.mxu2 %v804_v12  ;;  %v774_v11 = vunpack.c.l.b16 %v262_v1  ;;  %v783_v12 = vunpack.c.l.b16 %v271_v3  ;;  %v763_v16 = vunpack.c.l.b16 %v251_v6  ;;  %v263_v34 = vpack.c.bf16 %v227_v23, %v227_v23  ;;  %v3846_v23 = vld [vmem:[%s5140_s2 + $0x1f0] sm:$0xff] }
  0x3c   : > { %2267 = vmatpush.bf16.msrb.mxu2 %v3803_v9  ;;  %2168 = vmatpush.bf16.msrb.mxu1 %v3795_v10  ;;  %v356_v9 = vld [vmem:[%s4064_s30 + $0x1f] sm:$0xff]  ;;  %v773_v10 = vunpack.c.l.b16 %v261_v0  ;;  %v466_v3 = vpack.c.bf16 %v430_v61, %v430_v61  ;;  %v865_v6 = vunpack.c.l.b16 %v317_v62 }
  0x3d   : > { %2465 = vmatpush.bf16.msrb.mxu0 %v3819_v22  ;;  %2153 = vmatmul.bf16.gmra.mxu3 %v809_v20  ;;  %v806_v19 = vpack.c.b16 %v784_v13, %v783_v12  ;;  %v975_v20 = vunpack.c.l.b16 %v391_v14  ;;  %v796_v22 = vpack.c.b16 %v764_v17, %v763_v16  ;;  %v775_v42 = vunpack.c.l.b16 %v263_v34 }
  0x3e   : > { %2078 = vmatmul.bf16.gmra.mxu0 %v794_v15  ;;  %2366 = vmatpush.bf16.msrb.mxu3 %v3811_v37  ;;  %v392_v15 = vpack.c.bf16 %v356_v9, %v356_v9  ;;  %v801_v18 = vpack.c.b16 %v774_v11, %v773_v10  ;;  %v274_v37 = vpack.c.bf16 %v238_v28, %v238_v28  ;;  %v1088_v13 = vunpack.c.l.b16 %v466_v3  ;;  %v287_v3 = vld [vmem:[%s4064_s30 + $0x36] sm:$0xff] }
  0x3f   : > { %v802_v50 = vpack.c.b16 %v776_v43, %v775_v42  ;;  %v395_v10 = vpack.c.bf16 %v359_v4, %v359_v4  ;;  %v288_v4 = vld [vmem:[%s4064_s30 + $0x3e] sm:$0xff] }
  0x40   : > { %2268 = vmatpush.bf16.msrb.mxu2 %v3802_v21  ;;  %2169 = vmatpush.bf16.msrb.mxu1 %v3794_v26  ;;  %v976_v21 = vunpack.c.l.b16 %v392_v15  ;;  %v786_v45 = vunpack.c.l.b16 %v274_v37 }
  0x41   : > { %2466 = vmatpush.bf16.msrb.mxu0 %v3818_v30  ;;  %v3831_v30 = vld [vmem:[%s5140_s2 + $0x178] sm:$0xff]  ;;  %v979_v16 = vunpack.c.l.b16 %v395_v10 }
  0x42   : > { %2367 = vmatpush.bf16.msrb.mxu3 %v3810_v46  ;;  %v4206_v26 = vpack.c.b16 %v976_v21, %v975_v20  ;;  %v393_v46 = vpack.c.bf16 %v357_v40, %v357_v40  ;;  %v284_v20 = vld [vmem:[%s4064_s30 + $0x1e] sm:$0xff] }
  0x44   : > { %2269 = vmatpush.bf16.msrb.mxu2 %v3801_v29  ;;  %2170 = vmatpush.bf16.msrb.mxu1 %v3793_v57  ;;  %v3847_v29 = vld [vmem:[%s5140_s2 + $0x1f8] sm:$0xff]  ;;  %v977_v52 = vunpack.c.l.b16 %v393_v46  ;;  %v285_v46 = vld [vmem:[%s4064_s30 + $0x26] sm:$0xff] }
  0x45   : > { %2467 = vmatpush.bf16.msrb.mxu0 %v3817_v60  ;;  %v429_v60 = vld [vmem:[%s4064_s30 + $0x18] sm:$0xff] }
  0x46   : > { %2368 = vmatpush.bf16.msrb.mxu3 %v3809_v58  ;;  %v353_v58 = vld [vmem:[%s4064_s30 + $0x7] sm:$0xff] }
  0x47   : > { %v389_v0 = vpack.c.bf16 %v353_v58, %v353_v58 }
  0x48   : > { %2270 = vmatpush.bf16.msrb.mxu2 %v3800_v59  ;;  %2171 = vmatpush.bf16.msrb.mxu1 %v3792_v63  ;;  %v354_v59 = vld [vmem:[%s4064_s30 + $0xf] sm:$0xff] }
  0x49   : > { %2468 = vmatpush.bf16.msrb.mxu0 %v3816_v5  ;;  %v390_v1 = vpack.c.bf16 %v354_v59, %v354_v59  ;;  %v360_v5 = vld [vmem:[%s4064_s30 + $0x3f] sm:$0xff]  ;;  %v973_v8 = vunpack.c.l.b16 %v389_v0  ;;  %v400_v59 = vpack.c.bf16 %v364_v55, %v364_v55 }
  0x4a   : > { %2369 = vmatpush.bf16.msrb.mxu3 %v3808_v2  ;;  %v465_v2 = vpack.c.bf16 %v429_v60, %v429_v60  ;;  %v396_v11 = vpack.c.bf16 %v360_v5, %v360_v5  ;;  %v435_v5 = vld [vmem:[%s4064_s30 + $0x48] sm:$0xff] }
  0x4b   : > { %2108 = vmatmul.bf16.gmra.mxu1 %v800_v47  ;;  %2133 = vmatmul.bf16.gmra.mxu2 %v805_v48  ;;  %v394_v47 = vpack.c.bf16 %v358_v41, %v358_v41  ;;  %v765_v48 = vunpack.c.l.b16 %v253_v38  ;;  %v974_v9 = vunpack.c.l.b16 %v390_v1  ;;  %v981_v41 = vunpack.c.l.b16 %v397_v36 }
  0x4c   : > { %2659 = vmatpush.bf16.msra.mxu2 %v3839_v27  ;;  %2560 = vmatpush.bf16.msra.mxu1 %v3831_v30  ;;  %v1087_v12 = vunpack.c.l.b16 %v465_v2  ;;  %v980_v17 = vunpack.c.l.b16 %v396_v11  ;;  %v432_v27 = vld [vmem:[%s4064_s30 + $0x30] sm:$0xff]  ;;  %v467_v30 = vpack.c.bf16 %v431_v25, %v431_v25  ;;  %v984_v0 = vunpack.c.l.b16 %v400_v59  ;;  %v365_v11 = vld [vmem:[%s4064_s30 + $0x67] sm:$0xff] }
  0x4d   : > { %2158 = vmatmul.bf16.gmra.mxu3 %v810_v56  ;;  %2857 = vmatpush.bf16.msra.mxu0 %v3855_v33  ;;  %v978_v53 = vunpack.c.l.b16 %v394_v47  ;;  %v797_v54 = vpack.c.b16 %v766_v49, %v765_v48  ;;  %v282_v56 = vld [vmem:[%s4064_s30 + $0xe] sm:$0xff]  ;;  %v1009_v15 = vpack.c.b16 %v974_v9, %v973_v8  ;;  %v468_v31 = vpack.c.bf16 %v432_v27, %v432_v27  ;;  %v433_v48 = vld [vmem:[%s4064_s30 + $0x38] sm:$0xff]  ;;  %v434_v49 = vld [vmem:[%s4064_s30 + $0x40] sm:$0xff] }
  0x4e   : > { %2083 = vmatmul.bf16.gmra.mxu0 %v795_v51  ;;  %2758 = vmatpush.bf16.msra.mxu3 %v3847_v29  ;;  %v807_v51 = vpack.c.b16 %v786_v45, %v785_v44  ;;  %v318_v63 = vpack.c.bf16 %v282_v56, %v282_v56  ;;  %v4239_v21 = vpack.c.b16 %v980_v17, %v979_v16  ;;  %v362_v33 = vld [vmem:[%s4064_s30 + $0x4f] sm:$0xff]  ;;  %v1089_v38 = vunpack.c.l.b16 %v467_v30  ;;  %v289_v30 = vld [vmem:[%s4064_s30 + $0x46] sm:$0xff] }
  0x4f   : > { %v4228_v57 = vpack.c.b16 %v978_v53, %v977_v52  ;;  %v320_v29 = vpack.c.bf16 %v284_v20, %v284_v20  ;;  %v398_v37 = vpack.c.bf16 %v362_v33, %v362_v33  ;;  %v1090_v39 = vunpack.c.l.b16 %v468_v31  ;;  %v3854_v44 = vld [vmem:[%s5140_s2 + $0x230] sm:$0xff]  ;;  %v3829_v20 = vld [vmem:[%s5140_s2 + $0x168] sm:$0xff]  ;;  %v437_v33 = vld [vmem:[%s4064_s30 + $0x58] sm:$0xff] }
  0x50   : > { %v866_v7 = vunpack.c.l.b16 %v318_v63  ;;  %2561 = vmatpush.bf16.msra.mxu1 %v3830_v24  ;;  %v286_v47 = vld [vmem:[%s4064_s30 + $0x2e] sm:$0xff]  ;;  %v469_v52 = vpack.c.bf16 %v433_v48, %v433_v48  ;;  %v470_v53 = vpack.c.bf16 %v434_v49, %v434_v49  ;;  %v324_v8 = vpack.c.bf16 %v288_v4, %v288_v4 }
  0x51   : > { %v868_v35 = vunpack.c.l.b16 %v320_v29  ;;  %v982_v42 = vunpack.c.l.b16 %v398_v37  ;;  %v1124_v43 = vpack.c.b16 %v1090_v39, %v1089_v38  ;;  %2858 = vmatpush.bf16.msra.mxu0 %v3854_v44  ;;  %v471_v9 = vpack.c.bf16 %v435_v5, %v435_v5  ;;  %v290_v31 = vld [vmem:[%s4064_s30 + $0x4e] sm:$0xff] }
  0x52   : > { %v901_v14 = vpack.c.b16 %v866_v7, %v865_v6  ;;  %2759 = vmatpush.bf16.msra.mxu3 %v3846_v23  ;;  %v1091_v60 = vunpack.c.l.b16 %v469_v52  ;;  %v1092_v61 = vunpack.c.l.b16 %v470_v53  ;;  %v436_v6 = vld [vmem:[%s4064_s30 + $0x50] sm:$0xff]  ;;  %v323_v7 = vpack.c.bf16 %v287_v3, %v287_v3 }
  0x53   : > { %v4259_v45 = vpack.c.b16 %v982_v42, %v981_v41  ;;  %v472_v10 = vpack.c.bf16 %v436_v6, %v436_v6  ;;  %v401_v16 = vpack.c.bf16 %v365_v11, %v365_v11  ;;  %v325_v36 = vpack.c.bf16 %v289_v30, %v289_v30  ;;  %v368_v41 = vld [vmem:[%s4064_s30 + $0x7f] sm:$0xff] }
  0x54   : > { %v1125_v1 = vpack.c.b16 %v1092_v61, %v1091_v60  ;;  %2562 = vmatpush.bf16.msra.mxu1 %v3829_v20  ;;  %v326_v37 = vpack.c.bf16 %v290_v31, %v290_v31  ;;  %v473_v38 = vpack.c.bf16 %v437_v33, %v437_v33  ;;  %v404_v48 = vpack.c.bf16 %v368_v41, %v368_v41  ;;  %v291_v60 = vld [vmem:[%s4064_s30 + $0x56] sm:$0xff]  ;;  %v292_v61 = vld [vmem:[%s4064_s30 + $0x5e] sm:$0xff]  ;;  %v294_v33 = vld [vmem:[%s4064_s30 + $0x6e] sm:$0xff] }
  0x55   : > { %v985_v23 = vunpack.c.l.b16 %v401_v16  ;;  %2859 = vmatpush.bf16.msra.mxu0 %v3853_v32  ;;  %v873_v44 = vunpack.c.l.b16 %v325_v36  ;;  %v328_v3 = vpack.c.bf16 %v292_v61, %v292_v61  ;;  %v3836_v16 = vld [vmem:[%s5140_s2 + $0x1a0] sm:$0xff] }
  0x56   : > { %v1095_v49 = vunpack.c.l.b16 %v473_v38  ;;  %v3828_v31 = vld [vmem:[%s5140_s2 + $0x160] sm:$0xff] }
  0x57   : > { %v876_v11 = vunpack.c.l.b16 %v328_v3  ;;  %v293_v32 = vld [vmem:[%s4064_s30 + $0x66] sm:$0xff] }
  0x58   : > { %v442_v36 = vld [vmem:[%s4064_s30 + $0x80] sm:$0xff]  ;;  %2563 = vmatpush.bf16.msra.mxu1 %v3828_v31  ;;  %v329_v38 = vpack.c.bf16 %v293_v32, %v293_v32 }
  0x59   : > { %v478_v41 = vpack.c.bf16 %v442_v36, %v442_v36 }
  0x5b   : > { %2113 = vmatmul.bf16.gmra.mxu1 %v801_v18  ;;  %2138 = vmatmul.bf16.gmra.mxu2 %v806_v19  ;;  %v1123_v18 = vpack.c.b16 %v1088_v13, %v1087_v12  ;;  %v283_v19 = vld [vmem:[%s4064_s30 + $0x16] sm:$0xff]  ;;  %v3837_v13 = vld [vmem:[%s5140_s2 + $0x1a8] sm:$0xff] }
  0x5c   : > { %v319_v28 = vpack.c.bf16 %v283_v19, %v283_v19  ;;  %v366_v12 = vld [vmem:[%s4064_s30 + $0x6f] sm:$0xff]  ;;  %v1094_v19 = vunpack.c.l.b16 %v472_v10 }
  0x5d   : > { %2370 = vmatmul.bf16.vlgmr.msrb.gmra.mxu3 %v4206_v26  ;;  %v402_v17 = vpack.c.bf16 %v366_v12, %v366_v12 }
  0x5e   : > { %2088 = vmatmul.bf16.gmra.mxu0 %v796_v22  ;;  %v3838_v22 = vld [vmem:[%s5140_s2 + $0x1b0] sm:$0xff]  ;;  %v867_v34 = vunpack.c.l.b16 %v319_v28 }
  0x5f   : > { %2660 = vmatpush.bf16.msra.mxu2 %v3838_v22  ;;  %v986_v24 = vunpack.c.l.b16 %v402_v17 }
  0x60   : > { %v902_v40 = vpack.c.b16 %v868_v35, %v867_v34  ;;  %v438_v34 = vld [vmem:[%s4064_s30 + $0x60] sm:$0xff] }
  0x61   : > { %v4292_v29 = vpack.c.b16 %v986_v24, %v985_v23  ;;  %v474_v39 = vpack.c.bf16 %v438_v34, %v438_v34  ;;  %v3844_v23 = vld [vmem:[%s5140_s2 + $0x1e0] sm:$0xff]  ;;  %v441_v34 = vld [vmem:[%s4064_s30 + $0x78] sm:$0xff] }
  0x63   : > { %2661 = vmatpush.bf16.msra.mxu2 %v3837_v13 }
  0x67   : > { %2662 = vmatpush.bf16.msra.mxu2 %v3836_v16 }
  0x6b   : > { %2118 = vmatmul.bf16.gmra.mxu1 %v802_v50  ;;  %2143 = vmatmul.bf16.gmra.mxu2 %v807_v51  ;;  %v321_v50 = vpack.c.bf16 %v285_v46, %v285_v46  ;;  %v322_v51 = vpack.c.bf16 %v286_v47, %v286_v47  ;;  %v874_v46 = vunpack.c.l.b16 %v326_v37 }
  0x6d   : > { %2375 = vmatmul.bf16.gmra.mxu3 %v4228_v57  ;;  %v869_v56 = vunpack.c.l.b16 %v321_v50  ;;  %v1096_v50 = vunpack.c.l.b16 %v474_v39  ;;  %v905_v52 = vpack.c.b16 %v874_v46, %v873_v44  ;;  %v330_v39 = vpack.c.bf16 %v294_v33, %v294_v33  ;;  %v3852_v44 = vld [vmem:[%s5140_s2 + $0x220] sm:$0xff]  ;;  %v371_v46 = vld [vmem:[%s4064_s30 + $0x97] sm:$0xff] }
  0x6e   : > { %2093 = vmatmul.bf16.gmra.mxu0 %v797_v54  ;;  %v363_v54 = vld [vmem:[%s4064_s30 + $0x57] sm:$0xff] }
  0x6f   : > { %v399_v58 = vpack.c.bf16 %v363_v54, %v363_v54  ;;  %v988_v54 = vunpack.c.l.b16 %v404_v48  ;;  %2860 = vmatpush.bf16.msra.mxu0 %v3852_v44 }
  0x71   : > { %v983_v63 = vunpack.c.l.b16 %v399_v58 }
  0x73   : > { %v4269_v2 = vpack.c.b16 %v984_v0, %v983_v63  ;;  %v440_v63 = vld [vmem:[%s4064_s30 + $0x70] sm:$0xff] }
  0x74   : > { %v476_v6 = vpack.c.bf16 %v440_v63, %v440_v63 }
  0x7b   : > { %2172 = vmatmul.bf16.vlgmr.msrb.gmra.mxu1 %v901_v14  ;;  %2271 = vmatmul.bf16.vlgmr.msrb.gmra.mxu2 %v1009_v15  ;;  %v871_v14 = vunpack.c.l.b16 %v323_v7  ;;  %v872_v15 = vunpack.c.l.b16 %v324_v8  ;;  %v369_v7 = vld [vmem:[%s4064_s30 + $0x87] sm:$0xff]  ;;  %v370_v8 = vld [vmem:[%s4064_s30 + $0x8f] sm:$0xff] }
  0x7c   : > { %v405_v12 = vpack.c.bf16 %v369_v7, %v369_v7  ;;  %v406_v13 = vpack.c.bf16 %v370_v8, %v370_v8 }
  0x7d   : > { %2380 = vmatmul.bf16.gmra.mxu3 %v4239_v21  ;;  %v904_v22 = vpack.c.b16 %v872_v15, %v871_v14  ;;  %v1098_v14 = vunpack.c.l.b16 %v476_v6 }
  0x7e   : > { %2469 = vmatmul.bf16.vlgmr.msrb.gmra.mxu0 %v1123_v18  ;;  %v1093_v18 = vunpack.c.l.b16 %v471_v9 }
  0x80   : > { %v1126_v27 = vpack.c.b16 %v1094_v19, %v1093_v18  ;;  %v989_v18 = vunpack.c.l.b16 %v405_v12  ;;  %v990_v19 = vunpack.c.l.b16 %v406_v13  ;;  %v443_v12 = vld [vmem:[%s4064_s30 + $0x88] sm:$0xff]  ;;  %v444_v13 = vld [vmem:[%s4064_s30 + $0x90] sm:$0xff] }
  0x82   : > { %v4353_v30 = vpack.c.b16 %v990_v19, %v989_v18  ;;  %v479_v18 = vpack.c.bf16 %v443_v12, %v443_v12  ;;  %v480_v19 = vpack.c.bf16 %v444_v13, %v444_v13 }
  0x8b   : > { %2177 = vmatmul.bf16.gmra.mxu1 %v902_v40  ;;  %2276 = vmatmul.bf16.gmra.mxu2 %v4206_v26  ;;  %v870_v26 = vunpack.c.l.b16 %v322_v51  ;;  %v367_v40 = vld [vmem:[%s4064_s30 + $0x77] sm:$0xff] }
  0x8c   : > { %v403_v47 = vpack.c.bf16 %v367_v40, %v367_v40  ;;  %v477_v40 = vpack.c.bf16 %v441_v34, %v441_v34 }
  0x8d   : > { %2385 = vmatmul.bf16.gmra.mxu3 %v4259_v45  ;;  %v903_v62 = vpack.c.b16 %v870_v26, %v869_v56  ;;  %v1127_v56 = vpack.c.b16 %v1096_v50, %v1095_v49  ;;  %v877_v50 = vunpack.c.l.b16 %v329_v38  ;;  %v1101_v38 = vunpack.c.l.b16 %v479_v18  ;;  %v376_v18 = vld [vmem:[%s4064_s30 + $0xbf] sm:$0xff] }
  0x8e   : > { %2474 = vmatmul.bf16.gmra.mxu0 %v1124_v43  ;;  %v987_v53 = vunpack.c.l.b16 %v403_v47  ;;  %v372_v47 = vld [vmem:[%s4064_s30 + $0x9f] sm:$0xff] }
  0x90   : > { %v4321_v59 = vpack.c.b16 %v988_v54, %v987_v53  ;;  %v407_v53 = vpack.c.bf16 %v371_v46, %v371_v46  ;;  %v408_v54 = vpack.c.bf16 %v372_v47, %v372_v47 }
  0x92   : > { %v991_v63 = vunpack.c.l.b16 %v407_v53 }
  0x9b   : > { %2182 = vmatmul.bf16.gmra.mxu1 %v903_v62  ;;  %2281 = vmatmul.bf16.gmra.mxu2 %v4228_v57  ;;  %v3845_v57 = vld [vmem:[%s5140_s2 + $0x1e8] sm:$0xff] }
  0x9c   : > { %2760 = vmatpush.bf16.msra.mxu3 %v3845_v57  ;;  %v439_v62 = vld [vmem:[%s4064_s30 + $0x68] sm:$0xff] }
  0x9d   : > { %2390 = vmatmul.bf16.gmra.mxu3 %v4269_v2  ;;  %v475_v5 = vpack.c.bf16 %v439_v62, %v439_v62 }
  0x9e   : > { %2479 = vmatmul.bf16.gmra.mxu0 %v1125_v1  ;;  %v327_v1 = vpack.c.bf16 %v291_v60, %v291_v60  ;;  %v1100_v60 = vunpack.c.l.b16 %v478_v41 }
  0x9f   : > { %v1097_v57 = vunpack.c.l.b16 %v475_v5 }
  0xa0   : > { %v875_v10 = vunpack.c.l.b16 %v327_v1  ;;  %2761 = vmatpush.bf16.msra.mxu3 %v3844_v23  ;;  %v992_v1 = vunpack.c.l.b16 %v408_v54  ;;  %v374_v23 = vld [vmem:[%s4064_s30 + $0xaf] sm:$0xff] }
  0xa1   : > { %v410_v36 = vpack.c.bf16 %v374_v23, %v374_v23  ;;  %v3851_v23 = vld [vmem:[%s5140_s2 + $0x218] sm:$0xff] }
  0xa2   : > { %v906_v17 = vpack.c.b16 %v876_v11, %v875_v10  ;;  %v4385_v8 = vpack.c.b16 %v992_v1, %v991_v63  ;;  %v295_v10 = vld [vmem:[%s4064_s30 + $0x76] sm:$0xff]  ;;  %v296_v11 = vld [vmem:[%s4064_s30 + $0x7e] sm:$0xff]  ;;  %2861 = vmatpush.bf16.msra.mxu0 %v3851_v23 }
  0xa3   : > { %v332_v16 = vpack.c.bf16 %v296_v11, %v296_v11  ;;  %v994_v46 = vunpack.c.l.b16 %v410_v36  ;;  %v3843_v63 = vld [vmem:[%s5140_s2 + $0x1d8] sm:$0xff] }
  0xa4   : > { %v445_v1 = vld [vmem:[%s4064_s30 + $0x98] sm:$0xff]  ;;  %2762 = vmatpush.bf16.msra.mxu3 %v3843_v63 }
  0xa5   : > { %v880_v33 = vunpack.c.l.b16 %v332_v16  ;;  %v481_v13 = vpack.c.bf16 %v445_v1, %v445_v1  ;;  %v375_v16 = vld [vmem:[%s4064_s30 + $0xb7] sm:$0xff] }
  0xa6   : > { %v411_v36 = vpack.c.bf16 %v375_v16, %v375_v16  ;;  %v448_v16 = vld [vmem:[%s4064_s30 + $0xb0] sm:$0xff] }
  0xa8   : > { %v4287_v25 = vpop.f32.mrf.mxu1 }
  0xab   : > { %v4289_v28 = vpop.f32.mrf.mxu0  ;;  %2187 = vmatmul.bf16.gmra.mxu1 %v904_v22  ;;  %2286 = vmatmul.bf16.gmra.mxu2 %v4239_v21  ;;  %v1128_v22 = vpack.c.b16 %v1098_v14, %v1097_v57  ;;  %v331_v14 = vpack.c.bf16 %v295_v10, %v295_v10 }
  0xad   : > { %2395 = vmatmul.bf16.gmra.mxu3 %v4292_v29  ;;  %v879_v32 = vunpack.c.l.b16 %v331_v14 }
  0xae   : > { %2484 = vmatmul.bf16.gmra.mxu0 %v1126_v27  ;;  %v4301_v35 = vpop.f32.mrf.mxu2 }
  0xaf   : > { %v908_v41 = vpack.c.b16 %v880_v33, %v879_v32 }
  0xb0   : > { %v4304_v21 = vpop.f32.mrf.mxu1  ;;  %v4310_v43 = vpop.f32.mrf.mxu3 }
  0xb3   : > { %v4308_v42 = vpop.f32.mrf.mxu0 }
  0xb6   : > { %v4312_v51 = vpop.f32.mrf.mxu2 }
  0xb8   : > { %v4314_v55 = vpop.f32.mrf.mxu1  ;;  %v4318_v58 = vpop.f32.mrf.mxu3 }
  0xbb   : > { %v4316_v26 = vpop.f32.mrf.mxu0  ;;  %2192 = vmatmul.bf16.gmra.mxu1 %v905_v52  ;;  %2291 = vmatmul.bf16.gmra.mxu2 %v4259_v45  ;;  %v878_v52 = vunpack.c.l.b16 %v330_v39  ;;  %v1102_v39 = vunpack.c.l.b16 %v480_v19 }
  0xbd   : > { %2400 = vmatmul.bf16.gmra.mxu3 %v4321_v59  ;;  %v907_v62 = vpack.c.b16 %v878_v52, %v877_v50  ;;  %v1130_v50 = vpack.c.b16 %v1102_v39, %v1101_v38  ;;  %v412_v38 = vpack.c.bf16 %v376_v18, %v376_v18  ;;  %v1103_v39 = vunpack.c.l.b16 %v481_v13 }
  0xbe   : > { %2489 = vmatmul.bf16.gmra.mxu0 %v1127_v56  ;;  %v4327_v0 = vpop.f32.mrf.mxu2  ;;  %v1099_v56 = vunpack.c.l.b16 %v477_v40 }
  0xc0   : > { %v4330_v4 = vpop.f32.mrf.mxu1  ;;  %v4336_v9 = vpop.f32.mrf.mxu3  ;;  %v1129_v5 = vpack.c.b16 %v1100_v60, %v1099_v56  ;;  %v3835_v56 = vld [vmem:[%s5140_s2 + $0x198] sm:$0xff]  ;;  %v297_v60 = vld [vmem:[%s4064_s30 + $0x86] sm:$0xff] }
  0xc1   : > { %2663 = vmatpush.bf16.msra.mxu2 %v3835_v56  ;;  %v996_v56 = vunpack.c.l.b16 %v412_v38  ;;  %v377_v38 = vld [vmem:[%s4064_s30 + $0xc7] sm:$0xff] }
  0xc3   : > { %v4334_v45 = vpop.f32.mrf.mxu0 }
  0xc6   : > { %v4338_v15 = vpop.f32.mrf.mxu2 }
  0xc8   : > { %v4343_v20 = vpop.f32.mrf.mxu1  ;;  %v4350_v27 = vpop.f32.mrf.mxu3 }
  0xcb   : > { %v4348_v24 = vpop.f32.mrf.mxu0  ;;  %2197 = vmatmul.bf16.gmra.mxu1 %v906_v17  ;;  %2296 = vmatmul.bf16.gmra.mxu2 %v4269_v2 }
  0xcd   : > { %2405 = vmatmul.bf16.gmra.mxu3 %v4353_v30 }
  0xce   : > { %2494 = vmatmul.bf16.gmra.mxu0 %v1128_v22  ;;  %v4362_v37 = vpop.f32.mrf.mxu2  ;;  %v373_v22 = vld [vmem:[%s4064_s30 + $0xa7] sm:$0xff] }
  0xcf   : > { %v409_v34 = vpack.c.bf16 %v373_v22, %v373_v22  ;;  %v3827_v22 = vld [vmem:[%s5140_s2 + $0x158] sm:$0xff] }
  0xd0   : > { %v4365_v2 = vpop.f32.mrf.mxu1  ;;  %v4374_v49 = vpop.f32.mrf.mxu3  ;;  %2564 = vmatpush.bf16.msra.mxu1 %v3827_v22 }
  0xd1   : > { %5143 = vst [vmem:[#allocation2_spill] sm:$0xff] %v4374_v49  ;;  %v993_v44 = vunpack.c.l.b16 %v409_v34 }
  0xd3   : > { %v4372_v48 = vpop.f32.mrf.mxu0  ;;  %v4411_v54 = vpack.c.b16 %v994_v46, %v993_v44 }
  0xd6   : > { %v4376_v61 = vpop.f32.mrf.mxu2 }
  0xd8   : > { %v4378_v3 = vpop.f32.mrf.mxu1  ;;  %v4382_v7 = vpop.f32.mrf.mxu3 }
  0xd9   : > { %5144 = vst [vmem:[#allocation3_spill] sm:$0xff] %v4382_v7 }
  0xdb   : > { %v4380_v6 = vpop.f32.mrf.mxu0  ;;  %2202 = vmatmul.bf16.gmra.mxu1 %v907_v62  ;;  %2301 = vmatmul.bf16.gmra.mxu2 %v4292_v29  ;;  %v298_v62 = vld [vmem:[%s4064_s30 + $0x8e] sm:$0xff] }
  0xdc   : > { %v334_v11 = vpack.c.bf16 %v298_v62, %v298_v62 }
  0xdd   : > { %2410 = vmatmul.bf16.gmra.mxu3 %v4385_v8 }
  0xde   : > { %2499 = vmatmul.bf16.gmra.mxu0 %v1129_v5  ;;  %v4391_v57 = vpop.f32.mrf.mxu2  ;;  %v446_v5 = vld [vmem:[%s4064_s30 + $0xa0] sm:$0xff]  ;;  %v882_v34 = vunpack.c.l.b16 %v334_v11 }
  0xdf   : > { %v482_v14 = vpack.c.bf16 %v446_v5, %v446_v5  ;;  %v299_v5 = vld [vmem:[%s4064_s30 + $0x96] sm:$0xff]  ;;  %v300_v11 = vld [vmem:[%s4064_s30 + $0x9e] sm:$0xff] }
  0xe0   : > { %v4394_v17 = vpop.f32.mrf.mxu1  ;;  %v4400_v31 = vpop.f32.mrf.mxu3  ;;  %v335_v22 = vpack.c.bf16 %v299_v5, %v299_v5 }
  0xe3   : > { %v4398_v29 = vpop.f32.mrf.mxu0 }
  0xe6   : > { %v4402_v40 = vpop.f32.mrf.mxu2 }
  0xe8   : > { %v4404_v47 = vpop.f32.mrf.mxu1  ;;  %v4408_v53 = vpop.f32.mrf.mxu3 }
  0xeb   : > { %v4406_v52 = vpop.f32.mrf.mxu0  ;;  %2207 = vmatmul.bf16.gmra.mxu1 %v908_v41  ;;  %2306 = vmatmul.bf16.gmra.mxu2 %v4321_v59  ;;  %v333_v59 = vpack.c.bf16 %v297_v60, %v297_v60  ;;  %v1104_v41 = vunpack.c.l.b16 %v482_v14  ;;  %v447_v14 = vld [vmem:[%s4064_s30 + $0xa8] sm:$0xff] }
  0xed   : > { %2415 = vmatmul.bf16.gmra.mxu3 %v4411_v54  ;;  %v881_v33 = vunpack.c.l.b16 %v333_v59  ;;  %v1131_v62 = vpack.c.b16 %v1104_v41, %v1103_v39  ;;  %v378_v39 = vld [vmem:[%s4064_s30 + $0xcf] sm:$0xff] }
  0xee   : > { %2504 = vmatmul.bf16.gmra.mxu0 %v1130_v50  ;;  %v4423_v10 = vpop.f32.mrf.mxu2  ;;  %v995_v50 = vunpack.c.l.b16 %v411_v36  ;;  %v483_v36 = vpack.c.bf16 %v447_v14, %v447_v14 }
  0xef   : > { %v909_v46 = vpack.c.b16 %v882_v34, %v881_v33  ;;  %v336_v33 = vpack.c.bf16 %v300_v11, %v300_v11 }
  0xf0   : > { %v4426_v12 = vpop.f32.mrf.mxu1  ;;  %v4438_v32 = vpop.f32.mrf.mxu3  ;;  %v4446_v59 = vpack.c.b16 %v996_v56, %v995_v50  ;;  %v883_v50 = vunpack.c.l.b16 %v335_v22  ;;  %v1105_v5 = vunpack.c.l.b16 %v483_v36  ;;  %v301_v36 = vld [vmem:[%s4064_s30 + $0xa6] sm:$0xff] }
  0xf3   : > { %v4430_v19 = vpop.f32.mrf.mxu0 }
  0xf6   : > { %v4440_v44 = vpop.f32.mrf.mxu2 }
  0xf8   : > { %v2173_v60 = vpop.f32.mrf.mxu1  ;;  %v4442_v1 = vpop.f32.mrf.mxu3 }
  0xf9   : > { %v2174_v13 = vadd.f32 %v2173_v60, %v4289_v28  ;;  %v884_v28 = vunpack.c.l.b16 %v336_v33  ;;  %v413_v60 = vpack.c.bf16 %v377_v38, %v377_v38 }
  0xfb   : > { %v2470_v63 = vpop.f32.mrf.mxu0  ;;  %2212 = vmatmul.bf16.gmra.mxu1 %v909_v46  ;;  %2311 = vmatmul.bf16.gmra.mxu2 %v4353_v30  ;;  %v484_v30 = vpack.c.bf16 %v448_v16, %v448_v16 }
  0xfd   : > { %2420 = vmatmul.bf16.gmra.mxu3 %v4446_v59  ;;  %v1106_v11 = vunpack.c.l.b16 %v484_v30  ;;  %v302_v30 = vld [vmem:[%s4064_s30 + $0xae] sm:$0xff] }
  0xfe   : > { %2509 = vmatmul.bf16.gmra.mxu0 %v1131_v62  ;;  %v2272_v18 = vpop.f32.mrf.mxu2  ;;  %v414_v62 = vpack.c.bf16 %v378_v39, %v378_v39 }
  0xff   : > { %v2273_v23 = vadd.f32 %v2272_v18, %v2174_v13  ;;  %v910_v18 = vpack.c.b16 %v884_v28, %v883_v50  ;;  %v1132_v49 = vpack.c.b16 %v1106_v11, %v1105_v5  ;;  %v450_v50 = vld [vmem:[%s4064_s30 + $0xc0] sm:$0xff]  ;;  %v337_v28 = vpack.c.bf16 %v301_v36, %v301_v36 }
 0x100   : > { %v2175_v34 = vpop.f32.mrf.mxu1  ;;  %v4456_v56 = vpop.f32.mrf.mxu3  ;;  %v998_v22 = vunpack.c.l.b16 %v414_v62  ;;  %v338_v62 = vpack.c.bf16 %v302_v30, %v302_v30  ;;  %v486_v11 = vpack.c.bf16 %v450_v50, %v450_v50 }
 0x101   : > { %v2372_v41 = vadd.f32 %v4400_v31, %v2273_v23  ;;  %v2176_v13 = vadd.f32 %v2175_v34, %v4308_v42  ;;  %v997_v31 = vunpack.c.l.b16 %v413_v60 }
 0x103   : > { %v2472_v46 = vpop.f32.mrf.mxu0  ;;  %v4458_v7 = vadd.f32 %v2470_v63, %v2372_v41  ;;  %v4466_v42 = vpack.c.b16 %v998_v22, %v997_v31  ;;  %v449_v41 = vld [vmem:[%s4064_s30 + $0xb8] sm:$0xff]  ;;  %v885_v31 = vunpack.c.l.b16 %v337_v28 }
 0x104   : > { %v485_v5 = vpack.c.bf16 %v449_v41, %v449_v41 }
 0x106   : > { %v2274_v14 = vpop.f32.mrf.mxu2  ;;  %v1107_v30 = vunpack.c.l.b16 %v485_v5  ;;  %v3850_v5 = vld [vmem:[%s5140_s2 + $0x210] sm:$0xff] }
 0x107   : > { %v2275_v16 = vadd.f32 %v2274_v14, %v2176_v13  ;;  %v379_v13 = vld [vmem:[%s4064_s30 + $0xd7] sm:$0xff]  ;;  %v380_v14 = vld [vmem:[%s4064_s30 + $0xdf] sm:$0xff]  ;;  %2862 = vmatpush.bf16.msra.mxu0 %v3850_v5 }
 0x108   : > { %v2178_v23 = vpop.f32.mrf.mxu1  ;;  %v4462_v63 = vpop.f32.mrf.mxu3 }
 0x109   : > { %v2374_v33 = vadd.f32 %v4408_v53, %v2275_v16  ;;  %v2179_v39 = vadd.f32 %v2178_v23, %v4316_v26  ;;  %v3834_v26 = vld [vmem:[%s5140_s2 + $0x190] sm:$0xff]  ;;  %v886_v23 = vunpack.c.l.b16 %v338_v62 }
 0x10a   : > { %2664 = vmatpush.bf16.msra.mxu2 %v3834_v26 }
 0x10b   : > { %v2475_v38 = vpop.f32.mrf.mxu0  ;;  %2217 = vmatmul.bf16.gmra.mxu1 %v910_v18  ;;  %2316 = vmatmul.bf16.gmra.mxu2 %v4385_v8  ;;  %v4468_v34 = vadd.f32 %v2472_v46, %v2374_v33  ;;  %v3826_v18 = vld [vmem:[%s5140_s2 + $0x150] sm:$0xff]  ;;  %v416_v33 = vpack.c.bf16 %v380_v14, %v380_v14 }
 0x10c   : > { %2565 = vmatpush.bf16.msra.mxu1 %v3826_v18  ;;  %v452_v18 = vld [vmem:[%s4064_s30 + $0xd0] sm:$0xff] }
 0x10d   : > { %5145 = vst [vmem:[#allocation4_spill] sm:$0xff] %v4468_v34  ;;  %2425 = vmatmul.bf16.gmra.mxu3 %v4466_v42  ;;  %v1000_v34 = vunpack.c.l.b16 %v416_v33 }
 0x10e   : > { %2514 = vmatmul.bf16.gmra.mxu0 %v1132_v49  ;;  %v2277_v53 = vpop.f32.mrf.mxu2  ;;  %v3842_v49 = vld [vmem:[%s5140_s2 + $0x1d0] sm:$0xff] }
 0x10f   : > { %v2278_v60 = vadd.f32 %v2277_v53, %v2179_v39  ;;  %2763 = vmatpush.bf16.msra.mxu3 %v3842_v49  ;;  %v1108_v39 = vunpack.c.l.b16 %v486_v11  ;;  %v451_v49 = vld [vmem:[%s4064_s30 + $0xc8] sm:$0xff] }
 0x110   : > { %v2180_v8 = vpop.f32.mrf.mxu1  ;;  %v4487_v22 = vpop.f32.mrf.mxu3 }
 0x111   : > { %v2377_v46 = vadd.f32 %v4438_v32, %v2278_v60  ;;  %v415_v32 = vpack.c.bf16 %v379_v13, %v379_v13  ;;  %v2181_v41 = vadd.f32 %v2180_v8, %v4334_v45  ;;  %v911_v60 = vpack.c.b16 %v886_v23, %v885_v31  ;;  %v303_v45 = vld [vmem:[%s4064_s30 + $0xb6] sm:$0xff] }
 0x112   : > { %v1133_v26 = vpack.c.b16 %v1108_v39, %v1107_v30  ;;  %v339_v23 = vpack.c.bf16 %v303_v45, %v303_v45  ;;  %v488_v30 = vpack.c.bf16 %v452_v18, %v452_v18  ;;  %v381_v39 = vld [vmem:[%s4064_s30 + $0xe7] sm:$0xff] }
 0x113   : > { %v2477_v16 = vpop.f32.mrf.mxu0  ;;  %v4489_v36 = vadd.f32 %v2475_v38, %v2377_v46  ;;  %v999_v28 = vunpack.c.l.b16 %v415_v32  ;;  %v304_v46 = vld [vmem:[%s4064_s30 + $0xbe] sm:$0xff] }
 0x114   : > { %v340_v33 = vpack.c.bf16 %v304_v46, %v304_v46  ;;  %v1110_v5 = vunpack.c.l.b16 %v488_v30  ;;  %v306_v30 = vld [vmem:[%s4064_s30 + $0xce] sm:$0xff] }
 0x115   : > { %v4500_v8 = vpack.c.b16 %v1000_v34, %v999_v28  ;;  %v487_v34 = vpack.c.bf16 %v451_v49, %v451_v49  ;;  %v417_v28 = vpack.c.bf16 %v381_v39, %v381_v39 }
 0x116   : > { %v2279_v50 = vpop.f32.mrf.mxu2 }
 0x117   : > { %v2280_v53 = vadd.f32 %v2279_v50, %v2181_v41 }
 0x118   : > { %v2183_v62 = vpop.f32.mrf.mxu1  ;;  %v4496_v11 = vpop.f32.mrf.mxu3 }
 0x119   : > { %v2379_v13 = vadd.f32 %v4442_v1, %v2280_v53  ;;  %v2184_v1 = vadd.f32 %v2183_v62, %v4348_v24  ;;  %v887_v53 = vunpack.c.l.b16 %v339_v23  ;;  %v888_v24 = vunpack.c.l.b16 %v340_v33 }
 0x11b   : > { %v2480_v38 = vpop.f32.mrf.mxu0  ;;  %2222 = vmatmul.bf16.gmra.mxu1 %v911_v60  ;;  %2321 = vmatmul.bf16.gmra.mxu2 %v4411_v54  ;;  %v4502_v14 = vadd.f32 %v2477_v16, %v2379_v13  ;;  %v382_v16 = vld [vmem:[%s4064_s30 + $0xef] sm:$0xff]  ;;  %v1109_v13 = vunpack.c.l.b16 %v487_v34  ;;  %v912_v49 = vpack.c.b16 %v888_v24, %v887_v53  ;;  %v305_v34 = vld [vmem:[%s4064_s30 + $0xc6] sm:$0xff] }
 0x11c   : > { %v418_v62 = vpack.c.bf16 %v382_v16, %v382_v16  ;;  %v453_v16 = vld [vmem:[%s4064_s30 + $0xd8] sm:$0xff]  ;;  %v341_v53 = vpack.c.bf16 %v305_v34, %v305_v34 }
 0x11d   : > { %2430 = vmatmul.bf16.gmra.mxu3 %v4500_v8  ;;  %v1134_v23 = vpack.c.b16 %v1110_v5, %v1109_v13  ;;  %v383_v5 = vld [vmem:[%s4064_s30 + $0xf7] sm:$0xff] }
 0x11e   : > { %2519 = vmatmul.bf16.gmra.mxu0 %v1133_v26  ;;  %v2282_v31 = vpop.f32.mrf.mxu2  ;;  %v1002_v18 = vunpack.c.l.b16 %v418_v62  ;;  %v489_v62 = vpack.c.bf16 %v453_v16, %v453_v16 }
 0x11f   : > { %v2283_v32 = vadd.f32 %v2282_v31, %v2184_v1 }
 0x120   : > { %v2185_v54 = vpop.f32.mrf.mxu1  ;;  %v4512_v60 = vpop.f32.mrf.mxu3 }
 0x121   : > { %v2382_v41 = vadd.f32 %v4456_v56, %v2283_v32  ;;  %v2186_v45 = vadd.f32 %v2185_v54, %v4372_v48  ;;  %v1001_v56 = vunpack.c.l.b16 %v417_v28  ;;  %v342_v28 = vpack.c.bf16 %v306_v30, %v306_v30 }
 0x123   : > { %v2482_v50 = vpop.f32.mrf.mxu0  ;;  %v4514_v26 = vadd.f32 %v2480_v38, %v2382_v41  ;;  %v4522_v48 = vpack.c.b16 %v1002_v18, %v1001_v56  ;;  %v454_v41 = vld [vmem:[%s4064_s30 + $0xe0] sm:$0xff]  ;;  %v890_v18 = vunpack.c.l.b16 %v342_v28 }
 0x124   : > { %v490_v13 = vpack.c.bf16 %v454_v41, %v454_v41 }
 0x126   : > { %v2284_v46 = vpop.f32.mrf.mxu2  ;;  %v1112_v34 = vunpack.c.l.b16 %v490_v13 }
 0x127   : > { %v2285_v1 = vadd.f32 %v2284_v46, %v2186_v45  ;;  %v384_v45 = vld [vmem:[%s4064_s30 + $0xff] sm:$0xff] }
 0x128   : > { %v2188_v31 = vpop.f32.mrf.mxu1  ;;  %v4518_v38 = vpop.f32.mrf.mxu3 }
 0x129   : > { %v2384_v32 = vadd.f32 %v4462_v63, %v2285_v1  ;;  %v2189_v39 = vadd.f32 %v2188_v31, %v4380_v6  ;;  %v3833_v6 = vld [vmem:[%s5140_s2 + $0x188] sm:$0xff]  ;;  %v419_v31 = vpack.c.bf16 %v383_v5, %v383_v5 }
 0x12a   : > { %v3841_v1 = vld [vmem:[%s5140_s2 + $0x1c8] sm:$0xff]  ;;  %2665 = vmatpush.bf16.msra.mxu2 %v3833_v6 }
 0x12b   : > { %v2485_v33 = vpop.f32.mrf.mxu0  ;;  %2227 = vmatmul.bf16.gmra.mxu1 %v912_v49  ;;  %2326 = vmatmul.bf16.gmra.mxu2 %v4446_v59  ;;  %v4524_v54 = vadd.f32 %v2482_v50, %v2384_v32  ;;  %v889_v49 = vunpack.c.l.b16 %v341_v53 }
 0x12c   : > { %2764 = vmatpush.bf16.msra.mxu3 %v3841_v1  ;;  %v455_v1 = vld [vmem:[%s4064_s30 + $0xe8] sm:$0xff] }
 0x12d   : > { %2435 = vmatmul.bf16.gmra.mxu3 %v4522_v48  ;;  %v913_v41 = vpack.c.b16 %v890_v18, %v889_v49  ;;  %v456_v49 = vld [vmem:[%s4064_s30 + $0xf0] sm:$0xff] }
 0x12e   : > { %2524 = vmatmul.bf16.gmra.mxu0 %v1134_v23  ;;  %v2287_v63 = vpop.f32.mrf.mxu2  ;;  %v420_v23 = vpack.c.bf16 %v384_v45, %v384_v45 }
 0x12f   : > { %v2288_v24 = vadd.f32 %v2287_v63, %v2189_v39  ;;  %v1003_v63 = vunpack.c.l.b16 %v419_v31 }
 0x130   : > { %v2190_v59 = vpop.f32.mrf.mxu1  ;;  %v4540_v56 = vpop.f32.mrf.mxu3  ;;  %v1004_v53 = vunpack.c.l.b16 %v420_v23 }
 0x131   : > { %v2387_v50 = vadd.f32 %v4487_v22, %v2288_v24  ;;  %v1111_v22 = vunpack.c.l.b16 %v489_v62  ;;  %v2191_v30 = vadd.f32 %v2190_v59, %v4398_v29  ;;  %v307_v29 = vld [vmem:[%s4064_s30 + $0xd6] sm:$0xff] }
 0x132   : > { %v4553_v59 = vpack.c.b16 %v1004_v53, %v1003_v63 }
 0x133   : > { %v2487_v46 = vpop.f32.mrf.mxu0  ;;  %v4542_v32 = vadd.f32 %v2485_v33, %v2387_v50  ;;  %v1135_v28 = vpack.c.b16 %v1112_v34, %v1111_v22  ;;  %v3825_v33 = vld [vmem:[%s5140_s2 + $0x148] sm:$0xff]  ;;  %v308_v50 = vld [vmem:[%s4064_s30 + $0xde] sm:$0xff]  ;;  %v491_v22 = vpack.c.bf16 %v455_v1, %v455_v1  ;;  %v492_v34 = vpack.c.bf16 %v456_v49, %v456_v49 }
 0x134   : > { %2566 = vmatpush.bf16.msra.mxu1 %v3825_v33  ;;  %v344_v23 = vpack.c.bf16 %v308_v50, %v308_v50 }
 0x135   : > { %v1113_v33 = vunpack.c.l.b16 %v491_v22  ;;  %v309_v22 = vld [vmem:[%s4064_s30 + $0xe6] sm:$0xff] }
 0x136   : > { %v2289_v39 = vpop.f32.mrf.mxu2 }
 0x137   : > { %v2290_v16 = vadd.f32 %v2289_v39, %v2191_v30  ;;  %v385_v30 = vld [vmem:[%s4064_s30 + $0x107] sm:$0xff]  ;;  %v386_v39 = vld [vmem:[%s4064_s30 + $0x10f] sm:$0xff] }
 0x138   : > { %v2193_v24 = vpop.f32.mrf.mxu1  ;;  %v4549_v62 = vpop.f32.mrf.mxu3 }
 0x139   : > { %v2389_v5 = vadd.f32 %v4496_v11, %v2290_v16  ;;  %v3849_v11 = vld [vmem:[%s5140_s2 + $0x208] sm:$0xff]  ;;  %v2194_v6 = vadd.f32 %v2193_v24, %v4406_v52  ;;  %v892_v52 = vunpack.c.l.b16 %v344_v23  ;;  %v421_v24 = vpack.c.bf16 %v385_v30, %v385_v30 }
 0x13a   : > { %2863 = vmatpush.bf16.msra.mxu0 %v3849_v11 }
 0x13b   : > { %v2490_v45 = vpop.f32.mrf.mxu0  ;;  %2232 = vmatmul.bf16.gmra.mxu1 %v913_v41  ;;  %2331 = vmatmul.bf16.gmra.mxu2 %v4466_v42  ;;  %v4555_v13 = vadd.f32 %v2487_v46, %v2389_v5  ;;  %v343_v42 = vpack.c.bf16 %v307_v29, %v307_v29  ;;  %v1114_v29 = vunpack.c.l.b16 %v492_v34  ;;  %v310_v34 = vld [vmem:[%s4064_s30 + $0xee] sm:$0xff] }
 0x13d   : > { %2440 = vmatmul.bf16.gmra.mxu3 %v4553_v59  ;;  %v891_v63 = vunpack.c.l.b16 %v343_v42  ;;  %v1136_v42 = vpack.c.b16 %v1114_v29, %v1113_v33  ;;  %v387_v29 = vld [vmem:[%s4064_s30 + $0x117] sm:$0xff] }
 0x13e   : > { %2529 = vmatmul.bf16.gmra.mxu0 %v1135_v28  ;;  %v2292_v18 = vpop.f32.mrf.mxu2  ;;  %v422_v28 = vpack.c.bf16 %v386_v39, %v386_v39  ;;  %v457_v39 = vld [vmem:[%s4064_s30 + $0xf8] sm:$0xff] }
 0x13f   : > { %v2293_v31 = vadd.f32 %v2292_v18, %v2194_v6  ;;  %v914_v1 = vpack.c.b16 %v892_v52, %v891_v63  ;;  %v345_v63 = vpack.c.bf16 %v309_v22, %v309_v22 }
 0x140   : > { %v2195_v46 = vpop.f32.mrf.mxu1  ;;  %v4568_v53 = vpop.f32.mrf.mxu3  ;;  %v1006_v49 = vunpack.c.l.b16 %v422_v28  ;;  %v493_v28 = vpack.c.bf16 %v457_v39, %v457_v39 }
 0x141   : > { %v2392_v16 = vadd.f32 %v4512_v60, %v2293_v31  ;;  %v2196_v50 = vadd.f32 %v2195_v46, %v4430_v19  ;;  %v1005_v60 = vunpack.c.l.b16 %v421_v24  ;;  %v346_v24 = vpack.c.bf16 %v310_v34, %v310_v34 }
 0x143   : > { %v2492_v41 = vpop.f32.mrf.mxu0  ;;  %v4570_v5 = vadd.f32 %v2490_v45, %v2392_v16  ;;  %v4578_v19 = vpack.c.b16 %v1006_v49, %v1005_v60  ;;  %v458_v16 = vld [vmem:[%s4064_s30 + $0x100] sm:$0xff]  ;;  %v423_v60 = vpack.c.bf16 %v387_v29, %v387_v29 }
 0x144   : > { %v494_v33 = vpack.c.bf16 %v458_v16, %v458_v16 }
 0x145   : > { %v1007_v16 = vunpack.c.l.b16 %v423_v60 }
 0x146   : > { %v2294_v11 = vpop.f32.mrf.mxu2 }
 0x147   : > { %v2295_v6 = vadd.f32 %v2294_v11, %v2196_v50  ;;  %v388_v50 = vld [vmem:[%s4064_s30 + $0x11f] sm:$0xff] }
 0x148   : > { %v2198_v18 = vpop.f32.mrf.mxu1  ;;  %v4574_v45 = vpop.f32.mrf.mxu3  ;;  %v424_v49 = vpack.c.bf16 %v388_v50, %v388_v50  ;;  %v312_v50 = vld [vmem:[%s4064_s30 + $0xfe] sm:$0xff] }
 0x149   : > { %v2394_v31 = vadd.f32 %v4518_v38, %v2295_v6  ;;  %v2199_v30 = vadd.f32 %v2198_v18, %v4287_v25  ;;  %v893_v6 = vunpack.c.l.b16 %v345_v63  ;;  %v894_v25 = vunpack.c.l.b16 %v346_v24 }
 0x14b   : > { %v2495_v23 = vpop.f32.mrf.mxu0  ;;  %2237 = vmatmul.bf16.gmra.mxu1 %v914_v1  ;;  %2336 = vmatmul.bf16.gmra.mxu2 %v4500_v8  ;;  %v4580_v46 = vadd.f32 %v2492_v41, %v2394_v31  ;;  %v1116_v31 = vunpack.c.l.b16 %v494_v33  ;;  %v915_v39 = vpack.c.b16 %v894_v25, %v893_v6  ;;  %v459_v6 = vld [vmem:[%s4064_s30 + $0x108] sm:$0xff]  ;;  %v460_v25 = vld [vmem:[%s4064_s30 + $0x110] sm:$0xff] }
 0x14d   : > { %2445 = vmatmul.bf16.gmra.mxu3 %v4578_v19 }
 0x14e   : > { %2534 = vmatmul.bf16.gmra.mxu0 %v1136_v42  ;;  %v2297_v38 = vpop.f32.mrf.mxu2  ;;  %v1115_v42 = vunpack.c.l.b16 %v493_v28  ;;  %v311_v28 = vld [vmem:[%s4064_s30 + $0xf6] sm:$0xff] }
 0x14f   : > { %v2298_v52 = vadd.f32 %v2297_v38, %v2199_v30  ;;  %v347_v60 = vpack.c.bf16 %v311_v28, %v311_v28 }
 0x150   : > { %v2200_v8 = vpop.f32.mrf.mxu1  ;;  %v4590_v1 = vpop.f32.mrf.mxu3  ;;  %v1137_v63 = vpack.c.b16 %v1116_v31, %v1115_v42  ;;  %v348_v42 = vpack.c.bf16 %v312_v50, %v312_v50 }
 0x151   : > { %v2397_v41 = vadd.f32 %v4540_v56, %v2298_v52  ;;  %v2201_v22 = vadd.f32 %v2200_v8, %v4304_v21  ;;  %v1008_v56 = vunpack.c.l.b16 %v424_v49  ;;  %v3840_v21 = vld [vmem:[%s5140_s2 + $0x1c0] sm:$0xff] }
 0x152   : > { %2765 = vmatpush.bf16.msra.mxu3 %v3840_v21 }
 0x153   : > { %v2497_v11 = vpop.f32.mrf.mxu0  ;;  %v4592_v18 = vadd.f32 %v2495_v23, %v2397_v41  ;;  %v3832_v23 = vld [vmem:[%s5140_s2 + $0x180] sm:$0xff]  ;;  %v4606_v33 = vpack.c.b16 %v1008_v56, %v1007_v16  ;;  %v895_v56 = vunpack.c.l.b16 %v347_v60 }
 0x154   : > { %2666 = vmatpush.bf16.msra.mxu2 %v3832_v23 }
 0x156   : > { %v2299_v34 = vpop.f32.mrf.mxu2 }
 0x157   : > { %v2300_v30 = vadd.f32 %v2299_v34, %v2201_v22  ;;  %v496_v22 = vpack.c.bf16 %v460_v25, %v460_v25  ;;  %v425_v34 = vld [vmem:[%s4064_s30 + $0x127] sm:$0xff] }
 0x158   : > { %v2203_v38 = vpop.f32.mrf.mxu1  ;;  %v4602_v8 = vpop.f32.mrf.mxu3 }
 0x159   : > { %v2399_v52 = vadd.f32 %v4549_v62, %v2300_v30  ;;  %v3824_v62 = vld [vmem:[%s5140_s2 + $0x140] sm:$0xff]  ;;  %v2204_v41 = vadd.f32 %v2203_v38, %v4314_v55  ;;  %v426_v30 = vld [vmem:[%s4064_s30 + $0x12f] sm:$0xff] }
 0x15a   : > { %2567 = vmatpush.bf16.msra.mxu1 %v3824_v62  ;;  %v3848_v55 = vld [vmem:[%s5140_s2 + $0x200] sm:$0xff]  ;;  %v428_v23 = vpack.c.bf16 %v426_v30, %v426_v30  ;;  %v1118_v62 = vunpack.c.l.b16 %v496_v22  ;;  %v314_v22 = vld [vmem:[%s4064_s30 + $0x10e] sm:$0xff] }
 0x15b   : > { %v2500_v24 = vpop.f32.mrf.mxu0  ;;  %2242 = vmatmul.bf16.gmra.mxu1 %v915_v39  ;;  %2341 = vmatmul.bf16.gmra.mxu2 %v4522_v48  ;;  %v4611_v29 = vadd.f32 %v2497_v11, %v2399_v52  ;;  %v495_v11 = vpack.c.bf16 %v459_v6, %v459_v6  ;;  %v427_v52 = vpack.c.bf16 %v425_v34, %v425_v34 }
 0x15c   : > { %2864 = vmatpush.bf16.msra.mxu0 %v3848_v55  ;;  %v462_v55 = vld [vmem:[%s4064_s30 + $0x120] sm:$0xff] }
 0x15d   : > { %2450 = vmatmul.bf16.gmra.mxu3 %v4606_v33  ;;  %v1117_v28 = vunpack.c.l.b16 %v495_v11  ;;  %v1047_v25 = vunpack.c.l.b16 %v427_v52  ;;  %v313_v11 = vld [vmem:[%s4064_s30 + $0x106] sm:$0xff]  ;;  %v350_v52 = vpack.c.bf16 %v314_v22, %v314_v22 }
 0x15e   : > { %2539 = vmatmul.bf16.gmra.mxu0 %v1137_v63  ;;  %v2302_v48 = vpop.f32.mrf.mxu2  ;;  %v896_v63 = vunpack.c.l.b16 %v348_v42 }
 0x15f   : > { %v2303_v49 = vadd.f32 %v2302_v48, %v2204_v41  ;;  %v1048_v48 = vunpack.c.l.b16 %v428_v23 }
 0x160   : > { %v2205_v31 = vpop.f32.mrf.mxu1  ;;  %v4624_v38 = vpop.f32.mrf.mxu3  ;;  %v916_v6 = vpack.c.b16 %v896_v63, %v895_v56 }
 0x161   : > { %v2402_v39 = vadd.f32 %v4568_v53, %v2303_v49  ;;  %v2206_v50 = vadd.f32 %v2205_v31, %v4330_v4  ;;  %v1138_v49 = vpack.c.b16 %v1118_v62, %v1117_v28  ;;  %v1049_v4 = vpack.c.b16 %v1048_v48, %v1047_v25  ;;  %v577_v62 = vld [vmem:[%s4064_s30 + $0x2a] sm:$0xff] }
 0x162   : > { %v898_v25 = vunpack.c.l.b16 %v350_v52  ;;  %v315_v52 = vld [vmem:[%s4064_s30 + $0x116] sm:$0xff] }
 0x163   : > { %v2502_v16 = vpop.f32.mrf.mxu0  ;;  %v4626_v21 = vadd.f32 %v2500_v24, %v2402_v39  ;;  %v461_v39 = vld [vmem:[%s4064_s30 + $0x118] sm:$0xff] }
 0x164   : > { %v497_v28 = vpack.c.bf16 %v461_v39, %v461_v39 }
 0x166   : > { %v2304_v53 = vpop.f32.mrf.mxu2 }
 0x167   : > { %v2305_v41 = vadd.f32 %v2304_v53, %v2206_v50  ;;  %v578_v50 = vld [vmem:[%s4064_s30 + $0x32] sm:$0xff] }
 0x168   : > { %v2208_v60 = vpop.f32.mrf.mxu1  ;;  %v4630_v24 = vpop.f32.mrf.mxu3  ;;  %v614_v48 = vpack.c.bf16 %v578_v50, %v578_v50  ;;  %v464_v50 = vld [vmem:[%s4064_s30 + $0x130] sm:$0xff] }
 0x169   : > { %v2404_v42 = vadd.f32 %v4574_v45, %v2305_v41  ;;  %v2209_v30 = vadd.f32 %v2208_v60, %v4343_v20  ;;  %v349_v45 = vpack.c.bf16 %v313_v11, %v313_v11  ;;  %v613_v20 = vpack.c.bf16 %v577_v62, %v577_v62  ;;  %v463_v62 = vld [vmem:[%s4064_s30 + $0x128] sm:$0xff] }
 0x16a   : > { %v1310_v39 = vunpack.c.l.b16 %v614_v48  ;;  %v499_v48 = vpack.c.bf16 %v463_v62, %v463_v62 }
 0x16b   : > { %v2505_v34 = vpop.f32.mrf.mxu0  ;;  %2247 = vmatmul.bf16.gmra.mxu1 %v916_v6  ;;  %2346 = vmatmul.bf16.gmra.mxu2 %v4553_v59  ;;  %v4634_v31 = vadd.f32 %v2502_v16, %v2404_v42  ;;  %v498_v59 = vpack.c.bf16 %v462_v55, %v462_v55  ;;  %v897_v41 = vunpack.c.l.b16 %v349_v45 }
 0x16d   : > { %2455 = vmatmul.bf16.gmra.mxu3 %v1049_v4  ;;  %v1120_v42 = vunpack.c.l.b16 %v498_v59 }
 0x16e   : > { %2544 = vmatmul.bf16.gmra.mxu0 %v1138_v49  ;;  %v2307_v56 = vpop.f32.mrf.mxu2  ;;  %v1119_v49 = vunpack.c.l.b16 %v497_v28  ;;  %v316_v28 = vld [vmem:[%s4064_s30 + $0x11e] sm:$0xff] }
 0x16f   : > { %v2308_v63 = vadd.f32 %v2307_v56, %v2209_v30  ;;  %v917_v30 = vpack.c.b16 %v898_v25, %v897_v41  ;;  %v352_v25 = vpack.c.bf16 %v316_v28, %v316_v28 }
 0x170   : > { %v2210_v23 = vpop.f32.mrf.mxu1  ;;  %v4643_v6 = vpop.f32.mrf.mxu3  ;;  %v1139_v56 = vpack.c.b16 %v1120_v42, %v1119_v49  ;;  %v579_v49 = vld [vmem:[%s4064_s30 + $0x3a] sm:$0xff]  ;;  %v580_v42 = vld [vmem:[%s4064_s30 + $0x42] sm:$0xff] }
 0x171   : > { %v2407_v53 = vadd.f32 %v4590_v1, %v2308_v63  ;;  %v2211_v11 = vadd.f32 %v2210_v23, %v4365_v2  ;;  %v1309_v1 = vunpack.c.l.b16 %v613_v20 }
 0x173   : > { %v2507_v16 = vpop.f32.mrf.mxu0  ;;  %v4645_v60 = vadd.f32 %v2505_v34, %v2407_v53  ;;  %v1345_v2 = vpack.c.b16 %v1310_v39, %v1309_v1  ;;  %v616_v1 = vpack.c.bf16 %v580_v42, %v580_v42  ;;  %v649_v42 = vld [vmem:[%s4064_s30 + $0x2b] sm:$0xff] }
 0x176   : > { %v2309_v4 = vpop.f32.mrf.mxu2 }
 0x177   : > { %v2310_v22 = vadd.f32 %v2309_v4, %v2211_v11 }
 0x178   : > { %v2213_v55 = vpop.f32.mrf.mxu1  ;;  %v4649_v34 = vpop.f32.mrf.mxu3 }
 0x179   : > { %v2409_v45 = vadd.f32 %v4602_v8, %v2310_v22  ;;  %v2214_v59 = vadd.f32 %v2213_v55, %v4378_v3  ;;  %v351_v8 = vpack.c.bf16 %v315_v52, %v315_v52  ;;  %v615_v3 = vpack.c.bf16 %v579_v49, %v579_v49 }
 0x17a   : > { %v1121_v55 = vunpack.c.l.b16 %v499_v48 }
 0x17b   : > { %v2510_v63 = vpop.f32.mrf.mxu0  ;;  %2252 = vmatmul.bf16.gmra.mxu1 %v917_v30  ;;  %2351 = vmatmul.bf16.gmra.mxu2 %v4578_v19  ;;  %v4653_v23 = vadd.f32 %v2507_v16, %v2409_v45  ;;  %v500_v19 = vpack.c.bf16 %v464_v50, %v464_v50  ;;  %v899_v4 = vunpack.c.l.b16 %v351_v8  ;;  %v900_v30 = vunpack.c.l.b16 %v352_v25  ;;  %v503_v25 = vld [vmem:[%s4064_s30 + $0x29] sm:$0xff] }
 0x17d   : > { %2766 = vmatmul.bf16.vlgmr.msra.gmra.mxu3 %v1345_v2  ;;  %v918_v28 = vpack.c.b16 %v900_v30, %v899_v4 }
 0x17e   : > { %2549 = vmatmul.bf16.gmra.mxu0 %v1139_v56  ;;  %v2312_v53 = vpop.f32.mrf.mxu2  ;;  %v1122_v56 = vunpack.c.l.b16 %v500_v19  ;;  %v504_v19 = vld [vmem:[%s4064_s30 + $0x31] sm:$0xff] }
 0x17f   : > { %v2313_v41 = vadd.f32 %v2312_v53, %v2214_v59  ;;  %v1312_v59 = vunpack.c.l.b16 %v616_v1 }
 0x180   : > { %v2215_v20 = vpop.f32.mrf.mxu1  ;;  %v4662_v22 = vpop.f32.mrf.mxu3  ;;  %v1140_v50 = vpack.c.b16 %v1122_v56, %v1121_v55  ;;  %v685_v56 = vpack.c.bf16 %v649_v42, %v649_v42 }
 0x181   : > { %v2412_v11 = vadd.f32 %v4624_v38, %v2313_v41  ;;  %v2216_v45 = vadd.f32 %v2215_v20, %v4394_v17  ;;  %v1311_v38 = vunpack.c.l.b16 %v615_v3  ;;  %v501_v41 = vld [vmem:[%s4064_s30 + $0x19] sm:$0xff]  ;;  %v502_v17 = vld [vmem:[%s4064_s30 + $0x21] sm:$0xff]  ;;  %v539_v3 = vpack.c.bf16 %v503_v25, %v503_v25 }
 0x182   : > { %v537_v4 = vpack.c.bf16 %v501_v41, %v501_v41  ;;  %v538_v30 = vpack.c.bf16 %v502_v17, %v502_v17 }
 0x183   : > { %v2512_v16 = vpop.f32.mrf.mxu0  ;;  %v4664_v39 = vadd.f32 %v2510_v63, %v2412_v11  ;;  %v1346_v20 = vpack.c.b16 %v1312_v59, %v1311_v38  ;;  %v4009_v38 = vmov 0  }
 0x184   : > { %3998 = vset.pattern.permute.xlu0 %v4009_v38  ;;  %3999 = vset.pattern.permute.xlu1 %v4009_v38  ;;  %v1195_v59 = vunpack.c.l.b16 %v537_v4 }
 0x185   : > { %4000 = vset.pattern.permute.xlu2 %v4009_v38  ;;  %v651_v38 = vld [vmem:[%s4064_s30 + $0x3b] sm:$0xff] }
 0x186   : > { %v2314_v52 = vpop.f32.mrf.mxu2 }
 0x187   : > { %v2315_v2 = vadd.f32 %v2314_v52, %v2216_v45  ;;  %v582_v52 = vld [vmem:[%s4064_s30 + $0x52] sm:$0xff] }
 0x188   : > { %v2218_v62 = vpop.f32.mrf.mxu1  ;;  %v4668_v8 = vpop.f32.mrf.mxu3  ;;  %v618_v25 = vpack.c.bf16 %v582_v52, %v582_v52 }
 0x189   : > { %v2414_v63 = vadd.f32 %v4630_v24, %v2315_v2  ;;  %v2219_v49 = vadd.f32 %v2218_v62, %v4404_v47  ;;  %v650_v24 = vld [vmem:[%s4064_s30 + $0x33] sm:$0xff]  ;;  %v2956_v47 = vld [vmem:[%s5139_s1] sm:$0xff]  ;;  %v1196_v62 = vunpack.c.l.b16 %v538_v30 }
 0x18a   : > { %v686_v45 = vpack.c.bf16 %v650_v24, %v650_v24  ;;  %2994 = vperm.xlu0 %3998, %v2956_v47   ;;  %v652_v47 = vld [vmem:[%s4064_s30 + $0x43] sm:$0xff] }
 0x18b   : > { %v2515_v53 = vpop.f32.mrf.mxu0  ;;  %2257 = vmatmul.bf16.gmra.mxu1 %v918_v28  ;;  %2356 = vmatmul.bf16.gmra.mxu2 %v4606_v33  ;;  %v4674_v48 = vadd.f32 %v2512_v16, %v2414_v63  ;;  %v540_v33 = vpack.c.bf16 %v504_v19, %v504_v19  ;;  %v581_v16 = vld [vmem:[%s4064_s30 + $0x4a] sm:$0xff]  ;;  %v1231_v24 = vpack.c.b16 %v1196_v62, %v1195_v59 }
 0x18c   : > { %v617_v17 = vpack.c.bf16 %v581_v16, %v581_v16  ;;  %v1418_v19 = vunpack.c.l.b16 %v686_v45 }
 0x18d   : > { %2771 = vmatmul.bf16.gmra.mxu3 %v1346_v20  ;;  %v1198_v41 = vunpack.c.l.b16 %v540_v33 }
 0x18e   : > { %2554 = vmatmul.bf16.gmra.mxu0 %v1140_v50  ;;  %v2317_v11 = vpop.f32.mrf.mxu2  ;;  %v1197_v50 = vunpack.c.l.b16 %v539_v3  ;;  %v1313_v30 = vunpack.c.l.b16 %v617_v17  ;;  %v1314_v3 = vunpack.c.l.b16 %v618_v25  ;;  %v687_v25 = vpack.c.bf16 %v651_v38, %v651_v38 }
 0x18f   : > { %v2318_v1 = vadd.f32 %v2317_v11, %v2219_v49 }
 0x190   : > { %v2220_v55 = vpop.f32.mrf.mxu1  ;;  %v4686_v63 = vpop.f32.mrf.mxu3  ;;  %v1232_v4 = vpack.c.b16 %v1198_v41, %v1197_v50  ;;  %v1347_v45 = vpack.c.b16 %v1314_v3, %v1313_v30 }
 0x191   : > { %v2417_v2 = vadd.f32 %v4643_v6, %v2318_v1  ;;  %v1417_v6 = vunpack.c.l.b16 %v685_v56  ;;  %v2221_v49 = vadd.f32 %v2220_v55, %v4426_v12  ;;  %v2957_v56 = vld [vmem:[%s5139_s1 + $0x8] sm:$0xff]  ;;  %v505_v55 = vld [vmem:[%s4064_s30 + $0x39] sm:$0xff] }
 0x192   : > { %2999 = vperm.xlu0 %3998, %v2957_v56   ;;  %v541_v62 = vpack.c.bf16 %v505_v55, %v505_v55 }
 0x193   : > { %v2517_v28 = vpop.f32.mrf.mxu0  ;;  %v4688_v20 = vadd.f32 %v2515_v53, %v2417_v2  ;;  %v1453_v33 = vpack.c.b16 %v1418_v19, %v1417_v6  ;;  %v506_v2 = vld [vmem:[%s4064_s30 + $0x41] sm:$0xff]  ;;  %v688_v6 = vpack.c.bf16 %v652_v47, %v652_v47 }
 0x194   : > { %v542_v41 = vpack.c.bf16 %v506_v2, %v506_v2  ;;  %v583_v19 = vld [vmem:[%s4064_s30 + $0x5a] sm:$0xff] }
 0x195   : > { %v619_v3 = vpack.c.bf16 %v583_v19, %v583_v19  ;;  %v1420_v56 = vunpack.c.l.b16 %v688_v6  ;;  %v508_v6 = vld [vmem:[%s4064_s30 + $0x51] sm:$0xff] }
 0x196   : > { %v2319_v42 = vpop.f32.mrf.mxu2  ;;  %v1200_v30 = vunpack.c.l.b16 %v542_v41  ;;  %v653_v19 = vld [vmem:[%s4064_s30 + $0x4b] sm:$0xff] }
 0x197   : > { %v2320_v11 = vadd.f32 %v2319_v42, %v2221_v49  ;;  %v584_v49 = vld [vmem:[%s4064_s30 + $0x62] sm:$0xff] }
 0x198   : > { %v2223_v1 = vpop.f32.mrf.mxu1  ;;  %v4695_v12 = vpop.f32.mrf.mxu3 }
 0x199   : > { %v2419_v16 = vadd.f32 %v4649_v34, %v2320_v11  ;;  %v2224_v34 = vadd.f32 %v2223_v1, %v4301_v35  ;;  %v1199_v35 = vunpack.c.l.b16 %v541_v62  ;;  %v620_v1 = vpack.c.bf16 %v584_v49, %v584_v49  ;;  %v654_v49 = vld [vmem:[%s4064_s30 + $0x53] sm:$0xff] }
 0x19b   : > { %v2520_v53 = vpop.f32.mrf.mxu0  ;;  %2568 = vmatmul.bf16.vlgmr.msra.gmra.mxu1 %v1231_v24  ;;  %2667 = vmatmul.bf16.vlgmr.msra.gmra.mxu2 %v1232_v4  ;;  %v4698_v52 = vadd.f32 %v2517_v28, %v2419_v16  ;;  %v2958_v24 = vld [vmem:[%s5139_s1 + $0x10] sm:$0xff]  ;;  %v1419_v16 = vunpack.c.l.b16 %v687_v25  ;;  %v1233_v2 = vpack.c.b16 %v1200_v30, %v1199_v35  ;;  %v1316_v38 = vunpack.c.l.b16 %v620_v1 }
 0x19c   : > { %3004 = vperm.xlu1 %3999, %v2958_v24   ;;  %v544_v30 = vpack.c.bf16 %v508_v6, %v508_v6  ;;  %v690_v1 = vpack.c.bf16 %v654_v49, %v654_v49 }
 0x19d   : > { %2776 = vmatmul.bf16.gmra.mxu3 %v1347_v45 }
 0x19e   : > { %2865 = vmatmul.bf16.vlgmr.msra.gmra.mxu0 %v1453_v33  ;;  %v2322_v59 = vpop.f32.mrf.mxu2 }
 0x19f   : > { %v2323_v50 = vadd.f32 %v2322_v59, %v2224_v34  ;;  %v1315_v34 = vunpack.c.l.b16 %v619_v3  ;;  %v1454_v59 = vpack.c.b16 %v1420_v56, %v1419_v16  ;;  %v585_v16 = vld [vmem:[%s4064_s30 + $0x6a] sm:$0xff]  ;;  %v586_v56 = vld [vmem:[%s4064_s30 + $0x72] sm:$0xff] }
 0x1a0   : > { %v2225_v17 = vpop.f32.mrf.mxu1  ;;  %v4710_v11 = vpop.f32.mrf.mxu3 }
 0x1a1   : > { %v2422_v42 = vadd.f32 %v4662_v22, %v2323_v50  ;;  %v2226_v55 = vadd.f32 %v2225_v17, %v4312_v51  ;;  %v507_v51 = vld [vmem:[%s4064_s30 + $0x49] sm:$0xff]  ;;  %v1348_v17 = vpack.c.b16 %v1316_v38, %v1315_v34  ;;  %v1202_v34 = vunpack.c.l.b16 %v544_v30 }
 0x1a2   : > { %v543_v24 = vpack.c.bf16 %v507_v51, %v507_v51  ;;  %v622_v38 = vpack.c.bf16 %v586_v56, %v586_v56 }
 0x1a3   : > { %v2522_v28 = vpop.f32.mrf.mxu0  ;;  %v4712_v33 = vadd.f32 %v2520_v53, %v2422_v42  ;;  %v2959_v53 = vld [vmem:[%s5139_s1 + $0x18] sm:$0xff] }
 0x1a4   : > { %3009 = vperm.xlu1 %3999, %v2959_v53  }
 0x1a6   : > { %v2324_v22 = vpop.f32.mrf.mxu2 }
 0x1a7   : > { %v2325_v45 = vadd.f32 %v2324_v22, %v2226_v55  ;;  %v1201_v22 = vunpack.c.l.b16 %v543_v24 }
 0x1a8   : > { %v2228_v47 = vpop.f32.mrf.mxu1  ;;  %v4719_v41 = vpop.f32.mrf.mxu3 }
 0x1a9   : > { %v2424_v62 = vadd.f32 %v4668_v8, %v2325_v45  ;;  %v2229_v8 = vadd.f32 %v2228_v47, %v4327_v0  ;;  %v621_v0 = vpack.c.bf16 %v585_v16, %v585_v16  ;;  %v1234_v6 = vpack.c.b16 %v1202_v34, %v1201_v22  ;;  %v656_v16 = vld [vmem:[%s4064_s30 + $0x63] sm:$0xff] }
 0x1ab   : > { %v2525_v50 = vpop.f32.mrf.mxu0  ;;  %2573 = vmatmul.bf16.gmra.mxu1 %v1232_v4  ;;  %2672 = vmatmul.bf16.gmra.mxu2 %v1233_v2  ;;  %v4722_v25 = vadd.f32 %v2522_v28, %v2424_v62  ;;  %v689_v4 = vpack.c.bf16 %v653_v19, %v653_v19  ;;  %v1422_v62 = vunpack.c.l.b16 %v690_v1  ;;  %v655_v1 = vld [vmem:[%s4064_s30 + $0x5b] sm:$0xff] }
 0x1ad   : > { %2781 = vmatmul.bf16.gmra.mxu3 %v1348_v17 }
 0x1ae   : > { %2870 = vmatmul.bf16.gmra.mxu0 %v1454_v59  ;;  %v2327_v42 = vpop.f32.mrf.mxu2  ;;  %v1421_v59 = vunpack.c.l.b16 %v689_v4 }
 0x1af   : > { %v2328_v35 = vadd.f32 %v2327_v42, %v2229_v8  ;;  %v1318_v8 = vunpack.c.l.b16 %v622_v38  ;;  %v587_v38 = vld [vmem:[%s4064_s30 + $0x7a] sm:$0xff] }
 0x1b0   : > { %v2230_v3 = vpop.f32.mrf.mxu1  ;;  %v4731_v45 = vpop.f32.mrf.mxu3  ;;  %v1455_v49 = vpack.c.b16 %v1422_v62, %v1421_v59  ;;  %v588_v59 = vld [vmem:[%s4064_s30 + $0x82] sm:$0xff] }
 0x1b1   : > { %v2427_v55 = vadd.f32 %v4686_v63, %v2328_v35  ;;  %v2231_v53 = vadd.f32 %v2230_v3, %v4338_v15  ;;  %v1317_v63 = vunpack.c.l.b16 %v621_v0  ;;  %v509_v35 = vld [vmem:[%s4064_s30 + $0x59] sm:$0xff]  ;;  %v510_v3 = vld [vmem:[%s4064_s30 + $0x61] sm:$0xff]  ;;  %v692_v0 = vpack.c.bf16 %v656_v16, %v656_v16 }
 0x1b2   : > { %v546_v22 = vpack.c.bf16 %v510_v3, %v510_v3 }
 0x1b3   : > { %v2527_v28 = vpop.f32.mrf.mxu0  ;;  %v4733_v47 = vadd.f32 %v2525_v50, %v2427_v55  ;;  %v1349_v15 = vpack.c.b16 %v1318_v8, %v1317_v63  ;;  %v545_v55 = vpack.c.bf16 %v509_v35, %v509_v35  ;;  %v623_v63 = vpack.c.bf16 %v587_v38, %v587_v38 }
 0x1b4   : > { %v624_v8 = vpack.c.bf16 %v588_v59, %v588_v59  ;;  %v657_v59 = vld [vmem:[%s4064_s30 + $0x6b] sm:$0xff] }
 0x1b6   : > { %v2329_v51 = vpop.f32.mrf.mxu2 }
 0x1b7   : > { %v2330_v17 = vadd.f32 %v2329_v51, %v2231_v53  ;;  %v2962_v53 = vld [vmem:[%s5139_s1 + $0x30] sm:$0xff] }
 0x1b8   : > { %v2233_v19 = vpop.f32.mrf.mxu1  ;;  %v4737_v50 = vpop.f32.mrf.mxu3  ;;  %3024 = vperm.xlu0 %3998, %v2962_v53  }
 0x1b9   : > { %v2429_v42 = vadd.f32 %v4695_v12, %v2330_v17  ;;  %v2234_v4 = vadd.f32 %v2233_v19, %v4362_v37  ;;  %v1203_v37 = vunpack.c.l.b16 %v545_v55  ;;  %v1204_v17 = vunpack.c.l.b16 %v546_v22 }
 0x1bb   : > { %v2530_v24 = vpop.f32.mrf.mxu0  ;;  %2578 = vmatmul.bf16.gmra.mxu1 %v1233_v2  ;;  %2677 = vmatmul.bf16.gmra.mxu2 %v1234_v6  ;;  %v4740_v30 = vadd.f32 %v2527_v28, %v2429_v42  ;;  %v691_v2 = vpack.c.bf16 %v655_v1, %v655_v1  ;;  %v1424_v42 = vunpack.c.l.b16 %v692_v0  ;;  %v1235_v3 = vpack.c.b16 %v1204_v17, %v1203_v37  ;;  %v512_v0 = vld [vmem:[%s4064_s30 + $0x71] sm:$0xff] }
 0x1bc   : > { %v1320_v1 = vunpack.c.l.b16 %v624_v8 }
 0x1bd   : > { %2786 = vmatmul.bf16.gmra.mxu3 %v1349_v15 }
 0x1be   : > { %2875 = vmatmul.bf16.gmra.mxu0 %v1455_v49  ;;  %v2332_v56 = vpop.f32.mrf.mxu2  ;;  %v1423_v49 = vunpack.c.l.b16 %v691_v2 }
 0x1bf   : > { %v2333_v12 = vadd.f32 %v2332_v56, %v2234_v4  ;;  %v1319_v4 = vunpack.c.l.b16 %v623_v63  ;;  %v548_v63 = vpack.c.bf16 %v512_v0, %v512_v0 }
 0x1c0   : > { %v2235_v34 = vpop.f32.mrf.mxu1  ;;  %v4752_v51 = vpop.f32.mrf.mxu3  ;;  %v1456_v56 = vpack.c.b16 %v1424_v42, %v1423_v49  ;;  %v589_v42 = vld [vmem:[%s4064_s30 + $0x8a] sm:$0xff] }
 0x1c1   : > { %v2432_v62 = vadd.f32 %v4710_v11, %v2333_v12  ;;  %v2236_v35 = vadd.f32 %v2235_v34, %v4376_v61  ;;  %v2963_v61 = vld [vmem:[%s5139_s1 + $0x38] sm:$0xff]  ;;  %v511_v34 = vld [vmem:[%s4064_s30 + $0x69] sm:$0xff]  ;;  %v1350_v2 = vpack.c.b16 %v1320_v1, %v1319_v4  ;;  %v1206_v1 = vunpack.c.l.b16 %v548_v63 }
 0x1c2   : > { %3029 = vperm.xlu1 %3999, %v2963_v61   ;;  %v547_v37 = vpack.c.bf16 %v511_v34, %v511_v34 }
 0x1c3   : > { %v2532_v28 = vpop.f32.mrf.mxu0  ;;  %v4754_v19 = vadd.f32 %v2530_v24, %v2432_v62  ;;  %v2960_v24 = vld [vmem:[%s5139_s1 + $0x20] sm:$0xff]  ;;  %v658_v62 = vld [vmem:[%s4064_s30 + $0x73] sm:$0xff] }
 0x1c4   : > { %3014 = vperm.xlu2 %4000, %v2960_v24   ;;  %v694_v49 = vpack.c.bf16 %v658_v62, %v658_v62 }
 0x1c6   : > { %v2334_v15 = vpop.f32.mrf.mxu2  ;;  %v1426_v61 = vunpack.c.l.b16 %v694_v49  ;;  %v514_v49 = vld [vmem:[%s4064_s30 + $0x81] sm:$0xff] }
 0x1c7   : > { %v2335_v11 = vadd.f32 %v2334_v15, %v2236_v35  ;;  %v590_v35 = vld [vmem:[%s4064_s30 + $0x92] sm:$0xff] }
 0x1c8   : > { %v2238_v16 = vpop.f32.mrf.mxu1  ;;  %v4764_v22 = vpop.f32.mrf.mxu3 }
 0x1c9   : > { %v2434_v55 = vadd.f32 %v4719_v41, %v2335_v11  ;;  %v2239_v38 = vadd.f32 %v2238_v16, %v4391_v57  ;;  %v2961_v11 = vld [vmem:[%s5139_s1 + $0x28] sm:$0xff]  ;;  %v1205_v57 = vunpack.c.l.b16 %v547_v37  ;;  %v625_v16 = vpack.c.bf16 %v589_v42, %v589_v42  ;;  %v659_v42 = vld [vmem:[%s4064_s30 + $0x7b] sm:$0xff] }
 0x1cb   : > { %v2535_v12 = vpop.f32.mrf.mxu0  ;;  %2583 = vmatmul.bf16.gmra.mxu1 %v1234_v6  ;;  %2682 = vmatmul.bf16.gmra.mxu2 %v1235_v3  ;;  %v4767_v41 = vadd.f32 %v2532_v28, %v2434_v55  ;;  %v693_v6 = vpack.c.bf16 %v657_v59, %v657_v59  ;;  %v1236_v0 = vpack.c.b16 %v1206_v1, %v1205_v57 }
 0x1cc   : > { %3019 = vperm.xlu2 %4000, %v2961_v11   ;;  %v550_v1 = vpack.c.bf16 %v514_v49, %v514_v49 }
 0x1cd   : > { %2791 = vmatmul.bf16.gmra.mxu3 %v1350_v2  ;;  %v1425_v24 = vunpack.c.l.b16 %v693_v6 }
 0x1ce   : > { %2880 = vmatmul.bf16.gmra.mxu0 %v1456_v56  ;;  %v2337_v53 = vpop.f32.mrf.mxu2  ;;  %v626_v56 = vpack.c.bf16 %v590_v35, %v590_v35  ;;  %v660_v35 = vld [vmem:[%s4064_s30 + $0x83] sm:$0xff] }
 0x1cf   : > { %v2338_v17 = vadd.f32 %v2337_v53, %v2239_v38  ;;  %v1321_v38 = vunpack.c.l.b16 %v625_v16  ;;  %v1457_v53 = vpack.c.b16 %v1426_v61, %v1425_v24  ;;  %v591_v24 = vld [vmem:[%s4064_s30 + $0x9a] sm:$0xff]  ;;  %v592_v61 = vld [vmem:[%s4064_s30 + $0xa2] sm:$0xff] }
 0x1d0   : > { %v2240_v8 = vpop.f32.mrf.mxu1  ;;  %v4779_v4 = vpop.f32.mrf.mxu3  ;;  %v1322_v59 = vunpack.c.l.b16 %v626_v56  ;;  %v696_v56 = vpack.c.bf16 %v660_v35, %v660_v35 }
 0x1d1   : > { %v2437_v15 = vadd.f32 %v4731_v45, %v2338_v17  ;;  %v2241_v34 = vadd.f32 %v2240_v8, %v4402_v40  ;;  %v513_v40 = vld [vmem:[%s4064_s30 + $0x79] sm:$0xff] }
 0x1d2   : > { %v1351_v8 = vpack.c.b16 %v1322_v59, %v1321_v38  ;;  %v549_v11 = vpack.c.bf16 %v513_v40, %v513_v40  ;;  %v1208_v38 = vunpack.c.l.b16 %v550_v1  ;;  %v627_v59 = vpack.c.bf16 %v591_v24, %v591_v24  ;;  %v661_v24 = vld [vmem:[%s4064_s30 + $0x8b] sm:$0xff] }
 0x1d3   : > { %v2537_v28 = vpop.f32.mrf.mxu0  ;;  %v4781_v55 = vadd.f32 %v2535_v12, %v2437_v15  ;;  %v2965_v12 = vld [vmem:[%s5139_s1 + $0x48] sm:$0xff] }
 0x1d4   : > { %3039 = vperm.xlu0 %3998, %v2965_v12   ;;  %v1428_v12 = vunpack.c.l.b16 %v696_v56  ;;  %v516_v56 = vld [vmem:[%s4064_s30 + $0x91] sm:$0xff] }
 0x1d6   : > { %v2339_v45 = vpop.f32.mrf.mxu2 }
 0x1d7   : > { %v2340_v2 = vadd.f32 %v2339_v45, %v2241_v34  ;;  %v2966_v45 = vld [vmem:[%s5139_s1 + $0x50] sm:$0xff] }
 0x1d8   : > { %v2243_v62 = vpop.f32.mrf.mxu1  ;;  %v4788_v63 = vpop.f32.mrf.mxu3  ;;  %3044 = vperm.xlu1 %3999, %v2966_v45  }
 0x1d9   : > { %v2439_v37 = vadd.f32 %v4737_v50, %v2340_v2  ;;  %v2244_v50 = vadd.f32 %v2243_v62, %v4423_v10  ;;  %v1207_v10 = vunpack.c.l.b16 %v549_v11  ;;  %v628_v62 = vpack.c.bf16 %v592_v61, %v592_v61  ;;  %v662_v61 = vld [vmem:[%s4064_s30 + $0x93] sm:$0xff] }
 0x1db   : > { %v2540_v17 = vpop.f32.mrf.mxu0  ;;  %2588 = vmatmul.bf16.gmra.mxu1 %v1235_v3  ;;  %2687 = vmatmul.bf16.gmra.mxu2 %v1236_v0  ;;  %v4791_v6 = vadd.f32 %v2537_v28, %v2439_v37  ;;  %v695_v3 = vpack.c.bf16 %v659_v42, %v659_v42  ;;  %v1237_v49 = vpack.c.b16 %v1208_v38, %v1207_v10  ;;  %v1324_v42 = vunpack.c.l.b16 %v628_v62 }
 0x1dc   : > { %v552_v38 = vpack.c.bf16 %v516_v56, %v516_v56  ;;  %v698_v62 = vpack.c.bf16 %v662_v61, %v662_v61 }
 0x1dd   : > { %2796 = vmatmul.bf16.gmra.mxu3 %v1351_v8  ;;  %v1427_v37 = vunpack.c.l.b16 %v695_v3 }
 0x1de   : > { %2885 = vmatmul.bf16.gmra.mxu0 %v1457_v53  ;;  %v2342_v15 = vpop.f32.mrf.mxu2 }
 0x1df   : > { %v2343_v57 = vadd.f32 %v2342_v15, %v2244_v50  ;;  %v1323_v50 = vunpack.c.l.b16 %v627_v59  ;;  %v1458_v15 = vpack.c.b16 %v1428_v12, %v1427_v37  ;;  %v593_v37 = vld [vmem:[%s4064_s30 + $0xaa] sm:$0xff]  ;;  %v594_v12 = vld [vmem:[%s4064_s30 + $0xb2] sm:$0xff] }
 0x1e0   : > { %v2245_v16 = vpop.f32.mrf.mxu1  ;;  %v4803_v2 = vpop.f32.mrf.mxu3 }
 0x1e1   : > { %v2442_v34 = vadd.f32 %v4752_v51, %v2343_v57  ;;  %v2246_v40 = vadd.f32 %v2245_v16, %v4440_v44  ;;  %v515_v44 = vld [vmem:[%s4064_s30 + $0x89] sm:$0xff]  ;;  %v1352_v16 = vpack.c.b16 %v1324_v42, %v1323_v50  ;;  %v1210_v50 = vunpack.c.l.b16 %v552_v38 }
 0x1e2   : > { %v551_v45 = vpack.c.bf16 %v515_v44, %v515_v44  ;;  %v629_v42 = vpack.c.bf16 %v593_v37, %v593_v37  ;;  %v663_v37 = vld [vmem:[%s4064_s30 + $0x9b] sm:$0xff] }
 0x1e3   : > { %v2542_v28 = vpop.f32.mrf.mxu0  ;;  %v4805_v53 = vadd.f32 %v2540_v17, %v2442_v34  ;;  %v2964_v17 = vld [vmem:[%s5139_s1 + $0x40] sm:$0xff] }
 0x1e4   : > { %3034 = vperm.xlu2 %4000, %v2964_v17   ;;  %v1430_v17 = vunpack.c.l.b16 %v698_v62  ;;  %v518_v62 = vld [vmem:[%s4064_s30 + $0xa1] sm:$0xff] }
 0x1e6   : > { %v2344_v51 = vpop.f32.mrf.mxu2 }
 0x1e7   : > { %v2345_v8 = vadd.f32 %v2344_v51, %v2246_v40  ;;  %v2968_v51 = vld [vmem:[%s5139_s1 + $0x60] sm:$0xff] }
 0x1e8   : > { %v2248_v35 = vpop.f32.mrf.mxu1  ;;  %v4812_v1 = vpop.f32.mrf.mxu3  ;;  %3054 = vperm.xlu0 %3998, %v2968_v51  }
 0x1e9   : > { %v2444_v11 = vadd.f32 %v4764_v22, %v2345_v8  ;;  %v2249_v22 = vadd.f32 %v2248_v35, %v4310_v43  ;;  %v1209_v43 = vunpack.c.l.b16 %v551_v45  ;;  %v630_v35 = vpack.c.bf16 %v594_v12, %v594_v12  ;;  %v664_v12 = vld [vmem:[%s4064_s30 + $0xa3] sm:$0xff] }
 0x1eb   : > { %v2545_v57 = vpop.f32.mrf.mxu0  ;;  %2593 = vmatmul.bf16.gmra.mxu1 %v1236_v0  ;;  %2692 = vmatmul.bf16.gmra.mxu2 %v1237_v49  ;;  %v4815_v3 = vadd.f32 %v2542_v28, %v2444_v11  ;;  %v697_v0 = vpack.c.bf16 %v661_v24, %v661_v24  ;;  %v1238_v56 = vpack.c.b16 %v1210_v50, %v1209_v43  ;;  %v1326_v24 = vunpack.c.l.b16 %v630_v35 }
 0x1ec   : > { %v554_v50 = vpack.c.bf16 %v518_v62, %v518_v62  ;;  %v700_v35 = vpack.c.bf16 %v664_v12, %v664_v12 }
 0x1ed   : > { %2801 = vmatmul.bf16.gmra.mxu3 %v1352_v16  ;;  %v1429_v11 = vunpack.c.l.b16 %v697_v0 }
 0x1ee   : > { %2890 = vmatmul.bf16.gmra.mxu0 %v1458_v15  ;;  %v2347_v34 = vpop.f32.mrf.mxu2 }
 0x1ef   : > { %v2348_v10 = vadd.f32 %v2347_v34, %v2249_v22  ;;  %v1325_v22 = vunpack.c.l.b16 %v629_v42  ;;  %v1459_v34 = vpack.c.b16 %v1430_v17, %v1429_v11  ;;  %v595_v11 = vld [vmem:[%s4064_s30 + $0xba] sm:$0xff]  ;;  %v596_v17 = vld [vmem:[%s4064_s30 + $0xc2] sm:$0xff] }
 0x1f0   : > { %v2250_v59 = vpop.f32.mrf.mxu1  ;;  %v4827_v8 = vpop.f32.mrf.mxu3 }
 0x1f1   : > { %v2447_v40 = vadd.f32 %v4779_v4, %v2348_v10  ;;  %v2251_v44 = vadd.f32 %v2250_v59, %v4318_v58  ;;  %v517_v58 = vld [vmem:[%s4064_s30 + $0x99] sm:$0xff]  ;;  %v1353_v59 = vpack.c.b16 %v1326_v24, %v1325_v22  ;;  %v1212_v22 = vunpack.c.l.b16 %v554_v50 }
 0x1f2   : > { %v553_v51 = vpack.c.bf16 %v517_v58, %v517_v58  ;;  %v631_v24 = vpack.c.bf16 %v595_v11, %v595_v11  ;;  %v5146_v11 = vld [vmem:[#allocation2_spill] sm:$0xff] }
 0x1f3   : > { %v2547_v28 = vpop.f32.mrf.mxu0  ;;  %v4829_v15 = vadd.f32 %v2545_v57, %v2447_v40  ;;  %v2969_v57 = vld [vmem:[%s5139_s1 + $0x68] sm:$0xff] }
 0x1f4   : > { %3059 = vperm.xlu1 %3999, %v2969_v57   ;;  %v1432_v57 = vunpack.c.l.b16 %v700_v35  ;;  %v520_v35 = vld [vmem:[%s4064_s30 + $0xb1] sm:$0xff] }
 0x1f6   : > { %v2349_v4 = vpop.f32.mrf.mxu2 }
 0x1f7   : > { %v2350_v16 = vadd.f32 %v2349_v4, %v2251_v44  ;;  %v2967_v4 = vld [vmem:[%s5139_s1 + $0x58] sm:$0xff] }
 0x1f8   : > { %v2253_v61 = vpop.f32.mrf.mxu1  ;;  %v4836_v38 = vpop.f32.mrf.mxu3  ;;  %3049 = vperm.xlu2 %4000, %v2967_v4  }
 0x1f9   : > { %v2449_v45 = vadd.f32 %v4788_v63, %v2350_v16  ;;  %v2254_v63 = vadd.f32 %v2253_v61, %v4336_v9  ;;  %v1211_v9 = vunpack.c.l.b16 %v553_v51  ;;  %v632_v61 = vpack.c.bf16 %v596_v17, %v596_v17  ;;  %v665_v17 = vld [vmem:[%s4064_s30 + $0xab] sm:$0xff] }
 0x1fb   : > { %v2550_v10 = vpop.f32.mrf.mxu0  ;;  %2598 = vmatmul.bf16.gmra.mxu1 %v1237_v49  ;;  %2697 = vmatmul.bf16.gmra.mxu2 %v1238_v56  ;;  %v4839_v0 = vadd.f32 %v2547_v28, %v2449_v45  ;;  %v699_v49 = vpack.c.bf16 %v663_v37, %v663_v37  ;;  %v1239_v62 = vpack.c.b16 %v1212_v22, %v1211_v9  ;;  %v1328_v37 = vunpack.c.l.b16 %v632_v61 }
 0x1fd   : > { %2806 = vmatmul.bf16.gmra.mxu3 %v1353_v59  ;;  %v1431_v45 = vunpack.c.l.b16 %v699_v49 }
 0x1fe   : > { %2895 = vmatmul.bf16.gmra.mxu0 %v1459_v34  ;;  %v2352_v40 = vpop.f32.mrf.mxu2 }
 0x1ff   : > { %v2353_v43 = vadd.f32 %v2352_v40, %v2254_v63  ;;  %v1327_v63 = vunpack.c.l.b16 %v631_v24  ;;  %v1460_v40 = vpack.c.b16 %v1432_v57, %v1431_v45  ;;  %v556_v24 = vpack.c.bf16 %v520_v35, %v520_v35  ;;  %v597_v57 = vld [vmem:[%s4064_s30 + $0xca] sm:$0xff] }
 0x200   : > { %v2255_v42 = vpop.f32.mrf.mxu1  ;;  %v4851_v16 = vpop.f32.mrf.mxu3  ;;  %v5147_v35 = vld [vmem:[#allocation3_spill] sm:$0xff] }
 0x201   : > { %v2452_v44 = vadd.f32 %v4803_v2, %v2353_v43  ;;  %v2256_v58 = vadd.f32 %v2255_v42, %v4350_v27  ;;  %v519_v27 = vld [vmem:[%s4064_s30 + $0xa9] sm:$0xff]  ;;  %v1354_v42 = vpack.c.b16 %v1328_v37, %v1327_v63 }
 0x202   : > { %v555_v9 = vpack.c.bf16 %v519_v27, %v519_v27 }
 0x203   : > { %v2552_v28 = vpop.f32.mrf.mxu0  ;;  %v4853_v34 = vadd.f32 %v2550_v10, %v2452_v44  ;;  %v2971_v10 = vld [vmem:[%s5139_s1 + $0x78] sm:$0xff] }
 0x204   : > { %3069 = vperm.xlu0 %3998, %v2971_v10   ;;  %v666_v44 = vld [vmem:[%s4064_s30 + $0xb3] sm:$0xff]  ;;  %v1213_v63 = vunpack.c.l.b16 %v555_v9 }
 0x205   : > { %v702_v45 = vpack.c.bf16 %v666_v44, %v666_v44 }
 0x206   : > { %v2354_v2 = vpop.f32.mrf.mxu2 }
 0x207   : > { %v2355_v59 = vadd.f32 %v2354_v2, %v2256_v58  ;;  %v598_v58 = vld [vmem:[%s4064_s30 + $0xd2] sm:$0xff] }
 0x208   : > { %v2258_v12 = vpop.f32.mrf.mxu1  ;;  %v4860_v50 = vpop.f32.mrf.mxu3 }
 0x209   : > { %v2454_v51 = vadd.f32 %v4812_v1, %v2355_v59  ;;  %v2259_v1 = vadd.f32 %v2258_v12, %v5146_v11  ;;  %v2972_v59 = vld [vmem:[%s5139_s1 + $0x80] sm:$0xff]  ;;  %v1214_v12 = vunpack.c.l.b16 %v556_v24 }
 0x20a   : > { %3074 = vperm.xlu1 %3999, %v2972_v59   ;;  %v667_v59 = vld [vmem:[%s4064_s30 + $0xbb] sm:$0xff] }
 0x20b   : > { %v2555_v43 = vpop.f32.mrf.mxu0  ;;  %2603 = vmatmul.bf16.gmra.mxu1 %v1238_v56  ;;  %2702 = vmatmul.bf16.gmra.mxu2 %v1239_v62  ;;  %v4863_v49 = vadd.f32 %v2552_v28, %v2454_v51  ;;  %v701_v56 = vpack.c.bf16 %v665_v17, %v665_v17  ;;  %v634_v51 = vpack.c.bf16 %v598_v58, %v598_v58 }
 0x20c   : > { %v1240_v17 = vpack.c.b16 %v1214_v12, %v1213_v63  ;;  %v668_v63 = vld [vmem:[%s4064_s30 + $0xc3] sm:$0xff] }
 0x20d   : > { %2811 = vmatmul.bf16.gmra.mxu3 %v1354_v42  ;;  %v1433_v27 = vunpack.c.l.b16 %v701_v56  ;;  %v1434_v42 = vunpack.c.l.b16 %v702_v45  ;;  %v522_v45 = vld [vmem:[%s4064_s30 + $0xc1] sm:$0xff] }
 0x20e   : > { %2900 = vmatmul.bf16.gmra.mxu0 %v1460_v40  ;;  %v2357_v4 = vpop.f32.mrf.mxu2  ;;  %v633_v40 = vpack.c.bf16 %v597_v57, %v597_v57 }
 0x20f   : > { %v2358_v22 = vadd.f32 %v2357_v4, %v2259_v1  ;;  %v1330_v4 = vunpack.c.l.b16 %v634_v51  ;;  %v558_v51 = vpack.c.bf16 %v522_v45, %v522_v45 }
 0x210   : > { %v2260_v61 = vpop.f32.mrf.mxu1  ;;  %v4875_v37 = vpop.f32.mrf.mxu3  ;;  %v1329_v44 = vunpack.c.l.b16 %v633_v40 }
 0x211   : > { %v2457_v2 = vadd.f32 %v4827_v8, %v2358_v22  ;;  %v2261_v11 = vadd.f32 %v2260_v61, %v5147_v35  ;;  %v1461_v22 = vpack.c.b16 %v1434_v42, %v1433_v27  ;;  %v521_v61 = vld [vmem:[%s4064_s30 + $0xb9] sm:$0xff]  ;;  %v703_v35 = vpack.c.bf16 %v667_v59, %v667_v59 }
 0x212   : > { %v1355_v58 = vpack.c.b16 %v1330_v4, %v1329_v44  ;;  %v557_v40 = vpack.c.bf16 %v521_v61, %v521_v61 }
 0x213   : > { %v2557_v28 = vpop.f32.mrf.mxu0  ;;  %v4877_v10 = vadd.f32 %v2555_v43, %v2457_v2  ;;  %v2970_v43 = vld [vmem:[%s5139_s1 + $0x70] sm:$0xff]  ;;  %v1435_v45 = vunpack.c.l.b16 %v703_v35 }
 0x214   : > { %3064 = vperm.xlu2 %4000, %v2970_v43   ;;  %v1215_v4 = vunpack.c.l.b16 %v557_v40 }
 0x216   : > { %v2359_v8 = vpop.f32.mrf.mxu2 }
 0x217   : > { %v2360_v1 = vadd.f32 %v2359_v8, %v2261_v11  ;;  %v704_v11 = vpack.c.bf16 %v668_v63, %v668_v63  ;;  %v599_v8 = vld [vmem:[%s4064_s30 + $0xda] sm:$0xff] }
 0x218   : > { %v2569_v9 = vpop.f32.mrf.mxu1  ;;  %v4884_v56 = vpop.f32.mrf.mxu3  ;;  %v635_v43 = vpack.c.bf16 %v599_v8, %v599_v8 }
 0x219   : > { %v2459_v24 = vadd.f32 %v4836_v38, %v2360_v1  ;;  %v2570_v38 = vadd.f32 %v2569_v9, %v4458_v7  ;;  %v600_v1 = vld [vmem:[%s4064_s30 + $0xe2] sm:$0xff]  ;;  %v2974_v7 = vld [vmem:[%s5139_s1 + $0x90] sm:$0xff]  ;;  %v1216_v9 = vunpack.c.l.b16 %v558_v51 }
 0x21a   : > { %3084 = vperm.xlu0 %3998, %v2974_v7   ;;  %v636_v61 = vpack.c.bf16 %v600_v1, %v600_v1  ;;  %v1331_v40 = vunpack.c.l.b16 %v635_v43  ;;  %v523_v7 = vld [vmem:[%s4064_s30 + $0xc9] sm:$0xff] }
 0x21b   : > { %v2866_v57 = vpop.f32.mrf.mxu0  ;;  %2608 = vmatmul.bf16.gmra.mxu1 %v1239_v62  ;;  %2707 = vmatmul.bf16.gmra.mxu2 %v1240_v17  ;;  %v4888_v2 = vadd.f32 %v2557_v28, %v2459_v24  ;;  %v2995_v62 = vpop.permute.xlu0 %2994 }
 0x21c   : > { %v1332_v51 = vunpack.c.l.b16 %v636_v61  ;;  %v669_v61 = vld [vmem:[%s4064_s30 + $0xcb] sm:$0xff] }
 0x21d   : > { %5148 = vst [vmem:[#allocation2_spill] sm:$0xff] %v4888_v2  ;;  %2816 = vmatmul.bf16.gmra.mxu3 %v1355_v58  ;;  %v1436_v58 = vunpack.c.l.b16 %v704_v11 }
 0x21e   : > { %2905 = vmatmul.bf16.gmra.mxu0 %v1461_v22  ;;  %v2668_v12 = vpop.f32.mrf.mxu2 }
 0x21f   : > { %v2669_v27 = vadd.f32 %v2668_v12, %v2570_v38  ;;  %v5149_v38 = vld [vmem:[#allocation4_spill] sm:$0xff]  ;;  %v4902_v12 = vpack.c.b16 %v1216_v9, %v1215_v4  ;;  %v1462_v35 = vpack.c.b16 %v1436_v58, %v1435_v45  ;;  %v1356_v9 = vpack.c.b16 %v1332_v51, %v1331_v40 }
 0x220   : > { %v2571_v42 = vpop.f32.mrf.mxu1  ;;  %v4899_v22 = vpop.f32.mrf.mxu3  ;;  %v524_v4 = vld [vmem:[%s4064_s30 + $0xd1] sm:$0xff] }
 0x221   : > { %v2768_v44 = vadd.f32 %v4851_v16, %v2669_v27  ;;  %v2572_v59 = vadd.f32 %v2571_v42, %v5149_v38  ;;  %v670_v45 = vld [vmem:[%s4064_s30 + $0xd3] sm:$0xff]  ;;  %v601_v40 = vld [vmem:[%s4064_s30 + $0xea] sm:$0xff] }
 0x223   : > { %v2868_v28 = vpop.f32.mrf.mxu0  ;;  %v2867_v24 = vadd.f32 %v2866_v57, %v2768_v44  ;;  %v2975_v57 = vld [vmem:[%s5139_s1 + $0x98] sm:$0xff]  ;;  %v3000_v11 = vpop.permute.xlu0 %2999 }
 0x224   : > { %3089 = vperm.xlu1 %3999, %v2975_v57   ;;  %v3005_v57 = vpop.permute.xlu1 %3004 }
 0x225   : > { %v3172_v63 = vmul.f32 %v2995_v62, %v2867_v24 }
 0x226   : > { %v2670_v16 = vpop.f32.mrf.mxu2 }
 0x227   : > { %v3250_v27 = vmul.f32 %v3172_v63, %v2867_v24  ;;  %v2671_v2 = vadd.f32 %v2670_v16, %v2572_v59  ;;  %v2978_v16 = vld [vmem:[%s5139_s1 + $0xb0] sm:$0xff] }
 0x228   : > { %v2574_v8 = vpop.f32.mrf.mxu1  ;;  %v4909_v1 = vpop.f32.mrf.mxu3 }
 0x229   : > { %v2770_v42 = vadd.f32 %v4860_v50, %v2671_v2  ;;  %v2575_v24 = vadd.f32 %v2574_v8, %v4489_v36  ;;  %v2977_v50 = vld [vmem:[%s5139_s1 + $0xa8] sm:$0xff]  ;;  %v559_v2 = vpack.c.bf16 %v523_v7, %v523_v7  ;;  %v705_v8 = vpack.c.bf16 %v669_v61, %v669_v61 }
 0x22a   : > { %3099 = vperm.xlu0 %3998, %v2977_v50  }
 0x22b   : > { %v2871_v62 = vpop.f32.mrf.mxu0  ;;  %2613 = vmatmul.bf16.gmra.mxu1 %v1240_v17  ;;  %2712 = vmatmul.bf16.gmra.mxu2 %v4902_v12  ;;  %v2869_v44 = vadd.f32 %v2868_v28, %v2770_v42  ;;  %v560_v28 = vpack.c.bf16 %v524_v4, %v524_v4  ;;  %v602_v42 = vld [vmem:[%s4064_s30 + $0xf2] sm:$0xff] }
 0x22c   : > { %3104 = vperm.xlu1 %3999, %v2978_v16   ;;  %v638_v61 = vpack.c.bf16 %v602_v42, %v602_v42 }
 0x22d   : > { %v3173_v43 = vmul.f32 %v3000_v11, %v2869_v44  ;;  %2821 = vmatmul.bf16.gmra.mxu3 %v1356_v9  ;;  %v1218_v9 = vunpack.c.l.b16 %v560_v28 }
 0x22e   : > { %2910 = vmatmul.bf16.gmra.mxu0 %v1462_v35  ;;  %v2673_v17 = vpop.f32.mrf.mxu2  ;;  %v706_v35 = vpack.c.bf16 %v670_v45, %v670_v45  ;;  %v1437_v45 = vunpack.c.l.b16 %v705_v8 }
 0x22f   : > { %v3208_v36 = vadd.f32 %v3173_v43, %v3172_v63  ;;  %v3251_v58 = vmul.f32 %v3173_v43, %v2869_v44  ;;  %v3859_v38 = vpack.c.bf16 %v3173_v43, %v3172_v63  ;;  %v2674_v59 = vadd.f32 %v2673_v17, %v2575_v24  ;;  %v2973_v63 = vld [vmem:[%s5139_s1 + $0x88] sm:$0xff] }
 0x230   : > { %v2576_v51 = vpop.f32.mrf.mxu1  ;;  %v1217_v44 = vunpack.c.l.b16 %v559_v2  ;;  %v4935_v24 = vpop.f32.mrf.mxu3  ;;  %3079 = vperm.xlu2 %4000, %v2973_v63   ;;  %v637_v43 = vpack.c.bf16 %v601_v40, %v601_v40  ;;  %v1438_v17 = vunpack.c.l.b16 %v706_v35  ;;  %v1334_v40 = vunpack.c.l.b16 %v638_v61 }
 0x231   : > { %v3286_v11 = vadd.f32 %v3251_v58, %v3250_v27  ;;  %3860 = vst [vmem:[%s4923_s23] sm:$0xff] %v3859_v38   ;;  %v2773_v7 = vadd.f32 %v4875_v37, %v2674_v59  ;;  %v2577_v27 = vadd.f32 %v2576_v51, %v4502_v14  ;;  %v2980_v37 = vld [vmem:[%s5139_s1 + $0xc0] sm:$0xff]  ;;  %v2981_v14 = vld [vmem:[%s5139_s1 + $0xc8] sm:$0xff] }
 0x232   : > { %v4941_v59 = vpack.c.b16 %v1218_v9, %v1217_v44  ;;  %v1333_v2 = vunpack.c.l.b16 %v637_v43  ;;  %3114 = vperm.xlu0 %3998, %v2980_v37   ;;  %v525_v44 = vld [vmem:[%s4064_s30 + $0xd9] sm:$0xff]  ;;  %v526_v9 = vld [vmem:[%s4064_s30 + $0xe1] sm:$0xff] }
 0x233   : > { %v2873_v4 = vpop.f32.mrf.mxu0  ;;  %v2872_v50 = vadd.f32 %v2871_v62, %v2773_v7  ;;  %v3010_v7 = vpop.permute.xlu1 %3009 }
 0x234   : > { %3119 = vperm.xlu1 %3999, %v2981_v14   ;;  %v1357_v43 = vpack.c.b16 %v1334_v40, %v1333_v2  ;;  %v3015_v40 = vpop.permute.xlu2 %3014 }
 0x235   : > { %v3174_v58 = vmul.f32 %v3005_v57, %v2872_v50  ;;  %v1463_v57 = vpack.c.b16 %v1438_v17, %v1437_v45  ;;  %v672_v45 = vld [vmem:[%s4064_s30 + $0xe3] sm:$0xff] }
 0x236   : > { %v2675_v38 = vpop.f32.mrf.mxu2 }
 0x237   : > { %v3209_v28 = vadd.f32 %v3208_v36, %v3174_v58  ;;  %v3252_v16 = vmul.f32 %v3174_v58, %v2872_v50  ;;  %v2676_v62 = vadd.f32 %v2675_v38, %v2577_v27  ;;  %v562_v27 = vpack.c.bf16 %v526_v9, %v526_v9 }
 0x238   : > { %v2579_v51 = vpop.f32.mrf.mxu1  ;;  %v4947_v36 = vpop.f32.mrf.mxu3 }
 0x239   : > { %v3287_v8 = vadd.f32 %v3286_v11, %v3252_v16  ;;  %v2775_v35 = vadd.f32 %v4884_v56, %v2676_v62  ;;  %v2580_v50 = vadd.f32 %v2579_v51, %v4514_v26  ;;  %v671_v11 = vld [vmem:[%s4064_s30 + $0xdb] sm:$0xff]  ;;  %v708_v51 = vpack.c.bf16 %v672_v45, %v672_v45 }
 0x23a   : > { %v2983_v56 = vld [vmem:[%s5139_s1 + $0xd8] sm:$0xff]  ;;  %v2984_v26 = vld [vmem:[%s5139_s1 + $0xe0] sm:$0xff]  ;;  %v707_v14 = vpack.c.bf16 %v671_v11, %v671_v11 }
 0x23b   : > { %v2876_v42 = vpop.f32.mrf.mxu0  ;;  %2618 = vmatmul.bf16.gmra.mxu1 %v4902_v12  ;;  %2717 = vmatmul.bf16.gmra.mxu2 %v4941_v59  ;;  %v2874_v63 = vadd.f32 %v2873_v4, %v2775_v35  ;;  %v561_v12 = vpack.c.bf16 %v525_v44, %v525_v44  ;;  %v603_v16 = vld [vmem:[%s4064_s30 + $0xfa] sm:$0xff]  ;;  %v1220_v44 = vunpack.c.l.b16 %v562_v27  ;;  %v1440_v45 = vunpack.c.l.b16 %v708_v51 }
 0x23c   : > { %3129 = vperm.xlu0 %3998, %v2983_v56   ;;  %3134 = vperm.xlu1 %3999, %v2984_v26   ;;  %v1439_v11 = vunpack.c.l.b16 %v707_v14  ;;  %v3020_v51 = vpop.permute.xlu2 %3019 }
 0x23d   : > { %v3175_v61 = vmul.f32 %v3010_v7, %v2874_v63  ;;  %2826 = vmatmul.bf16.gmra.mxu3 %v1357_v43  ;;  %v639_v43 = vpack.c.bf16 %v603_v16, %v603_v16 }
 0x23e   : > { %2915 = vmatmul.bf16.gmra.mxu0 %v1463_v57  ;;  %v2678_v17 = vpop.f32.mrf.mxu2  ;;  %v604_v57 = vld [vmem:[%s4064_s30 + $0x102] sm:$0xff]  ;;  %v1464_v16 = vpack.c.b16 %v1440_v45, %v1439_v11 }
 0x23f   : > { %v3210_v4 = vadd.f32 %v3209_v28, %v3175_v61  ;;  %v3253_v37 = vmul.f32 %v3175_v61, %v2874_v63  ;;  %v3864_v38 = vpack.c.bf16 %v3175_v61, %v3174_v58  ;;  %v2679_v2 = vadd.f32 %v2678_v17, %v2580_v50  ;;  %v2976_v58 = vld [vmem:[%s5139_s1 + $0xa0] sm:$0xff] }
 0x240   : > { %v2581_v62 = vpop.f32.mrf.mxu1  ;;  %v1219_v63 = vunpack.c.l.b16 %v561_v12  ;;  %v4969_v9 = vpop.f32.mrf.mxu3  ;;  %3094 = vperm.xlu2 %4000, %v2976_v58   ;;  %v640_v61 = vpack.c.bf16 %v604_v57, %v604_v57  ;;  %v1335_v12 = vunpack.c.l.b16 %v639_v43  ;;  %v527_v58 = vld [vmem:[%s4064_s30 + $0xe9] sm:$0xff] }
 0x241   : > { %v3288_v35 = vadd.f32 %v3287_v8, %v3253_v37  ;;  %3946 = vst [vmem:[%s4923_s23 + $0x8] sm:$0xff] %v3864_v38   ;;  %v2778_v7 = vadd.f32 %v4899_v22, %v2679_v2  ;;  %v2582_v8 = vadd.f32 %v2581_v62, %v4524_v54  ;;  %v2986_v22 = vld [vmem:[%s5139_s1 + $0xf0] sm:$0xff]  ;;  %v2987_v54 = vld [vmem:[%s5139_s1 + $0xf8] sm:$0xff] }
 0x242   : > { %v4975_v37 = vpack.c.b16 %v1220_v44, %v1219_v63  ;;  %v673_v43 = vld [vmem:[%s4064_s30 + $0xeb] sm:$0xff] }
 0x243   : > { %v2878_v28 = vpop.f32.mrf.mxu0  ;;  %v2877_v50 = vadd.f32 %v2876_v42, %v2778_v7  ;;  %v1336_v42 = vunpack.c.l.b16 %v640_v61  ;;  %v2989_v61 = vld [vmem:[%s5139_s1 + $0x108] sm:$0xff] }
 0x244   : > { %3144 = vperm.xlu0 %3998, %v2986_v22   ;;  %3149 = vperm.xlu1 %3999, %v2987_v54   ;;  %v606_v54 = vld [vmem:[%s4064_s30 + $0x112] sm:$0xff] }
 0x245   : > { %v3176_v56 = vmul.f32 %v3015_v40, %v2877_v50  ;;  %v1358_v63 = vpack.c.b16 %v1336_v42, %v1335_v12  ;;  %v605_v12 = vld [vmem:[%s4064_s30 + $0x10a] sm:$0xff] }
 0x246   : > { %v2680_v17 = vpop.f32.mrf.mxu2 }
 0x247   : > { %v3211_v27 = vadd.f32 %v3210_v4, %v3176_v56  ;;  %v3254_v38 = vmul.f32 %v3176_v56, %v2877_v50  ;;  %v2681_v2 = vadd.f32 %v2680_v17, %v2582_v8  ;;  %v2979_v4 = vld [vmem:[%s5139_s1 + $0xb8] sm:$0xff] }
 0x248   : > { %v2584_v26 = vpop.f32.mrf.mxu1  ;;  %v4984_v57 = vpop.f32.mrf.mxu3  ;;  %3109 = vperm.xlu2 %4000, %v2979_v4   ;;  %v674_v50 = vld [vmem:[%s4064_s30 + $0xf3] sm:$0xff] }
 0x249   : > { %v3289_v62 = vadd.f32 %v3288_v35, %v3254_v38  ;;  %v2780_v40 = vadd.f32 %v4909_v1, %v2681_v2  ;;  %v528_v35 = vld [vmem:[%s4064_s30 + $0xf1] sm:$0xff]  ;;  %v2585_v1 = vadd.f32 %v2584_v26, %v4542_v32  ;;  %v709_v2 = vpack.c.bf16 %v673_v43, %v673_v43 }
 0x24a   : > { %v564_v45 = vpack.c.bf16 %v528_v35, %v528_v35  ;;  %v2990_v32 = vld [vmem:[%s5139_s1 + $0x110] sm:$0xff]  ;;  %v710_v42 = vpack.c.bf16 %v674_v50, %v674_v50 }
 0x24b   : > { %v2881_v14 = vpop.f32.mrf.mxu0  ;;  %2623 = vmatmul.bf16.gmra.mxu1 %v4941_v59  ;;  %2722 = vmatmul.bf16.gmra.mxu2 %v4975_v37  ;;  %v2879_v7 = vadd.f32 %v2878_v28, %v2780_v40  ;;  %v563_v59 = vpack.c.bf16 %v527_v58, %v527_v58  ;;  %v641_v58 = vpack.c.bf16 %v605_v12, %v605_v12 }
 0x24c   : > { %3159 = vperm.xlu0 %3998, %v2989_v61   ;;  %3164 = vperm.xlu1 %3999, %v2990_v32  }
 0x24d   : > { %v3177_v44 = vmul.f32 %v3020_v51, %v2879_v7  ;;  %2831 = vmatmul.bf16.gmra.mxu3 %v1358_v63  ;;  %v1221_v4 = vunpack.c.l.b16 %v563_v59  ;;  %v1222_v51 = vunpack.c.l.b16 %v564_v45  ;;  %v642_v63 = vpack.c.bf16 %v606_v54, %v606_v54  ;;  %v530_v54 = vld [vmem:[%s4064_s30 + $0x101] sm:$0xff] }
 0x24e   : > { %2920 = vmatmul.bf16.gmra.mxu0 %v1464_v16  ;;  %v2683_v11 = vpop.f32.mrf.mxu2  ;;  %v1337_v61 = vunpack.c.l.b16 %v641_v58  ;;  %v566_v58 = vpack.c.bf16 %v530_v54, %v530_v54 }
 0x24f   : > { %v3212_v28 = vadd.f32 %v3211_v27, %v3177_v44  ;;  %v3255_v8 = vmul.f32 %v3177_v44, %v2879_v7  ;;  %v3869_v22 = vpack.c.bf16 %v3177_v44, %v3176_v56  ;;  %v2684_v17 = vadd.f32 %v2683_v11, %v2585_v1  ;;  %v2982_v56 = vld [vmem:[%s5139_s1 + $0xd0] sm:$0xff]  ;;  %v3025_v27 = vpop.permute.xlu0 %3024 }
 0x250   : > { %v2586_v38 = vpop.f32.mrf.mxu1  ;;  %v5006_v7 = vpop.f32.mrf.mxu3  ;;  %3124 = vperm.xlu2 %4000, %v2982_v56   ;;  %v1441_v1 = vunpack.c.l.b16 %v709_v2  ;;  %v1442_v44 = vunpack.c.l.b16 %v710_v42  ;;  %v5009_v50 = vpack.c.b16 %v1222_v51, %v1221_v4  ;;  %v1338_v45 = vunpack.c.l.b16 %v642_v63  ;;  %v529_v42 = vld [vmem:[%s4064_s30 + $0xf9] sm:$0xff] }
 0x251   : > { %v3290_v26 = vadd.f32 %v3289_v62, %v3255_v8  ;;  %3947 = vst [vmem:[%s4923_s23 + $0x10] sm:$0xff] %v3869_v22   ;;  %v2783_v16 = vadd.f32 %v4935_v24, %v2684_v17  ;;  %v2587_v62 = vadd.f32 %v2586_v38, %v4555_v13  ;;  %v2985_v13 = vld [vmem:[%s5139_s1 + $0xe8] sm:$0xff]  ;;  %v3030_v38 = vpop.permute.xlu1 %3029  ;;  %v675_v56 = vld [vmem:[%s4064_s30 + $0xfb] sm:$0xff]  ;;  %v565_v51 = vpack.c.bf16 %v529_v42, %v529_v42 }
 0x252   : > { %v1465_v17 = vpack.c.b16 %v1442_v44, %v1441_v1 }
 0x253   : > { %v2883_v40 = vpop.f32.mrf.mxu0  ;;  %v2882_v35 = vadd.f32 %v2881_v14, %v2783_v16 }
 0x255   : > { %v3178_v43 = vmul.f32 %v3025_v27, %v2882_v35  ;;  %v676_v27 = vld [vmem:[%s4064_s30 + $0x103] sm:$0xff] }
 0x256   : > { %v2685_v24 = vpop.f32.mrf.mxu2 }
 0x257   : > { %v3213_v11 = vadd.f32 %v3212_v28, %v3178_v43  ;;  %v3256_v8 = vmul.f32 %v3178_v43, %v2882_v35  ;;  %v2686_v59 = vadd.f32 %v2685_v24, %v2587_v62  ;;  %v711_v62 = vpack.c.bf16 %v675_v56, %v675_v56 }
 0x258   : > { %v2589_v22 = vpop.f32.mrf.mxu1  ;;  %v5015_v2 = vpop.f32.mrf.mxu3  ;;  %3139 = vperm.xlu2 %4000, %v2985_v13   ;;  %v712_v24 = vpack.c.bf16 %v676_v27, %v676_v27 }
 0x259   : > { %v3291_v32 = vadd.f32 %v3290_v26, %v3256_v8  ;;  %v2785_v14 = vadd.f32 %v4947_v36, %v2686_v59  ;;  %v1359_v26 = vpack.c.b16 %v1338_v45, %v1337_v61  ;;  %v2590_v36 = vadd.f32 %v2589_v22, %v4570_v5  ;;  %v608_v61 = vld [vmem:[%s4064_s30 + $0x122] sm:$0xff]  ;;  %v3035_v22 = vpop.permute.xlu2 %3034 }
 0x25a   : > { %v2988_v45 = vld [vmem:[%s5139_s1 + $0x100] sm:$0xff]  ;;  %v1444_v42 = vunpack.c.l.b16 %v712_v24 }
 0x25b   : > { %v2886_v12 = vpop.f32.mrf.mxu0  ;;  %2628 = vmatmul.bf16.gmra.mxu1 %v4975_v37  ;;  %2727 = vmatmul.bf16.gmra.mxu2 %v5009_v50  ;;  %v2884_v28 = vadd.f32 %v2883_v40, %v2785_v14  ;;  %v607_v40 = vld [vmem:[%s4064_s30 + $0x11a] sm:$0xff] }
 0x25c   : > { %v643_v14 = vpack.c.bf16 %v607_v40, %v607_v40 }
 0x25d   : > { %v3179_v16 = vmul.f32 %v3030_v38, %v2884_v28  ;;  %2836 = vmatmul.bf16.gmra.mxu3 %v1359_v26  ;;  %v644_v38 = vpack.c.bf16 %v608_v61, %v608_v61 }
 0x25e   : > { %2925 = vmatmul.bf16.gmra.mxu0 %v1465_v17  ;;  %v2688_v4 = vpop.f32.mrf.mxu2  ;;  %v1224_v17 = vunpack.c.l.b16 %v566_v58 }
 0x25f   : > { %v3214_v35 = vadd.f32 %v3213_v11, %v3179_v16  ;;  %v3257_v37 = vmul.f32 %v3179_v16, %v2884_v28  ;;  %v3874_v63 = vpack.c.bf16 %v3179_v16, %v3178_v43  ;;  %v2689_v1 = vadd.f32 %v2688_v4, %v2590_v36 }
 0x260   : > { %v2591_v44 = vpop.f32.mrf.mxu1  ;;  %v1223_v11 = vunpack.c.l.b16 %v565_v51  ;;  %v5031_v43 = vpop.f32.mrf.mxu3  ;;  %3154 = vperm.xlu2 %4000, %v2988_v45   ;;  %v1443_v28 = vunpack.c.l.b16 %v711_v62  ;;  %v1339_v36 = vunpack.c.l.b16 %v643_v14  ;;  %v1340_v4 = vunpack.c.l.b16 %v644_v38  ;;  %v532_v62 = vld [vmem:[%s4064_s30 + $0x111] sm:$0xff] }
 0x261   : > { %v3292_v8 = vadd.f32 %v3291_v32, %v3257_v37  ;;  %3948 = vst [vmem:[%s4923_s23 + $0x18] sm:$0xff] %v3874_v63   ;;  %v2788_v5 = vadd.f32 %v4969_v9, %v2689_v1  ;;  %v2592_v32 = vadd.f32 %v2591_v44, %v4580_v46  ;;  %v2991_v46 = vld [vmem:[%s5139_s1 + $0x118] sm:$0xff]  ;;  %v3040_v1 = vpop.permute.xlu0 %3039  ;;  %v531_v44 = vld [vmem:[%s4064_s30 + $0x109] sm:$0xff] }
 0x262   : > { %v5034_v26 = vpack.c.b16 %v1224_v17, %v1223_v11  ;;  %v1466_v58 = vpack.c.b16 %v1444_v42, %v1443_v28  ;;  %v1360_v24 = vpack.c.b16 %v1340_v4, %v1339_v36  ;;  %v568_v11 = vpack.c.bf16 %v532_v62, %v532_v62 }
 0x263   : > { %v2888_v59 = vpop.f32.mrf.mxu0  ;;  %v2887_v13 = vadd.f32 %v2886_v12, %v2788_v5  ;;  %v678_v5 = vld [vmem:[%s4064_s30 + $0x113] sm:$0xff] }
 0x264   : > { %v714_v42 = vpack.c.bf16 %v678_v5, %v678_v5  ;;  %v1226_v4 = vunpack.c.l.b16 %v568_v11 }
 0x265   : > { %v3180_v54 = vmul.f32 %v3035_v22, %v2887_v13  ;;  %v567_v22 = vpack.c.bf16 %v531_v44, %v531_v44 }
 0x266   : > { %v2690_v9 = vpop.f32.mrf.mxu2 }
 0x267   : > { %v3215_v16 = vadd.f32 %v3214_v35, %v3180_v54  ;;  %v3258_v56 = vmul.f32 %v3180_v54, %v2887_v13  ;;  %v2691_v27 = vadd.f32 %v2690_v9, %v2592_v32  ;;  %v610_v32 = vld [vmem:[%s4064_s30 + $0x132] sm:$0xff] }
 0x268   : > { %v2594_v51 = vpop.f32.mrf.mxu1  ;;  %v5040_v40 = vpop.f32.mrf.mxu3  ;;  %3169 = vperm.xlu2 %4000, %v2991_v46   ;;  %v1446_v46 = vunpack.c.l.b16 %v714_v42 }
 0x269   : > { %v3293_v37 = vadd.f32 %v3292_v8, %v3258_v56  ;;  %v2790_v12 = vadd.f32 %v4984_v57, %v2691_v27  ;;  %v2595_v57 = vadd.f32 %v2594_v51, %v4592_v18  ;;  %v677_v8 = vld [vmem:[%s4064_s30 + $0x10b] sm:$0xff]  ;;  %v3045_v56 = vpop.permute.xlu1 %3044  ;;  %v1225_v27 = vunpack.c.l.b16 %v567_v22 }
 0x26a   : > { %v713_v28 = vpack.c.bf16 %v677_v8, %v677_v8 }
 0x26b   : > { %v2891_v63 = vpop.f32.mrf.mxu0  ;;  %2633 = vmatmul.bf16.gmra.mxu1 %v5009_v50  ;;  %2732 = vmatmul.bf16.gmra.mxu2 %v5034_v26  ;;  %v2889_v35 = vadd.f32 %v2888_v59, %v2790_v12  ;;  %v609_v59 = vld [vmem:[%s4064_s30 + $0x12a] sm:$0xff]  ;;  %v5056_v62 = vpack.c.b16 %v1226_v4, %v1225_v27 }
 0x26c   : > { %v1445_v12 = vunpack.c.l.b16 %v713_v28  ;;  %v679_v28 = vld [vmem:[%s4064_s30 + $0x11b] sm:$0xff] }
 0x26d   : > { %v3181_v61 = vmul.f32 %v3040_v1, %v2889_v35  ;;  %2841 = vmatmul.bf16.gmra.mxu3 %v1360_v24 }
 0x26e   : > { %2930 = vmatmul.bf16.gmra.mxu0 %v1466_v58  ;;  %v2693_v45 = vpop.f32.mrf.mxu2  ;;  %v1467_v5 = vpack.c.b16 %v1446_v46, %v1445_v12 }
 0x26f   : > { %v3216_v17 = vadd.f32 %v3215_v16, %v3181_v61  ;;  %v3259_v50 = vmul.f32 %v3181_v61, %v2889_v35  ;;  %v3879_v14 = vpack.c.bf16 %v3181_v61, %v3180_v54  ;;  %v2694_v13 = vadd.f32 %v2693_v45, %v2595_v57 }
 0x270   : > { %v2596_v38 = vpop.f32.mrf.mxu1  ;;  %v5053_v51 = vpop.f32.mrf.mxu3  ;;  %v645_v16 = vpack.c.bf16 %v609_v59, %v609_v59  ;;  %v646_v54 = vpack.c.bf16 %v610_v32, %v610_v32 }
 0x271   : > { %v3294_v9 = vadd.f32 %v3293_v37, %v3259_v50  ;;  %3949 = vst [vmem:[%s4923_s23 + $0x20] sm:$0xff] %v3879_v14   ;;  %v2793_v18 = vadd.f32 %v5006_v7, %v2694_v13  ;;  %v2597_v1 = vadd.f32 %v2596_v38, %v4611_v29  ;;  %v3050_v29 = vpop.permute.xlu2 %3049  ;;  %v534_v14 = vld [vmem:[%s4064_s30 + $0x121] sm:$0xff] }
 0x272   : > { %v1341_v37 = vunpack.c.l.b16 %v645_v16  ;;  %v1342_v61 = vunpack.c.l.b16 %v646_v54  ;;  %v715_v16 = vpack.c.bf16 %v679_v28, %v679_v28  ;;  %v612_v54 = vld [vmem:[%s4064_s30 + $0x142] sm:$0xff] }
 0x273   : > { %v2893_v36 = vpop.f32.mrf.mxu0  ;;  %v2892_v58 = vadd.f32 %v2891_v63, %v2793_v18 }
 0x274   : > { %v1361_v13 = vpack.c.b16 %v1342_v61, %v1341_v37  ;;  %v1447_v61 = vunpack.c.l.b16 %v715_v16 }
 0x275   : > { %v3182_v35 = vmul.f32 %v3045_v56, %v2892_v58 }
 0x276   : > { %v2695_v44 = vpop.f32.mrf.mxu2 }
 0x277   : > { %v3217_v7 = vadd.f32 %v3216_v17, %v3182_v35  ;;  %v3260_v24 = vmul.f32 %v3182_v35, %v2892_v58  ;;  %v2696_v57 = vadd.f32 %v2695_v44, %v2597_v1  ;;  %v533_v17 = vld [vmem:[%s4064_s30 + $0x119] sm:$0xff]  ;;  %v3055_v1 = vpop.permute.xlu0 %3054 }
 0x278   : > { %v2599_v8 = vpop.f32.mrf.mxu1  ;;  %v5059_v11 = vpop.f32.mrf.mxu3  ;;  %v569_v32 = vpack.c.bf16 %v533_v17, %v533_v17 }
 0x279   : > { %v3295_v63 = vadd.f32 %v3294_v9, %v3260_v24  ;;  %v2795_v45 = vadd.f32 %v5015_v2, %v2696_v57  ;;  %v2600_v59 = vadd.f32 %v2599_v8, %v4626_v21  ;;  %v680_v2 = vld [vmem:[%s4064_s30 + $0x123] sm:$0xff]  ;;  %v570_v9 = vpack.c.bf16 %v534_v14, %v534_v14 }
 0x27a   : > { %v716_v58 = vpack.c.bf16 %v680_v2, %v680_v2  ;;  %v1227_v44 = vunpack.c.l.b16 %v569_v32 }
 0x27b   : > { %v2896_v22 = vpop.f32.mrf.mxu0  ;;  %2638 = vmatmul.bf16.gmra.mxu1 %v5034_v26  ;;  %2737 = vmatmul.bf16.gmra.mxu2 %v5056_v62  ;;  %v2894_v50 = vadd.f32 %v2893_v36, %v2795_v45  ;;  %v611_v36 = vld [vmem:[%s4064_s30 + $0x13a] sm:$0xff]  ;;  %v1228_v37 = vunpack.c.l.b16 %v570_v9  ;;  %v535_v9 = vld [vmem:[%s4064_s30 + $0x129] sm:$0xff] }
 0x27c   : > { %v1448_v8 = vunpack.c.l.b16 %v716_v58 }
 0x27d   : > { %v3183_v38 = vmul.f32 %v3050_v29, %v2894_v50  ;;  %2846 = vmatmul.bf16.gmra.mxu3 %v1361_v13 }
 0x27e   : > { %2935 = vmatmul.bf16.gmra.mxu0 %v1467_v5  ;;  %v2698_v42 = vpop.f32.mrf.mxu2 }
 0x27f   : > { %v3218_v18 = vadd.f32 %v3217_v7, %v3183_v38  ;;  %v3261_v26 = vmul.f32 %v3183_v38, %v2894_v50  ;;  %v3884_v56 = vpack.c.bf16 %v3183_v38, %v3182_v35  ;;  %v2699_v27 = vadd.f32 %v2698_v42, %v2600_v59  ;;  %v3060_v42 = vpop.permute.xlu1 %3059 }
 0x280   : > { %v2601_v4 = vpop.f32.mrf.mxu1  ;;  %v5072_v24 = vpop.f32.mrf.mxu3  ;;  %v647_v7 = vpack.c.bf16 %v611_v36, %v611_v36  ;;  %v648_v35 = vpack.c.bf16 %v612_v54, %v612_v54  ;;  %v1247_v50 = vpack.c.b16 %v1228_v37, %v1227_v44  ;;  %v1468_v38 = vpack.c.b16 %v1448_v8, %v1447_v61  ;;  %v681_v36 = vld [vmem:[%s4064_s30 + $0x12b] sm:$0xff] }
 0x281   : > { %v3296_v12 = vadd.f32 %v3295_v63, %v3261_v26  ;;  %3950 = vst [vmem:[%s4923_s23 + $0x28] sm:$0xff] %v3884_v56   ;;  %v2798_v21 = vadd.f32 %v5031_v43, %v2699_v27  ;;  %v2602_v5 = vadd.f32 %v2601_v4, %v4634_v31  ;;  %v682_v4 = vld [vmem:[%s4064_s30 + $0x133] sm:$0xff] }
 0x282   : > { %v1343_v63 = vunpack.c.l.b16 %v647_v7  ;;  %v1344_v13 = vunpack.c.l.b16 %v648_v35  ;;  %v718_v44 = vpack.c.bf16 %v682_v4, %v682_v4  ;;  %v684_v4 = vld [vmem:[%s4064_s30 + $0x143] sm:$0xff] }
 0x283   : > { %v2898_v46 = vpop.f32.mrf.mxu0  ;;  %v2897_v57 = vadd.f32 %v2896_v22, %v2798_v21 }
 0x284   : > { %v1362_v26 = vpack.c.b16 %v1344_v13, %v1343_v63  ;;  %v1450_v63 = vunpack.c.l.b16 %v718_v44 }
 0x285   : > { %v3184_v45 = vmul.f32 %v3055_v1, %v2897_v57 }
 0x286   : > { %v2700_v29 = vpop.f32.mrf.mxu2 }
 0x287   : > { %v3219_v43 = vadd.f32 %v3218_v18, %v3184_v45  ;;  %v3262_v17 = vmul.f32 %v3184_v45, %v2897_v57  ;;  %v2701_v14 = vadd.f32 %v2700_v29, %v2602_v5  ;;  %v536_v18 = vld [vmem:[%s4064_s30 + $0x131] sm:$0xff]  ;;  %v3065_v57 = vpop.permute.xlu2 %3064 }
 0x288   : > { %v2604_v59 = vpop.f32.mrf.mxu1  ;;  %v5076_v31 = vpop.f32.mrf.mxu3  ;;  %v572_v58 = vpack.c.bf16 %v536_v18, %v536_v18  ;;  %v573_v18 = vld [vmem:[%s4064_s30 + $0x139] sm:$0xff] }
 0x289   : > { %v3297_v22 = vadd.f32 %v3296_v12, %v3262_v17  ;;  %v2800_v28 = vadd.f32 %v5040_v40, %v2701_v14  ;;  %v2605_v56 = vadd.f32 %v2604_v59, %v4645_v60  ;;  %v571_v40 = vpack.c.bf16 %v535_v9, %v535_v9 }
 0x28a   : > { %v1230_v5 = vunpack.c.l.b16 %v572_v58 }
 0x28b   : > { %v2901_v2 = vpop.f32.mrf.mxu0  ;;  %2643 = vmatmul.bf16.gmra.mxu1 %v5056_v62  ;;  %2742 = vmatmul.bf16.gmra.mxu2 %v1247_v50  ;;  %v2899_v32 = vadd.f32 %v2898_v46, %v2800_v28  ;;  %v717_v46 = vpack.c.bf16 %v681_v36, %v681_v36  ;;  %v1229_v8 = vunpack.c.l.b16 %v571_v40  ;;  %v683_v36 = vld [vmem:[%s4064_s30 + $0x13b] sm:$0xff]  ;;  %v575_v40 = vpack.c.bf16 %v573_v18, %v573_v18 }
 0x28d   : > { %v3185_v27 = vmul.f32 %v3060_v42, %v2899_v32  ;;  %2851 = vmatmul.bf16.gmra.mxu3 %v1362_v26  ;;  %v1449_v29 = vunpack.c.l.b16 %v717_v46  ;;  %v574_v26 = vld [vmem:[%s4064_s30 + $0x141] sm:$0xff]  ;;  %s3493_s30 = sshll.u32 %s5152_s16, 1 }
 0x28e   : > { %2940 = vmatmul.bf16.gmra.mxu0 %v1468_v38  ;;  %v2703_v16 = vpop.f32.mrf.mxu2  ;;  %v1248_v38 = vpack.c.b16 %v1230_v5, %v1229_v8  ;;  %v576_v58 = vpack.c.bf16 %v574_v26, %v574_v26  ;;  %s208_s11 = scalar_lea.vmem %s5142_s4, %s3493_s30 }
 0x28f   : > { %v3220_v54 = vadd.f32 %v3219_v43, %v3185_v27  ;;  %v3263_v12 = vmul.f32 %v3185_v27, %v2899_v32  ;;  %v3889_v21 = vpack.c.bf16 %v3185_v27, %v3184_v45  ;;  %v2704_v1 = vadd.f32 %v2703_v16, %v2605_v56  ;;  %v3070_v32 = vpop.permute.xlu0 %3069 }
 0x290   : > { %v2606_v62 = vpop.f32.mrf.mxu1  ;;  %v5086_v35 = vpop.f32.mrf.mxu3 }
 0x291   : > { %v3298_v37 = vadd.f32 %v3297_v22, %v3263_v12  ;;  %3951 = vst [vmem:[%s4923_s23 + $0x30] sm:$0xff] %v3889_v21   ;;  %v2803_v7 = vadd.f32 %v5053_v51, %v2704_v1  ;;  %v2607_v45 = vadd.f32 %v2606_v62, %v4653_v23  ;;  %v1469_v22 = vpack.c.b16 %v1450_v63, %v1449_v29 }
 0x292   : > { %v720_v62 = vpack.c.bf16 %v684_v4, %v684_v4 }
 0x293   : > { %v2903_v60 = vpop.f32.mrf.mxu0  ;;  %v2902_v61 = vadd.f32 %v2901_v2, %v2803_v7  ;;  %v3075_v7 = vpop.permute.xlu1 %3074 }
 0x294   : > { %v1452_v5 = vunpack.c.l.b16 %v720_v62 }
 0x295   : > { %v3186_v43 = vmul.f32 %v3065_v57, %v2902_v61  ;;  %v1269_v57 = vunpack.c.l.b16 %v575_v40 }
 0x296   : > { %v2705_v17 = vpop.f32.mrf.mxu2 }
 0x297   : > { %v3221_v14 = vadd.f32 %v3220_v54, %v3186_v43  ;;  %v3264_v13 = vmul.f32 %v3186_v43, %v2902_v61  ;;  %v2706_v59 = vadd.f32 %v2705_v17, %v2607_v45  ;;  %v1270_v61 = vunpack.c.l.b16 %v576_v58  ;;  %v3085_v58 = vpop.permute.xlu0 %3084 }
 0x298   : > { %v2609_v51 = vpop.f32.mrf.mxu1  ;;  %v5090_v9 = vpop.f32.mrf.mxu3 }
 0x299   : > { %v3299_v28 = vadd.f32 %v3298_v37, %v3264_v13  ;;  %v2805_v2 = vadd.f32 %v5059_v11, %v2706_v59  ;;  %v2610_v56 = vadd.f32 %v2609_v51, %v4664_v39  ;;  %v1271_v13 = vpack.c.b16 %v1270_v61, %v1269_v57 }
 0x29b   : > { %v2906_v42 = vpop.f32.mrf.mxu0  ;;  %2648 = vmatmul.bf16.gmra.mxu1 %v1247_v50  ;;  %2747 = vmatmul.bf16.gmra.mxu2 %v1248_v38  ;;  %v2904_v23 = vadd.f32 %v2903_v60, %v2805_v2  ;;  %v719_v50 = vpack.c.bf16 %v683_v36, %v683_v36  ;;  %v3080_v2 = vpop.permute.xlu2 %3079 }
 0x29d   : > { %v3187_v27 = vmul.f32 %v3070_v32, %v2904_v23  ;;  %v1451_v8 = vunpack.c.l.b16 %v719_v50 }
 0x29e   : > { %2945 = vmatmul.bf16.gmra.mxu0 %v1469_v22  ;;  %v2708_v16 = vpop.f32.mrf.mxu2 }
 0x29f   : > { %v3222_v11 = vadd.f32 %v3221_v14, %v3187_v27  ;;  %v3265_v54 = vmul.f32 %v3187_v27, %v2904_v23  ;;  %v3894_v12 = vpack.c.bf16 %v3187_v27, %v3186_v43  ;;  %v2709_v21 = vadd.f32 %v2708_v16, %v2610_v56 }
 0x2a0   : > { %v2611_v1 = vpop.f32.mrf.mxu1  ;;  %v2817_v39 = vpop.f32.mrf.mxu3  ;;  %v1470_v51 = vpack.c.b16 %v1452_v5, %v1451_v8 }
 0x2a1   : > { %v3300_v46 = vadd.f32 %v3299_v28, %v3265_v54  ;;  %3952 = vst [vmem:[%s4923_s23 + $0x38] sm:$0xff] %v3894_v12   ;;  %v2808_v44 = vadd.f32 %v5072_v24, %v2709_v21  ;;  %v2612_v29 = vadd.f32 %v2611_v1, %v4674_v48 }
 0x2a3   : > { %v2908_v37 = vpop.f32.mrf.mxu0  ;;  %v2907_v60 = vadd.f32 %v2906_v42, %v2808_v44 }
 0x2a5   : > { %v3188_v63 = vmul.f32 %v3075_v7, %v2907_v60 }
 0x2a6   : > { %v2710_v45 = vpop.f32.mrf.mxu2 }
 0x2a7   : > { %v3223_v43 = vadd.f32 %v3222_v11, %v3188_v63  ;;  %v3266_v17 = vmul.f32 %v3188_v63, %v2907_v60  ;;  %v2711_v14 = vadd.f32 %v2710_v45, %v2612_v29  ;;  %v3090_v60 = vpop.permute.xlu1 %3089 }
 0x2a8   : > { %v2614_v59 = vpop.f32.mrf.mxu1  ;;  %v2819_v32 = vpop.f32.mrf.mxu3 }
 0x2a9   : > { %v3301_v22 = vadd.f32 %v3300_v46, %v3266_v17  ;;  %v2810_v24 = vadd.f32 %v5076_v31, %v2711_v14  ;;  %v2615_v48 = vadd.f32 %v2614_v59, %v4688_v20  ;;  %v3095_v59 = vpop.permute.xlu2 %3094 }
 0x2ab   : > { %v2911_v28 = vpop.f32.mrf.mxu0  ;;  %2653 = vmatmul.bf16.gmra.mxu1 %v1248_v38  ;;  %2752 = vmatmul.bf16.gmra.mxu2 %v1271_v13  ;;  %v2909_v42 = vadd.f32 %v2908_v37, %v2810_v24 }
 0x2ad   : > { %v3189_v23 = vmul.f32 %v3080_v2, %v2909_v42 }
 0x2ae   : > { %2950 = vmatmul.bf16.gmra.mxu0 %v1470_v51  ;;  %v2713_v18 = vpop.f32.mrf.mxu2 }
 0x2af   : > { %v3224_v26 = vadd.f32 %v3223_v43, %v3189_v23  ;;  %v3267_v56 = vmul.f32 %v3189_v23, %v2909_v42  ;;  %v3899_v27 = vpack.c.bf16 %v3189_v23, %v3188_v63  ;;  %v2714_v36 = vadd.f32 %v2713_v18, %v2615_v48 }
 0x2b0   : > { %v2616_v4 = vpop.f32.mrf.mxu1  ;;  %v2822_v21 = vpop.f32.mrf.mxu3 }
 0x2b1   : > { %v3302_v16 = vadd.f32 %v3301_v22, %v3267_v56  ;;  %3953 = vst [vmem:[%s4923_s23 + $0x40] sm:$0xff] %v3899_v27   ;;  %v2813_v31 = vadd.f32 %v5086_v35, %v2714_v36  ;;  %v2617_v11 = vadd.f32 %v2616_v4, %v4698_v52  ;;  %v3100_v56 = vpop.permute.xlu0 %3099 }
 0x2b3   : > { %v2913_v40 = vpop.f32.mrf.mxu0  ;;  %v2912_v38 = vadd.f32 %v2911_v28, %v2813_v31 }
 0x2b5   : > { %v3190_v54 = vmul.f32 %v3085_v58, %v2912_v38 }
 0x2b6   : > { %v2715_v12 = vpop.f32.mrf.mxu2 }
 0x2b7   : > { %v3225_v20 = vadd.f32 %v3224_v26, %v3190_v54  ;;  %v3268_v1 = vmul.f32 %v3190_v54, %v2912_v38  ;;  %v2716_v50 = vadd.f32 %v2715_v12, %v2617_v11  ;;  %v3105_v12 = vpop.permute.xlu1 %3104 }
 0x2b8   : > { %v2619_v62 = vpop.f32.mrf.mxu1  ;;  %v2824_v45 = vpop.f32.mrf.mxu3 }
 0x2b9   : > { %v3303_v46 = vadd.f32 %v3302_v16, %v3268_v1  ;;  %v2815_v44 = vadd.f32 %v5090_v9, %v2716_v50  ;;  %v2620_v35 = vadd.f32 %v2619_v62, %v4712_v33 }
 0x2bb   : > { %v2916_v37 = vpop.f32.mrf.mxu0  ;;  %v2914_v7 = vadd.f32 %v2913_v40, %v2815_v44 }
 0x2bd   : > { %v3191_v57 = vmul.f32 %v3090_v60, %v2914_v7 }
 0x2be   : > { %v2718_v61 = vpop.f32.mrf.mxu2 }
 0x2bf   : > { %v3226_v8 = vadd.f32 %v3225_v20, %v3191_v57  ;;  %v3269_v52 = vmul.f32 %v3191_v57, %v2914_v7  ;;  %v3904_v5 = vpack.c.bf16 %v3191_v57, %v3190_v54  ;;  %v2719_v29 = vadd.f32 %v2718_v61, %v2620_v35  ;;  %v3110_v57 = vpop.permute.xlu2 %3109 }
 0x2c0   : > { %v2621_v63 = vpop.f32.mrf.mxu1  ;;  %v2827_v18 = vpop.f32.mrf.mxu3 }
 0x2c1   : > { %v3304_v43 = vadd.f32 %v3303_v46, %v3269_v52  ;;  %3954 = vst [vmem:[%s4923_s23 + $0x48] sm:$0xff] %v3904_v5   ;;  %v2818_v17 = vadd.f32 %v2817_v39, %v2719_v29  ;;  %v2622_v51 = vadd.f32 %v2621_v63, %v4722_v25 }
 0x2c3   : > { %v2918_v14 = vpop.f32.mrf.mxu0  ;;  %v2917_v13 = vadd.f32 %v2916_v37, %v2818_v17 }
 0x2c5   : > { %v3192_v9 = vmul.f32 %v3095_v59, %v2917_v13 }
 0x2c6   : > { %v2720_v22 = vpop.f32.mrf.mxu2 }
 0x2c7   : > { %v3227_v24 = vadd.f32 %v3226_v8, %v3192_v9  ;;  %v3270_v33 = vmul.f32 %v3192_v9, %v2917_v13  ;;  %v2721_v28 = vadd.f32 %v2720_v22, %v2622_v51 }
 0x2c8   : > { %v2624_v2 = vpop.f32.mrf.mxu1 }
 0x2c9   : > { %v3305_v42 = vadd.f32 %v3304_v43, %v3270_v33  ;;  %v2820_v48 = vadd.f32 %v2819_v32, %v2721_v28  ;;  %v2625_v39 = vadd.f32 %v2624_v2, %v4733_v47  ;;  %v2829_v32 = vpop.f32.mrf.mxu3 }
 0x2cb   : > { %v2921_v23 = vpop.f32.mrf.mxu0  ;;  %v2919_v26 = vadd.f32 %v2918_v14, %v2820_v48 }
 0x2cd   : > { %v3193_v27 = vmul.f32 %v3100_v56, %v2919_v26  ;;  %v3120_v56 = vpop.permute.xlu1 %3119 }
 0x2ce   : > { %v2723_v36 = vpop.f32.mrf.mxu2 }
 0x2cf   : > { %v3228_v4 = vadd.f32 %v3227_v24, %v3193_v27  ;;  %v3271_v16 = vmul.f32 %v3193_v27, %v2919_v26  ;;  %v3909_v31 = vpack.c.bf16 %v3193_v27, %v3192_v9  ;;  %v2724_v25 = vadd.f32 %v2723_v36, %v2625_v39  ;;  %v3115_v9 = vpop.permute.xlu0 %3114 }
 0x2d0   : > { %v2626_v40 = vpop.f32.mrf.mxu1 }
 0x2d1   : > { %v3306_v58 = vadd.f32 %v3305_v42, %v3271_v16  ;;  %3955 = vst [vmem:[%s4923_s23 + $0x50] sm:$0xff] %v3909_v31   ;;  %v2823_v38 = vadd.f32 %v2822_v21, %v2724_v25  ;;  %v2627_v1 = vadd.f32 %v2626_v40, %v4740_v30  ;;  %v2832_v52 = vpop.f32.mrf.mxu3 }
 0x2d3   : > { %v2923_v11 = vpop.f32.mrf.mxu0  ;;  %v2922_v54 = vadd.f32 %v2921_v23, %v2823_v38 }
 0x2d5   : > { %v3194_v20 = vmul.f32 %v3105_v12, %v2922_v54 }
 0x2d6   : > { %v2725_v50 = vpop.f32.mrf.mxu2 }
 0x2d7   : > { %v3229_v62 = vadd.f32 %v3228_v4, %v3194_v20  ;;  %v3272_v46 = vmul.f32 %v3194_v20, %v2922_v54  ;;  %v2726_v47 = vadd.f32 %v2725_v50, %v2627_v1  ;;  %v3125_v54 = vpop.permute.xlu2 %3124 }
 0x2d8   : > { %v2629_v44 = vpop.f32.mrf.mxu1 }
 0x2d9   : > { %v3307_v37 = vadd.f32 %v3306_v58, %v3272_v46  ;;  %v2825_v7 = vadd.f32 %v2824_v45, %v2726_v47  ;;  %v2630_v21 = vadd.f32 %v2629_v44, %v4754_v19  ;;  %v2834_v2 = vpop.f32.mrf.mxu3 }
 0x2db   : > { %v2926_v60 = vpop.f32.mrf.mxu0  ;;  %v2924_v35 = vadd.f32 %v2923_v11, %v2825_v7  ;;  %v3130_v7 = vpop.permute.xlu0 %3129 }
 0x2dd   : > { %v3195_v61 = vmul.f32 %v3110_v57, %v2924_v35 }
 0x2de   : > { %v2728_v8 = vpop.f32.mrf.mxu2 }
 0x2df   : > { %v3230_v5 = vadd.f32 %v3229_v62, %v3195_v61  ;;  %v3273_v29 = vmul.f32 %v3195_v61, %v2924_v35  ;;  %v3914_v63 = vpack.c.bf16 %v3195_v61, %v3194_v20  ;;  %v2729_v30 = vadd.f32 %v2728_v8, %v2630_v21 }
 0x2e0   : > { %v2631_v43 = vpop.f32.mrf.mxu1 }
 0x2e1   : > { %v3308_v17 = vadd.f32 %v3307_v37, %v3273_v29  ;;  %3956 = vst [vmem:[%s4923_s23 + $0x58] sm:$0xff] %v3914_v63   ;;  %v2828_v14 = vadd.f32 %v2827_v18, %v2729_v30  ;;  %v2632_v51 = vadd.f32 %v2631_v43, %v4767_v41  ;;  %v2837_v38 = vpop.f32.mrf.mxu3 }
 0x2e3   : > { %v2928_v13 = vpop.f32.mrf.mxu0  ;;  %v2927_v59 = vadd.f32 %v2926_v60, %v2828_v14 }
 0x2e5   : > { %v3196_v45 = vmul.f32 %v3115_v9, %v2927_v59 }
 0x2e6   : > { %v2730_v22 = vpop.f32.mrf.mxu2 }
 0x2e7   : > { %v3231_v24 = vadd.f32 %v3230_v5, %v3196_v45  ;;  %v3274_v33 = vmul.f32 %v3196_v45, %v2927_v59  ;;  %v2731_v19 = vadd.f32 %v2730_v22, %v2632_v51 }
 0x2e8   : > { %v2634_v28 = vpop.f32.mrf.mxu1 }
 0x2e9   : > { %v3309_v42 = vadd.f32 %v3308_v17, %v3274_v33  ;;  %v2830_v48 = vadd.f32 %v2829_v32, %v2731_v19  ;;  %v2635_v18 = vadd.f32 %v2634_v28, %v4781_v55  ;;  %v2839_v60 = vpop.f32.mrf.mxu3  ;;  %v3135_v17 = vpop.permute.xlu1 %3134 }
 0x2eb   : > { %v2931_v23 = vpop.f32.mrf.mxu0  ;;  %v2929_v26 = vadd.f32 %v2928_v13, %v2830_v48 }
 0x2ed   : > { %v3197_v27 = vmul.f32 %v3120_v56, %v2929_v26 }
 0x2ee   : > { %v2733_v39 = vpop.f32.mrf.mxu2 }
 0x2ef   : > { %v3232_v36 = vadd.f32 %v3231_v24, %v3197_v27  ;;  %v3275_v4 = vmul.f32 %v3197_v27, %v2929_v26  ;;  %v3919_v16 = vpack.c.bf16 %v3197_v27, %v3196_v45  ;;  %v2734_v41 = vadd.f32 %v2733_v39, %v2635_v18 }
 0x2f0   : > { %v2636_v31 = vpop.f32.mrf.mxu1 }
 0x2f1   : > { %v3310_v25 = vadd.f32 %v3309_v42, %v3275_v4  ;;  %3957 = vst [vmem:[%s4923_s23 + $0x60] sm:$0xff] %v3919_v16   ;;  %v2833_v40 = vadd.f32 %v2832_v52, %v2734_v41  ;;  %v2637_v32 = vadd.f32 %v2636_v31, %v4791_v6  ;;  %v2842_v9 = vpop.f32.mrf.mxu3  ;;  %v3145_v31 = vpop.permute.xlu0 %3144 }
 0x2f3   : > { %v2933_v58 = vpop.f32.mrf.mxu0  ;;  %v2932_v11 = vadd.f32 %v2931_v23, %v2833_v40 }
 0x2f5   : > { %v3198_v12 = vmul.f32 %v3125_v54, %v2932_v11 }
 0x2f6   : > { %v2735_v20 = vpop.f32.mrf.mxu2 }
 0x2f7   : > { %v3233_v1 = vadd.f32 %v3232_v36, %v3198_v12  ;;  %v3276_v50 = vmul.f32 %v3198_v12, %v2932_v11  ;;  %v2736_v55 = vadd.f32 %v2735_v20, %v2637_v32 }
 0x2f8   : > { %v2639_v62 = vpop.f32.mrf.mxu1 }
 0x2f9   : > { %v3311_v46 = vadd.f32 %v3310_v25, %v3276_v50  ;;  %v2835_v47 = vadd.f32 %v2834_v2, %v2736_v55  ;;  %v2640_v57 = vadd.f32 %v2639_v62, %v4805_v53  ;;  %v3140_v2 = vpop.permute.xlu2 %3139  ;;  %v2844_v39 = vpop.f32.mrf.mxu3 }
 0x2fa   : > { %v3150_v50 = vpop.permute.xlu1 %3149 }
 0x2fb   : > { %v2936_v44 = vpop.f32.mrf.mxu0  ;;  %v2934_v37 = vadd.f32 %v2933_v58, %v2835_v47 }
 0x2fd   : > { %v3199_v35 = vmul.f32 %v3130_v7, %v2934_v37 }
 0x2fe   : > { %v2738_v61 = vpop.f32.mrf.mxu2 }
 0x2ff   : > { %v3234_v21 = vadd.f32 %v3233_v1, %v3199_v35  ;;  %v3277_v8 = vmul.f32 %v3199_v35, %v2934_v37  ;;  %v3924_v52 = vpack.c.bf16 %v3199_v35, %v3198_v12  ;;  %v2739_v6 = vadd.f32 %v2738_v61, %v2640_v57 }
 0x300   : > { %v2641_v5 = vpop.f32.mrf.mxu1 }
 0x301   : > { %v3312_v29 = vadd.f32 %v3311_v46, %v3277_v8  ;;  %3958 = vst [vmem:[%s4923_s23 + $0x68] sm:$0xff] %v3924_v52   ;;  %v2838_v63 = vadd.f32 %v2837_v38, %v2739_v6  ;;  %v2642_v13 = vadd.f32 %v2641_v5, %v4815_v3  ;;  %v2847_v20 = vpop.f32.mrf.mxu3 }
 0x303   : > { %v2938_v30 = vpop.f32.mrf.mxu0  ;;  %v2937_v43 = vadd.f32 %v2936_v44, %v2838_v63 }
 0x305   : > { %v3200_v14 = vmul.f32 %v3135_v17, %v2937_v43 }
 0x306   : > { %v2740_v59 = vpop.f32.mrf.mxu2 }
 0x307   : > { %v3235_v45 = vadd.f32 %v3234_v21, %v3200_v14  ;;  %v3278_v51 = vmul.f32 %v3200_v14, %v2937_v43  ;;  %v2741_v53 = vadd.f32 %v2740_v59, %v2642_v13  ;;  %v3155_v21 = vpop.permute.xlu2 %3154  ;;  %v3160_v59 = vpop.permute.xlu0 %3159 }
 0x308   : > { %v2644_v22 = vpop.f32.mrf.mxu1 }
 0x309   : > { %v3313_v24 = vadd.f32 %v3312_v29, %v3278_v51  ;;  %v2840_v33 = vadd.f32 %v2839_v60, %v2741_v53  ;;  %v2645_v48 = vadd.f32 %v2644_v22, %v4829_v15  ;;  %v2849_v8 = vpop.f32.mrf.mxu3 }
 0x30b   : > { %v2941_v19 = vpop.f32.mrf.mxu0  ;;  %v2939_v28 = vadd.f32 %v2938_v30, %v2840_v33 }
 0x30d   : > { %v3201_v42 = vmul.f32 %v3140_v2, %v2939_v28 }
 0x30e   : > { %v2743_v23 = vpop.f32.mrf.mxu2 }
 0x30f   : > { %v3236_v26 = vadd.f32 %v3235_v45, %v3201_v42  ;;  %v3279_v56 = vmul.f32 %v3201_v42, %v2939_v28  ;;  %v3929_v27 = vpack.c.bf16 %v3201_v42, %v3200_v14  ;;  %v2744_v3 = vadd.f32 %v2743_v23, %v2645_v48  ;;  %v3165_v23 = vpop.permute.xlu1 %3164 }
 0x310   : > { %v2646_v18 = vpop.f32.mrf.mxu1 }
 0x311   : > { %v3314_v36 = vadd.f32 %v3313_v24, %v3279_v56  ;;  %3959 = vst [vmem:[%s4923_s23 + $0x70] sm:$0xff] %v3929_v27   ;;  %v2843_v4 = vadd.f32 %v2842_v9, %v2744_v3  ;;  %v2647_v40 = vadd.f32 %v2646_v18, %v4839_v0  ;;  %v2852_v51 = vpop.f32.mrf.mxu3  ;;  %v5150_v56 = vld [vmem:[#allocation2_spill] sm:$0xff] }
 0x313   : > { %v2943_v16 = vpop.f32.mrf.mxu0  ;;  %v2942_v41 = vadd.f32 %v2941_v19, %v2843_v4 }
 0x315   : > { %v3202_v25 = vmul.f32 %v3145_v31, %v2942_v41 }
 0x316   : > { %v2745_v58 = vpop.f32.mrf.mxu2 }
 0x317   : > { %v3237_v38 = vadd.f32 %v3236_v26, %v3202_v25  ;;  %v3280_v11 = vmul.f32 %v3202_v25, %v2942_v41  ;;  %v2746_v15 = vadd.f32 %v2745_v58, %v2647_v40 }
 0x318   : > { %v2649_v54 = vpop.f32.mrf.mxu1 }
 0x319   : > { %v3315_v12 = vadd.f32 %v3314_v36, %v3280_v11  ;;  %v2845_v32 = vadd.f32 %v2844_v39, %v2746_v15  ;;  %v2650_v46 = vadd.f32 %v2649_v54, %v4853_v34  ;;  %v2854_v36 = vpop.f32.mrf.mxu3 }
 0x31b   : > { %v2944_v1 = vadd.f32 %v2943_v16, %v2845_v32  ;;  %v2946_v55 = vpop.f32.mrf.mxu0 }
 0x31d   : > { %v3203_v62 = vmul.f32 %v3150_v50, %v2944_v1 }
 0x31e   : > { %v2748_v47 = vpop.f32.mrf.mxu2 }
 0x31f   : > { %v3238_v44 = vadd.f32 %v3237_v38, %v3203_v62  ;;  %v3281_v37 = vmul.f32 %v3203_v62, %v2944_v1  ;;  %v3934_v7 = vpack.c.bf16 %v3203_v62, %v3202_v25  ;;  %v2749_v0 = vadd.f32 %v2748_v47, %v2650_v46  ;;  %v3170_v25 = vpop.permute.xlu2 %3169 }
 0x320   : > { %v2651_v60 = vpop.f32.mrf.mxu1 }
 0x321   : > { %v3316_v35 = vadd.f32 %v3315_v12, %v3281_v37  ;;  %3960 = vst [vmem:[%s4923_s23 + $0x78] sm:$0xff] %v3934_v7   ;;  %v2848_v57 = vadd.f32 %v2847_v20, %v2749_v0  ;;  %v2652_v6 = vadd.f32 %v2651_v60, %v4863_v49 }
 0x323   : > { %v2947_v61 = vadd.f32 %v2946_v55, %v2848_v57  ;;  %v2948_v5 = vpop.f32.mrf.mxu0 }
 0x325   : > { %v3204_v52 = vmul.f32 %v3155_v21, %v2947_v61 }
 0x326   : > { %v2750_v29 = vpop.f32.mrf.mxu2 }
 0x327   : > { %v3239_v63 = vadd.f32 %v3238_v44, %v3204_v52  ;;  %v3282_v30 = vmul.f32 %v3204_v52, %v2947_v61  ;;  %v2751_v34 = vadd.f32 %v2750_v29, %v2652_v6 }
 0x328   : > { %v2654_v43 = vpop.f32.mrf.mxu1 }
 0x329   : > { %v3317_v17 = vadd.f32 %v3316_v35, %v3282_v30  ;;  %v2850_v14 = vadd.f32 %v2849_v8, %v2751_v34  ;;  %v2655_v45 = vadd.f32 %v2654_v43, %v4877_v10 }
 0x32b   : > { %v2949_v13 = vadd.f32 %v2948_v5, %v2850_v14  ;;  %v2951_v19 = vpop.f32.mrf.mxu0 }
 0x32d   : > { %v3205_v9 = vmul.f32 %v3160_v59, %v2949_v13 }
 0x32e   : > { %v2753_v53 = vpop.f32.mrf.mxu2 }
 0x32f   : > { %v3240_v22 = vadd.f32 %v3239_v63, %v3205_v9  ;;  %v3283_v24 = vmul.f32 %v3205_v9, %v2949_v13  ;;  %v3939_v33 = vpack.c.bf16 %v3205_v9, %v3204_v52  ;;  %v2754_v49 = vadd.f32 %v2753_v53, %v2655_v45 }
 0x330   : > { %v2656_v42 = vpop.f32.mrf.mxu1 }
 0x331   : > { %v3318_v28 = vadd.f32 %v3317_v17, %v3283_v24  ;;  %3961 = vst [vmem:[%s4923_s23 + $0x80] sm:$0xff] %v3939_v33   ;;  %v2853_v2 = vadd.f32 %v2852_v51, %v2754_v49  ;;  %v2657_v27 = vadd.f32 %v2656_v42, %v5150_v56 }
 0x333   : > { %v2952_v48 = vadd.f32 %v2951_v19, %v2853_v2  ;;  %v2953_v41 = vpop.f32.mrf.mxu0 }
 0x335   : > { %v3206_v26 = vmul.f32 %v3165_v23, %v2952_v48 }
 0x336   : > { %v2755_v3 = vpop.f32.mrf.mxu2 }
 0x337   : > { %v3241_v18 = vadd.f32 %v3240_v22, %v3206_v26  ;;  %v3284_v10 = vmul.f32 %v3206_v26, %v2952_v48  ;;  %v2756_v39 = vadd.f32 %v2755_v3, %v2657_v27 }
 0x339   : > { %v3319_v4 = vadd.f32 %v3318_v28, %v3284_v10  ;;  %v2855_v16 = vadd.f32 %v2854_v36, %v2756_v39 }
 0x33b   : > { %v2954_v31 = vadd.f32 %v2953_v41, %v2855_v16 }
 0x33d   : > { %v3207_v40 = vmul.f32 %v3170_v25, %v2954_v31 }
 0x33f   : > { %v3242_v58 = vadd.f32 %v3241_v18, %v3207_v40  ;;  %v3285_v38 = vmul.f32 %v3207_v40, %v2954_v31  ;;  %v3944_v11 = vpack.c.bf16 %v3207_v40, %v3206_v26 }
 0x341   : > { %v3243_v15 = vrot.slane %v3242_v58, 4  ;;  %v3320_v54 = vadd.f32 %v3319_v4, %v3285_v38  ;;  %3962 = vst [vmem:[%s4923_s23 + $0x88] sm:$0xff] %v3944_v11  }
 0x343   : > { %v3244_v12 = vadd.f32 %v3243_v15, %v3242_v58  ;;  %v3321_v32 = vrot.slane %v3320_v54, 4 }
 0x345   : > { %v3245_v20 = vrot.slane %v3244_v12, 2  ;;  %v3322_v1 = vadd.f32 %v3321_v32, %v3320_v54 }
 0x347   : > { %v3246_v50 = vadd.f32 %v3245_v20, %v3244_v12  ;;  %v3323_v55 = vrot.slane %v3322_v1, 2 }
 0x349   : > { %v3247_v62 = vrot.slane %v3246_v50, 1  ;;  %v3324_v46 = vadd.f32 %v3323_v55, %v3322_v1 }
 0x34b   : > { %v3248_v47 = vadd.f32 %v3247_v62, %v3246_v50  ;;  %v3325_v44 = vrot.slane %v3324_v46, 1 }
 0x34d   : > { %3249 = vst [vmem:[%s208_s11] sm:$0x1] %v3248_v47  ;;  %v3326_v37 = vadd.f32 %v3325_v44, %v3324_v46 }
 0x34f   : > { %3327 = vst [vmem:[%s208_s11 + $0x1] sm:$0x1] %v3326_v37 }
 0x350 PF: > { %s15_s15 = sadd.s32 1, %s4007_s15  }
 0x351   : > { %p12_p4 = scmp.ge.s32.totalorder %s15_s15, 4  }
 0x353   :  { %14 = sbr.rel (!%p12_p4) target bundleno = 1 (0x1), region = 74 }

// kernel: res18_basicblock_forward.4
= control target key start
LH: loop header
LB: loop body
LE: loop exit
PB: predicated region body
PF: predicated region fallthrough
CT: control target
= control target key end

     0   :  { %s4457_s21 = smov 0   ;;  %s5428_s0 = inlined_call_operand.vmem [shape: bf16[2,288,128], index: 0, kind: input, shape index: {}]   ;;  %s5429_s1 = inlined_call_operand.vmem [shape: f32[288,1], index: 1, kind: input, shape index: {}]   ;;  %s5430_s2 = inlined_call_operand.vmem [shape: f32[1,128], index: 2, kind: input, shape index: {}]   ;;  %s5431_s3 = inlined_call_operand.vmem [shape: f32[1,128], index: 3, kind: input, shape index: {}]   ;;  %s5432_s4 = inlined_call_operand.vmem [shape: bf16[1152,128], index: 4, kind: input, shape index: {}]   ;;  %s5433_s5 = inlined_call_operand.vmem [shape: bf16[2,288,128], index: 5, kind: output, shape index: {0}]   ;;  %s5434_s6 = inlined_call_operand.vmem [shape: f32[2,2,128], index: 6, kind: output, shape index: {1}]  }
   0x1 LB: > { %s3806_s22 = sadd.s32 4294967295, %s4418_s21   ;;  %p3810_p0 = scmp.ge.s32.totalorder %s4418_s21, 1  ;;  %s4418_s21 = sphi %s4457_s21, %s17_s21  }
   0x2   : > { %p215_p1 = scmp.lt.s32.totalorder %s4418_s21, 3 }
   0x4   : > { %p216_p2 = pnand %p3810_p0, %p215_p1 }
   0x6   : > { %219 = sbr.rel (%p216_p2) target bundleno = 965 (0x3c5), region = 40 }
   0xb   : > { %v282_v0 = vld [vmem:[%s5429_s1 + $0x98] sm:$0xff]  ;;  %v280_v1 = vld [vmem:[%s5429_s1 + $0x88] sm:$0xff]  ;;  %v271_v2 = vld [vmem:[%s5429_s1 + $0x40] sm:$0xff]  ;;  %v4420_v3 = vmov 0   ;;  %p249_p3 = scmp.lt.s32.totalorder %s3806_s22, 1  ;;  %v4421_v57 = vmov 0.0  }
   0xc   : > { %4409 = vset.pattern.permute.xlu2 %v4420_v3  ;;  %4408 = vset.pattern.permute.xlu1 %v4420_v3  ;;  %v270_v4 = vld [vmem:[%s5429_s1 + $0x38] sm:$0xff]  ;;  %v281_v5 = vld [vmem:[%s5429_s1 + $0x90] sm:$0xff]  ;;  %v272_v6 = vld [vmem:[%s5429_s1 + $0x48] sm:$0xff]  ;;  %703 = vst [vmem:[#allocation2] sm:$0xff] %v4421_v57 }
   0xd   : > { %4407 = vset.pattern.permute.xlu0 %v4420_v3  ;;  %584 = vperm.xlu1 %4408, %v282_v0   ;;  %v284_v7 = vld [vmem:[%s5429_s1 + $0xa8] sm:$0xff]  ;;  %v283_v8 = vld [vmem:[%s5429_s1 + $0xa0] sm:$0xff]  ;;  %v273_v9 = vld [vmem:[%s5429_s1 + $0x50] sm:$0xff]  ;;  %s5544_s22 = smov (!%p249_p3, %s3806_s22), 1  ;;  %704 = vst [vmem:[#allocation2 + $0x8] sm:$0xff] %v4421_v57 }
   0xe   : > { %574 = vperm.xlu0 %4407, %v280_v1   ;;  %529 = vperm.xlu2 %4409, %v271_v2   ;;  %v263_v10 = vld [vmem:[%s5429_s1] sm:$0xff]  ;;  %v274_v11 = vld [vmem:[%s5429_s1 + $0x58] sm:$0xff]  ;;  %v264_v12 = vld [vmem:[%s5429_s1 + $0x8] sm:$0xff]  ;;  %s4396_s9 = smul.u32 144, %s5544_s22  ;;  %705 = vst [vmem:[#allocation2 + $0x10] sm:$0xff] %v4421_v57 }
   0xf   : > { %v286_v13 = vld [vmem:[%s5429_s1 + $0xb8] sm:$0xff]  ;;  %v285_v14 = vld [vmem:[%s5429_s1 + $0xb0] sm:$0xff]  ;;  %v292_v16 = vld [vmem:[%s5429_s1 + $0xe8] sm:$0xff]  ;;  %742 = vst [vmem:[#allocation2 + $0x138] sm:$0xff] %v4421_v57 }
  0x10   : > { %v290_v15 = vld [vmem:[%s5429_s1 + $0xd8] sm:$0xff]  ;;  %v291_v17 = vld [vmem:[%s5429_s1 + $0xe0] sm:$0xff]  ;;  %v265_v19 = vld [vmem:[%s5429_s1 + $0x10] sm:$0xff]  ;;  %s4567_s18 = scalar_lea.vmem %s5428_s0, %s4396_s9  ;;  %743 = vst [vmem:[#allocation2 + $0x140] sm:$0xff] %v4421_v57  ;;  %s5305_s16 = scalar_lea.vmem %s5433_s5, %s4396_s9 }
  0x11   : > { %v275_v18 = vld [vmem:[%s5429_s1 + $0x60] sm:$0xff]  ;;  %v276_v20 = vld [vmem:[%s5429_s1 + $0x68] sm:$0xff]  ;;  %v266_v21 = vld [vmem:[%s5429_s1 + $0x18] sm:$0xff]  ;;  %744 = vst [vmem:[#allocation2 + $0x148] sm:$0xff] %v4421_v57  ;;  %s3813_s9 = sshll.u32 %s5544_s22, 1 }
  0x12   : > { %v288_v22 = vld [vmem:[%s5429_s1 + $0xc8] sm:$0xff]  ;;  %v287_v23 = vld [vmem:[%s5429_s1 + $0xc0] sm:$0xff]  ;;  %v293_v24 = vld [vmem:[%s5429_s1 + $0xf0] sm:$0xff] }
  0x13   : > { %v277_v25 = vld [vmem:[%s5429_s1 + $0x70] sm:$0xff]  ;;  %v294_v26 = vld [vmem:[%s5429_s1 + $0xf8] sm:$0xff]  ;;  %v268_v28 = vld [vmem:[%s5429_s1 + $0x28] sm:$0xff] }
  0x14   : > { %v278_v27 = vld [vmem:[%s5429_s1 + $0x78] sm:$0xff]  ;;  %v267_v29 = vld [vmem:[%s5429_s1 + $0x20] sm:$0xff]  ;;  %v289_v30 = vld [vmem:[%s5429_s1 + $0xd0] sm:$0xff] }
  0x15   : > { %524 = vperm.xlu1 %4408, %v270_v4   ;;  %v4341_v31 = vld [vmem:[%s4567_s18 + $0x20] sm:$0xff]   ;;  %v4111_v32 = vld [vmem:[%s5432_s4 + $0x38] sm:$0xff]  ;;  %v296_v35 = vld [vmem:[%s5429_s1 + $0x108] sm:$0xff] }
  0x16   : > { %579 = vperm.xlu0 %4407, %v281_v5   ;;  %534 = vperm.xlu2 %4409, %v272_v6   ;;  %v4194_v33 = vunpack.c.l.bf16 %v4341_v31  ;;  %v295_v34 = vld [vmem:[%s5429_s1 + $0x100] sm:$0xff]  ;;  %v4110_v38 = vld [vmem:[%s5432_s4 + $0x30] sm:$0xff]  ;;  %v4109_v41 = vld [vmem:[%s5432_s4 + $0x28] sm:$0xff]  ;;  %v4195_v43 = vunpack.c.h.bf16 %v4341_v31 }
  0x17   : > { %2601 = vmatpush.bf16.msra.mxu0 %v4111_v32  ;;  %4372 = vmatpush.bf16.msra.mxu1 %v4111_v32  ;;  %v279_v36 = vld [vmem:[%s5429_s1 + $0x80] sm:$0xff]  ;;  %v297_v44 = vld [vmem:[%s5429_s1 + $0x110] sm:$0xff]  ;;  %v298_v46 = vld [vmem:[%s5429_s1 + $0x118] sm:$0xff] }
  0x18   : > { %v4585_v37 = vld [vmem:[%s5430_s2] ss:$0 sm:$0xff]  ;;  %4373 = vmatpush.bf16.msra.mxu2 %v4111_v32  ;;  %4374 = vmatpush.bf16.msra.mxu3 %v4111_v32  ;;  %v269_v45 = vld [vmem:[%s5429_s1 + $0x30] sm:$0xff]  ;;  %v4614_v50 = vld [vmem:[%s4567_s18 + $0x28] sm:$0xff]  }
  0x19   : > { %v383_v39 = vmul.f32 %v4585_v37, %v4194_v33  ;;  %v4594_v40 = vld [vmem:[%s5431_s3] ss:$0 sm:$0xff]  ;;  %v384_v49 = vmul.f32 %v4585_v37, %v4195_v43  ;;  %v4198_v54 = vunpack.c.l.bf16 %v4614_v50  ;;  %v4107_v55 = vld [vmem:[%s5432_s4 + $0x18] sm:$0xff]  ;;  %v4106_v56 = vld [vmem:[%s5432_s4 + $0x10] sm:$0xff] }
  0x1a   : > { %v4108_v47 = vld [vmem:[%s5432_s4 + $0x20] sm:$0xff]  ;;  %v4346_v60 = vld [vmem:[%s4567_s18 + $0x48] sm:$0xff]   ;;  %v4119_v57 = vld [vmem:[%s5432_s4 + $0x78] sm:$0xff] }
  0x1b   : > { %2602 = vmatpush.bf16.msra.mxu0 %v4110_v38  ;;  %4375 = vmatpush.bf16.msra.mxu1 %v4110_v38  ;;  %v423_v42 = vadd.f32 %v4594_v40, %v383_v39  ;;  %v424_v53 = vadd.f32 %v4594_v40, %v384_v49  ;;  %v385_v59 = vmul.f32 %v4585_v37, %v4198_v54  ;;  %v4630_v61 = vld [vmem:[%s4567_s18 + $0x40] sm:$0xff]   ;;  %v4215_v0 = vunpack.c.h.bf16 %v4346_v60  ;;  %v4105_v5 = vld [vmem:[%s5432_s4 + $0x8] sm:$0xff] }
  0x1c   : > { %4376 = vmatpush.bf16.msra.mxu2 %v4110_v38  ;;  %4377 = vmatpush.bf16.msra.mxu3 %v4110_v38  ;;  %v4633_v62 = vld [vmem:[%s4567_s18] sm:$0xff]   ;;  %v4211_v1 = vunpack.c.h.bf16 %v4630_v61 }
  0x1d   : > { %594 = vperm.xlu1 %4408, %v284_v7   ;;  %v459_v48 = vmax.f32 %v423_v42, 0.0  ;;  %v460_v58 = vmax.f32 %v424_v53, 0.0  ;;  %v425_v3 = vadd.f32 %v4594_v40, %v385_v59  ;;  %v4179_v4 = vunpack.c.h.bf16 %v4633_v62 }
  0x1e   : > { %589 = vperm.xlu0 %4407, %v283_v8   ;;  %539 = vperm.xlu2 %4409, %v273_v9   ;;  %v394_v6 = vmul.f32 %v4585_v37, %v4215_v0  ;;  %v392_v7 = vmul.f32 %v4585_v37, %v4211_v1  ;;  %v4647_v8 = vld [vmem:[%s4567_s18 + $0x18] sm:$0xff]   ;;  %v4104_v9 = vld [vmem:[%s5432_s4] sm:$0xff]  ;;  %v4178_v1 = vunpack.c.l.bf16 %v4633_v62 }
  0x1f   : > { %2603 = vmatpush.bf16.msra.mxu0 %v4109_v41  ;;  %4378 = vmatpush.bf16.msra.mxu1 %v4109_v41 }
  0x20   : > { %4379 = vmatpush.bf16.msra.mxu2 %v4109_v41  ;;  %4380 = vmatpush.bf16.msra.mxu3 %v4109_v41 }
  0x23   : > { %2604 = vmatpush.bf16.msra.mxu0 %v4108_v47  ;;  %4381 = vmatpush.bf16.msra.mxu1 %v4108_v47 }
  0x24   : > { %4382 = vmatpush.bf16.msra.mxu2 %v4108_v47  ;;  %4383 = vmatpush.bf16.msra.mxu3 %v4108_v47 }
  0x25   : > { %489 = vperm.xlu1 %4408, %v263_v10   ;;  %v745_v10 = vld [vmem:[#allocation2 + $0x5] sm:$0xff] }
  0x26   : > { %544 = vperm.xlu0 %4407, %v274_v11   ;;  %494 = vperm.xlu2 %4409, %v264_v12   ;;  %v461_v11 = vmax.f32 %v425_v3, 0.0  ;;  %v376_v12 = vmul.f32 %v4585_v37, %v4179_v4 }
  0x27   : > { %2605 = vmatpush.bf16.msra.mxu0 %v4107_v55  ;;  %4384 = vmatpush.bf16.msra.mxu1 %v4107_v55 }
  0x28   : > { %4385 = vmatpush.bf16.msra.mxu2 %v4107_v55  ;;  %4386 = vmatpush.bf16.msra.mxu3 %v4107_v55 }
  0x2b   : > { %2606 = vmatpush.bf16.msra.mxu0 %v4106_v56  ;;  %4387 = vmatpush.bf16.msra.mxu1 %v4106_v56 }
  0x2c   : > { %4388 = vmatpush.bf16.msra.mxu2 %v4106_v56  ;;  %4389 = vmatpush.bf16.msra.mxu3 %v4106_v56 }
  0x2d   : > { %604 = vperm.xlu1 %4408, %v286_v13   ;;  %v746_v13 = vld [vmem:[#allocation2 + $0xd] sm:$0xff] }
  0x2e   : > { %599 = vperm.xlu0 %4407, %v285_v14   ;;  %624 = vperm.xlu2 %4409, %v290_v15   ;;  %v781_v14 = vpack.c.bf16 %v745_v10, %v745_v10  ;;  %v4654_v15 = vld [vmem:[%s4567_s18 + $0x68] sm:$0xff]  }
  0x2f   : > { %2607 = vmatpush.bf16.msra.mxu0 %v4105_v5  ;;  %4390 = vmatpush.bf16.msra.mxu1 %v4105_v5 }
  0x30   : > { %4391 = vmatpush.bf16.msra.mxu2 %v4105_v5  ;;  %4392 = vmatpush.bf16.msra.mxu3 %v4105_v5 }
  0x33   : > { %2608 = vmatpush.bf16.msra.mxu0 %v4104_v9  ;;  %4393 = vmatpush.bf16.msra.mxu1 %v4104_v9 }
  0x34   : > { %4394 = vmatpush.bf16.msra.mxu2 %v4104_v9  ;;  %4395 = vmatpush.bf16.msra.mxu3 %v4104_v9 }
  0x35   : > { %634 = vperm.xlu1 %4408, %v292_v16   ;;  %v782_v16 = vpack.c.bf16 %v746_v13, %v746_v13  ;;  %v4348_v13 = vld [vmem:[%s4567_s18 + $0x58] sm:$0xff]  }
  0x36   : > { %629 = vperm.xlu0 %4407, %v291_v17   ;;  %549 = vperm.xlu2 %4409, %v275_v18   ;;  %v4191_v17 = vunpack.c.h.bf16 %v4647_v8  ;;  %v1293_v18 = vunpack.c.l.b16 %v781_v14 }
  0x37   : > { %2700 = vmatpush.bf16.msrb.mxu1 %v4119_v57 }
  0x3d   : > { %499 = vperm.xlu1 %4408, %v265_v19  }
  0x3e   : > { %554 = vperm.xlu0 %4407, %v276_v20   ;;  %504 = vperm.xlu2 %4409, %v266_v21   ;;  %v434_v20 = vadd.f32 %v4594_v40, %v394_v6  ;;  %v432_v21 = vadd.f32 %v4594_v40, %v392_v7 }
  0x40   : > { %v468_v31 = vmax.f32 %v432_v21, 0.0 }
  0x45   : > { %614 = vperm.xlu1 %4408, %v288_v22   ;;  %v1294_v22 = vunpack.c.l.b16 %v782_v16  ;;  %v4126_v16 = vld [vmem:[%s5432_s4 + $0xb0] sm:$0xff] }
  0x46   : > { %609 = vperm.xlu0 %4407, %v287_v23   ;;  %639 = vperm.xlu2 %4409, %v293_v24   ;;  %v416_v24 = vadd.f32 %v4594_v40, %v376_v12  ;;  %v375_v12 = vmul.f32 %v4585_v37, %v4178_v1  ;;  %v4142_v1 = vld [vmem:[%s5432_s4 + $0x130] sm:$0xff] }
  0x48   : > { %v452_v32 = vmax.f32 %v416_v24, 0.0  ;;  %v4725_v24 = vld [vmem:[%s4567_s18 + $0x78] sm:$0xff]  }
  0x4d   : > { %559 = vperm.xlu1 %4408, %v277_v25   ;;  %v4214_v25 = vunpack.c.l.bf16 %v4346_v60  ;;  %v4694_v60 = vld [vmem:[%s4567_s18 + $0x8] sm:$0xff]  }
  0x4e   : > { %644 = vperm.xlu0 %4407, %v294_v26   ;;  %564 = vperm.xlu2 %4409, %v278_v27   ;;  %v4231_v26 = vunpack.c.h.bf16 %v4654_v15  ;;  %v1329_v27 = vpack.c.b16 %v1294_v22, %v1293_v18  ;;  %v4183_v62 = vunpack.c.h.bf16 %v4694_v60 }
  0x4f   : > { %v393_v33 = vmul.f32 %v4585_v37, %v4214_v25 }
  0x50   : > { %2609 = vmatmul.bf16.vlgmr.msra.gmra.mxu0 %v1329_v27  ;;  %v378_v22 = vmul.f32 %v4585_v37, %v4183_v62  ;;  %v4222_v27 = vunpack.c.l.bf16 %v4348_v13 }
  0x51   : > { %v433_v49 = vadd.f32 %v4594_v40, %v393_v33  ;;  %v4223_v33 = vunpack.c.h.bf16 %v4348_v13 }
  0x55   : > { %514 = vperm.xlu1 %4408, %v268_v28   ;;  %v382_v28 = vmul.f32 %v4585_v37, %v4191_v17  ;;  %v4143_v17 = vld [vmem:[%s5432_s4 + $0x138] sm:$0xff] }
  0x56   : > { %509 = vperm.xlu0 %4407, %v267_v29   ;;  %619 = vperm.xlu2 %4409, %v289_v30   ;;  %v470_v29 = vmax.f32 %v434_v20, 0.0  ;;  %v4127_v30 = vld [vmem:[%s5432_s4 + $0xb8] sm:$0xff] }
  0x57   : > { %2799 = vmatpush.bf16.msrb.mxu2 %v4127_v30  ;;  %v422_v39 = vadd.f32 %v4594_v40, %v382_v28  ;;  %2997 = vmatpush.bf16.msrb.mxu0 %v4143_v17 }
  0x59   : > { %v458_v53 = vmax.f32 %v422_v39, 0.0 }
  0x5b   : > { %2800 = vmatpush.bf16.msrb.mxu2 %v4126_v16  ;;  %2998 = vmatpush.bf16.msrb.mxu0 %v4142_v1 }
  0x5d   : > { %654 = vperm.xlu1 %4408, %v296_v35   ;;  %v4347_v35 = vld [vmem:[%s4567_s18 + $0x50] sm:$0xff]  }
  0x5e   : > { %649 = vperm.xlu0 %4407, %v295_v34   ;;  %569 = vperm.xlu2 %4409, %v279_v36   ;;  %v402_v34 = vmul.f32 %v4585_v37, %v4231_v26  ;;  %v4672_v36 = vld [vmem:[%s4567_s18 + $0x30] sm:$0xff]   ;;  %v415_v26 = vadd.f32 %v4594_v40, %v375_v12 }
  0x65   : > { %659 = vperm.xlu1 %4408, %v297_v44   ;;  %v4218_v44 = vunpack.c.l.bf16 %v4347_v35 }
  0x66   : > { %519 = vperm.xlu0 %4407, %v269_v45   ;;  %664 = vperm.xlu2 %4409, %v298_v46   ;;  %v4219_v45 = vunpack.c.h.bf16 %v4347_v35  ;;  %v4202_v46 = vunpack.c.l.bf16 %v4672_v36 }
  0x67   : > { %v395_v54 = vmul.f32 %v4585_v37, %v4218_v44 }
  0x68   : > { %v4616_v51 = vpop.permute.xlu2 %529  ;;  %v396_v55 = vmul.f32 %v4585_v37, %v4219_v45  ;;  %v387_v56 = vmul.f32 %v4585_v37, %v4202_v46 }
  0x69   : > { %5470 = vst [vmem:[#allocation3_spill] sm:$0xff] %v4616_v51  ;;  %v675_v52 = vmul.f32 %v4616_v51, %v459_v48  ;;  %v435_v5 = vadd.f32 %v4594_v40, %v395_v54  ;;  %v4351_v54 = vld [vmem:[%s4567_s18 + $0x70] sm:$0xff]  }
  0x6a   : > { %v436_v6 = vadd.f32 %v4594_v40, %v396_v55  ;;  %v427_v7 = vadd.f32 %v4594_v40, %v387_v56  ;;  %v4235_v62 = vunpack.c.h.bf16 %v4351_v54 }
  0x6b   : > { %714 = vst [vmem:[#allocation2 + $0x58] sm:$0xff] %v675_v52  ;;  %v442_v52 = vadd.f32 %v4594_v40, %v402_v34  ;;  %v471_v18 = vmax.f32 %v435_v5, 0.0 }
  0x6c   : > { %v472_v14 = vmax.f32 %v436_v6, 0.0  ;;  %v463_v20 = vmax.f32 %v427_v7, 0.0 }
  0x6d   : > { %v478_v59 = vmax.f32 %v442_v52, 0.0 }
  0x70   : > { %v4635_v63 = vpop.permute.xlu2 %534 }
  0x71   : > { %5471 = vst [vmem:[#allocation4_spill] sm:$0xff] %v4635_v63  ;;  %v676_v2 = vmul.f32 %v4635_v63, %v460_v58  ;;  %v469_v58 = vmax.f32 %v433_v49, 0.0 }
  0x73   : > { %715 = vst [vmem:[#allocation2 + $0x60] sm:$0xff] %v676_v2 }
  0x78   : > { %v4657_v19 = vpop.permute.xlu2 %539 }
  0x79   : > { %5472 = vst [vmem:[#allocation5_spill] sm:$0xff] %v4657_v19  ;;  %v677_v23 = vmul.f32 %v4657_v19, %v461_v11  ;;  %v4199_v11 = vunpack.c.h.bf16 %v4614_v50  ;;  %v4118_v50 = vld [vmem:[%s5432_s4 + $0x70] sm:$0xff] }
  0x7a   : > { %2701 = vmatpush.bf16.msrb.mxu1 %v4118_v50 }
  0x7b   : > { %716 = vst [vmem:[#allocation2 + $0x68] sm:$0xff] %v677_v23  ;;  %v386_v21 = vmul.f32 %v4585_v37, %v4199_v11  ;;  %v756_v23 = vld [vmem:[#allocation2 + $0x5d] sm:$0xff] }
  0x7c   : > { %v4754_v11 = vld [vmem:[%s4567_s18 + $0x38] sm:$0xff]  }
  0x7d   : > { %v426_v39 = vadd.f32 %v4594_v40, %v386_v21 }
  0x7f   : > { %v4674_v38 = vpop.permute.xlu1 %584  ;;  %v462_v5 = vmax.f32 %v426_v39, 0.0 }
  0x80   : > { %5473 = vst [vmem:[#allocation6_spill] sm:$0xff] %v4674_v38  ;;  %v686_v41 = vmul.f32 %v4674_v38, %v470_v29  ;;  %v4678_v42 = vpop.permute.xlu0 %574  ;;  %v4680_v43 = vpop.permute.xlu2 %494 }
  0x81   : > { %5474 = vst [vmem:[#allocation7_spill] sm:$0xff] %v4678_v42  ;;  %v684_v47 = vmul.f32 %v4678_v42, %v468_v31  ;;  %v668_v48 = vmul.f32 %v4680_v43, %v452_v32  ;;  %v792_v31 = vpack.c.bf16 %v756_v23, %v756_v23  ;;  %v4238_v32 = vunpack.c.l.bf16 %v4725_v24 }
  0x82   : > { %5475 = vst [vmem:[#allocation8_spill] sm:$0xff] %v4680_v43  ;;  %v4234_v23 = vunpack.c.l.bf16 %v4351_v54 }
  0x83   : > { %725 = vst [vmem:[#allocation2 + $0xb0] sm:$0xff] %v686_v41  ;;  %v418_v41 = vadd.f32 %v4594_v40, %v378_v22  ;;  %v1304_v56 = vunpack.c.l.b16 %v792_v31  ;;  %v405_v57 = vmul.f32 %v4585_v37, %v4238_v32 }
  0x84   : > { %723 = vst [vmem:[#allocation2 + $0xa0] sm:$0xff] %v684_v47 }
  0x85   : > { %707 = vst [vmem:[#allocation2 + $0x20] sm:$0xff] %v668_v48  ;;  %v451_v48 = vmax.f32 %v415_v26, 0.0  ;;  %v454_v6 = vmax.f32 %v418_v41, 0.0  ;;  %v4207_v26 = vunpack.c.h.bf16 %v4754_v11  ;;  %v403_v41 = vmul.f32 %v4585_v37, %v4234_v23  ;;  %v4116_v23 = vld [vmem:[%s5432_s4 + $0x60] sm:$0xff] }
  0x87   : > { %v4696_v0 = vpop.permute.xlu1 %524 }
  0x88   : > { %5476 = vst [vmem:[#allocation9_spill] sm:$0xff] %v4696_v0  ;;  %v4699_v2 = vpop.permute.xlu0 %579  ;;  %v674_v3 = vmul.f32 %v4696_v0, %v458_v53  ;;  %v4702_v4 = vpop.permute.xlu2 %624  ;;  %v397_v53 = vmul.f32 %v4585_v37, %v4222_v27  ;;  %v404_v27 = vmul.f32 %v4585_v37, %v4235_v62 }
  0x89   : > { %5477 = vst [vmem:[#allocation10_spill] sm:$0xff] %v4699_v2  ;;  %v685_v9 = vmul.f32 %v4699_v2, %v469_v58  ;;  %v694_v10 = vmul.f32 %v4702_v4, %v478_v59  ;;  %v398_v58 = vmul.f32 %v4585_v37, %v4223_v33  ;;  %v4125_v59 = vld [vmem:[%s5432_s4 + $0xa8] sm:$0xff]  ;;  %v4124_v33 = vld [vmem:[%s5432_s4 + $0xa0] sm:$0xff] }
  0x8a   : > { %5478 = vst [vmem:[#allocation11_spill] sm:$0xff] %v4702_v4  ;;  %2801 = vmatpush.bf16.msrb.mxu2 %v4125_v59  ;;  %v437_v50 = vadd.f32 %v4594_v40, %v397_v53 }
  0x8b   : > { %713 = vst [vmem:[#allocation2 + $0x50] sm:$0xff] %v674_v3  ;;  %v4117_v3 = vld [vmem:[%s5432_s4 + $0x68] sm:$0xff] }
  0x8c   : > { %724 = vst [vmem:[#allocation2 + $0xa8] sm:$0xff] %v685_v9  ;;  %2702 = vmatpush.bf16.msrb.mxu1 %v4117_v3  ;;  %v443_v3 = vadd.f32 %v4594_v40, %v403_v41  ;;  %v4134_v41 = vld [vmem:[%s5432_s4 + $0xf0] sm:$0xff] }
  0x8d   : > { %733 = vst [vmem:[#allocation2 + $0xf0] sm:$0xff] %v694_v10 }
  0x8e   : > { %2802 = vmatpush.bf16.msrb.mxu2 %v4124_v33 }
  0x8f   : > { %v4727_v25 = vpop.permute.xlu1 %594 }
  0x90   : > { %5479 = vst [vmem:[#allocation12_spill] sm:$0xff] %v4727_v25  ;;  %v4730_v28 = vpop.permute.xlu0 %589  ;;  %v688_v29 = vmul.f32 %v4727_v25, %v472_v14  ;;  %v4733_v30 = vpop.permute.xlu2 %549  ;;  %2703 = vmatpush.bf16.msrb.mxu1 %v4116_v23 }
  0x91   : > { %5480 = vst [vmem:[#allocation13_spill] sm:$0xff] %v4730_v28  ;;  %v687_v34 = vmul.f32 %v4730_v28, %v471_v18  ;;  %v679_v35 = vmul.f32 %v4733_v30, %v463_v20  ;;  %v445_v18 = vadd.f32 %v4594_v40, %v405_v57  ;;  %v438_v20 = vadd.f32 %v4594_v40, %v398_v58 }
  0x92   : > { %5481 = vst [vmem:[#allocation14_spill] sm:$0xff] %v4733_v30  ;;  %v755_v44 = vld [vmem:[#allocation2 + $0x55] sm:$0xff]  ;;  %v4230_v57 = vunpack.c.l.bf16 %v4654_v15  ;;  %v4182_v58 = vunpack.c.l.bf16 %v4694_v60 }
  0x93   : > { %727 = vst [vmem:[#allocation2 + $0xc0] sm:$0xff] %v688_v29  ;;  %v791_v45 = vpack.c.bf16 %v755_v44, %v755_v44  ;;  %v765_v46 = vld [vmem:[#allocation2 + $0xa5] sm:$0xff]  ;;  %v766_v47 = vld [vmem:[#allocation2 + $0xad] sm:$0xff]  ;;  %v474_v31 = vmax.f32 %v438_v20, 0.0  ;;  %v481_v39 = vmax.f32 %v445_v18, 0.0  ;;  %v390_v44 = vmul.f32 %v4585_v37, %v4207_v26  ;;  %v4135_v26 = vld [vmem:[%s5432_s4 + $0xf8] sm:$0xff] }
  0x94   : > { %726 = vst [vmem:[#allocation2 + $0xb8] sm:$0xff] %v687_v34  ;;  %v801_v49 = vpack.c.bf16 %v765_v46, %v765_v46  ;;  %v802_v52 = vpack.c.bf16 %v766_v47, %v766_v47  ;;  %v4141_v34 = vld [vmem:[%s5432_s4 + $0x128] sm:$0xff]  ;;  %v444_v46 = vadd.f32 %v4594_v40, %v404_v27  ;;  %v4123_v27 = vld [vmem:[%s5432_s4 + $0x98] sm:$0xff]  ;;  %2898 = vmatpush.bf16.msrb.mxu3 %v4135_v26 }
  0x95   : > { %718 = vst [vmem:[#allocation2 + $0x78] sm:$0xff] %v679_v35  ;;  %v1303_v55 = vunpack.c.l.b16 %v791_v45  ;;  %v473_v35 = vmax.f32 %v437_v50, 0.0  ;;  %v757_v45 = vld [vmem:[#allocation2 + $0x65] sm:$0xff]  ;;  %2999 = vmatpush.bf16.msrb.mxu0 %v4141_v34  ;;  %2803 = vmatpush.bf16.msrb.mxu2 %v4123_v27 }
  0x96   : > { %v1313_v7 = vunpack.c.l.b16 %v801_v49  ;;  %v1314_v9 = vunpack.c.l.b16 %v802_v52  ;;  %v4203_v52 = vunpack.c.h.bf16 %v4672_v36  ;;  %v4349_v34 = vld [vmem:[%s4567_s18 + $0x60] sm:$0xff]  }
  0x97   : > { %v1334_v10 = vpack.c.b16 %v1304_v56, %v1303_v55  ;;  %v4756_v12 = vpop.permute.xlu1 %489  ;;  %v793_v56 = vpack.c.bf16 %v757_v45, %v757_v45 }
  0x98   : > { %v1339_v13 = vpack.c.b16 %v1314_v9, %v1313_v7  ;;  %v4758_v14 = vpop.permute.xlu0 %544  ;;  %v4760_v16 = vpop.permute.xlu2 %504  ;;  %v4763_v17 = vmul.f32 %v4756_v12, %v451_v48  ;;  %v480_v7 = vmax.f32 %v444_v46, 0.0  ;;  %v388_v50 = vmul.f32 %v4585_v37, %v4203_v52  ;;  %2899 = vmatpush.bf16.msrb.mxu3 %v4134_v41 }
  0x99   : > { %5482 = vst [vmem:[#allocation15_spill] sm:$0xff] %v4758_v14  ;;  %2634 = vmatmul.bf16.vlgmr.msra.gmra.mxu1 %v1334_v10  ;;  %v678_v21 = vmul.f32 %v4758_v14, %v462_v5  ;;  %v670_v22 = vmul.f32 %v4760_v16, %v454_v6  ;;  %v430_v5 = vadd.f32 %v4594_v40, %v390_v44 }
  0x9a   : > { %5483 = vst [vmem:[#allocation16_spill] sm:$0xff] %v4760_v16  ;;  %2659 = vmatmul.bf16.vlgmr.msra.gmra.mxu2 %v1339_v13 }
  0x9b   : > { %706 = vst [vmem:[#allocation2 + $0x18] sm:$0xff] %v4763_v17  ;;  %v767_v29 = vld [vmem:[#allocation2 + $0xb5] sm:$0xff]  ;;  %v768_v32 = vld [vmem:[#allocation2 + $0xbd] sm:$0xff] }
  0x9c   : > { %717 = vst [vmem:[#allocation2 + $0x70] sm:$0xff] %v678_v21  ;;  %v803_v48 = vpack.c.bf16 %v767_v29, %v767_v29  ;;  %v804_v49 = vpack.c.bf16 %v768_v32, %v768_v32  ;;  %v401_v21 = vmul.f32 %v4585_v37, %v4230_v57  ;;  %v479_v29 = vmax.f32 %v443_v3, 0.0 }
  0x9d   : > { %709 = vst [vmem:[#allocation2 + $0x30] sm:$0xff] %v670_v22  ;;  %v377_v22 = vmul.f32 %v4585_v37, %v4182_v58  ;;  %v1305_v32 = vunpack.c.l.b16 %v793_v56  ;;  %v4227_v58 = vunpack.c.h.bf16 %v4349_v34  ;;  %v4226_v3 = vunpack.c.l.bf16 %v4349_v34 }
  0x9e   : > { %v1315_v15 = vunpack.c.l.b16 %v803_v48  ;;  %v1316_v60 = vunpack.c.l.b16 %v804_v49  ;;  %v428_v48 = vadd.f32 %v4594_v40, %v388_v50  ;;  %v441_v56 = vadd.f32 %v4594_v40, %v401_v21  ;;  %v4838_v50 = vld [vmem:[%s4567_s18 + $0x88] sm:$0xff]  }
  0x9f   : > { %v4782_v47 = vpop.permute.xlu1 %604  ;;  %v417_v57 = vadd.f32 %v4594_v40, %v377_v22 }
  0xa0   : > { %5484 = vst [vmem:[#allocation17_spill] sm:$0xff] %v4782_v47  ;;  %v4785_v53 = vpop.permute.xlu0 %599  ;;  %v4787_v54 = vpop.permute.xlu2 %639  ;;  %v690_v55 = vmul.f32 %v4782_v47, %v474_v31  ;;  %v466_v31 = vmax.f32 %v430_v5, 0.0  ;;  %v1340_v46 = vpack.c.b16 %v1316_v60, %v1315_v15  ;;  %v4210_v5 = vunpack.c.l.bf16 %v4630_v61 }
  0xa1   : > { %5485 = vst [vmem:[#allocation18_spill] sm:$0xff] %v4785_v53  ;;  %v689_v59 = vmul.f32 %v4785_v53, %v473_v35  ;;  %v697_v1 = vmul.f32 %v4787_v54, %v481_v39  ;;  %v4140_v35 = vld [vmem:[%s5432_s4 + $0x120] sm:$0xff]  ;;  %v477_v15 = vmax.f32 %v441_v56, 0.0  ;;  %v399_v61 = vmul.f32 %v4585_v37, %v4226_v3  ;;  %v4122_v56 = vld [vmem:[%s5432_s4 + $0x90] sm:$0xff] }
  0xa2   : > { %5486 = vst [vmem:[#allocation19_spill] sm:$0xff] %v4787_v54  ;;  %v747_v36 = vld [vmem:[#allocation2 + $0x15] sm:$0xff]  ;;  %v748_v6 = vld [vmem:[#allocation2 + $0x1d] sm:$0xff]  ;;  %3000 = vmatpush.bf16.msrb.mxu0 %v4140_v35  ;;  %v391_v60 = vmul.f32 %v4585_v37, %v4210_v5  ;;  %2804 = vmatpush.bf16.msrb.mxu2 %v4122_v56 }
  0xa3   : > { %729 = vst [vmem:[#allocation2 + $0xd0] sm:$0xff] %v690_v55  ;;  %v783_v9 = vpack.c.bf16 %v747_v36, %v747_v36  ;;  %v784_v10 = vpack.c.bf16 %v748_v6, %v748_v6  ;;  %v758_v62 = vld [vmem:[#allocation2 + $0x6d] sm:$0xff]  ;;  %v4115_v36 = vld [vmem:[%s5432_s4 + $0x58] sm:$0xff]  ;;  %v439_v34 = vadd.f32 %v4594_v40, %v399_v61  ;;  %v4353_v56 = vld [vmem:[%s4567_s18 + $0x80] sm:$0xff]  }
  0xa4   : > { %728 = vst [vmem:[#allocation2 + $0xc8] sm:$0xff] %v689_v59  ;;  %v794_v13 = vpack.c.bf16 %v758_v62, %v758_v62  ;;  %v4133_v6 = vld [vmem:[%s5432_s4 + $0xe8] sm:$0xff]  ;;  %2704 = vmatpush.bf16.msrb.mxu1 %v4115_v36  ;;  %v431_v35 = vadd.f32 %v4594_v40, %v391_v60  ;;  %v4114_v5 = vld [vmem:[%s5432_s4 + $0x50] sm:$0xff] }
  0xa5   : > { %736 = vst [vmem:[#allocation2 + $0x108] sm:$0xff] %v697_v1  ;;  %v1295_v18 = vunpack.c.l.b16 %v783_v9  ;;  %v1296_v20 = vunpack.c.l.b16 %v784_v10  ;;  %v400_v9 = vmul.f32 %v4585_v37, %v4227_v58  ;;  %2900 = vmatpush.bf16.msrb.mxu3 %v4133_v6  ;;  %v4132_v58 = vld [vmem:[%s5432_s4 + $0xe0] sm:$0xff]  ;;  %v475_v36 = vmax.f32 %v439_v34, 0.0  ;;  %v831_v25 = vld [vmem:[#allocation2 + $0x76] sm:$0xff] }
  0xa6   : > { %v1306_v33 = vunpack.c.l.b16 %v794_v13  ;;  %v464_v13 = vmax.f32 %v428_v48, 0.0  ;;  %v467_v6 = vmax.f32 %v431_v35, 0.0 }
  0xa7   : > { %v1330_v39 = vpack.c.b16 %v1296_v20, %v1295_v18  ;;  %v4815_v44 = vpop.permute.xlu1 %634  ;;  %v4239_v18 = vunpack.c.h.bf16 %v4725_v24 }
  0xa8   : > { %5487 = vst [vmem:[#allocation20_spill] sm:$0xff] %v4815_v44  ;;  %v1335_v45 = vpack.c.b16 %v1306_v33, %v1305_v32  ;;  %v4818_v49 = vpop.permute.xlu0 %629  ;;  %v4820_v52 = vpop.permute.xlu2 %564  ;;  %v696_v55 = vmul.f32 %v4815_v44, %v480_v7  ;;  %v453_v7 = vmax.f32 %v417_v57, 0.0  ;;  %v4206_v32 = vunpack.c.l.bf16 %v4754_v11  ;;  %v4139_v57 = vld [vmem:[%s5432_s4 + $0x118] sm:$0xff]  ;;  %2705 = vmatpush.bf16.msrb.mxu1 %v4114_v5 }
  0xa9   : > { %5488 = vst [vmem:[#allocation21_spill] sm:$0xff] %v4818_v49  ;;  %2614 = vmatmul.bf16.gmra.mxu0 %v1330_v39  ;;  %v695_v59 = vmul.f32 %v4818_v49, %v479_v29  ;;  %v682_v1 = vmul.f32 %v4820_v52, %v466_v31  ;;  %v440_v29 = vadd.f32 %v4594_v40, %v400_v9  ;;  %v4247_v31 = vunpack.c.h.bf16 %v4838_v50 }
  0xaa   : > { %5489 = vst [vmem:[#allocation22_spill] sm:$0xff] %v4820_v52  ;;  %2639 = vmatmul.bf16.gmra.mxu1 %v1335_v45  ;;  %2664 = vmatmul.bf16.gmra.mxu2 %v1340_v46  ;;  %v406_v45 = vmul.f32 %v4585_v37, %v4239_v18  ;;  %v389_v3 = vmul.f32 %v4585_v37, %v4206_v32 }
  0xab   : > { %735 = vst [vmem:[#allocation2 + $0x100] sm:$0xff] %v696_v55  ;;  %v769_v10 = vld [vmem:[#allocation2 + $0xc5] sm:$0xff]  ;;  %v770_v62 = vld [vmem:[#allocation2 + $0xcd] sm:$0xff]  ;;  %3001 = vmatpush.bf16.msrb.mxu0 %v4139_v57  ;;  %2901 = vmatpush.bf16.msrb.mxu3 %v4132_v58  ;;  %v4131_v57 = vld [vmem:[%s5432_s4 + $0xd8] sm:$0xff] }
  0xac   : > { %734 = vst [vmem:[#allocation2 + $0xf8] sm:$0xff] %v695_v59  ;;  %v805_v21 = vpack.c.bf16 %v769_v10, %v769_v10  ;;  %v806_v22 = vpack.c.bf16 %v770_v62, %v770_v62  ;;  %v476_v59 = vmax.f32 %v440_v29, 0.0  ;;  %v4339_v10 = vld [vmem:[%s4567_s18 + $0x10] sm:$0xff]   ;;  %v446_v60 = vadd.f32 %v4594_v40, %v406_v45  ;;  %v4121_v58 = vld [vmem:[%s5432_s4 + $0x88] sm:$0xff]  ;;  %s262_s18 = scalar_lea.vmem %s5434_s6, %s3813_s9 }
  0xad   : > { %721 = vst [vmem:[#allocation2 + $0x90] sm:$0xff] %v682_v1  ;;  %v410_v1 = vmul.f32 %v4585_v37, %v4247_v31  ;;  %v759_v62 = vld [vmem:[#allocation2 + $0x75] sm:$0xff]  ;;  %v429_v31 = vadd.f32 %v4594_v40, %v389_v3  ;;  %v4187_v32 = vunpack.c.h.bf16 %v4339_v10  ;;  %2805 = vmatpush.bf16.msrb.mxu2 %v4121_v58 }
  0xae   : > { %v1317_v46 = vunpack.c.l.b16 %v805_v21  ;;  %v1318_v48 = vunpack.c.l.b16 %v806_v22 }
  0xaf   : > { %v4841_v20 = vpop.permute.xlu1 %499  ;;  %v450_v29 = vadd.f32 %v4594_v40, %v410_v1  ;;  %v380_v5 = vmul.f32 %v4585_v37, %v4187_v32  ;;  %2902 = vmatpush.bf16.msrb.mxu3 %v4131_v57  ;;  %v4243_v32 = vunpack.c.h.bf16 %v4353_v56 }
  0xb0   : > { %5490 = vst [vmem:[#allocation23_spill] sm:$0xff] %v4841_v20  ;;  %v4843_v23 = vpop.permute.xlu0 %554  ;;  %v4845_v26 = vpop.permute.xlu2 %619  ;;  %v4848_v27 = vmul.f32 %v4841_v20, %v453_v7 }
  0xb1   : > { %5491 = vst [vmem:[#allocation24_spill] sm:$0xff] %v4843_v23  ;;  %v680_v24 = vmul.f32 %v4843_v23, %v464_v13  ;;  %v693_v33 = vmul.f32 %v4845_v26, %v477_v15  ;;  %v1341_v15 = vpack.c.b16 %v1318_v48, %v1317_v46 }
  0xb2   : > { %5492 = vst [vmem:[#allocation25_spill] sm:$0xff] %v4845_v26 }
  0xb3   : > { %708 = vst [vmem:[#allocation2 + $0x28] sm:$0xff] %v4848_v27  ;;  %v775_v39 = vld [vmem:[#allocation2 + $0xf5] sm:$0xff]  ;;  %v776_v41 = vld [vmem:[#allocation2 + $0xfd] sm:$0xff] }
  0xb4   : > { %719 = vst [vmem:[#allocation2 + $0x80] sm:$0xff] %v680_v24  ;;  %v811_v55 = vpack.c.bf16 %v775_v39, %v775_v39  ;;  %v812_v11 = vpack.c.bf16 %v776_v41, %v776_v41  ;;  %v795_v39 = vpack.c.bf16 %v759_v62, %v759_v62  ;;  %v4186_v41 = vunpack.c.l.bf16 %v4339_v10 }
  0xb5   : > { %732 = vst [vmem:[#allocation2 + $0xe8] sm:$0xff] %v693_v33 }
  0xb6   : > { %v1323_v7 = vunpack.c.l.b16 %v811_v55  ;;  %v1324_v9 = vunpack.c.l.b16 %v812_v11  ;;  %v482_v55 = vmax.f32 %v446_v60, 0.0  ;;  %v379_v62 = vmul.f32 %v4585_v37, %v4186_v41 }
  0xb7   : > { %v4874_v13 = vpop.permute.xlu1 %614  ;;  %v4242_v60 = vunpack.c.l.bf16 %v4353_v56  ;;  %v4137_v56 = vld [vmem:[%s5432_s4 + $0x108] sm:$0xff] }
  0xb8   : > { %5493 = vst [vmem:[#allocation26_spill] sm:$0xff] %v4874_v13  ;;  %v1344_v61 = vpack.c.b16 %v1324_v9, %v1323_v7  ;;  %v4877_v18 = vpop.permute.xlu0 %609  ;;  %v4879_v21 = vpop.permute.xlu2 %569  ;;  %v692_v22 = vmul.f32 %v4874_v13, %v476_v59  ;;  %v465_v59 = vmax.f32 %v429_v31, 0.0  ;;  %v486_v7 = vmax.f32 %v450_v29, 0.0 }
  0xb9   : > { %5494 = vst [vmem:[#allocation27_spill] sm:$0xff] %v4877_v18  ;;  %v691_v24 = vmul.f32 %v4877_v18, %v475_v36  ;;  %v683_v33 = vmul.f32 %v4879_v21, %v467_v6  ;;  %v4138_v36 = vld [vmem:[%s5432_s4 + $0x110] sm:$0xff]  ;;  %v4113_v6 = vld [vmem:[%s5432_s4 + $0x48] sm:$0xff]  ;;  %v1307_v9 = vunpack.c.l.b16 %v795_v39  ;;  %v419_v41 = vadd.f32 %v4594_v40, %v379_v62 }
  0xba   : > { %5495 = vst [vmem:[#allocation28_spill] sm:$0xff] %v4879_v21  ;;  %2669 = vmatmul.bf16.gmra.mxu2 %v1341_v15  ;;  %2684 = vmatmul.bf16.vlgmr.msra.gmra.mxu3 %v1344_v61  ;;  %v749_v34 = vld [vmem:[#allocation2 + $0x25] sm:$0xff]  ;;  %v750_v35 = vld [vmem:[#allocation2 + $0x2d] sm:$0xff] }
  0xbb   : > { %731 = vst [vmem:[#allocation2 + $0xe0] sm:$0xff] %v692_v22  ;;  %v785_v45 = vpack.c.bf16 %v749_v34, %v749_v34  ;;  %v786_v46 = vpack.c.bf16 %v750_v35, %v750_v35  ;;  %v760_v48 = vld [vmem:[#allocation2 + $0x7d] sm:$0xff]  ;;  %v4130_v15 = vld [vmem:[%s5432_s4 + $0xd0] sm:$0xff]  ;;  %3002 = vmatpush.bf16.msrb.mxu0 %v4138_v36  ;;  %2706 = vmatpush.bf16.msrb.mxu1 %v4113_v6  ;;  %v777_v6 = vld [vmem:[#allocation2 + $0x105] sm:$0xff] }
  0xbc   : > { %730 = vst [vmem:[#allocation2 + $0xd8] sm:$0xff] %v691_v24  ;;  %v796_v11 = vpack.c.bf16 %v760_v48, %v760_v48  ;;  %v420_v34 = vadd.f32 %v4594_v40, %v380_v5  ;;  %2903 = vmatpush.bf16.msrb.mxu3 %v4130_v15  ;;  %v978_v26 = vld [vmem:[#allocation2 + $0x80] sm:$0xff]  ;;  %v980_v21 = vld [vmem:[#allocation2 + $0x90] sm:$0xff] }
  0xbd   : > { %722 = vst [vmem:[#allocation2 + $0x98] sm:$0xff] %v683_v33  ;;  %v1297_v1 = vunpack.c.l.b16 %v785_v45  ;;  %v1298_v3 = vunpack.c.l.b16 %v786_v46  ;;  %v4120_v45 = vld [vmem:[%s5432_s4 + $0x80] sm:$0xff]  ;;  %v4129_v46 = vld [vmem:[%s5432_s4 + $0xc8] sm:$0xff] }
  0xbe   : > { %v1308_v10 = vunpack.c.l.b16 %v796_v11  ;;  %2806 = vmatpush.bf16.msrb.mxu2 %v4120_v45 }
  0xbf   : > { %v1331_v61 = vpack.c.b16 %v1298_v3, %v1297_v1  ;;  %v4904_v22 = vpop.permute.xlu1 %559  ;;  %v456_v1 = vmax.f32 %v420_v34, 0.0  ;;  %3003 = vmatpush.bf16.msrb.mxu0 %v4137_v56  ;;  %v455_v3 = vmax.f32 %v419_v41, 0.0  ;;  %v4112_v41 = vld [vmem:[%s5432_s4 + $0x40] sm:$0xff] }
  0xc0   : > { %5496 = vst [vmem:[#allocation29_spill] sm:$0xff] %v4904_v22  ;;  %v1336_v31 = vpack.c.b16 %v1308_v10, %v1307_v9  ;;  %v4906_v24 = vpop.permute.xlu0 %644  ;;  %v4908_v29 = vpop.permute.xlu2 %664  ;;  %v4911_v33 = vmul.f32 %v4904_v22, %v465_v59  ;;  %v408_v59 = vmul.f32 %v4585_v37, %v4243_v32  ;;  %2904 = vmatpush.bf16.msrb.mxu3 %v4129_v46 }
  0xc1   : > { %5497 = vst [vmem:[#allocation30_spill] sm:$0xff] %v4906_v24  ;;  %2619 = vmatmul.bf16.gmra.mxu0 %v1331_v61  ;;  %v698_v35 = vmul.f32 %v4906_v24, %v482_v55  ;;  %v702_v39 = vmul.f32 %v4908_v29, %v486_v7  ;;  %v407_v55 = vmul.f32 %v4585_v37, %v4242_v60  ;;  %v4172_v24 = vld [vmem:[%s5432_s4 + $0x220] sm:$0xff] }
  0xc2   : > { %5498 = vst [vmem:[#allocation31_spill] sm:$0xff] %v4908_v29  ;;  %2644 = vmatmul.bf16.gmra.mxu1 %v1336_v31  ;;  %v448_v62 = vadd.f32 %v4594_v40, %v408_v59  ;;  %v813_v60 = vpack.c.bf16 %v777_v6, %v777_v6  ;;  %v4246_v31 = vunpack.c.l.bf16 %v4838_v50  ;;  %v4136_v50 = vld [vmem:[%s5432_s4 + $0x100] sm:$0xff]  ;;  %v818_v29 = vld [vmem:[#allocation2 + $0xe] sm:$0xff] }
  0xc3   : > { %720 = vst [vmem:[#allocation2 + $0x88] sm:$0xff] %v4911_v33  ;;  %v771_v48 = vld [vmem:[#allocation2 + $0xd5] sm:$0xff]  ;;  %v772_v11 = vld [vmem:[#allocation2 + $0xdd] sm:$0xff]  ;;  %v447_v10 = vadd.f32 %v4594_v40, %v407_v55  ;;  %2707 = vmatpush.bf16.msrb.mxu1 %v4112_v41  ;;  %v773_v6 = vld [vmem:[#allocation2 + $0xe5] sm:$0xff]  ;;  %3004 = vmatpush.bf16.msrb.mxu0 %v4136_v50 }
  0xc4   : > { %737 = vst [vmem:[#allocation2 + $0x110] sm:$0xff] %v698_v35  ;;  %v807_v57 = vpack.c.bf16 %v771_v48, %v771_v48  ;;  %v808_v58 = vpack.c.bf16 %v772_v11, %v772_v11  ;;  %v4128_v11 = vld [vmem:[%s5432_s4 + $0xc0] sm:$0xff]  ;;  %v4167_v50 = vld [vmem:[%s5432_s4 + $0x1f8] sm:$0xff] }
  0xc5   : > { %741 = vst [vmem:[#allocation2 + $0x130] sm:$0xff] %v702_v39  ;;  %v4190_v39 = vunpack.c.l.bf16 %v4647_v8  ;;  %v483_v56 = vmax.f32 %v447_v10, 0.0  ;;  %v484_v8 = vmax.f32 %v448_v62, 0.0  ;;  %2905 = vmatpush.bf16.msrb.mxu3 %v4128_v11  ;;  %v981_v19 = vld [vmem:[#allocation2 + $0x98] sm:$0xff] }
  0xc6   : > { %v1319_v5 = vunpack.c.l.b16 %v807_v57  ;;  %v1320_v36 = vunpack.c.l.b16 %v808_v58  ;;  %v4159_v58 = vld [vmem:[%s5432_s4 + $0x1b8] sm:$0xff] }
  0xc7   : > { %v4929_v7 = vpop.permute.xlu1 %514  ;;  %3195 = vmatpush.bf16.msra.mxu2 %v4159_v58  ;;  %v836_v0 = vld [vmem:[#allocation2 + $0x9e] sm:$0xff] }
  0xc8   : > { %5499 = vst [vmem:[#allocation32_spill] sm:$0xff] %v4929_v7  ;;  %v1342_v9 = vpack.c.b16 %v1320_v36, %v1319_v5  ;;  %v4933_v15 = vpop.permute.xlu0 %509  ;;  %v672_v61 = vmul.f32 %v4929_v7, %v456_v1  ;;  %v1325_v5 = vunpack.c.l.b16 %v813_v60  ;;  %v409_v36 = vmul.f32 %v4585_v37, %v4246_v31 }
  0xc9   : > { %5500 = vst [vmem:[#allocation33_spill] sm:$0xff] %v4933_v15  ;;  %v671_v32 = vmul.f32 %v4933_v15, %v455_v3  ;;  %3294 = vmatpush.bf16.msra.mxu3 %v4167_v50 }
  0xca   : > { %2674 = vmatmul.bf16.gmra.mxu2 %v1342_v9  ;;  %v761_v34 = vld [vmem:[#allocation2 + $0x85] sm:$0xff]  ;;  %v762_v35 = vld [vmem:[#allocation2 + $0x8d] sm:$0xff]  ;;  %711 = vst [vmem:[#allocation2 + $0x40] sm:$0xff] %v672_v61  ;;  %v1006_v55 = vpack.c.bf16 %v672_v61, %v672_v61  ;;  %v381_v61 = vmul.f32 %v4585_v37, %v4190_v39  ;;  %v449_v37 = vadd.f32 %v4594_v40, %v409_v36 }
  0xcb   : > { %v797_v45 = vpack.c.bf16 %v761_v34, %v761_v34  ;;  %v798_v46 = vpack.c.bf16 %v762_v35, %v762_v35  ;;  %v778_v48 = vld [vmem:[#allocation2 + $0x10d] sm:$0xff]  ;;  %710 = vst [vmem:[#allocation2 + $0x38] sm:$0xff] %v671_v32  ;;  %v1005_v59 = vpack.c.bf16 %v671_v32, %v671_v32 }
  0xcc   : > { %v814_v57 = vpack.c.bf16 %v778_v48, %v778_v48  ;;  %v4955_v62 = vunpack.c.l.b16 %v1006_v55  ;;  %v774_v35 = vld [vmem:[#allocation2 + $0xed] sm:$0xff]  ;;  %v421_v48 = vadd.f32 %v4594_v40, %v381_v61  ;;  %v4151_v55 = vld [vmem:[%s5432_s4 + $0x178] sm:$0xff] }
  0xcd   : > { %v1309_v1 = vunpack.c.l.b16 %v797_v45  ;;  %v1310_v3 = vunpack.c.l.b16 %v798_v46  ;;  %v4953_v10 = vunpack.c.l.b16 %v1005_v59  ;;  %v809_v45 = vpack.c.bf16 %v773_v6, %v773_v6  ;;  %3096 = vmatpush.bf16.msra.mxu1 %v4151_v55  ;;  %v763_v40 = vld [vmem:[#allocation2 + $0x95] sm:$0xff] }
  0xce   : > { %v1326_v9 = vunpack.c.l.b16 %v814_v57  ;;  %v810_v11 = vpack.c.bf16 %v774_v35, %v774_v35 }
  0xcf   : > { %v1337_v34 = vpack.c.b16 %v1310_v3, %v1309_v1  ;;  %v4957_v41 = vpop.permute.xlu1 %654  ;;  %v485_v1 = vmax.f32 %v449_v37, 0.0  ;;  %v764_v3 = vld [vmem:[#allocation2 + $0x9d] sm:$0xff]  ;;  %v889_v37 = vld [vmem:[#allocation2 + $0x7] sm:$0xff] }
  0xd0   : > { %5501 = vst [vmem:[#allocation34_spill] sm:$0xff] %v4957_v41  ;;  %v1345_v32 = vpack.c.b16 %v1326_v9, %v1325_v5  ;;  %v4961_v31 = vpop.permute.xlu0 %649  ;;  %v700_v46 = vmul.f32 %v4957_v41, %v484_v8  ;;  %v457_v5 = vmax.f32 %v421_v48, 0.0  ;;  %v1322_v9 = vunpack.c.l.b16 %v810_v11  ;;  %v890_v48 = vld [vmem:[#allocation2 + $0xf] sm:$0xff]  ;;  %v4175_v11 = vld [vmem:[%s5432_s4 + $0x238] sm:$0xff] }
  0xd1   : > { %5502 = vst [vmem:[#allocation35_spill] sm:$0xff] %v4961_v31  ;;  %v699_v39 = vmul.f32 %v4961_v31, %v483_v56  ;;  %v1321_v56 = vunpack.c.l.b16 %v809_v45  ;;  %3393 = vmatpush.bf16.msra.mxu0 %v4175_v11  ;;  %v830_v31 = vld [vmem:[#allocation2 + $0x6e] sm:$0xff] }
  0xd2   : > { %2649 = vmatmul.bf16.gmra.mxu1 %v1337_v34  ;;  %2689 = vmatmul.bf16.gmra.mxu3 %v1345_v32  ;;  %739 = vst [vmem:[#allocation2 + $0x120] sm:$0xff] %v700_v46  ;;  %v751_v57 = vld [vmem:[#allocation2 + $0x35] sm:$0xff]  ;;  %v752_v8 = vld [vmem:[#allocation2 + $0x3d] sm:$0xff]  ;;  %v799_v32 = vpack.c.bf16 %v763_v40, %v763_v40  ;;  %v800_v46 = vpack.c.bf16 %v764_v3, %v764_v3 }
  0xd3   : > { %738 = vst [vmem:[#allocation2 + $0x118] sm:$0xff] %v699_v39  ;;  %v787_v58 = vpack.c.bf16 %v751_v57, %v751_v57  ;;  %v788_v59 = vpack.c.bf16 %v752_v8, %v752_v8  ;;  %v1343_v35 = vpack.c.b16 %v1322_v9, %v1321_v56  ;;  %v925_v56 = vpack.c.bf16 %v889_v37, %v889_v37 }
  0xd4   : > { %v1311_v57 = vunpack.c.l.b16 %v799_v32  ;;  %v1312_v8 = vunpack.c.l.b16 %v800_v46 }
  0xd5   : > { %v1299_v36 = vunpack.c.l.b16 %v787_v58  ;;  %v1300_v6 = vunpack.c.l.b16 %v788_v59 }
  0xd7   : > { %v4973_v61 = vpop.permute.xlu1 %659  ;;  %v1332_v34 = vpack.c.b16 %v1300_v6, %v1299_v36  ;;  %v1509_v6 = vunpack.c.l.b16 %v925_v56 }
  0xd8   : > { %5503 = vst [vmem:[#allocation36_spill] sm:$0xff] %v4973_v61  ;;  %v4975_v60 = vpop.permute.xlu0 %519  ;;  %v701_v39 = vmul.f32 %v4973_v61, %v485_v1  ;;  %v926_v1 = vpack.c.bf16 %v890_v48, %v890_v48 }
  0xd9   : > { %5504 = vst [vmem:[#allocation37_spill] sm:$0xff] %v4975_v60  ;;  %v4979_v45 = vmul.f32 %v4975_v60, %v457_v5  ;;  %2624 = vmatmul.bf16.gmra.mxu0 %v1332_v34  ;;  %v1338_v5 = vpack.c.b16 %v1312_v8, %v1311_v57  ;;  %v817_v34 = vld [vmem:[#allocation2 + $0x6] sm:$0xff] }
  0xda   : > { %2679 = vmatmul.bf16.gmra.mxu2 %v1343_v35  ;;  %740 = vst [vmem:[#allocation2 + $0x128] sm:$0xff] %v701_v39  ;;  %v779_v50 = vld [vmem:[#allocation2 + $0x115] sm:$0xff]  ;;  %v780_v55 = vld [vmem:[#allocation2 + $0x11d] sm:$0xff]  ;;  %v1510_v9 = vunpack.c.l.b16 %v926_v1  ;;  %v853_v48 = vpack.c.bf16 %v817_v34, %v817_v34 }
  0xdb   : > { %712 = vst [vmem:[#allocation2 + $0x48] sm:$0xff] %v4979_v45  ;;  %v815_v58 = vpack.c.bf16 %v779_v50, %v779_v50  ;;  %v816_v59 = vpack.c.bf16 %v780_v55, %v780_v55  ;;  %v891_v50 = vld [vmem:[#allocation2 + $0x17] sm:$0xff]  ;;  %v892_v55 = vld [vmem:[#allocation2 + $0x1f] sm:$0xff] }
  0xdc   : > { %v1545_v46 = vpack.c.b16 %v1510_v9, %v1509_v6  ;;  %v927_v57 = vpack.c.bf16 %v891_v50, %v891_v50  ;;  %v928_v8 = vpack.c.bf16 %v892_v55, %v892_v55  ;;  %v1401_v56 = vunpack.c.l.b16 %v853_v48  ;;  %v893_v50 = vld [vmem:[#allocation2 + $0x27] sm:$0xff]  ;;  %v4150_v55 = vld [vmem:[%s5432_s4 + $0x170] sm:$0xff] }
  0xdd   : > { %v1327_v40 = vunpack.c.l.b16 %v815_v58  ;;  %v1328_v3 = vunpack.c.l.b16 %v816_v59  ;;  %v854_v58 = vpack.c.bf16 %v818_v29, %v818_v29  ;;  %v1001_v6 = vpack.c.bf16 %v4763_v17, %v4763_v17  ;;  %v4158_v29 = vld [vmem:[%s5432_s4 + $0x1b0] sm:$0xff]  ;;  %3097 = vmatpush.bf16.msra.mxu1 %v4150_v55 }
  0xde   : > { %3196 = vmatpush.bf16.msra.mxu2 %v4158_v29  ;;  %v894_v17 = vld [vmem:[#allocation2 + $0x2f] sm:$0xff]  ;;  %v821_v29 = vld [vmem:[#allocation2 + $0x26] sm:$0xff] }
  0xdf   : > { %v1346_v36 = vpack.c.b16 %v1328_v3, %v1327_v40  ;;  %v1402_v1 = vunpack.c.l.b16 %v854_v58  ;;  %v1511_v40 = vunpack.c.l.b16 %v927_v57  ;;  %v1512_v3 = vunpack.c.l.b16 %v928_v8 }
  0xe0   : > { %v1623_v34 = vunpack.c.l.b16 %v1001_v6  ;;  %v929_v58 = vpack.c.bf16 %v893_v50, %v893_v50  ;;  %v857_v50 = vpack.c.bf16 %v821_v29, %v821_v29  ;;  %v5505_v29 = vpack.c.b16 %v4955_v62, %v4953_v10  ;;  %v972_v10 = vld [vmem:[#allocation2 + $0x50] sm:$0xff] }
  0xe1   : > { %v1546_v9 = vpack.c.b16 %v1512_v3, %v1511_v40  ;;  %v4174_v40 = vld [vmem:[%s5432_s4 + $0x230] sm:$0xff] }
  0xe2   : > { %2654 = vmatmul.bf16.gmra.mxu1 %v1338_v5  ;;  %2694 = vmatmul.bf16.gmra.mxu3 %v1346_v36  ;;  %v753_v35 = vld [vmem:[#allocation2 + $0x45] sm:$0xff]  ;;  %v754_v39 = vld [vmem:[#allocation2 + $0x4d] sm:$0xff]  ;;  %v1437_v5 = vpack.c.b16 %v1402_v1, %v1401_v56  ;;  %v1513_v56 = vunpack.c.l.b16 %v929_v58 }
  0xe3   : > { %v789_v61 = vpack.c.bf16 %v753_v35, %v753_v35  ;;  %v790_v32 = vpack.c.bf16 %v754_v39, %v754_v39  ;;  %v966_v36 = vld [vmem:[#allocation2 + $0x20] sm:$0xff]  ;;  %v819_v39 = vld [vmem:[#allocation2 + $0x16] sm:$0xff]  ;;  %3394 = vmatpush.bf16.msra.mxu0 %v4174_v40 }
  0xe4   : > { %v1002_v35 = vpack.c.bf16 %v966_v36, %v966_v36  ;;  %v968_v3 = vld [vmem:[#allocation2 + $0x30] sm:$0xff] }
  0xe5   : > { %v1301_v11 = vunpack.c.l.b16 %v789_v61  ;;  %v1302_v37 = vunpack.c.l.b16 %v790_v32  ;;  %v4166_v61 = vld [vmem:[%s5432_s4 + $0x1f0] sm:$0xff] }
  0xe6   : > { %3295 = vmatpush.bf16.msra.mxu3 %v4166_v61  ;;  %v1624_v32 = vunpack.c.l.b16 %v1002_v35  ;;  %v1004_v35 = vpack.c.bf16 %v968_v3, %v968_v3  ;;  %v898_v40 = vld [vmem:[#allocation2 + $0x4f] sm:$0xff] }
  0xe7   : > { %v1333_v59 = vpack.c.b16 %v1302_v37, %v1301_v11  ;;  %v855_v37 = vpack.c.bf16 %v819_v39, %v819_v39  ;;  %v895_v39 = vld [vmem:[#allocation2 + $0x37] sm:$0xff]  ;;  %v4157_v3 = vld [vmem:[%s5432_s4 + $0x1a8] sm:$0xff] }
  0xe8   : > { %v1659_v11 = vpack.c.b16 %v1624_v32, %v1623_v34  ;;  %v1626_v61 = vunpack.c.l.b16 %v1004_v35  ;;  %v822_v34 = vld [vmem:[#allocation2 + $0x2e] sm:$0xff]  ;;  %v896_v32 = vld [vmem:[#allocation2 + $0x3f] sm:$0xff]  ;;  %v931_v55 = vpack.c.bf16 %v895_v39, %v895_v39  ;;  %3197 = vmatpush.bf16.msra.mxu2 %v4157_v3  ;;  %v934_v35 = vpack.c.bf16 %v898_v40, %v898_v40 }
  0xe9   : > { %2629 = vmatmul.bf16.gmra.mxu0 %v1333_v59  ;;  %v930_v59 = vpack.c.bf16 %v894_v17, %v894_v17  ;;  %v1403_v57 = vunpack.c.l.b16 %v855_v37  ;;  %v858_v17 = vpack.c.bf16 %v822_v34, %v822_v34  ;;  %v4149_v34 = vld [vmem:[%s5432_s4 + $0x168] sm:$0xff]  ;;  %v900_v3 = vld [vmem:[#allocation2 + $0x5f] sm:$0xff] }
  0xea   : > { %2807 = vmatmul.bf16.vlgmr.msrb.gmra.mxu2 %v1545_v46  ;;  %v820_v46 = vld [vmem:[#allocation2 + $0x1e] sm:$0xff]  ;;  %3098 = vmatpush.bf16.msra.mxu1 %v4149_v34 }
  0xeb   : > { %v856_v48 = vpack.c.bf16 %v820_v46, %v820_v46  ;;  %v1514_v1 = vunpack.c.l.b16 %v930_v59  ;;  %v1406_v37 = vunpack.c.l.b16 %v858_v17 }
  0xed   : > { %v1404_v8 = vunpack.c.l.b16 %v856_v48  ;;  %v1547_v6 = vpack.c.b16 %v1514_v1, %v1513_v56  ;;  %v1515_v48 = vunpack.c.l.b16 %v931_v55  ;;  %v824_v56 = vld [vmem:[#allocation2 + $0x3e] sm:$0xff]  ;;  %v897_v1 = vld [vmem:[#allocation2 + $0x47] sm:$0xff]  ;;  %v5017_v55 = vpop.f32.mrf.mxu0 }
  0xef   : > { %v1438_v36 = vpack.c.b16 %v1404_v8, %v1403_v57  ;;  %v823_v8 = vld [vmem:[#allocation2 + $0x36] sm:$0xff] }
  0xf2   : > { %2708 = vmatmul.bf16.vlgmr.msrb.gmra.mxu1 %v1437_v5  ;;  %2906 = vmatmul.bf16.vlgmr.msrb.gmra.mxu3 %v1546_v9  ;;  %v1003_v5 = vpack.c.bf16 %v4848_v27, %v4848_v27  ;;  %v1405_v27 = vunpack.c.l.b16 %v857_v50  ;;  %v1518_v50 = vunpack.c.l.b16 %v934_v35 }
  0xf4   : > { %v1439_v59 = vpack.c.b16 %v1406_v37, %v1405_v27  ;;  %v1007_v27 = vpack.c.bf16 %v4979_v45, %v4979_v45  ;;  %v1008_v37 = vpack.c.bf16 %v972_v10, %v972_v10  ;;  %v974_v10 = vld [vmem:[#allocation2 + $0x60] sm:$0xff] }
  0xf5   : > { %v5028_v35 = vpop.f32.mrf.mxu0 }
  0xf6   : > { %v1630_v40 = vunpack.c.l.b16 %v1008_v37 }
  0xf9   : > { %3005 = vmatmul.bf16.vlgmr.msrb.gmra.mxu0 %v1659_v11  ;;  %v932_v11 = vpack.c.bf16 %v896_v32, %v896_v32 }
  0xfa   : > { %2812 = vmatmul.bf16.gmra.mxu2 %v1546_v9  ;;  %v1625_v9 = vunpack.c.l.b16 %v1003_v5  ;;  %v859_v5 = vpack.c.bf16 %v823_v8, %v823_v8  ;;  %v825_v8 = vld [vmem:[#allocation2 + $0x46] sm:$0xff] }
  0xfb   : > { %v1516_v58 = vunpack.c.l.b16 %v932_v11  ;;  %v861_v45 = vpack.c.bf16 %v825_v8, %v825_v8 }
  0xfc   : > { %v1660_v46 = vpack.c.b16 %v1626_v61, %v1625_v9  ;;  %v4165_v61 = vld [vmem:[%s5432_s4 + $0x1e8] sm:$0xff]  ;;  %v1407_v39 = vunpack.c.l.b16 %v859_v5 }
  0xfd   : > { %v1548_v57 = vpack.c.b16 %v1516_v58, %v1515_v48  ;;  %3296 = vmatpush.bf16.msra.mxu3 %v4165_v61  ;;  %v4173_v48 = vld [vmem:[%s5432_s4 + $0x228] sm:$0xff]  ;;  %v1409_v61 = vunpack.c.l.b16 %v861_v45  ;;  %v828_v45 = vld [vmem:[#allocation2 + $0x5e] sm:$0xff] }
  0xfe   : > { %3395 = vmatpush.bf16.msra.mxu0 %v4173_v48 }
 0x102   : > { %2713 = vmatmul.bf16.gmra.mxu1 %v1438_v36  ;;  %2911 = vmatmul.bf16.gmra.mxu3 %v1547_v6  ;;  %v860_v36 = vpack.c.bf16 %v824_v56, %v824_v56  ;;  %v826_v56 = vld [vmem:[#allocation2 + $0x4e] sm:$0xff] }
 0x103   : > { %3396 = vmatpush.bf16.msra.mxu0 %v4172_v24  ;;  %v977_v24 = vld [vmem:[#allocation2 + $0x78] sm:$0xff] }
 0x104   : > { %v1408_v32 = vunpack.c.l.b16 %v860_v36  ;;  %v862_v36 = vpack.c.bf16 %v826_v56, %v826_v56 }
 0x106   : > { %v1440_v62 = vpack.c.b16 %v1408_v32, %v1407_v39  ;;  %v1410_v34 = vunpack.c.l.b16 %v862_v36  ;;  %v901_v36 = vld [vmem:[#allocation2 + $0x67] sm:$0xff] }
 0x109   : > { %3010 = vmatmul.bf16.gmra.mxu0 %v1660_v46 }
 0x10a   : > { %2817 = vmatmul.bf16.gmra.mxu2 %v1547_v6  ;;  %v933_v6 = vpack.c.bf16 %v897_v1, %v897_v1  ;;  %v899_v1 = vld [vmem:[#allocation2 + $0x57] sm:$0xff] }
 0x10c   : > { %v1517_v46 = vunpack.c.l.b16 %v933_v6  ;;  %v935_v6 = vpack.c.bf16 %v899_v1, %v899_v1 }
 0x10e   : > { %v1549_v11 = vpack.c.b16 %v1518_v50, %v1517_v46  ;;  %v1519_v39 = vunpack.c.l.b16 %v935_v6  ;;  %v973_v50 = vld [vmem:[#allocation2 + $0x58] sm:$0xff] }
 0x10f   : > { %v1009_v48 = vpack.c.bf16 %v973_v50, %v973_v50  ;;  %v4156_v50 = vld [vmem:[%s5432_s4 + $0x1a0] sm:$0xff] }
 0x110   : > { %3198 = vmatpush.bf16.msra.mxu2 %v4156_v50 }
 0x112   : > { %2718 = vmatmul.bf16.gmra.mxu1 %v1439_v59  ;;  %2916 = vmatmul.bf16.gmra.mxu3 %v1548_v57  ;;  %v1629_v59 = vunpack.c.l.b16 %v1007_v27  ;;  %v1441_v27 = vpack.c.b16 %v1410_v34, %v1409_v61  ;;  %v864_v34 = vpack.c.bf16 %v828_v45, %v828_v45  ;;  %v4148_v45 = vld [vmem:[%s5432_s4 + $0x160] sm:$0xff] }
 0x113   : > { %3099 = vmatpush.bf16.msra.mxu1 %v4148_v45 }
 0x114   : > { %v1662_v5 = vpack.c.b16 %v1630_v40, %v1629_v59  ;;  %v1010_v59 = vpack.c.bf16 %v974_v10, %v974_v10  ;;  %v827_v40 = vld [vmem:[#allocation2 + $0x56] sm:$0xff] }
 0x116   : > { %v5004_v9 = vpop.f32.mrf.mxu1  ;;  %v1632_v56 = vunpack.c.l.b16 %v1010_v59  ;;  %v976_v59 = vld [vmem:[#allocation2 + $0x70] sm:$0xff] }
 0x119   : > { %3015 = vmatmul.bf16.gmra.mxu0 %v5505_v29  ;;  %v936_v29 = vpack.c.bf16 %v900_v3, %v900_v3  ;;  %v902_v3 = vld [vmem:[#allocation2 + $0x6f] sm:$0xff] }
 0x11a   : > { %2822 = vmatmul.bf16.gmra.mxu2 %v1548_v57  ;;  %v938_v61 = vpack.c.bf16 %v902_v3, %v902_v3  ;;  %v975_v3 = vld [vmem:[#allocation2 + $0x68] sm:$0xff] }
 0x11d   : > { %v5015_v17 = vpop.f32.mrf.mxu2 }
 0x11e   : > { %v5024_v58 = vpop.f32.mrf.mxu1 }
 0x122   : > { %2723 = vmatmul.bf16.gmra.mxu1 %v1440_v62  ;;  %2921 = vmatmul.bf16.gmra.mxu3 %v1549_v11  ;;  %v1520_v62 = vunpack.c.l.b16 %v936_v29  ;;  %v863_v29 = vpack.c.bf16 %v827_v40, %v827_v40 }
 0x124   : > { %v1550_v37 = vpack.c.b16 %v1520_v62, %v1519_v39  ;;  %v937_v39 = vpack.c.bf16 %v901_v36, %v901_v36  ;;  %v1411_v10 = vunpack.c.l.b16 %v863_v29  ;;  %v1522_v62 = vunpack.c.l.b16 %v938_v61 }
 0x125   : > { %v5026_v57 = vpop.f32.mrf.mxu2  ;;  %v1012_v29 = vpack.c.bf16 %v976_v59, %v976_v59  ;;  %v1011_v61 = vpack.c.bf16 %v975_v3, %v975_v3  ;;  %v829_v59 = vld [vmem:[#allocation2 + $0x66] sm:$0xff]  ;;  %v866_v3 = vpack.c.bf16 %v830_v31, %v830_v31 }
 0x126   : > { %v5034_v8 = vpop.f32.mrf.mxu0 }
 0x127   : > { %v5030_v32 = vpop.f32.mrf.mxu1  ;;  %v1634_v41 = vunpack.c.l.b16 %v1012_v29  ;;  %v1414_v54 = vunpack.c.l.b16 %v866_v3  ;;  %v905_v3 = vld [vmem:[#allocation2 + $0x87] sm:$0xff] }
 0x129   : > { %3020 = vmatmul.bf16.gmra.mxu0 %v1662_v5 }
 0x12a   : > { %2827 = vmatmul.bf16.gmra.mxu2 %v1549_v11  ;;  %v1631_v11 = vunpack.c.l.b16 %v1009_v48 }
 0x12c   : > { %v1663_v6 = vpack.c.b16 %v1632_v56, %v1631_v11  ;;  %v4164_v11 = vld [vmem:[%s5432_s4 + $0x1e0] sm:$0xff]  ;;  %v1521_v56 = vunpack.c.l.b16 %v937_v39 }
 0x12d   : > { %v5032_v46 = vpop.f32.mrf.mxu2  ;;  %3297 = vmatpush.bf16.msra.mxu3 %v4164_v11  ;;  %v904_v11 = vld [vmem:[#allocation2 + $0x7f] sm:$0xff] }
 0x12e   : > { %v940_v45 = vpack.c.bf16 %v904_v11, %v904_v11  ;;  %v1013_v11 = vpack.c.bf16 %v977_v24, %v977_v24 }
 0x12f   : > { %v5038_v5 = vpop.f32.mrf.mxu1 }
 0x130   : > { %v1524_v44 = vunpack.c.l.b16 %v940_v45  ;;  %v906_v45 = vld [vmem:[#allocation2 + $0x8f] sm:$0xff] }
 0x132   : > { %2728 = vmatmul.bf16.gmra.mxu1 %v1441_v27  ;;  %2926 = vmatmul.bf16.gmra.mxu3 %v1550_v37  ;;  %v5043_v27 = vpop.f32.mrf.mxu0 }
 0x135   : > { %v5036_v1 = vpop.f32.mrf.mxu2 }
 0x139   : > { %3025 = vmatmul.bf16.gmra.mxu0 %v1663_v6  ;;  %v1551_v6 = vpack.c.b16 %v1522_v62, %v1521_v56 }
 0x13a   : > { %2832 = vmatmul.bf16.gmra.mxu2 %v1550_v37  ;;  %v1412_v37 = vunpack.c.l.b16 %v864_v34 }
 0x13c   : > { %v1442_v36 = vpack.c.b16 %v1412_v37, %v1411_v10  ;;  %v1633_v10 = vunpack.c.l.b16 %v1011_v61  ;;  %v903_v37 = vld [vmem:[#allocation2 + $0x77] sm:$0xff] }
 0x13d   : > { %v5045_v48 = vpop.f32.mrf.mxu2  ;;  %v5055_v50 = vpop.f32.mrf.mxu3  ;;  %v939_v29 = vpack.c.bf16 %v903_v37, %v903_v37 }
 0x13e   : > { %v5057_v34 = vpop.f32.mrf.mxu0  ;;  %v1664_v56 = vpack.c.b16 %v1634_v41, %v1633_v10 }
 0x13f   : > { %v5050_v40 = vpop.f32.mrf.mxu1  ;;  %v1523_v13 = vunpack.c.l.b16 %v939_v29 }
 0x141   : > { %v1552_v31 = vpack.c.b16 %v1524_v44, %v1523_v13  ;;  %v942_v13 = vpack.c.bf16 %v906_v45, %v906_v45  ;;  %v4163_v45 = vld [vmem:[%s5432_s4 + $0x1d8] sm:$0xff] }
 0x142   : > { %2733 = vmatmul.bf16.gmra.mxu1 %v1442_v36  ;;  %2931 = vmatmul.bf16.gmra.mxu3 %v1551_v6  ;;  %v865_v36 = vpack.c.bf16 %v829_v59, %v829_v59 }
 0x143   : > { %3298 = vmatpush.bf16.msra.mxu3 %v4163_v45  ;;  %v4171_v45 = vld [vmem:[%s5432_s4 + $0x218] sm:$0xff] }
 0x144   : > { %v1413_v61 = vunpack.c.l.b16 %v865_v36  ;;  %v1635_v36 = vunpack.c.l.b16 %v1013_v11  ;;  %3397 = vmatpush.bf16.msra.mxu0 %v4171_v45  ;;  %v910_v45 = vld [vmem:[#allocation2 + $0xaf] sm:$0xff] }
 0x145   : > { %v5059_v39 = vpop.f32.mrf.mxu2  ;;  %v5066_v49 = vpop.f32.mrf.mxu3 }
 0x146   : > { %v5070_v18 = vpop.f32.mrf.mxu0  ;;  %v1443_v41 = vpack.c.b16 %v1414_v54, %v1413_v61  ;;  %v867_v61 = vpack.c.bf16 %v831_v25, %v831_v25  ;;  %v4155_v25 = vld [vmem:[%s5432_s4 + $0x198] sm:$0xff] }
 0x147   : > { %v5064_v62 = vpop.f32.mrf.mxu1  ;;  %3199 = vmatpush.bf16.msra.mxu2 %v4155_v25 }
 0x148   : > { %v1415_v11 = vunpack.c.l.b16 %v867_v61  ;;  %v834_v61 = vld [vmem:[#allocation2 + $0x8e] sm:$0xff] }
 0x149   : > { %3030 = vmatmul.bf16.gmra.mxu0 %v1664_v56  ;;  %v832_v56 = vld [vmem:[#allocation2 + $0x7e] sm:$0xff]  ;;  %v870_v25 = vpack.c.bf16 %v834_v61, %v834_v61 }
 0x14a   : > { %2837 = vmatmul.bf16.gmra.mxu2 %v1551_v6  ;;  %v1014_v6 = vpack.c.bf16 %v978_v26, %v978_v26  ;;  %v868_v44 = vpack.c.bf16 %v832_v56, %v832_v56  ;;  %v941_v26 = vpack.c.bf16 %v905_v3, %v905_v3  ;;  %v1016_v3 = vpack.c.bf16 %v980_v21, %v980_v21  ;;  %v908_v21 = vld [vmem:[#allocation2 + $0x9f] sm:$0xff] }
 0x14b   : > { %v1418_v22 = vunpack.c.l.b16 %v870_v25  ;;  %v835_v25 = vld [vmem:[#allocation2 + $0x96] sm:$0xff] }
 0x14c   : > { %v1636_v10 = vunpack.c.l.b16 %v1014_v6  ;;  %v1416_v24 = vunpack.c.l.b16 %v868_v44  ;;  %v1526_v6 = vunpack.c.l.b16 %v942_v13  ;;  %v907_v44 = vld [vmem:[#allocation2 + $0x97] sm:$0xff]  ;;  %v833_v13 = vld [vmem:[#allocation2 + $0x86] sm:$0xff]  ;;  %v871_v20 = vpack.c.bf16 %v835_v25, %v835_v25 }
 0x14d   : > { %v5068_v4 = vpop.f32.mrf.mxu2  ;;  %v869_v52 = vpack.c.bf16 %v833_v13, %v833_v13  ;;  %v982_v13 = vld [vmem:[#allocation2 + $0xa0] sm:$0xff]  ;;  %v984_v25 = vld [vmem:[#allocation2 + $0xb0] sm:$0xff] }
 0x14e   : > { %v1665_v54 = vpack.c.b16 %v1636_v10, %v1635_v36  ;;  %v1444_v10 = vpack.c.b16 %v1416_v24, %v1415_v11  ;;  %v4147_v36 = vld [vmem:[%s5432_s4 + $0x158] sm:$0xff]  ;;  %v1638_v24 = vunpack.c.l.b16 %v1016_v3  ;;  %v943_v11 = vpack.c.bf16 %v907_v44, %v907_v44 }
 0x14f   : > { %v5072_v47 = vpop.f32.mrf.mxu1  ;;  %3100 = vmatpush.bf16.msra.mxu1 %v4147_v36  ;;  %v1417_v36 = vunpack.c.l.b16 %v869_v52 }
 0x150   : > { %v1527_v23 = vunpack.c.l.b16 %v943_v11 }
 0x151   : > { %v1445_v61 = vpack.c.b16 %v1418_v22, %v1417_v36  ;;  %v946_v22 = vpack.c.bf16 %v910_v45, %v910_v45 }
 0x152   : > { %2738 = vmatmul.bf16.gmra.mxu1 %v1443_v41  ;;  %2936 = vmatmul.bf16.gmra.mxu3 %v1552_v31  ;;  %v1525_v41 = vunpack.c.l.b16 %v941_v26 }
 0x154   : > { %v1553_v56 = vpack.c.b16 %v1526_v6, %v1525_v41 }
 0x155   : > { %v5074_v59 = vpop.f32.mrf.mxu2  ;;  %v5076_v37 = vpop.f32.mrf.mxu3 }
 0x156   : > { %v5078_v29 = vpop.f32.mrf.mxu0 }
 0x157   : > { %v5080_v53 = vpop.f32.mrf.mxu1 }
 0x159   : > { %3035 = vmatmul.bf16.gmra.mxu0 %v1665_v54 }
 0x15a   : > { %2842 = vmatmul.bf16.gmra.mxu2 %v1552_v31  ;;  %v1015_v31 = vpack.c.bf16 %v4911_v33, %v4911_v33 }
 0x15c   : > { %v1637_v54 = vunpack.c.l.b16 %v1015_v31  ;;  %v944_v31 = vpack.c.bf16 %v908_v21, %v908_v21 }
 0x15d   : > { %v5082_v28 = vpop.f32.mrf.mxu2  ;;  %v5084_v38 = vpop.f32.mrf.mxu3 }
 0x15e   : > { %v5086_v2 = vpop.f32.mrf.mxu0  ;;  %v1528_v30 = vunpack.c.l.b16 %v944_v31  ;;  %v909_v31 = vld [vmem:[#allocation2 + $0xa7] sm:$0xff] }
 0x15f   : > { %v5088_v42 = vpop.f32.mrf.mxu1 }
 0x160   : > { %v1554_v21 = vpack.c.b16 %v1528_v30, %v1527_v23  ;;  %v872_v23 = vpack.c.bf16 %v836_v0, %v836_v0 }
 0x162   : > { %2743 = vmatmul.bf16.gmra.mxu1 %v1444_v10  ;;  %2941 = vmatmul.bf16.gmra.mxu3 %v1553_v56  ;;  %v1666_v10 = vpack.c.b16 %v1638_v24, %v1637_v54  ;;  %v1017_v24 = vpack.c.bf16 %v981_v19, %v981_v19 }
 0x164   : > { %v1639_v11 = vunpack.c.l.b16 %v1017_v24 }
 0x165   : > { %v5101_v33 = vpop.f32.mrf.mxu2  ;;  %v5103_v26 = vpop.f32.mrf.mxu3 }
 0x166   : > { %v5105_v41 = vpop.f32.mrf.mxu0 }
 0x167   : > { %v5107_v6 = vpop.f32.mrf.mxu1 }
 0x169   : > { %3040 = vmatmul.bf16.gmra.mxu0 %v1666_v10  ;;  %v1018_v10 = vpack.c.bf16 %v982_v13, %v982_v13  ;;  %v1420_v13 = vunpack.c.l.b16 %v872_v23 }
 0x16a   : > { %2847 = vmatmul.bf16.gmra.mxu2 %v1553_v56 }
 0x16b   : > { %v1640_v7 = vunpack.c.l.b16 %v1018_v10 }
 0x16d   : > { %v5112_v3 = vpop.f32.mrf.mxu3  ;;  %v2808_v14 = vpop.f32.mrf.mxu2 }
 0x16e   : > { %v5114_v44 = vpop.f32.mrf.mxu0 }
 0x16f   : > { %v2709_v54 = vpop.f32.mrf.mxu1 }
 0x170   : > { %v2710_v56 = vadd.f32 %v2709_v54, %v5017_v55  ;;  %v945_v55 = vpack.c.bf16 %v909_v31, %v909_v31  ;;  %v1419_v54 = vunpack.c.l.b16 %v871_v20  ;;  %v4154_v20 = vld [vmem:[%s5432_s4 + $0x190] sm:$0xff] }
 0x171   : > { %3200 = vmatpush.bf16.msra.mxu2 %v4154_v20  ;;  %v986_v20 = vld [vmem:[#allocation2 + $0xc0] sm:$0xff] }
 0x172   : > { %2748 = vmatmul.bf16.gmra.mxu1 %v1445_v61  ;;  %2946 = vmatmul.bf16.gmra.mxu3 %v1554_v21  ;;  %v2809_v52 = vadd.f32 %v2808_v14, %v2710_v56  ;;  %v1667_v14 = vpack.c.b16 %v1640_v7, %v1639_v11  ;;  %v1529_v56 = vunpack.c.l.b16 %v945_v55  ;;  %v1530_v61 = vunpack.c.l.b16 %v946_v22  ;;  %v838_v11 = vld [vmem:[#allocation2 + $0xae] sm:$0xff] }
 0x173   : > { %v1446_v0 = vpack.c.b16 %v1420_v13, %v1419_v54 }
 0x174   : > { %v1555_v7 = vpack.c.b16 %v1530_v61, %v1529_v56 }
 0x175   : > { %v2810_v63 = vpop.f32.mrf.mxu2  ;;  %v2907_v51 = vpop.f32.mrf.mxu3 }
 0x176   : > { %v2908_v60 = vadd.f32 %v2907_v51, %v2809_v52  ;;  %v3006_v16 = vpop.f32.mrf.mxu0  ;;  %v983_v51 = vld [vmem:[#allocation2 + $0xa8] sm:$0xff] }
 0x177   : > { %v2711_v15 = vpop.f32.mrf.mxu1  ;;  %v1019_v43 = vpack.c.bf16 %v983_v51, %v983_v51  ;;  %v874_v51 = vpack.c.bf16 %v838_v11, %v838_v11  ;;  %v4170_v11 = vld [vmem:[%s5432_s4 + $0x210] sm:$0xff] }
 0x178   : > { %v2712_v19 = vadd.f32 %v2711_v15, %v5028_v35  ;;  %v5118_v30 = vadd.f32 %v3006_v16, %v2908_v60  ;;  %v1020_v60 = vpack.c.bf16 %v984_v25, %v984_v25  ;;  %v4146_v25 = vld [vmem:[%s5432_s4 + $0x150] sm:$0xff]  ;;  %3398 = vmatpush.bf16.msra.mxu0 %v4170_v11 }
 0x179   : > { %3045 = vmatmul.bf16.gmra.mxu0 %v1667_v14  ;;  %v1641_v35 = vunpack.c.l.b16 %v1019_v43  ;;  %v912_v14 = vld [vmem:[#allocation2 + $0xbf] sm:$0xff]  ;;  %3101 = vmatpush.bf16.msra.mxu1 %v4146_v25  ;;  %v914_v25 = vld [vmem:[#allocation2 + $0xcf] sm:$0xff] }
 0x17a   : > { %2852 = vmatmul.bf16.gmra.mxu2 %v1554_v21  ;;  %v2811_v36 = vadd.f32 %v2810_v63, %v2712_v19  ;;  %v837_v21 = vld [vmem:[#allocation2 + $0xa6] sm:$0xff]  ;;  %v1642_v19 = vunpack.c.l.b16 %v1020_v60 }
 0x17b   : > { %v873_v61 = vpack.c.bf16 %v837_v21, %v837_v21 }
 0x17c   : > { %v1668_v56 = vpack.c.b16 %v1642_v19, %v1641_v35 }
 0x17d   : > { %v2813_v24 = vpop.f32.mrf.mxu2  ;;  %v2909_v52 = vpop.f32.mrf.mxu3 }
 0x17e   : > { %v2910_v10 = vadd.f32 %v2909_v52, %v2811_v36  ;;  %v3008_v45 = vpop.f32.mrf.mxu0  ;;  %v4162_v36 = vld [vmem:[%s5432_s4 + $0x1d0] sm:$0xff] }
 0x17f   : > { %v2714_v31 = vpop.f32.mrf.mxu1  ;;  %3299 = vmatpush.bf16.msra.mxu3 %v4162_v36 }
 0x180   : > { %v2715_v16 = vadd.f32 %v2714_v31, %v5034_v8  ;;  %v5121_v15 = vadd.f32 %v3008_v45, %v2910_v10  ;;  %v911_v8 = vld [vmem:[#allocation2 + $0xb7] sm:$0xff]  ;;  %v948_v10 = vpack.c.bf16 %v912_v14, %v912_v14  ;;  %v1421_v45 = vunpack.c.l.b16 %v873_v61 }
 0x181   : > { %v947_v52 = vpack.c.bf16 %v911_v8, %v911_v8  ;;  %v839_v61 = vld [vmem:[#allocation2 + $0xb6] sm:$0xff] }
 0x182   : > { %2753 = vmatmul.bf16.gmra.mxu1 %v1446_v0  ;;  %2951 = vmatmul.bf16.gmra.mxu3 %v1555_v7  ;;  %v2814_v63 = vadd.f32 %v2813_v24, %v2715_v16  ;;  %v1422_v16 = vunpack.c.l.b16 %v874_v51  ;;  %v1532_v60 = vunpack.c.l.b16 %v948_v10  ;;  %v840_v51 = vld [vmem:[#allocation2 + $0xbe] sm:$0xff]  ;;  %v913_v10 = vld [vmem:[#allocation2 + $0xc7] sm:$0xff] }
 0x183   : > { %v1531_v0 = vunpack.c.l.b16 %v947_v52 }
 0x185   : > { %v2815_v55 = vpop.f32.mrf.mxu2  ;;  %v2912_v22 = vpop.f32.mrf.mxu3  ;;  %v1556_v36 = vpack.c.b16 %v1532_v60, %v1531_v0  ;;  %v949_v0 = vpack.c.bf16 %v913_v10, %v913_v10  ;;  %v950_v60 = vpack.c.bf16 %v914_v25, %v914_v25 }
 0x186   : > { %v2913_v23 = vadd.f32 %v2912_v22, %v2814_v63  ;;  %v3011_v13 = vpop.f32.mrf.mxu0  ;;  %v985_v63 = vld [vmem:[#allocation2 + $0xb8] sm:$0xff] }
 0x187   : > { %v2716_v54 = vpop.f32.mrf.mxu1  ;;  %v1021_v8 = vpack.c.bf16 %v985_v63, %v985_v63 }
 0x188   : > { %v2717_v43 = vadd.f32 %v2716_v54, %v5043_v27  ;;  %v5130_v24 = vadd.f32 %v3011_v13, %v2913_v23  ;;  %v1447_v23 = vpack.c.b16 %v1422_v16, %v1421_v45 }
 0x189   : > { %3050 = vmatmul.bf16.gmra.mxu0 %v1668_v56  ;;  %v1643_v13 = vunpack.c.l.b16 %v1021_v8  ;;  %v1534_v8 = vunpack.c.l.b16 %v950_v60 }
 0x18a   : > { %2857 = vmatmul.bf16.gmra.mxu2 %v1555_v7  ;;  %v2816_v31 = vadd.f32 %v2815_v55, %v2717_v43  ;;  %v1022_v7 = vpack.c.bf16 %v986_v20, %v986_v20 }
 0x18c   : > { %v1644_v56 = vunpack.c.l.b16 %v1022_v7  ;;  %v987_v7 = vld [vmem:[#allocation2 + $0xc8] sm:$0xff] }
 0x18d   : > { %v2818_v27 = vpop.f32.mrf.mxu2  ;;  %v2914_v35 = vpop.f32.mrf.mxu3 }
 0x18e   : > { %v2915_v21 = vadd.f32 %v2914_v35, %v2816_v31  ;;  %v3013_v19 = vpop.f32.mrf.mxu0  ;;  %v875_v35 = vpack.c.bf16 %v839_v61, %v839_v61 }
 0x18f   : > { %v2719_v22 = vpop.f32.mrf.mxu1 }
 0x190   : > { %v2720_v55 = vadd.f32 %v2719_v22, %v5057_v34  ;;  %v5139_v14 = vadd.f32 %v3013_v19, %v2915_v21  ;;  %v1669_v34 = vpack.c.b16 %v1644_v56, %v1643_v13  ;;  %v876_v21 = vpack.c.bf16 %v840_v51, %v840_v51 }
 0x191   : > { %v1423_v11 = vunpack.c.l.b16 %v875_v35  ;;  %v1533_v19 = vunpack.c.l.b16 %v949_v0  ;;  %v1023_v51 = vpack.c.bf16 %v987_v7, %v987_v7  ;;  %v916_v0 = vld [vmem:[#allocation2 + $0xdf] sm:$0xff] }
 0x192   : > { %2758 = vmatmul.bf16.gmra.mxu1 %v1447_v23  ;;  %2956 = vmatmul.bf16.gmra.mxu3 %v1556_v36  ;;  %v2819_v54 = vadd.f32 %v2818_v27, %v2720_v55  ;;  %v1424_v22 = vunpack.c.l.b16 %v876_v21  ;;  %v988_v55 = vld [vmem:[#allocation2 + $0xd0] sm:$0xff] }
 0x193   : > { %v1557_v25 = vpack.c.b16 %v1534_v8, %v1533_v19  ;;  %v952_v8 = vpack.c.bf16 %v916_v0, %v916_v0 }
 0x195   : > { %v2820_v43 = vpop.f32.mrf.mxu2  ;;  %v2917_v52 = vpop.f32.mrf.mxu3 }
 0x196   : > { %v2918_v31 = vadd.f32 %v2917_v52, %v2819_v54  ;;  %v3016_v20 = vpop.f32.mrf.mxu0 }
 0x197   : > { %v2721_v63 = vpop.f32.mrf.mxu1 }
 0x198   : > { %v2722_v45 = vadd.f32 %v2721_v63, %v5070_v18  ;;  %v5142_v16 = vadd.f32 %v3016_v20, %v2918_v31  ;;  %v1024_v18 = vpack.c.bf16 %v988_v55, %v988_v55  ;;  %v1645_v31 = vunpack.c.l.b16 %v1023_v51  ;;  %v841_v20 = vld [vmem:[#allocation2 + $0xc6] sm:$0xff] }
 0x199   : > { %3055 = vmatmul.bf16.gmra.mxu0 %v1669_v34  ;;  %v842_v34 = vld [vmem:[#allocation2 + $0xce] sm:$0xff] }
 0x19a   : > { %2862 = vmatmul.bf16.gmra.mxu2 %v1556_v36  ;;  %v2821_v27 = vadd.f32 %v2820_v43, %v2722_v45  ;;  %v1448_v36 = vpack.c.b16 %v1424_v22, %v1423_v11  ;;  %v1646_v63 = vunpack.c.l.b16 %v1024_v18  ;;  %v915_v45 = vld [vmem:[#allocation2 + $0xd7] sm:$0xff] }
 0x19b   : > { %v951_v19 = vpack.c.bf16 %v915_v45, %v915_v45 }
 0x19c   : > { %v1670_v55 = vpack.c.b16 %v1646_v63, %v1645_v31  ;;  %v990_v31 = vld [vmem:[#allocation2 + $0xe0] sm:$0xff] }
 0x19d   : > { %v2823_v23 = vpop.f32.mrf.mxu2  ;;  %v2919_v54 = vpop.f32.mrf.mxu3  ;;  %v1535_v18 = vunpack.c.l.b16 %v951_v19  ;;  %v844_v19 = vld [vmem:[#allocation2 + $0xde] sm:$0xff] }
 0x19e   : > { %v2920_v13 = vadd.f32 %v2919_v54, %v2821_v27  ;;  %v3018_v61 = vpop.f32.mrf.mxu0  ;;  %v878_v54 = vpack.c.bf16 %v842_v34, %v842_v34 }
 0x19f   : > { %v2724_v56 = vpop.f32.mrf.mxu1 }
 0x1a0   : > { %v2725_v52 = vadd.f32 %v2724_v56, %v5078_v29  ;;  %v5145_v10 = vadd.f32 %v3018_v61, %v2920_v13  ;;  %v877_v29 = vpack.c.bf16 %v841_v20, %v841_v20  ;;  %v4161_v56 = vld [vmem:[%s5432_s4 + $0x1c8] sm:$0xff]  ;;  %v1426_v51 = vunpack.c.l.b16 %v878_v54 }
 0x1a1   : > { %v4145_v61 = vld [vmem:[%s5432_s4 + $0x148] sm:$0xff]  ;;  %3300 = vmatpush.bf16.msra.mxu3 %v4161_v56 }
 0x1a2   : > { %2763 = vmatmul.bf16.gmra.mxu1 %v1448_v36  ;;  %2961 = vmatmul.bf16.gmra.mxu3 %v1557_v25  ;;  %v2824_v43 = vadd.f32 %v2823_v23, %v2725_v52  ;;  %v4153_v23 = vld [vmem:[%s5432_s4 + $0x188] sm:$0xff]  ;;  %v1536_v52 = vunpack.c.l.b16 %v952_v8  ;;  %v989_v36 = vld [vmem:[#allocation2 + $0xd8] sm:$0xff] }
 0x1a3   : > { %3201 = vmatpush.bf16.msra.mxu2 %v4153_v23  ;;  %3102 = vmatpush.bf16.msra.mxu1 %v4145_v61 }
 0x1a5   : > { %v2825_v35 = vpop.f32.mrf.mxu2  ;;  %v2922_v21 = vpop.f32.mrf.mxu3 }
 0x1a6   : > { %v2923_v60 = vadd.f32 %v2922_v21, %v2824_v43  ;;  %v3021_v7 = vpop.f32.mrf.mxu0  ;;  %v1025_v21 = vpack.c.bf16 %v989_v36, %v989_v36 }
 0x1a7   : > { %v2726_v27 = vpop.f32.mrf.mxu1 }
 0x1a8   : > { %v2727_v11 = vadd.f32 %v2726_v27, %v5086_v2  ;;  %v5148_v22 = vadd.f32 %v3021_v7, %v2923_v60  ;;  %v1425_v2 = vunpack.c.l.b16 %v877_v29  ;;  %v1558_v60 = vpack.c.b16 %v1536_v52, %v1535_v18  ;;  %v918_v18 = vld [vmem:[#allocation2 + $0xef] sm:$0xff] }
 0x1a9   : > { %3060 = vmatmul.bf16.gmra.mxu0 %v1670_v55  ;;  %v1026_v27 = vpack.c.bf16 %v990_v31, %v990_v31  ;;  %v4169_v55 = vld [vmem:[%s5432_s4 + $0x208] sm:$0xff]  ;;  %v1647_v29 = vunpack.c.l.b16 %v1025_v21 }
 0x1aa   : > { %2867 = vmatmul.bf16.gmra.mxu2 %v1557_v25  ;;  %v2826_v13 = vadd.f32 %v2825_v35, %v2727_v11  ;;  %v1449_v35 = vpack.c.b16 %v1426_v51, %v1425_v2  ;;  %v843_v11 = vld [vmem:[#allocation2 + $0xd6] sm:$0xff]  ;;  %3399 = vmatpush.bf16.msra.mxu0 %v4169_v55  ;;  %v880_v51 = vpack.c.bf16 %v844_v19, %v844_v19  ;;  %v991_v21 = vld [vmem:[#allocation2 + $0xe8] sm:$0xff] }
 0x1ab   : > { %v1648_v54 = vunpack.c.l.b16 %v1026_v27  ;;  %v879_v2 = vpack.c.bf16 %v843_v11, %v843_v11 }
 0x1ad   : > { %v2828_v43 = vpop.f32.mrf.mxu2  ;;  %v2924_v25 = vpop.f32.mrf.mxu3 }
 0x1ae   : > { %v2925_v63 = vadd.f32 %v2924_v25, %v2826_v13  ;;  %v3023_v34 = vpop.f32.mrf.mxu0  ;;  %v917_v13 = vld [vmem:[#allocation2 + $0xe7] sm:$0xff] }
 0x1af   : > { %v2729_v20 = vpop.f32.mrf.mxu1  ;;  %v953_v25 = vpack.c.bf16 %v917_v13, %v917_v13 }
 0x1b0   : > { %v2730_v45 = vadd.f32 %v2729_v20, %v5105_v41  ;;  %v5160_v0 = vadd.f32 %v3023_v34, %v2925_v63  ;;  %v954_v63 = vpack.c.bf16 %v918_v18, %v918_v18  ;;  %v1427_v20 = vunpack.c.l.b16 %v879_v2  ;;  %v920_v2 = vld [vmem:[#allocation2 + $0xff] sm:$0xff] }
 0x1b1   : > { %v1428_v34 = vunpack.c.l.b16 %v880_v51 }
 0x1b2   : > { %2768 = vmatmul.bf16.gmra.mxu1 %v1449_v35  ;;  %2966 = vmatmul.bf16.gmra.mxu3 %v1558_v60  ;;  %v2829_v7 = vadd.f32 %v2828_v43, %v2730_v45  ;;  %v1671_v43 = vpack.c.b16 %v1648_v54, %v1647_v29  ;;  %v1537_v35 = vunpack.c.l.b16 %v953_v25  ;;  %v1538_v55 = vunpack.c.l.b16 %v954_v63 }
 0x1b4   : > { %v1559_v54 = vpack.c.b16 %v1538_v55, %v1537_v35 }
 0x1b5   : > { %v2830_v8 = vpop.f32.mrf.mxu2  ;;  %v2927_v23 = vpop.f32.mrf.mxu3 }
 0x1b6   : > { %v2928_v41 = vadd.f32 %v2927_v23, %v2829_v7  ;;  %v3026_v61 = vpop.f32.mrf.mxu0  ;;  %v992_v23 = vld [vmem:[#allocation2 + $0xf0] sm:$0xff] }
 0x1b7   : > { %v2731_v56 = vpop.f32.mrf.mxu1  ;;  %v1028_v13 = vpack.c.bf16 %v992_v23, %v992_v23 }
 0x1b8   : > { %v2732_v52 = vadd.f32 %v2731_v56, %v5114_v44  ;;  %v5166_v36 = vadd.f32 %v3026_v61, %v2928_v41  ;;  %v1027_v44 = vpack.c.bf16 %v991_v21, %v991_v21  ;;  %v919_v61 = vld [vmem:[#allocation2 + $0xf7] sm:$0xff]  ;;  %v846_v21 = vld [vmem:[#allocation2 + $0xee] sm:$0xff] }
 0x1b9   : > { %3065 = vmatmul.bf16.gmra.mxu0 %v1671_v43  ;;  %v1650_v25 = vunpack.c.l.b16 %v1028_v13  ;;  %v882_v55 = vpack.c.bf16 %v846_v21, %v846_v21 }
 0x1ba   : > { %2872 = vmatmul.bf16.gmra.mxu2 %v1558_v60  ;;  %v2831_v31 = vadd.f32 %v2830_v8, %v2732_v52  ;;  %v1450_v60 = vpack.c.b16 %v1428_v34, %v1427_v20  ;;  %v1649_v56 = vunpack.c.l.b16 %v1027_v44  ;;  %v845_v52 = vld [vmem:[#allocation2 + $0xe6] sm:$0xff] }
 0x1bc   : > { %v1672_v35 = vpack.c.b16 %v1650_v25, %v1649_v56 }
 0x1bd   : > { %v2833_v45 = vpop.f32.mrf.mxu2  ;;  %v2929_v27 = vpop.f32.mrf.mxu3 }
 0x1be   : > { %v2930_v7 = vadd.f32 %v2929_v27, %v2831_v31  ;;  %v3028_v19 = vpop.f32.mrf.mxu0  ;;  %v956_v27 = vpack.c.bf16 %v920_v2, %v920_v2 }
 0x1bf   : > { %v2734_v11 = vpop.f32.mrf.mxu1 }
 0x1c0   : > { %v2735_v41 = vadd.f32 %v2734_v11, %v5004_v9  ;;  %v5169_v29 = vadd.f32 %v3028_v19, %v2930_v7  ;;  %v955_v9 = vpack.c.bf16 %v919_v61, %v919_v61  ;;  %v4152_v11 = vld [vmem:[%s5432_s4 + $0x180] sm:$0xff]  ;;  %v1540_v44 = vunpack.c.l.b16 %v956_v27 }
 0x1c1   : > { %3202 = vmatpush.bf16.msra.mxu2 %v4152_v11  ;;  %v1430_v61 = vunpack.c.l.b16 %v882_v55  ;;  %v4168_v11 = vld [vmem:[%s5432_s4 + $0x200] sm:$0xff] }
 0x1c2   : > { %2773 = vmatmul.bf16.gmra.mxu1 %v1450_v60  ;;  %2971 = vmatmul.bf16.gmra.mxu3 %v1559_v54  ;;  %v2834_v8 = vadd.f32 %v2833_v45, %v2735_v41  ;;  %v881_v45 = vpack.c.bf16 %v845_v52, %v845_v52  ;;  %v1539_v23 = vunpack.c.l.b16 %v955_v9  ;;  %v993_v41 = vld [vmem:[#allocation2 + $0xf8] sm:$0xff]  ;;  %v994_v60 = vld [vmem:[#allocation2 + $0x100] sm:$0xff] }
 0x1c3   : > { %3400 = vmatpush.bf16.msra.mxu0 %v4168_v11 }
 0x1c4   : > { %v1429_v19 = vunpack.c.l.b16 %v881_v45 }
 0x1c5   : > { %v2835_v51 = vpop.f32.mrf.mxu2  ;;  %v2932_v18 = vpop.f32.mrf.mxu3 }
 0x1c6   : > { %v2933_v43 = vadd.f32 %v2932_v18, %v2834_v8  ;;  %v3031_v63 = vpop.f32.mrf.mxu0  ;;  %v1030_v18 = vpack.c.bf16 %v994_v60, %v994_v60  ;;  %v1451_v25 = vpack.c.b16 %v1430_v61, %v1429_v19  ;;  %v921_v60 = vld [vmem:[#allocation2 + $0x107] sm:$0xff] }
 0x1c7   : > { %v2736_v31 = vpop.f32.mrf.mxu1 }
 0x1c8   : > { %v2737_v20 = vadd.f32 %v2736_v31, %v5024_v58  ;;  %v5172_v34 = vadd.f32 %v3031_v63, %v2933_v43  ;;  %v1560_v31 = vpack.c.b16 %v1540_v44, %v1539_v23  ;;  %v4144_v63 = vld [vmem:[%s5432_s4 + $0x140] sm:$0xff]  ;;  %v1652_v27 = vunpack.c.l.b16 %v1030_v18 }
 0x1c9   : > { %3070 = vmatmul.bf16.gmra.mxu0 %v1672_v35  ;;  %3103 = vmatpush.bf16.msra.mxu1 %v4144_v63  ;;  %v848_v35 = vld [vmem:[#allocation2 + $0xfe] sm:$0xff] }
 0x1ca   : > { %2877 = vmatmul.bf16.gmra.mxu2 %v1559_v54  ;;  %v2836_v7 = vadd.f32 %v2835_v51, %v2737_v20  ;;  %v4160_v54 = vld [vmem:[%s5432_s4 + $0x1c0] sm:$0xff]  ;;  %v1029_v51 = vpack.c.bf16 %v993_v41, %v993_v41  ;;  %v847_v20 = vld [vmem:[#allocation2 + $0xf6] sm:$0xff]  ;;  %v884_v41 = vpack.c.bf16 %v848_v35, %v848_v35  ;;  %v995_v35 = vld [vmem:[#allocation2 + $0x108] sm:$0xff] }
 0x1cb   : > { %3301 = vmatpush.bf16.msra.mxu3 %v4160_v54  ;;  %v883_v44 = vpack.c.bf16 %v847_v20, %v847_v20 }
 0x1cc   : > { %v1651_v9 = vunpack.c.l.b16 %v1029_v51  ;;  %v1432_v51 = vunpack.c.l.b16 %v884_v41 }
 0x1cd   : > { %v2838_v8 = vpop.f32.mrf.mxu2  ;;  %v2934_v58 = vpop.f32.mrf.mxu3 }
 0x1ce   : > { %v2935_v13 = vadd.f32 %v2934_v58, %v2836_v7  ;;  %v3033_v2 = vpop.f32.mrf.mxu0 }
 0x1cf   : > { %v2739_v56 = vpop.f32.mrf.mxu1 }
 0x1d0   : > { %v2740_v52 = vadd.f32 %v2739_v56, %v5030_v32  ;;  %v5181_v43 = vadd.f32 %v3033_v2, %v2935_v13  ;;  %v922_v32 = vld [vmem:[#allocation2 + $0x10f] sm:$0xff]  ;;  %v1673_v13 = vpack.c.b16 %v1652_v27, %v1651_v9  ;;  %v957_v56 = vpack.c.bf16 %v921_v60, %v921_v60 }
 0x1d1   : > { %v958_v61 = vpack.c.bf16 %v922_v32, %v922_v32  ;;  %v1431_v2 = vunpack.c.l.b16 %v883_v44 }
 0x1d2   : > { %2778 = vmatmul.bf16.gmra.mxu1 %v1451_v25  ;;  %2976 = vmatmul.bf16.gmra.mxu3 %v1560_v31  ;;  %v2839_v21 = vadd.f32 %v2838_v8, %v2740_v52  ;;  %v996_v52 = vld [vmem:[#allocation2 + $0x110] sm:$0xff]  ;;  %v1541_v20 = vunpack.c.l.b16 %v957_v56 }
 0x1d3   : > { %v1542_v18 = vunpack.c.l.b16 %v958_v61 }
 0x1d5   : > { %v2840_v45 = vpop.f32.mrf.mxu2  ;;  %v2937_v7 = vpop.f32.mrf.mxu3  ;;  %v1561_v32 = vpack.c.b16 %v1542_v18, %v1541_v20 }
 0x1d6   : > { %v2938_v55 = vadd.f32 %v2937_v7, %v2839_v21  ;;  %v3036_v23 = vpop.f32.mrf.mxu0 }
 0x1d7   : > { %v2741_v19 = vpop.f32.mrf.mxu1 }
 0x1d8   : > { %v2742_v8 = vadd.f32 %v2741_v19, %v5038_v5  ;;  %v5190_v58 = vadd.f32 %v3036_v23, %v2938_v55  ;;  %v1032_v55 = vpack.c.bf16 %v996_v52, %v996_v52  ;;  %v850_v23 = vld [vmem:[#allocation2 + $0x10e] sm:$0xff] }
 0x1d9   : > { %3075 = vmatmul.bf16.gmra.mxu0 %v1673_v13  ;;  %v924_v13 = vld [vmem:[#allocation2 + $0x11f] sm:$0xff] }
 0x1da   : > { %2882 = vmatmul.bf16.gmra.mxu2 %v1560_v31  ;;  %v2841_v54 = vadd.f32 %v2840_v45, %v2742_v8  ;;  %v1452_v31 = vpack.c.b16 %v1432_v51, %v1431_v2  ;;  %v1031_v45 = vpack.c.bf16 %v995_v35, %v995_v35  ;;  %v1654_v19 = vunpack.c.l.b16 %v1032_v55  ;;  %v923_v8 = vld [vmem:[#allocation2 + $0x117] sm:$0xff] }
 0x1db   : > { %v959_v18 = vpack.c.bf16 %v923_v8, %v923_v8  ;;  %v997_v55 = vld [vmem:[#allocation2 + $0x118] sm:$0xff] }
 0x1dc   : > { %v1653_v60 = vunpack.c.l.b16 %v1031_v45 }
 0x1dd   : > { %v2843_v25 = vpop.f32.mrf.mxu2  ;;  %v2939_v63 = vpop.f32.mrf.mxu3 }
 0x1de   : > { %v2940_v21 = vadd.f32 %v2939_v63, %v2841_v54  ;;  %v3038_v5 = vpop.f32.mrf.mxu0  ;;  %v1674_v52 = vpack.c.b16 %v1654_v19, %v1653_v60  ;;  %v886_v63 = vpack.c.bf16 %v850_v23, %v850_v23 }
 0x1df   : > { %v2744_v7 = vpop.f32.mrf.mxu1 }
 0x1e0   : > { %v2745_v9 = vadd.f32 %v2744_v7, %v5050_v40  ;;  %v5193_v27 = vadd.f32 %v3038_v5, %v2940_v21  ;;  %v849_v40 = vld [vmem:[#allocation2 + $0x106] sm:$0xff]  ;;  %v960_v21 = vpack.c.bf16 %v924_v13, %v924_v13  ;;  %v1434_v35 = vunpack.c.l.b16 %v886_v63 }
 0x1e1   : > { %v885_v20 = vpack.c.bf16 %v849_v40, %v849_v40  ;;  %v1543_v7 = vunpack.c.l.b16 %v959_v18  ;;  %v852_v40 = vld [vmem:[#allocation2 + $0x11e] sm:$0xff]  ;;  %v961_v18 = vld [vmem:[#allocation2 + $0x127] sm:$0xff] }
 0x1e2   : > { %2783 = vmatmul.bf16.gmra.mxu1 %v1452_v31  ;;  %2981 = vmatmul.bf16.gmra.mxu3 %v1561_v32  ;;  %v2844_v11 = vadd.f32 %v2843_v25, %v2745_v9  ;;  %v1544_v5 = vunpack.c.l.b16 %v960_v21  ;;  %v998_v9 = vld [vmem:[#allocation2 + $0x120] sm:$0xff]  ;;  %v962_v21 = vld [vmem:[#allocation2 + $0x12f] sm:$0xff] }
 0x1e3   : > { %v1433_v19 = vunpack.c.l.b16 %v885_v20  ;;  %v1034_v60 = vpack.c.bf16 %v998_v9, %v998_v9 }
 0x1e5   : > { %v2845_v44 = vpop.f32.mrf.mxu2  ;;  %v2942_v41 = vpop.f32.mrf.mxu3 }
 0x1e6   : > { %v2943_v61 = vadd.f32 %v2942_v41, %v2844_v11  ;;  %v3041_v56 = vpop.f32.mrf.mxu0 }
 0x1e7   : > { %v2746_v54 = vpop.f32.mrf.mxu1 }
 0x1e8   : > { %v2747_v2 = vadd.f32 %v2746_v54, %v5064_v62  ;;  %v5196_v51 = vadd.f32 %v3041_v56, %v2943_v61  ;;  %v1033_v62 = vpack.c.bf16 %v997_v55, %v997_v55  ;;  %v1656_v56 = vunpack.c.l.b16 %v1034_v60  ;;  %v1040_v60 = vld [vmem:[#allocation2 + $0x31] sm:$0xff] }
 0x1e9   : > { %3080 = vmatmul.bf16.gmra.mxu0 %v1674_v52  ;;  %v851_v52 = vld [vmem:[#allocation2 + $0x116] sm:$0xff] }
 0x1ea   : > { %2887 = vmatmul.bf16.gmra.mxu2 %v1561_v32  ;;  %v2846_v25 = vadd.f32 %v2845_v44, %v2747_v2  ;;  %v1453_v32 = vpack.c.b16 %v1434_v35, %v1433_v19  ;;  %v1562_v44 = vpack.c.b16 %v1544_v5, %v1543_v7  ;;  %v1655_v54 = vunpack.c.l.b16 %v1033_v62 }
 0x1eb   : > { %v963_v5 = vpack.c.bf16 %v961_v18, %v961_v18 }
 0x1ec   : > { %v1675_v9 = vpack.c.b16 %v1656_v56, %v1655_v54 }
 0x1ed   : > { %v2848_v31 = vpop.f32.mrf.mxu2  ;;  %v2944_v45 = vpop.f32.mrf.mxu3 }
 0x1ee   : > { %v2945_v11 = vadd.f32 %v2944_v45, %v2846_v25  ;;  %v3043_v41 = vpop.f32.mrf.mxu0  ;;  %v888_v45 = vpack.c.bf16 %v852_v40, %v852_v40 }
 0x1ef   : > { %v2749_v23 = vpop.f32.mrf.mxu1 }
 0x1f0   : > { %v2750_v8 = vadd.f32 %v2749_v23, %v5072_v47  ;;  %v5199_v13 = vadd.f32 %v3043_v41, %v2945_v11  ;;  %v887_v47 = vpack.c.bf16 %v851_v52, %v851_v52  ;;  %v1436_v23 = vunpack.c.l.b16 %v888_v45 }
 0x1f1   : > { %v1583_v41 = vunpack.c.l.b16 %v963_v5  ;;  %v1114_v5 = vld [vmem:[#allocation2 + $0x32] sm:$0xff] }
 0x1f2   : > { %2788 = vmatmul.bf16.gmra.mxu1 %v1453_v32  ;;  %2986 = vmatmul.bf16.gmra.mxu3 %v1562_v44  ;;  %v2849_v61 = vadd.f32 %v2848_v31, %v2750_v8  ;;  %v964_v31 = vpack.c.bf16 %v962_v21, %v962_v21  ;;  %v1435_v19 = vunpack.c.l.b16 %v887_v47 }
 0x1f4   : > { %v1584_v62 = vunpack.c.l.b16 %v964_v31  ;;  %v1454_v40 = vpack.c.b16 %v1436_v23, %v1435_v19 }
 0x1f5   : > { %v2850_v63 = vpop.f32.mrf.mxu2  ;;  %v2947_v2 = vpop.f32.mrf.mxu3 }
 0x1f6   : > { %v2948_v25 = vadd.f32 %v2947_v2, %v2849_v61  ;;  %v3046_v55 = vpop.f32.mrf.mxu0  ;;  %v999_v61 = vld [vmem:[#allocation2 + $0x128] sm:$0xff] }
 0x1f7   : > { %v2751_v20 = vpop.f32.mrf.mxu1  ;;  %v1039_v2 = vld [vmem:[#allocation2 + $0x29] sm:$0xff]  ;;  %v1035_v21 = vpack.c.bf16 %v999_v61, %v999_v61 }
 0x1f8   : > { %v2752_v35 = vadd.f32 %v2751_v20, %v5080_v53  ;;  %v5202_v7 = vadd.f32 %v3046_v55, %v2948_v25  ;;  %v1000_v53 = vld [vmem:[#allocation2 + $0x130] sm:$0xff]  ;;  %v1076_v25 = vpack.c.bf16 %v1040_v60, %v1040_v60 }
 0x1f9   : > { %3085 = vmatmul.bf16.gmra.mxu0 %v1675_v9  ;;  %v1036_v55 = vpack.c.bf16 %v1000_v53, %v1000_v53  ;;  %v1075_v9 = vpack.c.bf16 %v1039_v2, %v1039_v2  ;;  %v1657_v47 = vunpack.c.l.b16 %v1035_v21  ;;  %v1186_v21 = vld [vmem:[#allocation2 + $0x33] sm:$0xff] }
 0x1fa   : > { %2892 = vmatmul.bf16.gmra.mxu2 %v1562_v44  ;;  %v2851_v11 = vadd.f32 %v2850_v63, %v2752_v35  ;;  %v1585_v63 = vpack.c.b16 %v1584_v62, %v1583_v41  ;;  %v1734_v45 = vunpack.c.l.b16 %v1076_v25  ;;  %v1038_v35 = vld [vmem:[#allocation2 + $0x21] sm:$0xff]  ;;  %v1113_v41 = vld [vmem:[#allocation2 + $0x2a] sm:$0xff]  ;;  %v1150_v62 = vpack.c.bf16 %v1114_v5, %v1114_v5 }
 0x1fb   : > { %v1658_v23 = vunpack.c.l.b16 %v1036_v55  ;;  %v1733_v60 = vunpack.c.l.b16 %v1075_v9  ;;  %v1149_v25 = vpack.c.bf16 %v1113_v41, %v1113_v41 }
 0x1fd   : > { %v2853_v8 = vpop.f32.mrf.mxu2  ;;  %v2949_v32 = vpop.f32.mrf.mxu3 }
 0x1fe   : > { %v2950_v54 = vadd.f32 %v2949_v32, %v2851_v11  ;;  %v3048_v52 = vpop.f32.mrf.mxu0  ;;  %v1037_v32 = vld [vmem:[#allocation2 + $0x19] sm:$0xff] }
 0x1ff   : > { %v2754_v56 = vpop.f32.mrf.mxu1  ;;  %v1073_v53 = vpack.c.bf16 %v1037_v32, %v1037_v32 }
 0x200   : > { %v2755_v18 = vadd.f32 %v2754_v56, %v5088_v42  ;;  %v5205_v44 = vadd.f32 %v3048_v52, %v2950_v54  ;;  %v1074_v56 = vpack.c.bf16 %v1038_v35, %v1038_v35  ;;  %v1676_v52 = vpack.c.b16 %v1658_v23, %v1657_v47  ;;  %v1042_v35 = vld [vmem:[#allocation2 + $0x41] sm:$0xff]  ;;  %v1041_v23 = vld [vmem:[#allocation2 + $0x39] sm:$0xff] }
 0x201   : > { %v1731_v9 = vunpack.c.l.b16 %v1073_v53 }
 0x202   : > { %2793 = vmatmul.bf16.gmra.mxu1 %v1454_v40  ;;  %2991 = vmatmul.bf16.gmra.mxu3 %v1585_v63  ;;  %v2854_v20 = vadd.f32 %v2853_v8, %v2755_v18  ;;  %v5210_v40 = vpack.c.b16 %v1734_v45, %v1733_v60  ;;  %v1732_v18 = vunpack.c.l.b16 %v1074_v56  ;;  %v1846_v63 = vunpack.c.l.b16 %v1150_v62 }
 0x203   : > { %v1222_v60 = vpack.c.bf16 %v1186_v21, %v1186_v21  ;;  %v1077_v62 = vpack.c.bf16 %v1041_v23, %v1041_v23 }
 0x204   : > { %v1767_v45 = vpack.c.b16 %v1732_v18, %v1731_v9 }
 0x205   : > { %v2855_v31 = vpop.f32.mrf.mxu2  ;;  %v2952_v11 = vpop.f32.mrf.mxu3  ;;  %v1735_v9 = vunpack.c.l.b16 %v1077_v62  ;;  %v1187_v62 = vld [vmem:[#allocation2 + $0x3b] sm:$0xff] }
 0x206   : > { %v2953_v19 = vadd.f32 %v2952_v11, %v2854_v20  ;;  %v3051_v54 = vpop.f32.mrf.mxu0  ;;  %v1185_v11 = vld [vmem:[#allocation2 + $0x2b] sm:$0xff] }
 0x207   : > { %v2756_v42 = vpop.f32.mrf.mxu1  ;;  %v1221_v56 = vpack.c.bf16 %v1185_v11, %v1185_v11 }
 0x208   : > { %v2757_v61 = vadd.f32 %v2756_v42, %v5107_v6  ;;  %v5208_v8 = vadd.f32 %v3051_v54, %v2953_v19  ;;  %v1845_v6 = vunpack.c.l.b16 %v1149_v25  ;;  %v1078_v54 = vpack.c.bf16 %v1042_v35, %v1042_v35 }
 0x209   : > { %3090 = vmatmul.bf16.gmra.mxu0 %v1676_v52  ;;  %v1953_v25 = vunpack.c.l.b16 %v1221_v56 }
 0x20a   : > { %5506 = vst [vmem:[#allocation38_spill] sm:$0xff] %v5208_v8  ;;  %3203 = vmatmul.bf16.vlgmr.msra.gmra.mxu2 %v5210_v40  ;;  %v2856_v2 = vadd.f32 %v2855_v31, %v2757_v61  ;;  %v1881_v31 = vpack.c.b16 %v1846_v63, %v1845_v6  ;;  %v1954_v61 = vunpack.c.l.b16 %v1222_v60  ;;  %v1736_v52 = vunpack.c.l.b16 %v1078_v54 }
 0x20c   : > { %v5219_v6 = vpack.c.b16 %v1736_v52, %v1735_v9 }
 0x20d   : > { %v2858_v20 = vpop.f32.mrf.mxu2  ;;  %v2954_v55 = vpop.f32.mrf.mxu3 }
 0x20e   : > { %v2955_v5 = vadd.f32 %v2954_v55, %v2856_v2  ;;  %v3053_v47 = vpop.f32.mrf.mxu0  ;;  %v1116_v55 = vld [vmem:[#allocation2 + $0x42] sm:$0xff] }
 0x20f   : > { %v2759_v19 = vpop.f32.mrf.mxu1 }
 0x210   : > { %v2760_v32 = vadd.f32 %v2759_v19, %v5015_v17  ;;  %v5214_v42 = vadd.f32 %v3053_v47, %v2955_v5  ;;  %v1989_v17 = vpack.c.b16 %v1954_v61, %v1953_v25  ;;  %v1115_v5 = vld [vmem:[#allocation2 + $0x3a] sm:$0xff] }
 0x211   : > { %v1151_v19 = vpack.c.bf16 %v1115_v5, %v1115_v5 }
 0x212   : > { %3104 = vmatmul.bf16.vlgmr.msra.gmra.mxu1 %v1767_v45  ;;  %3302 = vmatmul.bf16.vlgmr.msra.gmra.mxu3 %v1881_v31  ;;  %v2859_v41 = vadd.f32 %v2858_v20, %v2760_v32  ;;  %v1152_v20 = vpack.c.bf16 %v1116_v55, %v1116_v55  ;;  %v1043_v45 = vld [vmem:[#allocation2 + $0x49] sm:$0xff] }
 0x213   : > { %v1188_v32 = vld [vmem:[#allocation2 + $0x43] sm:$0xff]  ;;  %v1847_v54 = vunpack.c.l.b16 %v1151_v19 }
 0x214   : > { %v1848_v47 = vunpack.c.l.b16 %v1152_v20  ;;  %v1224_v25 = vpack.c.bf16 %v1188_v32, %v1188_v32 }
 0x215   : > { %v2860_v53 = vpop.f32.mrf.mxu2  ;;  %v2957_v2 = vpop.f32.mrf.mxu3 }
 0x216   : > { %v2958_v18 = vadd.f32 %v2957_v2, %v2859_v41  ;;  %v3056_v8 = vpop.f32.mrf.mxu0  ;;  %v1882_v2 = vpack.c.b16 %v1848_v47, %v1847_v54 }
 0x217   : > { %v2761_v21 = vpop.f32.mrf.mxu1 }
 0x218   : > { %v2762_v63 = vadd.f32 %v2761_v21, %v5026_v57  ;;  %v5217_v35 = vadd.f32 %v3056_v8, %v2958_v18  ;;  %v1044_v57 = vld [vmem:[#allocation2 + $0x51] sm:$0xff]  ;;  %v1079_v8 = vpack.c.bf16 %v1043_v45, %v1043_v45  ;;  %v1223_v18 = vpack.c.bf16 %v1187_v62, %v1187_v62 }
 0x219   : > { %3401 = vmatmul.bf16.vlgmr.msra.gmra.mxu0 %v1989_v17  ;;  %v1080_v55 = vpack.c.bf16 %v1044_v57, %v1044_v57  ;;  %v1956_v21 = vunpack.c.l.b16 %v1224_v25  ;;  %v1117_v17 = vld [vmem:[#allocation2 + $0x4a] sm:$0xff]  ;;  %v1045_v57 = vld [vmem:[#allocation2 + $0x59] sm:$0xff] }
 0x21a   : > { %3208 = vmatmul.bf16.gmra.mxu2 %v5219_v6  ;;  %v2861_v11 = vadd.f32 %v2860_v53, %v2762_v63  ;;  %v1737_v9 = vunpack.c.l.b16 %v1079_v8  ;;  %v1955_v19 = vunpack.c.l.b16 %v1223_v18  ;;  %v1046_v8 = vld [vmem:[#allocation2 + $0x61] sm:$0xff]  ;;  %v1081_v18 = vpack.c.bf16 %v1045_v57, %v1045_v57 }
 0x21d   : > { %v2863_v23 = vpop.f32.mrf.mxu2  ;;  %v2959_v60 = vpop.f32.mrf.mxu3 }
 0x21e   : > { %v2960_v31 = vadd.f32 %v2959_v60, %v2861_v11  ;;  %v3058_v41 = vpop.f32.mrf.mxu0  ;;  %v1738_v11 = vunpack.c.l.b16 %v1080_v55  ;;  %v1118_v60 = vld [vmem:[#allocation2 + $0x52] sm:$0xff] }
 0x21f   : > { %v2764_v56 = vpop.f32.mrf.mxu1 }
 0x220   : > { %v2765_v61 = vadd.f32 %v2764_v56, %v5032_v46  ;;  %v5223_v52 = vadd.f32 %v3058_v41, %v2960_v31  ;;  %v1153_v31 = vpack.c.bf16 %v1117_v17, %v1117_v17  ;;  %v1154_v56 = vpack.c.bf16 %v1118_v60, %v1118_v60 }
 0x221   : > { %v1082_v17 = vpack.c.bf16 %v1046_v8, %v1046_v8 }
 0x222   : > { %3109 = vmatmul.bf16.gmra.mxu1 %v5210_v40  ;;  %3307 = vmatmul.bf16.gmra.mxu3 %v1882_v2  ;;  %v2864_v53 = vadd.f32 %v2863_v23, %v2765_v61  ;;  %v5229_v40 = vpack.c.b16 %v1738_v11, %v1737_v9  ;;  %v1990_v23 = vpack.c.b16 %v1956_v21, %v1955_v19  ;;  %v1849_v41 = vunpack.c.l.b16 %v1153_v31  ;;  %v1189_v2 = vld [vmem:[#allocation2 + $0x4b] sm:$0xff]  ;;  %v1190_v9 = vld [vmem:[#allocation2 + $0x53] sm:$0xff] }
 0x223   : > { %v1226_v19 = vpack.c.bf16 %v1190_v9, %v1190_v9  ;;  %v1119_v31 = vld [vmem:[#allocation2 + $0x5a] sm:$0xff] }
 0x224   : > { %v1191_v9 = vld [vmem:[#allocation2 + $0x5b] sm:$0xff] }
 0x225   : > { %v2865_v5 = vpop.f32.mrf.mxu2  ;;  %v2962_v63 = vpop.f32.mrf.mxu3  ;;  %v1958_v57 = vunpack.c.l.b16 %v1226_v19 }
 0x226   : > { %v2963_v20 = vadd.f32 %v2962_v63, %v2864_v53  ;;  %v3061_v46 = vpop.f32.mrf.mxu0  ;;  %v1850_v53 = vunpack.c.l.b16 %v1154_v56 }
 0x227   : > { %v2766_v45 = vpop.f32.mrf.mxu1 }
 0x228   : > { %v2767_v47 = vadd.f32 %v2766_v45, %v5036_v1  ;;  %v5227_v32 = vadd.f32 %v3061_v46, %v2963_v20  ;;  %v1883_v20 = vpack.c.b16 %v1850_v53, %v1849_v41  ;;  %v1739_v45 = vunpack.c.l.b16 %v1081_v18  ;;  %v1047_v18 = vld [vmem:[#allocation2 + $0x69] sm:$0xff] }
 0x229   : > { %3406 = vmatmul.bf16.gmra.mxu0 %v1990_v23  ;;  %v1740_v46 = vunpack.c.l.b16 %v1082_v17  ;;  %v1048_v17 = vld [vmem:[#allocation2 + $0x71] sm:$0xff] }
 0x22a   : > { %3213 = vmatmul.bf16.gmra.mxu2 %v5229_v40  ;;  %v2866_v54 = vadd.f32 %v2865_v5, %v2767_v47  ;;  %v1225_v5 = vpack.c.bf16 %v1189_v2, %v1189_v2  ;;  %v1120_v47 = vld [vmem:[#allocation2 + $0x62] sm:$0xff] }
 0x22c   : > { %v1957_v60 = vunpack.c.l.b16 %v1225_v5  ;;  %v1192_v5 = vld [vmem:[#allocation2 + $0x63] sm:$0xff] }
 0x22d   : > { %v2868_v62 = vpop.f32.mrf.mxu2  ;;  %v2964_v61 = vpop.f32.mrf.mxu3 }
 0x22e   : > { %v2965_v25 = vadd.f32 %v2964_v61, %v2866_v54  ;;  %v3063_v1 = vpop.f32.mrf.mxu0  ;;  %v1155_v61 = vpack.c.bf16 %v1119_v31, %v1119_v31  ;;  %v1083_v31 = vpack.c.bf16 %v1047_v18, %v1047_v18 }
 0x22f   : > { %v2769_v55 = vpop.f32.mrf.mxu1 }
 0x230   : > { %v2770_v21 = vadd.f32 %v2769_v55, %v5045_v48  ;;  %v5233_v63 = vadd.f32 %v3063_v1, %v2965_v25  ;;  %v1156_v25 = vpack.c.bf16 %v1120_v47, %v1120_v47  ;;  %v1851_v55 = vunpack.c.l.b16 %v1155_v61 }
 0x231   : > { %v1084_v47 = vpack.c.bf16 %v1048_v17, %v1048_v17 }
 0x232   : > { %3114 = vmatmul.bf16.gmra.mxu1 %v5219_v6  ;;  %3312 = vmatmul.bf16.gmra.mxu3 %v1883_v20  ;;  %v2869_v11 = vadd.f32 %v2868_v62, %v2770_v21  ;;  %v5239_v6 = vpack.c.b16 %v1740_v46, %v1739_v45  ;;  %v1991_v62 = vpack.c.b16 %v1958_v57, %v1957_v60  ;;  %v1852_v1 = vunpack.c.l.b16 %v1156_v25  ;;  %v1121_v25 = vld [vmem:[#allocation2 + $0x6a] sm:$0xff] }
 0x233   : > { %v1227_v45 = vpack.c.bf16 %v1191_v9, %v1191_v9  ;;  %v1741_v57 = vunpack.c.l.b16 %v1083_v31  ;;  %v1194_v31 = vld [vmem:[#allocation2 + $0x73] sm:$0xff] }
 0x235   : > { %v2870_v23 = vpop.f32.mrf.mxu2  ;;  %v2967_v54 = vpop.f32.mrf.mxu3 }
 0x236   : > { %v2968_v56 = vadd.f32 %v2967_v54, %v2869_v11  ;;  %v3066_v48 = vpop.f32.mrf.mxu0  ;;  %v1884_v54 = vpack.c.b16 %v1852_v1, %v1851_v55 }
 0x237   : > { %v2771_v8 = vpop.f32.mrf.mxu1 }
 0x238   : > { %v2772_v41 = vadd.f32 %v2771_v8, %v5059_v39  ;;  %v5237_v2 = vadd.f32 %v3066_v48, %v2968_v56  ;;  %v1742_v8 = vunpack.c.l.b16 %v1084_v47  ;;  %v1959_v48 = vunpack.c.l.b16 %v1227_v45 }
 0x239   : > { %3411 = vmatmul.bf16.gmra.mxu0 %v1991_v62 }
 0x23a   : > { %3218 = vmatmul.bf16.gmra.mxu2 %v5239_v6  ;;  %v2871_v53 = vadd.f32 %v2870_v23, %v2772_v41  ;;  %v1228_v23 = vpack.c.bf16 %v1192_v5, %v1192_v5  ;;  %v1122_v41 = vld [vmem:[#allocation2 + $0x72] sm:$0xff] }
 0x23c   : > { %v1960_v61 = vunpack.c.l.b16 %v1228_v23 }
 0x23d   : > { %v2873_v21 = vpop.f32.mrf.mxu2  ;;  %v2969_v20 = vpop.f32.mrf.mxu3 }
 0x23e   : > { %v2970_v11 = vadd.f32 %v2969_v20, %v2871_v53  ;;  %v3068_v39 = vpop.f32.mrf.mxu0  ;;  %v1158_v20 = vpack.c.bf16 %v1122_v41, %v1122_v41  ;;  %v1992_v5 = vpack.c.b16 %v1960_v61, %v1959_v48 }
 0x23f   : > { %v2774_v19 = vpop.f32.mrf.mxu1 }
 0x240   : > { %v2775_v46 = vadd.f32 %v2774_v19, %v5068_v4  ;;  %v5243_v60 = vadd.f32 %v3068_v39, %v2970_v11  ;;  %v1157_v4 = vpack.c.bf16 %v1121_v25, %v1121_v25  ;;  %v1854_v19 = vunpack.c.l.b16 %v1158_v20  ;;  %v1193_v39 = vld [vmem:[#allocation2 + $0x6b] sm:$0xff]  ;;  %v1049_v25 = vld [vmem:[#allocation2 + $0x79] sm:$0xff] }
 0x241   : > { %v1229_v41 = vpack.c.bf16 %v1193_v39, %v1193_v39 }
 0x242   : > { %3119 = vmatmul.bf16.gmra.mxu1 %v5229_v40  ;;  %3317 = vmatmul.bf16.gmra.mxu3 %v1884_v54  ;;  %v2874_v56 = vadd.f32 %v2873_v21, %v2775_v46  ;;  %v1772_v40 = vpack.c.b16 %v1742_v8, %v1741_v57  ;;  %v1853_v11 = vunpack.c.l.b16 %v1157_v4  ;;  %v1050_v46 = vld [vmem:[#allocation2 + $0x81] sm:$0xff] }
 0x243   : > { %v1086_v48 = vpack.c.bf16 %v1050_v46, %v1050_v46 }
 0x244   : > { %v1885_v8 = vpack.c.b16 %v1854_v19, %v1853_v11 }
 0x245   : > { %v2875_v62 = vpop.f32.mrf.mxu2  ;;  %v2972_v53 = vpop.f32.mrf.mxu3 }
 0x246   : > { %v2973_v18 = vadd.f32 %v2972_v53, %v2874_v56  ;;  %v3071_v9 = vpop.f32.mrf.mxu0 }
 0x247   : > { %v2776_v17 = vpop.f32.mrf.mxu1 }
 0x248   : > { %v2777_v55 = vadd.f32 %v2776_v17, %v5074_v59  ;;  %v5247_v1 = vadd.f32 %v3071_v9, %v2973_v18  ;;  %v1230_v59 = vpack.c.bf16 %v1194_v31, %v1194_v31  ;;  %v1961_v18 = vunpack.c.l.b16 %v1229_v41 }
 0x249   : > { %3416 = vmatmul.bf16.gmra.mxu0 %v1992_v5  ;;  %v1744_v9 = vunpack.c.l.b16 %v1086_v48 }
 0x24a   : > { %3223 = vmatmul.bf16.gmra.mxu2 %v1772_v40  ;;  %v2876_v21 = vadd.f32 %v2875_v62, %v2777_v55  ;;  %v1085_v62 = vpack.c.bf16 %v1049_v25, %v1049_v25  ;;  %v1962_v17 = vunpack.c.l.b16 %v1230_v59  ;;  %v1124_v55 = vld [vmem:[#allocation2 + $0x82] sm:$0xff] }
 0x24b   : > { %v1196_v59 = vld [vmem:[#allocation2 + $0x83] sm:$0xff] }
 0x24d   : > { %v2878_v47 = vpop.f32.mrf.mxu2  ;;  %v2974_v45 = vpop.f32.mrf.mxu3 }
 0x24e   : > { %v2975_v54 = vadd.f32 %v2974_v45, %v2876_v21  ;;  %v3073_v56 = vpop.f32.mrf.mxu0  ;;  %v1743_v21 = vunpack.c.l.b16 %v1085_v62  ;;  %v1123_v45 = vld [vmem:[#allocation2 + $0x7a] sm:$0xff] }
 0x24f   : > { %v2779_v23 = vpop.f32.mrf.mxu1 }
 0x250   : > { %v2780_v53 = vadd.f32 %v2779_v23, %v5082_v28  ;;  %v5250_v57 = vadd.f32 %v3073_v56, %v2975_v54  ;;  %v1993_v28 = vpack.c.b16 %v1962_v17, %v1961_v18  ;;  %v1159_v54 = vpack.c.bf16 %v1123_v45, %v1123_v45  ;;  %v1051_v56 = vld [vmem:[#allocation2 + $0x89] sm:$0xff]  ;;  %v1195_v18 = vld [vmem:[#allocation2 + $0x7b] sm:$0xff] }
 0x251   : > { %v1087_v62 = vpack.c.bf16 %v1051_v56, %v1051_v56 }
 0x252   : > { %3124 = vmatmul.bf16.gmra.mxu1 %v5239_v6  ;;  %3322 = vmatmul.bf16.gmra.mxu3 %v1885_v8  ;;  %v2879_v61 = vadd.f32 %v2878_v47, %v2780_v53  ;;  %v5256_v6 = vpack.c.b16 %v1744_v9, %v1743_v21  ;;  %v1160_v47 = vpack.c.bf16 %v1124_v55, %v1124_v55  ;;  %v1855_v8 = vunpack.c.l.b16 %v1159_v54 }
 0x253   : > { %v1232_v55 = vpack.c.bf16 %v1196_v59, %v1196_v59  ;;  %v1231_v21 = vpack.c.bf16 %v1195_v18, %v1195_v18 }
 0x254   : > { %v1856_v23 = vunpack.c.l.b16 %v1160_v47 }
 0x255   : > { %v2880_v4 = vpop.f32.mrf.mxu2  ;;  %v2977_v20 = vpop.f32.mrf.mxu3  ;;  %v1963_v54 = vunpack.c.l.b16 %v1231_v21 }
 0x256   : > { %v2978_v5 = vadd.f32 %v2977_v20, %v2879_v61  ;;  %v3076_v31 = vpop.f32.mrf.mxu0  ;;  %v1886_v20 = vpack.c.b16 %v1856_v23, %v1855_v8 }
 0x257   : > { %v2781_v39 = vpop.f32.mrf.mxu1 }
 0x258   : > { %v2782_v11 = vadd.f32 %v2781_v39, %v5101_v33  ;;  %v5254_v19 = vadd.f32 %v3076_v31, %v2978_v5  ;;  %v1052_v33 = vld [vmem:[#allocation2 + $0x91] sm:$0xff]  ;;  %v1745_v39 = vunpack.c.l.b16 %v1087_v62  ;;  %v1964_v31 = vunpack.c.l.b16 %v1232_v55 }
 0x259   : > { %3421 = vmatmul.bf16.gmra.mxu0 %v1993_v28  ;;  %v1088_v5 = vpack.c.bf16 %v1052_v33, %v1052_v33  ;;  %v1125_v28 = vld [vmem:[#allocation2 + $0x8a] sm:$0xff]  ;;  %v1053_v33 = vld [vmem:[#allocation2 + $0x99] sm:$0xff] }
 0x25a   : > { %3228 = vmatmul.bf16.gmra.mxu2 %v5256_v6  ;;  %v2881_v46 = vadd.f32 %v2880_v4, %v2782_v11  ;;  %v1089_v21 = vpack.c.bf16 %v1053_v33, %v1053_v33 }
 0x25d   : > { %v2883_v25 = vpop.f32.mrf.mxu2  ;;  %v2979_v41 = vpop.f32.mrf.mxu3 }
 0x25e   : > { %v2980_v53 = vadd.f32 %v2979_v41, %v2881_v46  ;;  %v3078_v61 = vpop.f32.mrf.mxu0  ;;  %v1746_v46 = vunpack.c.l.b16 %v1088_v5 }
 0x25f   : > { %v2784_v48 = vpop.f32.mrf.mxu1 }
 0x260   : > { %v2785_v17 = vadd.f32 %v2784_v48, %v5055_v50  ;;  %v5260_v9 = vadd.f32 %v3078_v61, %v2980_v53  ;;  %v1126_v50 = vld [vmem:[#allocation2 + $0x92] sm:$0xff]  ;;  %v1161_v53 = vpack.c.bf16 %v1125_v28, %v1125_v28 }
 0x261   : > { %v1162_v48 = vpack.c.bf16 %v1126_v50, %v1126_v50  ;;  %v1198_v28 = vld [vmem:[#allocation2 + $0x93] sm:$0xff] }
 0x262   : > { %3129 = vmatmul.bf16.gmra.mxu1 %v1772_v40  ;;  %3327 = vmatmul.bf16.gmra.mxu3 %v1886_v20  ;;  %v2884_v4 = vadd.f32 %v2883_v25, %v2785_v17  ;;  %v5265_v40 = vpack.c.b16 %v1746_v46, %v1745_v39  ;;  %v1994_v25 = vpack.c.b16 %v1964_v31, %v1963_v54  ;;  %v1857_v61 = vunpack.c.l.b16 %v1161_v53  ;;  %v1197_v17 = vld [vmem:[#allocation2 + $0x8b] sm:$0xff]  ;;  %v1127_v50 = vld [vmem:[#allocation2 + $0x9a] sm:$0xff] }
 0x263   : > { %v1858_v55 = vunpack.c.l.b16 %v1162_v48  ;;  %v1234_v54 = vpack.c.bf16 %v1198_v28, %v1198_v28 }
 0x265   : > { %v2885_v45 = vpop.f32.mrf.mxu2  ;;  %v2982_v11 = vpop.f32.mrf.mxu3  ;;  %v1966_v48 = vunpack.c.l.b16 %v1234_v54 }
 0x266   : > { %v2983_v47 = vadd.f32 %v2982_v11, %v2884_v4  ;;  %v3081_v41 = vpop.f32.mrf.mxu0  ;;  %v1887_v11 = vpack.c.b16 %v1858_v55, %v1857_v61 }
 0x267   : > { %v2786_v56 = vpop.f32.mrf.mxu1 }
 0x268   : > { %v2787_v23 = vadd.f32 %v2786_v56, %v5066_v49  ;;  %v5263_v59 = vadd.f32 %v3081_v41, %v2983_v47  ;;  %v1054_v49 = vld [vmem:[#allocation2 + $0xa1] sm:$0xff]  ;;  %v1233_v47 = vpack.c.bf16 %v1197_v17, %v1197_v17  ;;  %v1747_v56 = vunpack.c.l.b16 %v1089_v21 }
 0x269   : > { %3426 = vmatmul.bf16.gmra.mxu0 %v1994_v25  ;;  %v1090_v46 = vpack.c.bf16 %v1054_v49, %v1054_v49  ;;  %v1056_v49 = vld [vmem:[#allocation2 + $0xb1] sm:$0xff] }
 0x26a   : > { %3233 = vmatmul.bf16.gmra.mxu2 %v5265_v40  ;;  %v2886_v8 = vadd.f32 %v2885_v45, %v2787_v23  ;;  %v1965_v41 = vunpack.c.l.b16 %v1233_v47  ;;  %v1092_v54 = vpack.c.bf16 %v1056_v49, %v1056_v49 }
 0x26d   : > { %v2888_v62 = vpop.f32.mrf.mxu2  ;;  %v2984_v18 = vpop.f32.mrf.mxu3 }
 0x26e   : > { %v2985_v20 = vadd.f32 %v2984_v18, %v2886_v8  ;;  %v3083_v5 = vpop.f32.mrf.mxu0  ;;  %v1748_v8 = vunpack.c.l.b16 %v1090_v46  ;;  %v1128_v18 = vld [vmem:[#allocation2 + $0xa2] sm:$0xff] }
 0x26f   : > { %v2789_v4 = vpop.f32.mrf.mxu1 }
 0x270   : > { %v2790_v39 = vadd.f32 %v2789_v4, %v5076_v37  ;;  %v5269_v31 = vadd.f32 %v3083_v5, %v2985_v20  ;;  %v1163_v20 = vpack.c.bf16 %v1127_v50, %v1127_v50  ;;  %v1164_v4 = vpack.c.bf16 %v1128_v18, %v1128_v18  ;;  %v1200_v50 = vld [vmem:[#allocation2 + $0xa3] sm:$0xff] }
 0x272   : > { %3134 = vmatmul.bf16.gmra.mxu1 %v5256_v6  ;;  %3332 = vmatmul.bf16.gmra.mxu3 %v1887_v11  ;;  %v2889_v45 = vadd.f32 %v2888_v62, %v2790_v39  ;;  %v5275_v6 = vpack.c.b16 %v1748_v8, %v1747_v56  ;;  %v1995_v62 = vpack.c.b16 %v1966_v48, %v1965_v41  ;;  %v1859_v5 = vunpack.c.l.b16 %v1163_v20  ;;  %v1199_v39 = vld [vmem:[#allocation2 + $0x9b] sm:$0xff] }
 0x273   : > { %v1860_v47 = vunpack.c.l.b16 %v1164_v4  ;;  %v1236_v48 = vpack.c.bf16 %v1200_v50, %v1200_v50 }
 0x275   : > { %v2890_v53 = vpop.f32.mrf.mxu2  ;;  %v2987_v23 = vpop.f32.mrf.mxu3  ;;  %v1968_v4 = vunpack.c.l.b16 %v1236_v48  ;;  %v1057_v48 = vld [vmem:[#allocation2 + $0xb9] sm:$0xff] }
 0x276   : > { %v2988_v25 = vadd.f32 %v2987_v23, %v2889_v45  ;;  %v3086_v37 = vpop.f32.mrf.mxu0  ;;  %v1055_v45 = vld [vmem:[#allocation2 + $0xa9] sm:$0xff]  ;;  %v1888_v23 = vpack.c.b16 %v1860_v47, %v1859_v5 }
 0x277   : > { %v2791_v33 = vpop.f32.mrf.mxu1  ;;  %v1129_v5 = vld [vmem:[#allocation2 + $0xaa] sm:$0xff] }
 0x278   : > { %v2792_v61 = vadd.f32 %v2791_v33, %v5084_v38  ;;  %v5273_v17 = vadd.f32 %v3086_v37, %v2988_v25  ;;  %v1235_v25 = vpack.c.bf16 %v1199_v39, %v1199_v39  ;;  %v1750_v33 = vunpack.c.l.b16 %v1092_v54 }
 0x279   : > { %3431 = vmatmul.bf16.gmra.mxu0 %v1995_v62  ;;  %v1130_v62 = vld [vmem:[#allocation2 + $0xb2] sm:$0xff] }
 0x27a   : > { %3238 = vmatmul.bf16.gmra.mxu2 %v5275_v6  ;;  %v2891_v55 = vadd.f32 %v2890_v53, %v2792_v61  ;;  %v1091_v53 = vpack.c.bf16 %v1055_v45, %v1055_v45  ;;  %v1967_v37 = vunpack.c.l.b16 %v1235_v25  ;;  %v1165_v45 = vpack.c.bf16 %v1129_v5, %v1129_v5  ;;  %v1132_v5 = vld [vmem:[#allocation2 + $0xc2] sm:$0xff] }
 0x27c   : > { %v1749_v61 = vunpack.c.l.b16 %v1091_v53  ;;  %v1861_v25 = vunpack.c.l.b16 %v1165_v45 }
 0x27d   : > { %v2893_v21 = vpop.f32.mrf.mxu2  ;;  %v2989_v28 = vpop.f32.mrf.mxu3 }
 0x27e   : > { %v2990_v11 = vadd.f32 %v2989_v28, %v2891_v55  ;;  %v3088_v38 = vpop.f32.mrf.mxu0  ;;  %v5282_v28 = vpack.c.b16 %v1750_v33, %v1749_v61  ;;  %v1201_v33 = vld [vmem:[#allocation2 + $0xab] sm:$0xff] }
 0x27f   : > { %v2794_v46 = vpop.f32.mrf.mxu1 }
 0x280   : > { %v2795_v56 = vadd.f32 %v2794_v46, %v5103_v26  ;;  %v5279_v41 = vadd.f32 %v3088_v38, %v2990_v11  ;;  %v1058_v38 = vld [vmem:[#allocation2 + $0xc1] sm:$0xff] }
 0x282   : > { %3139 = vmatmul.bf16.gmra.mxu1 %v5265_v40  ;;  %3337 = vmatmul.bf16.gmra.mxu3 %v1888_v23  ;;  %v2894_v8 = vadd.f32 %v2893_v21, %v2795_v56  ;;  %v1996_v40 = vpack.c.b16 %v1968_v4, %v1967_v37  ;;  %v1166_v21 = vpack.c.bf16 %v1130_v62, %v1130_v62  ;;  %v1202_v56 = vld [vmem:[#allocation2 + $0xb3] sm:$0xff] }
 0x283   : > { %v1238_v62 = vpack.c.bf16 %v1202_v56, %v1202_v56 }
 0x284   : > { %v1862_v46 = vunpack.c.l.b16 %v1166_v21 }
 0x285   : > { %v2895_v18 = vpop.f32.mrf.mxu2  ;;  %v2992_v20 = vpop.f32.mrf.mxu3 }
 0x286   : > { %v2993_v55 = vadd.f32 %v2992_v20, %v2894_v8  ;;  %v3091_v26 = vpop.f32.mrf.mxu0  ;;  %v1889_v61 = vpack.c.b16 %v1862_v46, %v1861_v25 }
 0x287   : > { %v2796_v49 = vpop.f32.mrf.mxu1 }
 0x288   : > { %v2797_v39 = vadd.f32 %v2796_v49, %v5112_v3  ;;  %v5285_v11 = vadd.f32 %v3091_v26, %v2993_v55  ;;  %v1094_v3 = vpack.c.bf16 %v1058_v38, %v1058_v38  ;;  %v1237_v55 = vpack.c.bf16 %v1201_v33, %v1201_v33  ;;  %v1060_v33 = vld [vmem:[#allocation2 + $0xd1] sm:$0xff] }
 0x289   : > { %3436 = vmatmul.bf16.gmra.mxu0 %v1996_v40  ;;  %v1970_v26 = vunpack.c.l.b16 %v1238_v62 }
 0x28a   : > { %3243 = vmatmul.bf16.gmra.mxu2 %v5282_v28  ;;  %v2896_v47 = vadd.f32 %v2895_v18, %v2797_v39  ;;  %v1093_v18 = vpack.c.bf16 %v1057_v48, %v1057_v48  ;;  %v1752_v49 = vunpack.c.l.b16 %v1094_v3  ;;  %v1969_v45 = vunpack.c.l.b16 %v1237_v55  ;;  %v1203_v55 = vld [vmem:[#allocation2 + $0xbb] sm:$0xff] }
 0x28c   : > { %v1997_v25 = vpack.c.b16 %v1970_v26, %v1969_v45  ;;  %v1059_v26 = vld [vmem:[#allocation2 + $0xc9] sm:$0xff]  ;;  %v1239_v45 = vpack.c.bf16 %v1203_v55, %v1203_v55 }
 0x28d   : > { %v2994_v54 = vpop.f32.mrf.mxu3  ;;  %v3204_v50 = vpop.f32.mrf.mxu2 }
 0x28e   : > { %v2995_v23 = vadd.f32 %v2994_v54, %v2896_v47  ;;  %v3093_v53 = vpop.f32.mrf.mxu0  ;;  %v1751_v47 = vunpack.c.l.b16 %v1093_v18 }
 0x28f   : > { %v3105_v8 = vpop.f32.mrf.mxu1 }
 0x290   : > { %v5288_v20 = vadd.f32 %v3093_v53, %v2995_v23  ;;  %v3106_v37 = vadd.f32 %v3105_v8, %v5118_v30  ;;  %v1131_v23 = vld [vmem:[#allocation2 + $0xba] sm:$0xff]  ;;  %v1168_v30 = vpack.c.bf16 %v1132_v5, %v1132_v5  ;;  %v1096_v5 = vpack.c.bf16 %v1060_v33, %v1060_v33  ;;  %v1134_v33 = vld [vmem:[#allocation2 + $0xd2] sm:$0xff] }
 0x291   : > { %v1167_v53 = vpack.c.bf16 %v1131_v23, %v1131_v23 }
 0x292   : > { %3144 = vmatmul.bf16.gmra.mxu1 %v5275_v6  ;;  %3342 = vmatmul.bf16.gmra.mxu3 %v1889_v61  ;;  %v3205_v4 = vadd.f32 %v3204_v50, %v3106_v37  ;;  %v5293_v6 = vpack.c.b16 %v1752_v49, %v1751_v47  ;;  %v1864_v3 = vunpack.c.l.b16 %v1168_v30  ;;  %v1204_v37 = vld [vmem:[#allocation2 + $0xc3] sm:$0xff]  ;;  %v1754_v23 = vunpack.c.l.b16 %v1096_v5 }
 0x295   : > { %v3206_v39 = vpop.f32.mrf.mxu2  ;;  %v3303_v40 = vpop.f32.mrf.mxu3 }
 0x296   : > { %v3304_v21 = vadd.f32 %v3303_v40, %v3205_v4  ;;  %v3402_v54 = vpop.f32.mrf.mxu0 }
 0x297   : > { %v3107_v38 = vpop.f32.mrf.mxu1 }
 0x298   : > { %v3108_v46 = vadd.f32 %v3107_v38, %v5121_v15  ;;  %v3403_v56 = vadd.f32 %v3402_v54, %v3304_v21  ;;  %v1863_v15 = vunpack.c.l.b16 %v1167_v53  ;;  %v1095_v54 = vpack.c.bf16 %v1059_v26, %v1059_v26 }
 0x299   : > { %3441 = vmatmul.bf16.gmra.mxu0 %v1997_v25 }
 0x29a   : > { %v3492_v50 = vmul.f32 %v3403_v56, %v4756_v12  ;;  %3248 = vmatmul.bf16.gmra.mxu2 %v5293_v6  ;;  %v3207_v48 = vadd.f32 %v3206_v39, %v3108_v46  ;;  %v1240_v12 = vpack.c.bf16 %v1204_v37, %v1204_v37  ;;  %v1890_v47 = vpack.c.b16 %v1864_v3, %v1863_v15  ;;  %v5507_v39 = vld [vmem:[#allocation8_spill] sm:$0xff] }
 0x29b   : > { %v1971_v3 = vunpack.c.l.b16 %v1239_v45 }
 0x29c   : > { %v3570_v8 = vmul.f32 %v3492_v50, %v3403_v56  ;;  %v1972_v30 = vunpack.c.l.b16 %v1240_v12  ;;  %v1170_v12 = vpack.c.bf16 %v1134_v33, %v1134_v33 }
 0x29d   : > { %v3209_v61 = vpop.f32.mrf.mxu2  ;;  %v3305_v62 = vpop.f32.mrf.mxu3 }
 0x29e   : > { %v3306_v18 = vadd.f32 %v3305_v62, %v3207_v48  ;;  %v3404_v49 = vpop.f32.mrf.mxu0  ;;  %v1753_v62 = vunpack.c.l.b16 %v1095_v54  ;;  %v1998_v55 = vpack.c.b16 %v1972_v30, %v1971_v3  ;;  %v1866_v45 = vunpack.c.l.b16 %v1170_v12  ;;  %v1206_v54 = vld [vmem:[#allocation2 + $0xd3] sm:$0xff] }
 0x29f   : > { %v3110_v4 = vpop.f32.mrf.mxu1 }
 0x2a0   : > { %v3111_v40 = vadd.f32 %v3110_v4, %v5130_v24  ;;  %v3405_v21 = vadd.f32 %v3404_v49, %v3306_v18  ;;  %v1133_v4 = vld [vmem:[#allocation2 + $0xca] sm:$0xff]  ;;  %v5309_v5 = vpack.c.b16 %v1754_v23, %v1753_v62  ;;  %v1242_v62 = vpack.c.bf16 %v1206_v54, %v1206_v54 }
 0x2a2   : > { %v3493_v38 = vmul.f32 %v3405_v21, %v5507_v39  ;;  %3149 = vmatmul.bf16.gmra.mxu1 %v5282_v28  ;;  %3347 = vmatmul.bf16.gmra.mxu3 %v1890_v47  ;;  %v3210_v25 = vadd.f32 %v3209_v61, %v3111_v40  ;;  %v1169_v40 = vpack.c.bf16 %v1133_v4, %v1133_v4  ;;  %v1061_v39 = vld [vmem:[#allocation2 + $0xd9] sm:$0xff] }
 0x2a3   : > { %v1097_v3 = vpack.c.bf16 %v1061_v39, %v1061_v39  ;;  %v1136_v39 = vld [vmem:[#allocation2 + $0xe2] sm:$0xff] }
 0x2a4   : > { %v3528_v46 = vadd.f32 %v3493_v38, %v3492_v50  ;;  %v3571_v24 = vmul.f32 %v3493_v38, %v3405_v21  ;;  %v4251_v56 = vpack.c.bf16 %v3493_v38, %v3492_v50  ;;  %v5508_v50 = vld [vmem:[#allocation23_spill] sm:$0xff]  ;;  %v1062_v38 = vld [vmem:[#allocation2 + $0xe1] sm:$0xff]  ;;  %v1865_v23 = vunpack.c.l.b16 %v1169_v40 }
 0x2a5   : > { %v3211_v53 = vpop.f32.mrf.mxu2  ;;  %v3308_v48 = vpop.f32.mrf.mxu3  ;;  %v1098_v33 = vpack.c.bf16 %v1062_v38, %v1062_v38 }
 0x2a6   : > { %v3606_v28 = vadd.f32 %v3571_v24, %v3570_v8  ;;  %4252 = vst [vmem:[%s5305_s16] sm:$0xff] %v4251_v56   ;;  %v3309_v37 = vadd.f32 %v3308_v48, %v3210_v25  ;;  %v3407_v15 = vpop.f32.mrf.mxu0 }
 0x2a7   : > { %v3112_v18 = vpop.f32.mrf.mxu1 }
 0x2a8   : > { %v3113_v49 = vadd.f32 %v3112_v18, %v5139_v14  ;;  %v3408_v26 = vadd.f32 %v3407_v15, %v3309_v37  ;;  %v1205_v37 = vld [vmem:[#allocation2 + $0xcb] sm:$0xff]  ;;  %v1891_v15 = vpack.c.b16 %v1866_v45, %v1865_v23 }
 0x2a9   : > { %3446 = vmatmul.bf16.gmra.mxu0 %v1998_v55  ;;  %v1241_v4 = vpack.c.bf16 %v1205_v37, %v1205_v37 }
 0x2aa   : > { %v3494_v61 = vmul.f32 %v3408_v26, %v5508_v50  ;;  %3253 = vmatmul.bf16.gmra.mxu2 %v5309_v5  ;;  %v3212_v47 = vadd.f32 %v3211_v53, %v3113_v49  ;;  %v5509_v53 = vld [vmem:[#allocation16_spill] sm:$0xff]  ;;  %v1756_v49 = vunpack.c.l.b16 %v1098_v33 }
 0x2ac   : > { %v3529_v8 = vadd.f32 %v3528_v46, %v3494_v61  ;;  %v3572_v21 = vmul.f32 %v3494_v61, %v3408_v26  ;;  %v1974_v26 = vunpack.c.l.b16 %v1242_v62 }
 0x2ad   : > { %v3214_v30 = vpop.f32.mrf.mxu2  ;;  %v3310_v24 = vpop.f32.mrf.mxu3 }
 0x2ae   : > { %v3607_v14 = vadd.f32 %v3606_v28, %v3572_v21  ;;  %v3311_v56 = vadd.f32 %v3310_v24, %v3212_v47  ;;  %v3409_v48 = vpop.f32.mrf.mxu0  ;;  %v1755_v28 = vunpack.c.l.b16 %v1097_v3  ;;  %v1135_v47 = vld [vmem:[#allocation2 + $0xda] sm:$0xff]  ;;  %v1973_v24 = vunpack.c.l.b16 %v1241_v4 }
 0x2af   : > { %v3115_v25 = vpop.f32.mrf.mxu1 }
 0x2b0   : > { %v3116_v18 = vadd.f32 %v3115_v25, %v5142_v16  ;;  %v3410_v46 = vadd.f32 %v3409_v48, %v3311_v56  ;;  %v1172_v25 = vpack.c.bf16 %v1136_v39, %v1136_v39  ;;  %v5318_v33 = vpack.c.b16 %v1756_v49, %v1755_v28 }
 0x2b2   : > { %v3495_v55 = vmul.f32 %v3410_v46, %v5509_v53  ;;  %3154 = vmatmul.bf16.gmra.mxu1 %v5293_v6  ;;  %3352 = vmatmul.bf16.gmra.mxu3 %v1891_v15  ;;  %v3215_v21 = vadd.f32 %v3214_v30, %v3116_v18  ;;  %v1171_v6 = vpack.c.bf16 %v1135_v47, %v1135_v47  ;;  %v1063_v15 = vld [vmem:[#allocation2 + $0xe9] sm:$0xff]  ;;  %v1207_v53 = vld [vmem:[#allocation2 + $0xdb] sm:$0xff] }
 0x2b3   : > { %v1243_v47 = vpack.c.bf16 %v1207_v53, %v1207_v53 }
 0x2b4   : > { %v3530_v12 = vadd.f32 %v3529_v8, %v3495_v55  ;;  %v3573_v50 = vmul.f32 %v3495_v55, %v3410_v46  ;;  %v4256_v40 = vpack.c.bf16 %v3495_v55, %v3494_v61  ;;  %v1999_v8 = vpack.c.b16 %v1974_v26, %v1973_v24  ;;  %v5510_v61 = vld [vmem:[#allocation33_spill] sm:$0xff]  ;;  %v1064_v26 = vld [vmem:[#allocation2 + $0xf1] sm:$0xff] }
 0x2b5   : > { %v3216_v38 = vpop.f32.mrf.mxu2  ;;  %v3313_v16 = vpop.f32.mrf.mxu3  ;;  %v1867_v37 = vunpack.c.l.b16 %v1171_v6  ;;  %v1868_v46 = vunpack.c.l.b16 %v1172_v25  ;;  %v1208_v55 = vld [vmem:[#allocation2 + $0xe3] sm:$0xff]  ;;  %v5511_v24 = vld [vmem:[#allocation32_spill] sm:$0xff] }
 0x2b6   : > { %v3608_v54 = vadd.f32 %v3607_v14, %v3573_v50  ;;  %4355 = vst [vmem:[%s5305_s16 + $0x8] sm:$0xff] %v4256_v40   ;;  %v3314_v45 = vadd.f32 %v3313_v16, %v3215_v21  ;;  %v3412_v23 = vpop.f32.mrf.mxu0  ;;  %v1099_v21 = vpack.c.bf16 %v1063_v15, %v1063_v15  ;;  %v1244_v39 = vpack.c.bf16 %v1208_v55, %v1208_v55  ;;  %v1138_v55 = vld [vmem:[#allocation2 + $0xf2] sm:$0xff] }
 0x2b7   : > { %v3117_v56 = vpop.f32.mrf.mxu1 }
 0x2b8   : > { %v3118_v48 = vadd.f32 %v3117_v56, %v5145_v10  ;;  %v3413_v3 = vadd.f32 %v3412_v23, %v3314_v45  ;;  %v1100_v56 = vpack.c.bf16 %v1064_v26, %v1064_v26  ;;  %v1757_v23 = vunpack.c.l.b16 %v1099_v21 }
 0x2b9   : > { %3451 = vmatmul.bf16.gmra.mxu0 %v1999_v8  ;;  %v1976_v6 = vunpack.c.l.b16 %v1244_v39  ;;  %v1065_v39 = vld [vmem:[#allocation2 + $0xf9] sm:$0xff] }
 0x2ba   : > { %v3496_v30 = vmul.f32 %v3413_v3, %v5510_v61  ;;  %3258 = vmatmul.bf16.gmra.mxu2 %v5318_v33  ;;  %v3217_v18 = vadd.f32 %v3216_v38, %v3118_v48  ;;  %v1137_v61 = vld [vmem:[#allocation2 + $0xea] sm:$0xff] }
 0x2bc   : > { %v3531_v14 = vadd.f32 %v3530_v12, %v3496_v30  ;;  %v3574_v62 = vmul.f32 %v3496_v30, %v3413_v3  ;;  %v1892_v12 = vpack.c.b16 %v1868_v46, %v1867_v37  ;;  %v1758_v46 = vunpack.c.l.b16 %v1100_v56 }
 0x2bd   : > { %v3219_v4 = vpop.f32.mrf.mxu2  ;;  %v3315_v50 = vpop.f32.mrf.mxu3 }
 0x2be   : > { %v3609_v10 = vadd.f32 %v3608_v54, %v3574_v62  ;;  %v3316_v40 = vadd.f32 %v3315_v50, %v3217_v18  ;;  %v3414_v49 = vpop.f32.mrf.mxu0  ;;  %v1975_v54 = vunpack.c.l.b16 %v1243_v47 }
 0x2bf   : > { %v3120_v28 = vpop.f32.mrf.mxu1 }
 0x2c0   : > { %v3121_v16 = vadd.f32 %v3120_v28, %v5148_v22  ;;  %v3415_v45 = vadd.f32 %v3414_v49, %v3316_v40  ;;  %v5327_v28 = vpack.c.b16 %v1758_v46, %v1757_v23  ;;  %v5512_v49 = vld [vmem:[#allocation37_spill] sm:$0xff] }
 0x2c2   : > { %v3497_v38 = vmul.f32 %v3415_v45, %v5511_v24  ;;  %3159 = vmatmul.bf16.gmra.mxu1 %v5309_v5  ;;  %3357 = vmatmul.bf16.gmra.mxu3 %v1892_v12  ;;  %v3220_v8 = vadd.f32 %v3219_v4, %v3121_v16  ;;  %v1173_v5 = vpack.c.bf16 %v1137_v61, %v1137_v61  ;;  %v1066_v16 = vld [vmem:[#allocation2 + $0x101] sm:$0xff] }
 0x2c3   : > { %v1174_v4 = vpack.c.bf16 %v1138_v55, %v1138_v55 }
 0x2c4   : > { %v3532_v25 = vadd.f32 %v3531_v14, %v3497_v38  ;;  %v3575_v48 = vmul.f32 %v3497_v38, %v3415_v45  ;;  %v4261_v3 = vpack.c.bf16 %v3497_v38, %v3496_v30  ;;  %v2000_v14 = vpack.c.b16 %v1976_v6, %v1975_v54  ;;  %v1209_v45 = vld [vmem:[#allocation2 + $0xeb] sm:$0xff] }
 0x2c5   : > { %v3221_v62 = vpop.f32.mrf.mxu2  ;;  %v3318_v18 = vpop.f32.mrf.mxu3  ;;  %v1869_v47 = vunpack.c.l.b16 %v1173_v5  ;;  %v1870_v56 = vunpack.c.l.b16 %v1174_v4  ;;  %v1101_v6 = vpack.c.bf16 %v1065_v39, %v1065_v39 }
 0x2c6   : > { %v3610_v22 = vadd.f32 %v3609_v10, %v3575_v48  ;;  %4356 = vst [vmem:[%s5305_s16 + $0x10] sm:$0xff] %v4261_v3   ;;  %v3319_v37 = vadd.f32 %v3318_v18, %v3220_v8  ;;  %v3417_v53 = vpop.f32.mrf.mxu0  ;;  %v1102_v48 = vpack.c.bf16 %v1066_v16, %v1066_v16  ;;  %v1210_v3 = vld [vmem:[#allocation2 + $0xf3] sm:$0xff]  ;;  %v1245_v8 = vpack.c.bf16 %v1209_v45, %v1209_v45 }
 0x2c7   : > { %v3122_v15 = vpop.f32.mrf.mxu1  ;;  %v1893_v18 = vpack.c.b16 %v1870_v56, %v1869_v47  ;;  %v1246_v46 = vpack.c.bf16 %v1210_v3, %v1210_v3  ;;  %v1068_v3 = vld [vmem:[#allocation2 + $0x111] sm:$0xff] }
 0x2c8   : > { %v3123_v50 = vadd.f32 %v3122_v15, %v5160_v0  ;;  %v3418_v40 = vadd.f32 %v3417_v53, %v3319_v37  ;;  %v1760_v15 = vunpack.c.l.b16 %v1102_v48  ;;  %v1977_v53 = vunpack.c.l.b16 %v1245_v8  ;;  %v1211_v8 = vld [vmem:[#allocation2 + $0xfb] sm:$0xff] }
 0x2c9   : > { %3456 = vmatmul.bf16.gmra.mxu0 %v2000_v14  ;;  %v1139_v14 = vld [vmem:[#allocation2 + $0xfa] sm:$0xff]  ;;  %v1978_v47 = vunpack.c.l.b16 %v1246_v46 }
 0x2ca   : > { %v3498_v30 = vmul.f32 %v3418_v40, %v5512_v49  ;;  %3263 = vmatmul.bf16.gmra.mxu2 %v5327_v28  ;;  %v3222_v21 = vadd.f32 %v3221_v62, %v3123_v50  ;;  %v5513_v62 = vld [vmem:[#allocation9_spill] sm:$0xff]  ;;  %v1175_v45 = vpack.c.bf16 %v1139_v14, %v1139_v14  ;;  %v5515_v14 = vld [vmem:[#allocation4_spill] sm:$0xff] }
 0x2cc   : > { %v3533_v10 = vadd.f32 %v3532_v25, %v3498_v30  ;;  %v3576_v26 = vmul.f32 %v3498_v30, %v3418_v40 }
 0x2cd   : > { %v3224_v12 = vpop.f32.mrf.mxu2  ;;  %v3320_v24 = vpop.f32.mrf.mxu3 }
 0x2ce   : > { %v3611_v0 = vadd.f32 %v3610_v22, %v3576_v26  ;;  %v3321_v38 = vadd.f32 %v3320_v24, %v3222_v21  ;;  %v3419_v54 = vpop.f32.mrf.mxu0  ;;  %v1759_v22 = vunpack.c.l.b16 %v1101_v6 }
 0x2cf   : > { %v3125_v23 = vpop.f32.mrf.mxu1 }
 0x2d0   : > { %v3126_v61 = vadd.f32 %v3125_v23, %v5166_v36  ;;  %v3420_v25 = vadd.f32 %v3419_v54, %v3321_v38  ;;  %v1140_v36 = vld [vmem:[#allocation2 + $0x102] sm:$0xff]  ;;  %v1871_v23 = vunpack.c.l.b16 %v1175_v45 }
 0x2d1   : > { %v1176_v56 = vpack.c.bf16 %v1140_v36, %v1140_v36 }
 0x2d2   : > { %v3499_v37 = vmul.f32 %v3420_v25, %v5513_v62  ;;  %3164 = vmatmul.bf16.gmra.mxu1 %v5318_v33  ;;  %3362 = vmatmul.bf16.gmra.mxu3 %v1893_v18  ;;  %v3225_v40 = vadd.f32 %v3224_v12, %v3126_v61  ;;  %v5335_v33 = vpack.c.b16 %v1760_v15, %v1759_v22  ;;  %v1212_v61 = vld [vmem:[#allocation2 + $0x103] sm:$0xff] }
 0x2d3   : > { %v1872_v48 = vunpack.c.l.b16 %v1176_v56  ;;  %v1067_v22 = vld [vmem:[#allocation2 + $0x109] sm:$0xff]  ;;  %v1104_v15 = vpack.c.bf16 %v1068_v3, %v1068_v3 }
 0x2d4   : > { %v3534_v55 = vadd.f32 %v3533_v10, %v3499_v37  ;;  %v3577_v5 = vmul.f32 %v3499_v37, %v3420_v25  ;;  %v4266_v50 = vpack.c.bf16 %v3499_v37, %v3498_v30  ;;  %v2001_v10 = vpack.c.b16 %v1978_v47, %v1977_v53  ;;  %v5514_v30 = vld [vmem:[#allocation3_spill] sm:$0xff] }
 0x2d5   : > { %v3226_v49 = vpop.f32.mrf.mxu2  ;;  %v3323_v4 = vpop.f32.mrf.mxu3  ;;  %v1247_v53 = vpack.c.bf16 %v1211_v8, %v1211_v8  ;;  %v1762_v36 = vunpack.c.l.b16 %v1104_v15 }
 0x2d6   : > { %v3612_v26 = vadd.f32 %v3611_v0, %v3577_v5  ;;  %4357 = vst [vmem:[%s5305_s16 + $0x18] sm:$0xff] %v4266_v50   ;;  %v3324_v21 = vadd.f32 %v3323_v4, %v3225_v40  ;;  %v3422_v16 = vpop.f32.mrf.mxu0  ;;  %v1248_v5 = vpack.c.bf16 %v1212_v61, %v1212_v61  ;;  %v1103_v4 = vpack.c.bf16 %v1067_v22, %v1067_v22  ;;  %v5516_v61 = vld [vmem:[#allocation5_spill] sm:$0xff]  ;;  %v1214_v22 = vld [vmem:[#allocation2 + $0x113] sm:$0xff] }
 0x2d7   : > { %v3127_v39 = vpop.f32.mrf.mxu1 }
 0x2d8   : > { %v3128_v24 = vadd.f32 %v3127_v39, %v5169_v29  ;;  %v3423_v38 = vadd.f32 %v3422_v16, %v3324_v21  ;;  %v1980_v21 = vunpack.c.l.b16 %v1248_v5 }
 0x2d9   : > { %3461 = vmatmul.bf16.gmra.mxu0 %v2001_v10  ;;  %v1142_v10 = vld [vmem:[#allocation2 + $0x112] sm:$0xff] }
 0x2da   : > { %v3500_v12 = vmul.f32 %v3423_v38, %v5514_v30  ;;  %3268 = vmatmul.bf16.gmra.mxu2 %v5335_v33  ;;  %v3227_v6 = vadd.f32 %v3226_v49, %v3128_v24  ;;  %v1761_v30 = vunpack.c.l.b16 %v1103_v4 }
 0x2dc   : > { %v3535_v0 = vadd.f32 %v3534_v55, %v3500_v12  ;;  %v3578_v54 = vmul.f32 %v3500_v12, %v3423_v38  ;;  %v1894_v55 = vpack.c.b16 %v1872_v48, %v1871_v23  ;;  %v5345_v8 = vpack.c.b16 %v1762_v36, %v1761_v30 }
 0x2dd   : > { %v3229_v25 = vpop.f32.mrf.mxu2  ;;  %v3325_v18 = vpop.f32.mrf.mxu3  ;;  %v1250_v36 = vpack.c.bf16 %v1214_v22, %v1214_v22 }
 0x2de   : > { %v3613_v62 = vadd.f32 %v3612_v26, %v3578_v54  ;;  %v3326_v29 = vadd.f32 %v3325_v18, %v3227_v6  ;;  %v3424_v46 = vpop.f32.mrf.mxu0  ;;  %v1979_v26 = vunpack.c.l.b16 %v1247_v53 }
 0x2df   : > { %v3130_v37 = vpop.f32.mrf.mxu1 }
 0x2e0   : > { %v3131_v50 = vadd.f32 %v3130_v37, %v5172_v34  ;;  %v3425_v40 = vadd.f32 %v3424_v46, %v3326_v29  ;;  %v2002_v6 = vpack.c.b16 %v1980_v21, %v1979_v26  ;;  %v1070_v46 = vld [vmem:[#allocation2 + $0x121] sm:$0xff] }
 0x2e1   : > { %v1106_v4 = vpack.c.bf16 %v1070_v46, %v1070_v46 }
 0x2e2   : > { %v3501_v49 = vmul.f32 %v3425_v40, %v5515_v14  ;;  %3169 = vmatmul.bf16.gmra.mxu1 %v5327_v28  ;;  %3367 = vmatmul.bf16.gmra.mxu3 %v1894_v55  ;;  %v3230_v45 = vadd.f32 %v3229_v25, %v3131_v50  ;;  %v1141_v28 = vld [vmem:[#allocation2 + $0x10a] sm:$0xff] }
 0x2e3   : > { %v1177_v25 = vpack.c.bf16 %v1141_v28, %v1141_v28 }
 0x2e4   : > { %v3536_v47 = vadd.f32 %v3535_v0, %v3501_v49  ;;  %v3579_v39 = vmul.f32 %v3501_v49, %v3425_v40  ;;  %v4271_v16 = vpack.c.bf16 %v3501_v49, %v3500_v12  ;;  %v1178_v0 = vpack.c.bf16 %v1142_v10, %v1142_v10  ;;  %v1213_v40 = vld [vmem:[#allocation2 + $0x10b] sm:$0xff]  ;;  %v1069_v49 = vld [vmem:[#allocation2 + $0x119] sm:$0xff] }
 0x2e5   : > { %v3231_v24 = vpop.f32.mrf.mxu2  ;;  %v3328_v38 = vpop.f32.mrf.mxu3  ;;  %v1873_v50 = vunpack.c.l.b16 %v1177_v25  ;;  %v1982_v10 = vunpack.c.l.b16 %v1250_v36 }
 0x2e6   : > { %v3614_v34 = vadd.f32 %v3613_v62, %v3579_v39  ;;  %4358 = vst [vmem:[%s5305_s16 + $0x20] sm:$0xff] %v4271_v16   ;;  %v3329_v56 = vadd.f32 %v3328_v38, %v3230_v45  ;;  %v3427_v54 = vpop.f32.mrf.mxu0  ;;  %v1874_v37 = vunpack.c.l.b16 %v1178_v0  ;;  %v1249_v39 = vpack.c.bf16 %v1213_v40, %v1213_v40  ;;  %v5517_v16 = vld [vmem:[#allocation15_spill] sm:$0xff] }
 0x2e7   : > { %v3132_v23 = vpop.f32.mrf.mxu1  ;;  %v1764_v38 = vunpack.c.l.b16 %v1106_v4  ;;  %v1071_v40 = vld [vmem:[#allocation2 + $0x129] sm:$0xff] }
 0x2e8   : > { %v3133_v48 = vadd.f32 %v3132_v23, %v5181_v43  ;;  %v3428_v3 = vadd.f32 %v3427_v54, %v3329_v56  ;;  %v1981_v28 = vunpack.c.l.b16 %v1249_v39  ;;  %v1107_v39 = vpack.c.bf16 %v1071_v40, %v1071_v40 }
 0x2e9   : > { %3466 = vmatmul.bf16.gmra.mxu0 %v2002_v6 }
 0x2ea   : > { %v3502_v12 = vmul.f32 %v3428_v3, %v5516_v61  ;;  %3273 = vmatmul.bf16.gmra.mxu2 %v5345_v8  ;;  %v3232_v29 = vadd.f32 %v3231_v24, %v3133_v48  ;;  %v1105_v24 = vpack.c.bf16 %v1069_v49, %v1069_v49 }
 0x2ec   : > { %v3537_v18 = vadd.f32 %v3536_v47, %v3502_v12  ;;  %v3580_v62 = vmul.f32 %v3502_v12, %v3428_v3  ;;  %v1895_v47 = vpack.c.b16 %v1874_v37, %v1873_v50  ;;  %v1763_v0 = vunpack.c.l.b16 %v1105_v24 }
 0x2ed   : > { %v3234_v15 = vpop.f32.mrf.mxu2  ;;  %v3330_v53 = vpop.f32.mrf.mxu3 }
 0x2ee   : > { %v3615_v5 = vadd.f32 %v3614_v34, %v3580_v62  ;;  %v3331_v43 = vadd.f32 %v3330_v53, %v3232_v29  ;;  %v3429_v14 = vpop.f32.mrf.mxu0  ;;  %v2003_v62 = vpack.c.b16 %v1982_v10, %v1981_v28  ;;  %v5354_v46 = vpack.c.b16 %v1764_v38, %v1763_v0  ;;  %v1145_v0 = vld [vmem:[#allocation2 + $0x12a] sm:$0xff] }
 0x2ef   : > { %v3135_v55 = vpop.f32.mrf.mxu1 }
 0x2f0   : > { %v3136_v26 = vadd.f32 %v3135_v55, %v5190_v58  ;;  %v3430_v21 = vadd.f32 %v3429_v14, %v3331_v43  ;;  %v1144_v58 = vld [vmem:[#allocation2 + $0x122] sm:$0xff] }
 0x2f1   : > { %v1216_v55 = vld [vmem:[#allocation2 + $0x123] sm:$0xff] }
 0x2f2   : > { %v3503_v45 = vmul.f32 %v3430_v21, %v5517_v16  ;;  %3174 = vmatmul.bf16.gmra.mxu1 %v5335_v33  ;;  %3372 = vmatmul.bf16.gmra.mxu3 %v1895_v47  ;;  %v3235_v23 = vadd.f32 %v3234_v15, %v3136_v26  ;;  %v1143_v33 = vld [vmem:[#allocation2 + $0x11a] sm:$0xff]  ;;  %v1072_v47 = vld [vmem:[#allocation2 + $0x131] sm:$0xff] }
 0x2f3   : > { %v1179_v15 = vpack.c.bf16 %v1143_v33, %v1143_v33  ;;  %v1215_v16 = vld [vmem:[#allocation2 + $0x11b] sm:$0xff] }
 0x2f4   : > { %v3538_v34 = vadd.f32 %v3537_v18, %v3503_v45  ;;  %v3581_v56 = vmul.f32 %v3503_v45, %v3430_v21  ;;  %v4276_v30 = vpack.c.bf16 %v3503_v45, %v3502_v12  ;;  %v1180_v18 = vpack.c.bf16 %v1144_v58, %v1144_v58  ;;  %v5518_v12 = vld [vmem:[#allocation14_spill] sm:$0xff] }
 0x2f5   : > { %v3236_v54 = vpop.f32.mrf.mxu2  ;;  %v3333_v6 = vpop.f32.mrf.mxu3  ;;  %v1875_v36 = vunpack.c.l.b16 %v1179_v15  ;;  %v1252_v45 = vpack.c.bf16 %v1216_v55, %v1216_v55  ;;  %v1109_v55 = vld [vmem:[#allocation2 + $0x139] sm:$0xff] }
 0x2f6   : > { %v3616_v48 = vadd.f32 %v3615_v5, %v3581_v56  ;;  %4359 = vst [vmem:[%s5305_s16 + $0x28] sm:$0xff] %v4276_v30   ;;  %v3334_v3 = vadd.f32 %v3333_v6, %v3235_v23  ;;  %v3432_v25 = vpop.f32.mrf.mxu0  ;;  %v1876_v50 = vunpack.c.l.b16 %v1180_v18  ;;  %v1108_v30 = vpack.c.bf16 %v1072_v47, %v1072_v47 }
 0x2f7   : > { %v3137_v61 = vpop.f32.mrf.mxu1  ;;  %v1251_v23 = vpack.c.bf16 %v1215_v16, %v1215_v16  ;;  %v1984_v6 = vunpack.c.l.b16 %v1252_v45  ;;  %v1111_v45 = vpack.c.bf16 %v1109_v55, %v1109_v55 }
 0x2f8   : > { %v3138_v29 = vadd.f32 %v3137_v61, %v5193_v27  ;;  %v3433_v37 = vadd.f32 %v3432_v25, %v3334_v3  ;;  %v1896_v10 = vpack.c.b16 %v1876_v50, %v1875_v36  ;;  %v1766_v33 = vunpack.c.l.b16 %v1108_v30  ;;  %v5520_v50 = vld [vmem:[#allocation29_spill] sm:$0xff] }
 0x2f9   : > { %3471 = vmatmul.bf16.gmra.mxu0 %v2003_v62 }
 0x2fa   : > { %v3504_v22 = vmul.f32 %v3433_v37, %v5518_v12  ;;  %3278 = vmatmul.bf16.gmra.mxu2 %v5354_v46  ;;  %v3237_v43 = vadd.f32 %v3236_v54, %v3138_v29  ;;  %v1765_v54 = vunpack.c.l.b16 %v1107_v39  ;;  %v1983_v29 = vunpack.c.l.b16 %v1251_v23 }
 0x2fb   : > { %v1181_v12 = vpack.c.bf16 %v1145_v0, %v1145_v0  ;;  %v1147_v0 = vld [vmem:[#allocation2 + $0x13a] sm:$0xff] }
 0x2fc   : > { %v3539_v53 = vadd.f32 %v3538_v34, %v3504_v22  ;;  %v3582_v5 = vmul.f32 %v3504_v22, %v3433_v37  ;;  %v5519_v34 = vld [vmem:[#allocation24_spill] sm:$0xff] }
 0x2fd   : > { %v3239_v14 = vpop.f32.mrf.mxu2  ;;  %v3335_v49 = vpop.f32.mrf.mxu3  ;;  %v1146_v37 = vld [vmem:[#allocation2 + $0x132] sm:$0xff]  ;;  %v1877_v36 = vunpack.c.l.b16 %v1181_v12 }
 0x2fe   : > { %v3617_v4 = vadd.f32 %v3616_v48, %v3582_v5  ;;  %v3336_v27 = vadd.f32 %v3335_v49, %v3237_v43  ;;  %v3434_v21 = vpop.f32.mrf.mxu0  ;;  %v5363_v43 = vpack.c.b16 %v1766_v33, %v1765_v54 }
 0x2ff   : > { %v3140_v26 = vpop.f32.mrf.mxu1 }
 0x300   : > { %v3141_v24 = vadd.f32 %v3140_v26, %v5196_v51  ;;  %v3435_v38 = vadd.f32 %v3434_v21, %v3336_v27  ;;  %v1217_v26 = vld [vmem:[#allocation2 + $0x12b] sm:$0xff] }
 0x302   : > { %v3505_v56 = vmul.f32 %v3435_v38, %v5519_v34  ;;  %3179 = vmatmul.bf16.gmra.mxu1 %v5345_v8  ;;  %3377 = vmatmul.bf16.gmra.mxu3 %v1896_v10  ;;  %v3240_v3 = vadd.f32 %v3239_v14, %v3141_v24  ;;  %v1110_v14 = vld [vmem:[#allocation2 + $0x141] sm:$0xff]  ;;  %v1218_v34 = vld [vmem:[#allocation2 + $0x133] sm:$0xff] }
 0x303   : > { %v1112_v24 = vpack.c.bf16 %v1110_v14, %v1110_v14 }
 0x304   : > { %v3540_v28 = vadd.f32 %v3539_v53, %v3505_v56  ;;  %v3583_v58 = vmul.f32 %v3505_v56, %v3435_v38  ;;  %v4281_v48 = vpack.c.bf16 %v3505_v56, %v3504_v22  ;;  %v2004_v53 = vpack.c.b16 %v1984_v6, %v1983_v29  ;;  %v5521_v6 = vld [vmem:[#allocation22_spill] sm:$0xff] }
 0x305   : > { %v3241_v61 = vpop.f32.mrf.mxu2  ;;  %v3338_v25 = vpop.f32.mrf.mxu3  ;;  %v1182_v22 = vpack.c.bf16 %v1146_v37, %v1146_v37  ;;  %v1253_v56 = vpack.c.bf16 %v1217_v26, %v1217_v26  ;;  %v1220_v26 = vld [vmem:[#allocation2 + $0x143] sm:$0xff] }
 0x306   : > { %v3618_v51 = vadd.f32 %v3617_v4, %v3583_v58  ;;  %4360 = vst [vmem:[%s5305_s16 + $0x30] sm:$0xff] %v4281_v48   ;;  %v3339_v62 = vadd.f32 %v3338_v25, %v3240_v3  ;;  %v3437_v8 = vpop.f32.mrf.mxu0  ;;  %v1805_v58 = vunpack.c.l.b16 %v1111_v45  ;;  %v1806_v48 = vunpack.c.l.b16 %v1112_v24 }
 0x307   : > { %v3142_v18 = vpop.f32.mrf.mxu1  ;;  %v1254_v3 = vpack.c.bf16 %v1218_v34, %v1218_v34  ;;  %v1985_v25 = vunpack.c.l.b16 %v1253_v56 }
 0x308   : > { %v3143_v15 = vadd.f32 %v3142_v18, %v5199_v13  ;;  %v3438_v5 = vadd.f32 %v3437_v8, %v3339_v62  ;;  %v1878_v13 = vunpack.c.l.b16 %v1182_v22  ;;  %v1183_v18 = vpack.c.bf16 %v1147_v0, %v1147_v0 }
 0x309   : > { %3476 = vmatmul.bf16.gmra.mxu0 %v2004_v53 }
 0x30a   : > { %v3506_v40 = vmul.f32 %v3438_v5, %v5520_v50  ;;  %3283 = vmatmul.bf16.gmra.mxu2 %v5363_v43  ;;  %v3242_v27 = vadd.f32 %v3241_v61, %v3143_v15  ;;  %v1897_v54 = vpack.c.b16 %v1878_v13, %v1877_v36  ;;  %v1148_v61 = vld [vmem:[#allocation2 + $0x142] sm:$0xff] }
 0x30b   : > { %v1184_v8 = vpack.c.bf16 %v1148_v61, %v1148_v61  ;;  %v1219_v36 = vld [vmem:[#allocation2 + $0x13b] sm:$0xff] }
 0x30c   : > { %v3541_v49 = vadd.f32 %v3540_v28, %v3506_v40  ;;  %v3584_v4 = vmul.f32 %v3506_v40, %v3438_v5  ;;  %v1986_v5 = vunpack.c.l.b16 %v1254_v3 }
 0x30d   : > { %v3244_v21 = vpop.f32.mrf.mxu2  ;;  %v3340_v47 = vpop.f32.mrf.mxu3 }
 0x30e   : > { %v3619_v39 = vadd.f32 %v3618_v51, %v3584_v4  ;;  %v3341_v16 = vadd.f32 %v3340_v47, %v3242_v27  ;;  %v3439_v10 = vpop.f32.mrf.mxu0  ;;  %v2005_v14 = vpack.c.b16 %v1986_v5, %v1985_v25  ;;  %v1879_v4 = vunpack.c.l.b16 %v1183_v18  ;;  %v5522_v27 = vld [vmem:[#allocation28_spill] sm:$0xff] }
 0x30f   : > { %v3145_v38 = vpop.f32.mrf.mxu1 }
 0x310   : > { %v3146_v30 = vadd.f32 %v3145_v38, %v5202_v7  ;;  %v3440_v23 = vadd.f32 %v3439_v10, %v3341_v16  ;;  %v1255_v10 = vpack.c.bf16 %v1219_v36, %v1219_v36  ;;  %v5526_v36 = vld [vmem:[#allocation6_spill] sm:$0xff] }
 0x312   : > { %v3507_v28 = vmul.f32 %v3440_v23, %v5521_v6  ;;  %3184 = vmatmul.bf16.gmra.mxu1 %v5354_v46  ;;  %3382 = vmatmul.bf16.gmra.mxu3 %v1897_v54  ;;  %v3245_v29 = vadd.f32 %v3244_v21, %v3146_v30  ;;  %v1807_v46 = vpack.c.b16 %v1806_v48, %v1805_v58  ;;  %v5523_v30 = vld [vmem:[#allocation38_spill] sm:$0xff]  ;;  %v5524_v6 = vld [vmem:[#allocation7_spill] sm:$0xff]  ;;  %v1987_v58 = vunpack.c.l.b16 %v1255_v10 }
 0x314   : > { %v3542_v51 = vadd.f32 %v3541_v49, %v3507_v28  ;;  %v3585_v62 = vmul.f32 %v3507_v28, %v3440_v23  ;;  %v4286_v33 = vpack.c.bf16 %v3507_v28, %v3506_v40  ;;  %v1880_v49 = vunpack.c.l.b16 %v1184_v8 }
 0x315   : > { %v3246_v37 = vpop.f32.mrf.mxu2  ;;  %v3343_v7 = vpop.f32.mrf.mxu3 }
 0x316   : > { %v3620_v12 = vadd.f32 %v3619_v39, %v3585_v62  ;;  %4361 = vst [vmem:[%s5305_s16 + $0x38] sm:$0xff] %v4286_v33   ;;  %v3344_v15 = vadd.f32 %v3343_v7, %v3245_v29  ;;  %v3442_v22 = vpop.f32.mrf.mxu0  ;;  %v1898_v45 = vpack.c.b16 %v1880_v49, %v1879_v4 }
 0x317   : > { %v3147_v53 = vpop.f32.mrf.mxu1 }
 0x318   : > { %v3148_v50 = vadd.f32 %v3147_v53, %v5205_v44  ;;  %v3443_v55 = vadd.f32 %v3442_v22, %v3344_v15  ;;  %v1256_v44 = vpack.c.bf16 %v1220_v26, %v1220_v26  ;;  %v5525_v15 = vld [vmem:[#allocation10_spill] sm:$0xff] }
 0x319   : > { %3481 = vmatmul.bf16.gmra.mxu0 %v2005_v14 }
 0x31a   : > { %v3508_v40 = vmul.f32 %v3443_v55, %v5522_v27  ;;  %3288 = vmatmul.bf16.gmra.mxu2 %v1807_v46  ;;  %v3247_v13 = vadd.f32 %v3246_v37, %v3148_v50  ;;  %v1988_v48 = vunpack.c.l.b16 %v1256_v44 }
 0x31c   : > { %v3543_v21 = vadd.f32 %v3542_v51, %v3508_v40  ;;  %v3586_v47 = vmul.f32 %v3508_v40, %v3443_v55  ;;  %v2006_v37 = vpack.c.b16 %v1988_v48, %v1987_v58 }
 0x31d   : > { %v3249_v39 = vpop.f32.mrf.mxu2  ;;  %v3345_v16 = vpop.f32.mrf.mxu3 }
 0x31e   : > { %v3621_v24 = vadd.f32 %v3620_v12, %v3586_v47  ;;  %v3346_v38 = vadd.f32 %v3345_v16, %v3247_v13  ;;  %v3444_v56 = vpop.f32.mrf.mxu0 }
 0x31f   : > { %v3150_v34 = vpop.f32.mrf.mxu1 }
 0x320   : > { %v3151_v23 = vadd.f32 %v3150_v34, %v5523_v30  ;;  %v3445_v54 = vadd.f32 %v3444_v56, %v3346_v38  ;;  %v5527_v56 = vld [vmem:[#allocation13_spill] sm:$0xff] }
 0x322   : > { %v3509_v28 = vmul.f32 %v3445_v54, %v5524_v6  ;;  %3189 = vmatmul.bf16.gmra.mxu1 %v5363_v43  ;;  %3387 = vmatmul.bf16.gmra.mxu3 %v1898_v45  ;;  %v3250_v25 = vadd.f32 %v3249_v39, %v3151_v23 }
 0x324   : > { %v3544_v3 = vadd.f32 %v3543_v21, %v3509_v28  ;;  %v3587_v0 = vmul.f32 %v3509_v28, %v3445_v54  ;;  %v4291_v61 = vpack.c.bf16 %v3509_v28, %v3508_v40 }
 0x325   : > { %v3251_v51 = vpop.f32.mrf.mxu2  ;;  %v3348_v62 = vpop.f32.mrf.mxu3 }
 0x326   : > { %v3622_v33 = vadd.f32 %v3621_v24, %v3587_v0  ;;  %4362 = vst [vmem:[%s5305_s16 + $0x40] sm:$0xff] %v4291_v61   ;;  %v3349_v29 = vadd.f32 %v3348_v62, %v3250_v25  ;;  %v3447_v18 = vpop.f32.mrf.mxu0 }
 0x327   : > { %v3152_v7 = vpop.f32.mrf.mxu1 }
 0x328   : > { %v3153_v8 = vadd.f32 %v3152_v7, %v5214_v42  ;;  %v3448_v12 = vadd.f32 %v3447_v18, %v3349_v29 }
 0x329   : > { %3486 = vmatmul.bf16.gmra.mxu0 %v2006_v37 }
 0x32a   : > { %v3510_v43 = vmul.f32 %v3448_v12, %v5525_v15  ;;  %v3252_v53 = vadd.f32 %v3251_v51, %v3153_v8  ;;  %v5528_v51 = vld [vmem:[#allocation12_spill] sm:$0xff] }
 0x32c   : > { %v3545_v46 = vadd.f32 %v3544_v3, %v3510_v43  ;;  %v3588_v5 = vmul.f32 %v3510_v43, %v3448_v12 }
 0x32d   : > { %v3254_v22 = vpop.f32.mrf.mxu2  ;;  %v3350_v50 = vpop.f32.mrf.mxu3 }
 0x32e   : > { %v3623_v55 = vadd.f32 %v3622_v33, %v3588_v5  ;;  %v3351_v14 = vadd.f32 %v3350_v50, %v3252_v53  ;;  %v3449_v49 = vpop.f32.mrf.mxu0  ;;  %v5529_v53 = vld [vmem:[#allocation18_spill] sm:$0xff] }
 0x32f   : > { %v3155_v4 = vpop.f32.mrf.mxu1 }
 0x330   : > { %v3156_v27 = vadd.f32 %v3155_v4, %v5217_v35  ;;  %v3450_v40 = vadd.f32 %v3449_v49, %v3351_v14 }
 0x332   : > { %v3511_v26 = vmul.f32 %v3450_v40, %v5526_v36  ;;  %v3255_v13 = vadd.f32 %v3254_v22, %v3156_v27 }
 0x334   : > { %v3546_v42 = vadd.f32 %v3545_v46, %v3511_v26  ;;  %v3589_v21 = vmul.f32 %v3511_v26, %v3450_v40  ;;  %v4296_v47 = vpack.c.bf16 %v3511_v26, %v3510_v43 }
 0x335   : > { %v3256_v39 = vpop.f32.mrf.mxu2  ;;  %v3353_v16 = vpop.f32.mrf.mxu3 }
 0x336   : > { %v3624_v45 = vadd.f32 %v3623_v55, %v3589_v21  ;;  %4363 = vst [vmem:[%s5305_s16 + $0x48] sm:$0xff] %v4296_v47   ;;  %v3354_v24 = vadd.f32 %v3353_v16, %v3255_v13  ;;  %v3452_v10 = vpop.f32.mrf.mxu0  ;;  %v5530_v21 = vld [vmem:[#allocation17_spill] sm:$0xff] }
 0x337   : > { %v3157_v38 = vpop.f32.mrf.mxu1 }
 0x338   : > { %v3158_v44 = vadd.f32 %v3157_v38, %v5223_v52  ;;  %v3453_v34 = vadd.f32 %v3452_v10, %v3354_v24 }
 0x33a   : > { %v3512_v30 = vmul.f32 %v3453_v34, %v5527_v56  ;;  %v3257_v54 = vadd.f32 %v3256_v39, %v3158_v44 }
 0x33c   : > { %v3547_v35 = vadd.f32 %v3546_v42, %v3512_v30  ;;  %v3590_v23 = vmul.f32 %v3512_v30, %v3453_v34 }
 0x33d   : > { %v3259_v6 = vpop.f32.mrf.mxu2  ;;  %v3355_v28 = vpop.f32.mrf.mxu3 }
 0x33e   : > { %v3625_v58 = vadd.f32 %v3624_v45, %v3590_v23  ;;  %v3356_v48 = vadd.f32 %v3355_v28, %v3257_v54  ;;  %v3454_v0 = vpop.f32.mrf.mxu0 }
 0x33f   : > { %v3160_v3 = vpop.f32.mrf.mxu1 }
 0x340   : > { %v3161_v61 = vadd.f32 %v3160_v3, %v5227_v32  ;;  %v3455_v25 = vadd.f32 %v3454_v0, %v3356_v48 }
 0x342   : > { %v3513_v62 = vmul.f32 %v3455_v25, %v5528_v51  ;;  %v3260_v37 = vadd.f32 %v3259_v6, %v3161_v61 }
 0x344   : > { %v3548_v33 = vadd.f32 %v3547_v35, %v3513_v62  ;;  %v3591_v52 = vmul.f32 %v3513_v62, %v3455_v25  ;;  %v4301_v29 = vpack.c.bf16 %v3513_v62, %v3512_v30  ;;  %v5531_v35 = vld [vmem:[#allocation27_spill] sm:$0xff]  ;;  %v5532_v62 = vld [vmem:[#allocation26_spill] sm:$0xff] }
 0x345   : > { %v3261_v7 = vpop.f32.mrf.mxu2  ;;  %v3358_v18 = vpop.f32.mrf.mxu3 }
 0x346   : > { %v3626_v8 = vadd.f32 %v3625_v58, %v3591_v52  ;;  %4364 = vst [vmem:[%s5305_s16 + $0x50] sm:$0xff] %v4301_v29   ;;  %v3359_v12 = vadd.f32 %v3358_v18, %v3260_v37  ;;  %v3457_v43 = vpop.f32.mrf.mxu0 }
 0x347   : > { %v3162_v15 = vpop.f32.mrf.mxu1 }
 0x348   : > { %v3163_v46 = vadd.f32 %v3162_v15, %v5233_v63  ;;  %v3458_v5 = vadd.f32 %v3457_v43, %v3359_v12 }
 0x34a   : > { %v3514_v22 = vmul.f32 %v3458_v5, %v5529_v53  ;;  %v3262_v55 = vadd.f32 %v3261_v7, %v3163_v46  ;;  %v5533_v53 = vld [vmem:[#allocation25_spill] sm:$0xff] }
 0x34c   : > { %v3549_v32 = vadd.f32 %v3548_v33, %v3514_v22  ;;  %v3592_v50 = vmul.f32 %v3514_v22, %v3458_v5 }
 0x34d   : > { %v3264_v14 = vpop.f32.mrf.mxu2  ;;  %v3360_v4 = vpop.f32.mrf.mxu3 }
 0x34e   : > { %v3627_v49 = vadd.f32 %v3626_v8, %v3592_v50  ;;  %v3361_v27 = vadd.f32 %v3360_v4, %v3262_v55  ;;  %v3459_v36 = vpop.f32.mrf.mxu0 }
 0x34f   : > { %v3165_v40 = vpop.f32.mrf.mxu1 }
 0x350   : > { %v3166_v26 = vadd.f32 %v3165_v40, %v5237_v2  ;;  %v3460_v42 = vadd.f32 %v3459_v36, %v3361_v27 }
 0x352   : > { %v3515_v47 = vmul.f32 %v3460_v42, %v5530_v21  ;;  %v3265_v16 = vadd.f32 %v3264_v14, %v3166_v26 }
 0x354   : > { %v3550_v13 = vadd.f32 %v3549_v32, %v3515_v47  ;;  %v3593_v63 = vmul.f32 %v3515_v47, %v3460_v42  ;;  %v4306_v39 = vpack.c.bf16 %v3515_v47, %v3514_v22  ;;  %v5534_v42 = vld [vmem:[#allocation11_spill] sm:$0xff] }
 0x355   : > { %v3266_v45 = vpop.f32.mrf.mxu2  ;;  %v3363_v24 = vpop.f32.mrf.mxu3 }
 0x356   : > { %v3628_v38 = vadd.f32 %v3627_v49, %v3593_v63  ;;  %4365 = vst [vmem:[%s5305_s16 + $0x58] sm:$0xff] %v4306_v39   ;;  %v3364_v10 = vadd.f32 %v3363_v24, %v3265_v16  ;;  %v3462_v34 = vpop.f32.mrf.mxu0 }
 0x357   : > { %v3167_v44 = vpop.f32.mrf.mxu1 }
 0x358   : > { %v3168_v56 = vadd.f32 %v3167_v44, %v5243_v60  ;;  %v3463_v30 = vadd.f32 %v3462_v34, %v3364_v10 }
 0x35a   : > { %v3516_v23 = vmul.f32 %v3463_v30, %v5531_v35  ;;  %v3267_v6 = vadd.f32 %v3266_v45, %v3168_v56  ;;  %v5535_v56 = vld [vmem:[#allocation21_spill] sm:$0xff] }
 0x35c   : > { %v3551_v2 = vadd.f32 %v3550_v13, %v3516_v23  ;;  %v3594_v54 = vmul.f32 %v3516_v23, %v3463_v30 }
 0x35d   : > { %v3269_v28 = vpop.f32.mrf.mxu2  ;;  %v3365_v58 = vpop.f32.mrf.mxu3 }
 0x35e   : > { %v3629_v48 = vadd.f32 %v3628_v38, %v3594_v54  ;;  %v3366_v3 = vadd.f32 %v3365_v58, %v3267_v6  ;;  %v3464_v61 = vpop.f32.mrf.mxu0 }
 0x35f   : > { %v3170_v0 = vpop.f32.mrf.mxu1 }
 0x360   : > { %v3171_v25 = vadd.f32 %v3170_v0, %v5247_v1  ;;  %v3465_v51 = vadd.f32 %v3464_v61, %v3366_v3  ;;  %v5536_v61 = vld [vmem:[#allocation20_spill] sm:$0xff] }
 0x362   : > { %v3517_v33 = vmul.f32 %v3465_v51, %v5532_v62  ;;  %v3270_v37 = vadd.f32 %v3269_v28, %v3171_v25 }
 0x364   : > { %v3552_v52 = vadd.f32 %v3551_v2, %v3517_v33  ;;  %v3595_v60 = vmul.f32 %v3517_v33, %v3465_v51  ;;  %v4311_v29 = vpack.c.bf16 %v3517_v33, %v3516_v23 }
 0x365   : > { %v3271_v7 = vpop.f32.mrf.mxu2  ;;  %v3368_v18 = vpop.f32.mrf.mxu3 }
 0x366   : > { %v3630_v8 = vadd.f32 %v3629_v48, %v3595_v60  ;;  %4366 = vst [vmem:[%s5305_s16 + $0x60] sm:$0xff] %v4311_v29   ;;  %v3369_v12 = vadd.f32 %v3368_v18, %v3270_v37  ;;  %v3467_v43 = vpop.f32.mrf.mxu0 }
 0x367   : > { %v3172_v15 = vpop.f32.mrf.mxu1 }
 0x368   : > { %v3173_v46 = vadd.f32 %v3172_v15, %v5250_v57  ;;  %v3468_v5 = vadd.f32 %v3467_v43, %v3369_v12  ;;  %v5537_v15 = vld [vmem:[#allocation19_spill] sm:$0xff] }
 0x36a   : > { %v3518_v22 = vmul.f32 %v3468_v5, %v5533_v53  ;;  %v3272_v50 = vadd.f32 %v3271_v7, %v3173_v46 }
 0x36c   : > { %v3553_v1 = vadd.f32 %v3552_v52, %v3518_v22  ;;  %v3596_v32 = vmul.f32 %v3518_v22, %v3468_v5 }
 0x36d   : > { %v3274_v55 = vpop.f32.mrf.mxu2  ;;  %v3370_v14 = vpop.f32.mrf.mxu3 }
 0x36e   : > { %v3631_v4 = vadd.f32 %v3630_v8, %v3596_v32  ;;  %v3371_v49 = vadd.f32 %v3370_v14, %v3272_v50  ;;  %v3469_v40 = vpop.f32.mrf.mxu0 }
 0x36f   : > { %v3175_v27 = vpop.f32.mrf.mxu1 }
 0x370   : > { %v3176_v36 = vadd.f32 %v3175_v27, %v5254_v19  ;;  %v3470_v26 = vadd.f32 %v3469_v40, %v3371_v49  ;;  %v5538_v49 = vld [vmem:[#allocation30_spill] sm:$0xff] }
 0x372   : > { %v3519_v21 = vmul.f32 %v3470_v26, %v5534_v42  ;;  %v3275_v63 = vadd.f32 %v3274_v55, %v3176_v36 }
 0x374   : > { %v3554_v47 = vadd.f32 %v3553_v1, %v3519_v21  ;;  %v3597_v57 = vmul.f32 %v3519_v21, %v3470_v26  ;;  %v4316_v13 = vpack.c.bf16 %v3519_v21, %v3518_v22 }
 0x375   : > { %v3276_v39 = vpop.f32.mrf.mxu2  ;;  %v3373_v16 = vpop.f32.mrf.mxu3 }
 0x376   : > { %v3632_v45 = vadd.f32 %v3631_v4, %v3597_v57  ;;  %4367 = vst [vmem:[%s5305_s16 + $0x68] sm:$0xff] %v4316_v13   ;;  %v3374_v24 = vadd.f32 %v3373_v16, %v3275_v63  ;;  %v3472_v10 = vpop.f32.mrf.mxu0 }
 0x377   : > { %v3177_v38 = vpop.f32.mrf.mxu1 }
 0x378   : > { %v3178_v44 = vadd.f32 %v3177_v38, %v5260_v9  ;;  %v3473_v34 = vadd.f32 %v3472_v10, %v3374_v24 }
 0x37a   : > { %v3520_v30 = vmul.f32 %v3473_v34, %v5535_v56  ;;  %v3277_v23 = vadd.f32 %v3276_v39, %v3178_v44 }
 0x37c   : > { %v3555_v19 = vadd.f32 %v3554_v47, %v3520_v30  ;;  %v3598_v35 = vmul.f32 %v3520_v30, %v3473_v34 }
 0x37d   : > { %v3279_v2 = vpop.f32.mrf.mxu2  ;;  %v3375_v54 = vpop.f32.mrf.mxu3 }
 0x37e   : > { %v3633_v6 = vadd.f32 %v3632_v45, %v3598_v35  ;;  %v3376_v28 = vadd.f32 %v3375_v54, %v3277_v23  ;;  %v3474_v48 = vpop.f32.mrf.mxu0  ;;  %v5539_v45 = vld [vmem:[#allocation35_spill] sm:$0xff]  ;;  %v5540_v54 = vld [vmem:[#allocation34_spill] sm:$0xff] }
 0x37f   : > { %v3180_v58 = vpop.f32.mrf.mxu1 }
 0x380   : > { %v3181_v3 = vadd.f32 %v3180_v58, %v5263_v59  ;;  %v3475_v0 = vadd.f32 %v3474_v48, %v3376_v28 }
 0x382   : > { %v3521_v25 = vmul.f32 %v3475_v0, %v5536_v61  ;;  %v3280_v33 = vadd.f32 %v3279_v2, %v3181_v3 }
 0x384   : > { %v3556_v51 = vadd.f32 %v3555_v19, %v3521_v25  ;;  %v3599_v9 = vmul.f32 %v3521_v25, %v3475_v0  ;;  %v4321_v62 = vpack.c.bf16 %v3521_v25, %v3520_v30 }
 0x385   : > { %v3281_v52 = vpop.f32.mrf.mxu2  ;;  %v3378_v60 = vpop.f32.mrf.mxu3 }
 0x386   : > { %v3634_v29 = vadd.f32 %v3633_v6, %v3599_v9  ;;  %4368 = vst [vmem:[%s5305_s16 + $0x70] sm:$0xff] %v4321_v62   ;;  %v3379_v37 = vadd.f32 %v3378_v60, %v3280_v33  ;;  %v3477_v18 = vpop.f32.mrf.mxu0  ;;  %v5541_v33 = vld [vmem:[#allocation36_spill] sm:$0xff] }
 0x387   : > { %v3182_v7 = vpop.f32.mrf.mxu1 }
 0x388   : > { %v3183_v8 = vadd.f32 %v3182_v7, %v5269_v31  ;;  %v3478_v12 = vadd.f32 %v3477_v18, %v3379_v37 }
 0x38a   : > { %v3522_v43 = vmul.f32 %v3478_v12, %v5537_v15  ;;  %v3282_v5 = vadd.f32 %v3281_v52, %v3183_v8 }
 0x38c   : > { %v3557_v59 = vadd.f32 %v3556_v51, %v3522_v43  ;;  %v3600_v46 = vmul.f32 %v3522_v43, %v3478_v12 }
 0x38d   : > { %v3284_v53 = vpop.f32.mrf.mxu2  ;;  %v3380_v22 = vpop.f32.mrf.mxu3 }
 0x38e   : > { %v3635_v1 = vadd.f32 %v3634_v29, %v3600_v46  ;;  %v3381_v32 = vadd.f32 %v3380_v22, %v3282_v5  ;;  %v3479_v55 = vpop.f32.mrf.mxu0 }
 0x38f   : > { %v3185_v50 = vpop.f32.mrf.mxu1 }
 0x390   : > { %v3186_v14 = vadd.f32 %v3185_v50, %v5273_v17  ;;  %v3480_v4 = vadd.f32 %v3479_v55, %v3381_v32 }
 0x392   : > { %v3523_v27 = vmul.f32 %v3480_v4, %v5538_v49  ;;  %v3285_v26 = vadd.f32 %v3284_v53, %v3186_v14 }
 0x394   : > { %v3558_v40 = vadd.f32 %v3557_v59, %v3523_v27  ;;  %v3601_v31 = vmul.f32 %v3523_v27, %v3480_v4  ;;  %v4326_v36 = vpack.c.bf16 %v3523_v27, %v3522_v43  ;;  %v5542_v43 = vld [vmem:[#allocation31_spill] sm:$0xff] }
 0x395   : > { %v3383_v42 = vpop.f32.mrf.mxu3  ;;  %v3286_v47 = vpop.f32.mrf.mxu2 }
 0x396   : > { %v3636_v21 = vadd.f32 %v3635_v1, %v3601_v31  ;;  %4369 = vst [vmem:[%s5305_s16 + $0x78] sm:$0xff] %v4326_v36   ;;  %v3384_v57 = vadd.f32 %v3383_v42, %v3285_v26  ;;  %v3482_v63 = vpop.f32.mrf.mxu0 }
 0x397   : > { %v3187_v13 = vpop.f32.mrf.mxu1 }
 0x398   : > { %v3188_v39 = vadd.f32 %v3187_v13, %v5279_v41  ;;  %v3483_v16 = vadd.f32 %v3482_v63, %v3384_v57 }
 0x39a   : > { %v3524_v24 = vmul.f32 %v3483_v16, %v5539_v45  ;;  %v3287_v10 = vadd.f32 %v3286_v47, %v3188_v39 }
 0x39c   : > { %v3559_v17 = vadd.f32 %v3558_v40, %v3524_v24  ;;  %v3602_v38 = vmul.f32 %v3524_v24, %v3483_v16 }
 0x39d   : > { %v3385_v44 = vpop.f32.mrf.mxu3  ;;  %v3289_v2 = vpop.f32.mrf.mxu2 }
 0x39e   : > { %v3637_v34 = vadd.f32 %v3636_v21, %v3602_v38  ;;  %v3386_v56 = vadd.f32 %v3385_v44, %v3287_v10  ;;  %v3484_v19 = vpop.f32.mrf.mxu0 }
 0x39f   : > { %v3190_v30 = vpop.f32.mrf.mxu1 }
 0x3a0   : > { %v3191_v35 = vadd.f32 %v3190_v30, %v5285_v11  ;;  %v3485_v23 = vadd.f32 %v3484_v19, %v3386_v56 }
 0x3a2   : > { %v3525_v6 = vmul.f32 %v3485_v23, %v5540_v54  ;;  %v3290_v48 = vadd.f32 %v3289_v2, %v3191_v35 }
 0x3a4   : > { %v3560_v28 = vadd.f32 %v3559_v17, %v3525_v6  ;;  %v3603_v41 = vmul.f32 %v3525_v6, %v3485_v23  ;;  %v4331_v58 = vpack.c.bf16 %v3525_v6, %v3524_v24 }
 0x3a5   : > { %v3388_v3 = vpop.f32.mrf.mxu3  ;;  %v3291_v11 = vpop.f32.mrf.mxu2 }
 0x3a6   : > { %v3638_v0 = vadd.f32 %v3637_v34, %v3603_v41  ;;  %4370 = vst [vmem:[%s5305_s16 + $0x80] sm:$0xff] %v4331_v58   ;;  %v3389_v61 = vadd.f32 %v3388_v3, %v3290_v48  ;;  %v3487_v51 = vpop.f32.mrf.mxu0 }
 0x3a7   : > { %v3192_v25 = vpop.f32.mrf.mxu1 }
 0x3a8   : > { %v3193_v9 = vadd.f32 %v3192_v25, %v5288_v20  ;;  %v3488_v62 = vadd.f32 %v3487_v51, %v3389_v61 }
 0x3aa   : > { %v3526_v52 = vmul.f32 %v3488_v62, %v5541_v33  ;;  %v3292_v37 = vadd.f32 %v3291_v11, %v3193_v9 }
 0x3ac   : > { %v3561_v60 = vadd.f32 %v3560_v28, %v3526_v52  ;;  %v3604_v29 = vmul.f32 %v3526_v52, %v3488_v62 }
 0x3ad   : > { %v3390_v7 = vpop.f32.mrf.mxu3 }
 0x3ae   : > { %v3639_v18 = vadd.f32 %v3638_v0, %v3604_v29  ;;  %v3391_v8 = vadd.f32 %v3390_v7, %v3292_v37  ;;  %v3489_v12 = vpop.f32.mrf.mxu0 }
 0x3b0   : > { %v3490_v15 = vadd.f32 %v3489_v12, %v3391_v8 }
 0x3b2   : > { %v3527_v59 = vmul.f32 %v3490_v15, %v5542_v43 }
 0x3b4   : > { %v3562_v46 = vadd.f32 %v3561_v60, %v3527_v59  ;;  %v3605_v5 = vmul.f32 %v3527_v59, %v3490_v15  ;;  %v4336_v53 = vpack.c.bf16 %v3527_v59, %v3526_v52 }
 0x3b6   : > { %v3563_v20 = vrot.slane %v3562_v46, 4  ;;  %v3640_v22 = vadd.f32 %v3639_v18, %v3605_v5  ;;  %4371 = vst [vmem:[%s5305_s16 + $0x88] sm:$0xff] %v4336_v53  }
 0x3b8   : > { %v3564_v1 = vadd.f32 %v3563_v20, %v3562_v46  ;;  %v3641_v32 = vrot.slane %v3640_v22, 4 }
 0x3ba   : > { %v3565_v50 = vrot.slane %v3564_v1, 2  ;;  %v3642_v55 = vadd.f32 %v3641_v32, %v3640_v22 }
 0x3bc   : > { %v3566_v14 = vadd.f32 %v3565_v50, %v3564_v1  ;;  %v3643_v4 = vrot.slane %v3642_v55, 2 }
 0x3be   : > { %v3567_v49 = vrot.slane %v3566_v14, 1  ;;  %v3644_v27 = vadd.f32 %v3643_v4, %v3642_v55 }
 0x3c0   : > { %v3568_v40 = vadd.f32 %v3567_v49, %v3566_v14  ;;  %v3645_v31 = vrot.slane %v3644_v27, 1 }
 0x3c2   : > { %3569 = vst [vmem:[%s262_s18] sm:$0x1] %v3568_v40  ;;  %v3646_v36 = vadd.f32 %v3645_v31, %v3644_v27 }
 0x3c4   : > { %3647 = vst [vmem:[%s262_s18 + $0x1] sm:$0x1] %v3646_v36 }
 0x3c5 PF: > { %s17_s21 = sadd.s32 1, %s4418_s21  }
 0x3c6   : > { %p14_p4 = scmp.ge.s32.totalorder %s17_s21, 4  }
 0x3c8   :  { %16 = sbr.rel (!%p14_p4) target bundleno = 1 (0x1), region = 82 }

</bundles_post_ra>
